<compile_context>
chip_gen: v6e
topology: v6e:2x2x1
jax: 0.10.0
libtpu: 0.0.40
codegen_flags: <defaults>
</compile_context>

<pallas_src>
import jax
import jax.numpy as jnp
from jax import lax
from jax.experimental import pallas as pl
from jax.experimental.pallas import tpu as pltpu

# Model dimensions implied by CnnModel (MNIST: 1x28x28 input)
H0, W0 = 28, 28
K = 5
C1, C2, C3 = 8, 16, 4
H1, W1 = 24, 24
H2, W2 = 20, 20
H3, W3 = 16, 16
WC1, WC2, WC3 = W1 * C1, W2 * C2, W3 * C3       # 192, 320, 64
FC1_IN = C3 * H3 * W3                           # 1024
FC1_OUT = 256
FC2_OUT = 10
OUT_PAD = 128                                   # lane-dense padded logits width


def make_cnn_kernel(tb):
    """Kernel processing TB images per grid step (batch folded onto sublanes)."""

    def kernel(x_ref, w1_ref, b1_ref, w2_ref, b2_ref, w3_ref, b3_ref,
               wf1_ref, bf1_ref, wf2_ref, bf2_ref, out_ref,
               h1_ref, h2_ref, h3_ref):
        f32 = jnp.float32
        bf16 = jnp.bfloat16

        # Input block is (H0, tb, W0) f32; fold batch into sublanes -> rows ordered
        # (h, b).  Keep the 3D->2D reshape in f32 (layout-friendly), then cast the
        # small 2-D tile to bf16 for the MXU.
        x2 = x_ref[...].reshape(H0 * tb, W0).astype(bf16)

        # conv1 + bias + ReLU: 5 kh taps, kw folded into banded weights.  Accumulate in
        # a local f32 value and write the bf16 scratch exactly once.
        acc = jnp.dot(x2[0:H1 * tb, :], w1_ref[0], preferred_element_type=f32)
        for kh in range(1, K):
            acc = acc + jnp.dot(x2[kh * tb:(kh + H1) * tb, :], w1_ref[kh],
                                preferred_element_type=f32)
        h1_ref[...] = jnp.maximum(acc + b1_ref[...], 0.0).astype(bf16)

        # conv2 + bias + ReLU: (H1*tb, 192) -> (H2*tb, 320)
        acc = jnp.dot(h1_ref[0:H2 * tb, :], w2_ref[0], preferred_element_type=f32)
        for kh in range(1, K):
            acc = acc + jnp.dot(h1_ref[kh * tb:(kh + H2) * tb, :], w2_ref[kh],
                                preferred_element_type=f32)
        h2_ref[...] = jnp.maximum(acc + b2_ref[...], 0.0).astype(bf16)

        # conv3 + bias + ReLU: (H2*tb, 320) -> (H3*tb, 64)
        acc = jnp.dot(h2_ref[0:H3 * tb, :], w3_ref[0], preferred_element_type=f32)
        for kh in range(1, K):
            acc = acc + jnp.dot(h2_ref[kh * tb:(kh + H3) * tb, :], w3_ref[kh],
                                preferred_element_type=f32)
        h3_ref[...] = jnp.maximum(acc + b3_ref[...], 0.0).astype(bf16)

        # fc1 + ReLU: flatten folded into 16 per-h partial matmuls.  fc1 weight rows
        # are pre-permuted to (h, w, c) order, so row block h*64:(h+1)*64 lines up with
        # the (w*4 + c) columns of h3 row block h.  No (tb,1024) flat slab needed.
        y1 = jnp.dot(h3_ref[0:tb, :], wf1_ref[0:WC3, :], preferred_element_type=f32)
        for h in range(1, H3):
            y1 = y1 + jnp.dot(h3_ref[h * tb:(h + 1) * tb, :],
                              wf1_ref[h * WC3:(h + 1) * WC3, :],
                              preferred_element_type=f32)
        y1 = jnp.maximum(y1 + bf1_ref[...], 0.0)

        # fc2 -> lane-dense padded (tb, 128) store (lanes 10..127 have zero weights)
        out_ref[...] = (jnp.dot(y1.astype(bf16), wf2_ref[...],
                                preferred_element_type=f32) + bf2_ref[...])

    return kernel


def conv_weight_folded(w, w_in, w_out):
    # w: (Cout, Cin, K, K) torch layout -> (K, w_in*Cin, w_out*Cout)
    # M_kh[(wcol+kw)*Cin + ci, wcol*Cout + co] = w[co, ci, kh, kw]   (kw folded/banded)
    cout, cin = int(w.shape[0]), int(w.shape[1])
    mats = []
    for kh in range(K):
        m = jnp.zeros((w_in * cin, w_out * cout), jnp.float32)
        for kw in range(K):
            sel = jnp.eye(w_in, w_out, k=-kw, dtype=jnp.float32)
            m = m + jnp.kron(sel, w[:, :, kh, kw].T.astype(jnp.float32))
        mats.append(m)
    return jnp.stack(mats)


def tile_bias(b, w_out):
    return jnp.tile(b.astype(jnp.float32), w_out)[None, :]      # (1, w_out*Cout), f32


def fold_params(params):
    """One-time weight preprocessing (hoisted out of the per-call path)."""
    (w1, b1, w2, b2, w3, b3, fw1, fb1, fw2, fb2) = params
    bf16 = jnp.bfloat16
    w1k = conv_weight_folded(w1, W0, W1).astype(bf16)            # (5,  28, 192)
    w2k = conv_weight_folded(w2, W1, W2).astype(bf16)            # (5, 192, 320)
    w3k = conv_weight_folded(w3, W2, W3).astype(bf16)            # (5, 320,  64)
    b1r = tile_bias(b1, W1)
    b2r = tile_bias(b2, W2)
    b3r = tile_bias(b3, W3)
    # fc1 weight (256,1024), torch flat idx = c*256 + h*16 + w -> rows ordered (h,w,c)
    fw1d = jnp.transpose(fw1.reshape(FC1_OUT, C3, H3, W3),
                         (2, 3, 1, 0)).reshape(FC1_IN, FC1_OUT).astype(bf16)
    fb1r = fb1.astype(jnp.float32)[None, :]
    fw2p = jnp.pad(fw2.T.astype(jnp.float32),
                   ((0, 0), (0, OUT_PAD - FC2_OUT))).astype(bf16)        # (256, 128)
    fb2p = jnp.pad(fb2.astype(jnp.float32), (0, OUT_PAD - FC2_OUT))[None, :]
    return (w1k, b1r, w2k, b2r, w3k, b3r, fw1d, fb1r, fw2p, fb2p)


def _choose_tb(batch, tb_req):
    tb = max(8, (int(tb_req) // 8) * 8)          # multiple of 8 (sublane width)
    bp8 = -(-batch // 8) * 8                     # batch padded to sublane multiple
    tb = min(tb, bp8)
    # Keep n_steps >= 2 when the batch allows it, so the "parallel" grid axis can be
    # split across v7x's two TensorCores.
    if bp8 // tb < 2 and bp8 >= 16:
        tb = -(-(bp8 // 2) // 8) * 8
    bp = -(-bp8 // tb) * tb
    return tb, bp


def cnn_forward_pallas(x_nchw, folded, tb=128):
    (w1k, b1r, w2k, b2r, w3k, b3r, fw1d, fb1r, fw2p, fb2p) = folded
    B = int(x_nchw.shape[0])
    tb, Bp = _choose_tb(B, tb)
    n_steps = Bp // tb

    x2d = x_nchw[:, 0, :, :].astype(jnp.float32)                 # (B, 28, 28)
    if Bp != B:
        x2d = jnp.pad(x2d, ((0, Bp - B), (0, 0), (0, 0)))
    x_hbw = jnp.transpose(x2d, (1, 0, 2))                        # (28, Bp, 28): (h, b)

    def resident(a):
        # Constant index map, never re-fetched across steps -> single-buffer it.
        nd = a.ndim
        return pl.BlockSpec(a.shape, lambda i, nd=nd: (0,) * nd,
                            pipeline_mode=pl.Buffered(1))

    grid_spec = pltpu.PrefetchScalarGridSpec(
        num_scalar_prefetch=0,
        grid=(n_steps,),
        in_specs=[
            pl.BlockSpec((H0, tb, W0), lambda i: (0, i, 0)),
            resident(w1k), resident(b1r),
            resident(w2k), resident(b2r),
            resident(w3k), resident(b3r),
            resident(fw1d), resident(fb1r),
            resident(fw2p), resident(fb2p),
        ],
        out_specs=pl.BlockSpec((tb, OUT_PAD), lambda i: (i, 0)),
        scratch_shapes=[
            pltpu.VMEM((H1 * tb, WC1), jnp.bfloat16),
            pltpu.VMEM((H2 * tb, WC2), jnp.bfloat16),
            pltpu.VMEM((H3 * tb, WC3), jnp.bfloat16),
        ],
    )
    out = pl.pallas_call(
        make_cnn_kernel(tb),
        out_shape=jax.ShapeDtypeStruct((Bp, OUT_PAD), jnp.float32),
        grid_spec=grid_spec,
        compiler_params=pltpu.CompilerParams(
            dimension_semantics=("parallel",),
            # well under v7x's 64 MiB physical VMEM; raised vs. v5e's 16 MiB default
            vmem_limit_bytes=48 * 1024 * 1024),
    )(x_hbw, w1k, b1r, w2k, b2r, w3k, b3r, fw1d, fb1r, fw2p, fb2p)
    return out[:B, :FC2_OUT]


def init_params(key):
    ks = jax.random.split(key, 10)

    def u(k, shape, fan_in):
        bound = 1.0 / (fan_in ** 0.5)
        return jax.random.uniform(k, shape, jnp.float32, -bound, bound)

    w1 = u(ks[0], (C1, 1, K, K), 1 * K * K)
    b1 = u(ks[1], (C1,), 1 * K * K)
    w2 = u(ks[2], (C2, C1, K, K), C1 * K * K)
    b2 = u(ks[3], (C2,), C1 * K * K)
    w3 = u(ks[4], (C3, C2, K, K), C2 * K * K)
    b3 = u(ks[5], (C3,), C2 * K * K)
    fw1 = u(ks[6], (FC1_OUT, FC1_IN), FC1_IN)
    fb1 = u(ks[7], (FC1_OUT,), FC1_IN)
    fw2 = u(ks[8], (FC2_OUT, FC1_OUT), FC1_OUT)
    fb2 = u(ks[9], (FC2_OUT,), FC1_OUT)
    return (w1, b1, w2, b2, w3, b3, fw1, fb1, fw2, fb2)


def reference_forward(x, params):
    # Plain-JAX replica of the PyTorch forward (NCHW), used only for validation.
    (w1, b1, w2, b2, w3, b3, fw1, fb1, fw2, fb2) = params
    hp = lax.Precision.HIGHEST

    def conv(y, w):
        dn = lax.conv_dimension_numbers(y.shape, w.shape, ('NCHW', 'OIHW', 'NCHW'))
        return lax.conv_general_dilated(y, w, (1, 1), 'VALID',
                                        dimension_numbers=dn, precision=hp)

    y = jax.nn.relu(conv(x, w1) + b1[None, :, None, None])
    y = jax.nn.relu(conv(y, w2) + b2[None, :, None, None])
    y = jax.nn.relu(conv(y, w3) + b3[None, :, None, None])
    y = y.reshape(y.shape[0], -1)                           # torch nn.Flatten (NCHW)
    y = jax.nn.relu(jnp.dot(y, fw1.T, precision=hp) + fb1)
    y = jnp.dot(y, fw2.T, precision=hp) + fb2
    return y


if __name__ == "__main__":
    key = jax.random.PRNGKey(0)
    pkey, xkey = jax.random.split(key)
    params = init_params(pkey)
    folded = fold_params(params)            # weight preprocessing: once per param set

    B = 8
    x = jax.random.normal(xkey, (B, 1, H0, W0), jnp.float32)   # NCHW like PyTorch

    out = cnn_forward_pallas(x, folded)
    out = jax.block_until_ready(out)
    assert out.shape == (B, FC2_OUT)

    ref = reference_forward(x, params)
    max_diff = float(jnp.max(jnp.abs(out - ref)))
    # bf16 weights/activations with f32 accumulation: error stays well inside this.
    assert max_diff < 2e-2, f"max diff too large: {max_diff}"

    print("KERNEL_OK")
</pallas_src>

<mosaic_0001>
module attributes {stable_mosaic.version = 11 : i64} {
  func.func @kernel(%arg0: i32, %arg1: memref<28x8x28xf32, #tpu.memory_space<vmem>>, %arg2: memref<5x28x192xbf16, #tpu.memory_space<vmem>>, %arg3: memref<1x192xf32, #tpu.memory_space<vmem>>, %arg4: memref<5x192x320xbf16, #tpu.memory_space<vmem>>, %arg5: memref<1x320xf32, #tpu.memory_space<vmem>>, %arg6: memref<5x320x64xbf16, #tpu.memory_space<vmem>>, %arg7: memref<1x64xf32, #tpu.memory_space<vmem>>, %arg8: memref<1024x256xbf16, #tpu.memory_space<vmem>>, %arg9: memref<1x256xf32, #tpu.memory_space<vmem>>, %arg10: memref<256x128xbf16, #tpu.memory_space<vmem>>, %arg11: memref<1x128xf32, #tpu.memory_space<vmem>>, %arg12: memref<8x128xf32, #tpu.memory_space<vmem>>, %arg13: memref<192x192xbf16, #tpu.memory_space<vmem>>, %arg14: memref<160x320xbf16, #tpu.memory_space<vmem>>, %arg15: memref<128x64xbf16, #tpu.memory_space<vmem>>) attributes {dimension_semantics = [#tpu.dimension_semantics<parallel>], iteration_bounds = array<i64: 1>, scalar_prefetch = 0 : i64, scratch_operands = 3 : i64, tpu.core_type = #tpu.core_type<tc>, window_params = [{transform_indices = @transform_0, window_bounds = array<i64: 28, 8, 28>}, {pipeline_mode = #tpu.pipeline_mode<synchronous>, transform_indices = @transform_1, window_bounds = array<i64: 5, 28, 192>}, {pipeline_mode = #tpu.pipeline_mode<synchronous>, transform_indices = @transform_2, window_bounds = array<i64: 1, 192>}, {pipeline_mode = #tpu.pipeline_mode<synchronous>, transform_indices = @transform_3, window_bounds = array<i64: 5, 192, 320>}, {pipeline_mode = #tpu.pipeline_mode<synchronous>, transform_indices = @transform_4, window_bounds = array<i64: 1, 320>}, {pipeline_mode = #tpu.pipeline_mode<synchronous>, transform_indices = @transform_5, window_bounds = array<i64: 5, 320, 64>}, {pipeline_mode = #tpu.pipeline_mode<synchronous>, transform_indices = @transform_6, window_bounds = array<i64: 1, 64>}, {pipeline_mode = #tpu.pipeline_mode<synchronous>, transform_indices = @transform_7, window_bounds = array<i64: 1024, 256>}, {pipeline_mode = #tpu.pipeline_mode<synchronous>, transform_indices = @transform_8, window_bounds = array<i64: 1, 256>}, {pipeline_mode = #tpu.pipeline_mode<synchronous>, transform_indices = @transform_9, window_bounds = array<i64: 256, 128>}, {pipeline_mode = #tpu.pipeline_mode<synchronous>, transform_indices = @transform_10, window_bounds = array<i64: 1, 128>}, {transform_indices = @transform_11, window_bounds = array<i64: 8, 128>}]} {
    %c0 = arith.constant 0 : index
    %c0_0 = arith.constant 0 : index
    %c0_1 = arith.constant 0 : index
    %0 = vector.load %arg1[%c0, %c0_0, %c0_1] : memref<28x8x28xf32, #tpu.memory_space<vmem>>, vector<28x8x28xf32>
    %1 = vector.shape_cast %0 : vector<28x8x28xf32> to vector<224x28xf32>
    %2 = arith.truncf %1 : vector<224x28xf32> to vector<224x28xbf16>
    %3 = vector.extract_strided_slice %2 {offsets = [0, 0], sizes = [192, 28], strides = [1, 1]} : vector<224x28xbf16> to vector<192x28xbf16>
    %c0_2 = arith.constant 0 : index
    %c0_3 = arith.constant 0 : index
    %c0_4 = arith.constant 0 : index
    %4 = vector.load %arg2[%c0_2, %c0_3, %c0_4] : memref<5x28x192xbf16, #tpu.memory_space<vmem>>, vector<1x28x192xbf16>
    %5 = vector.shape_cast %4 : vector<1x28x192xbf16> to vector<28x192xbf16>
    %cst = arith.constant dense<0.000000e+00> : vector<192x192xf32>
    %6 = tpu.matmul %3, %5, %cst {dimension_numbers = #tpu.dot_dimension_numbers<[1], [0], [0], [1], [0, 0, 1, 1], [], []>} : vector<192x28xbf16>, vector<28x192xbf16>, vector<192x192xf32> -> vector<192x192xf32>
    %7 = vector.extract_strided_slice %2 {offsets = [8, 0], sizes = [192, 28], strides = [1, 1]} : vector<224x28xbf16> to vector<192x28xbf16>
    %c1 = arith.constant 1 : index
    %c0_5 = arith.constant 0 : index
    %c0_6 = arith.constant 0 : index
    %8 = vector.load %arg2[%c1, %c0_5, %c0_6] : memref<5x28x192xbf16, #tpu.memory_space<vmem>>, vector<1x28x192xbf16>
    %9 = vector.shape_cast %8 : vector<1x28x192xbf16> to vector<28x192xbf16>
    %cst_7 = arith.constant dense<0.000000e+00> : vector<192x192xf32>
    %10 = tpu.matmul %7, %9, %cst_7 {dimension_numbers = #tpu.dot_dimension_numbers<[1], [0], [0], [1], [0, 0, 1, 1], [], []>} : vector<192x28xbf16>, vector<28x192xbf16>, vector<192x192xf32> -> vector<192x192xf32>
    %11 = arith.addf %6, %10 : vector<192x192xf32>
    %12 = vector.extract_strided_slice %2 {offsets = [16, 0], sizes = [192, 28], strides = [1, 1]} : vector<224x28xbf16> to vector<192x28xbf16>
    %c2 = arith.constant 2 : index
    %c0_8 = arith.constant 0 : index
    %c0_9 = arith.constant 0 : index
    %13 = vector.load %arg2[%c2, %c0_8, %c0_9] : memref<5x28x192xbf16, #tpu.memory_space<vmem>>, vector<1x28x192xbf16>
    %14 = vector.shape_cast %13 : vector<1x28x192xbf16> to vector<28x192xbf16>
    %cst_10 = arith.constant dense<0.000000e+00> : vector<192x192xf32>
    %15 = tpu.matmul %12, %14, %cst_10 {dimension_numbers = #tpu.dot_dimension_numbers<[1], [0], [0], [1], [0, 0, 1, 1], [], []>} : vector<192x28xbf16>, vector<28x192xbf16>, vector<192x192xf32> -> vector<192x192xf32>
    %16 = arith.addf %11, %15 : vector<192x192xf32>
    %17 = vector.extract_strided_slice %2 {offsets = [24, 0], sizes = [192, 28], strides = [1, 1]} : vector<224x28xbf16> to vector<192x28xbf16>
    %c3 = arith.constant 3 : index
    %c0_11 = arith.constant 0 : index
    %c0_12 = arith.constant 0 : index
    %18 = vector.load %arg2[%c3, %c0_11, %c0_12] : memref<5x28x192xbf16, #tpu.memory_space<vmem>>, vector<1x28x192xbf16>
    %19 = vector.shape_cast %18 : vector<1x28x192xbf16> to vector<28x192xbf16>
    %cst_13 = arith.constant dense<0.000000e+00> : vector<192x192xf32>
    %20 = tpu.matmul %17, %19, %cst_13 {dimension_numbers = #tpu.dot_dimension_numbers<[1], [0], [0], [1], [0, 0, 1, 1], [], []>} : vector<192x28xbf16>, vector<28x192xbf16>, vector<192x192xf32> -> vector<192x192xf32>
    %21 = arith.addf %16, %20 : vector<192x192xf32>
    %22 = vector.extract_strided_slice %2 {offsets = [32, 0], sizes = [192, 28], strides = [1, 1]} : vector<224x28xbf16> to vector<192x28xbf16>
    %c4 = arith.constant 4 : index
    %c0_14 = arith.constant 0 : index
    %c0_15 = arith.constant 0 : index
    %23 = vector.load %arg2[%c4, %c0_14, %c0_15] : memref<5x28x192xbf16, #tpu.memory_space<vmem>>, vector<1x28x192xbf16>
    %24 = vector.shape_cast %23 : vector<1x28x192xbf16> to vector<28x192xbf16>
    %cst_16 = arith.constant dense<0.000000e+00> : vector<192x192xf32>
    %25 = tpu.matmul %22, %24, %cst_16 {dimension_numbers = #tpu.dot_dimension_numbers<[1], [0], [0], [1], [0, 0, 1, 1], [], []>} : vector<192x28xbf16>, vector<28x192xbf16>, vector<192x192xf32> -> vector<192x192xf32>
    %26 = arith.addf %21, %25 : vector<192x192xf32>
    %c0_17 = arith.constant 0 : index
    %c0_18 = arith.constant 0 : index
    %27 = vector.load %arg3[%c0_17, %c0_18] : memref<1x192xf32, #tpu.memory_space<vmem>>, vector<1x192xf32>
    %28 = vector.broadcast %27 : vector<1x192xf32> to vector<192x192xf32>
    %29 = arith.addf %26, %28 : vector<192x192xf32>
    %cst_19 = arith.constant 0.000000e+00 : f32
    %30 = vector.broadcast %cst_19 : f32 to vector<192x192xf32>
    %31 = arith.maximumf %29, %30 : vector<192x192xf32>
    %32 = arith.truncf %31 : vector<192x192xf32> to vector<192x192xbf16>
    %c0_20 = arith.constant 0 : index
    %c0_21 = arith.constant 0 : index
    %33 = vector.load %arg13[%c0_20, %c0_21] : memref<192x192xbf16, #tpu.memory_space<vmem>>, vector<192x192xbf16>
    tpu.vector_store %arg13[%c0_20, %c0_21], %32 {strides = array<i32>} : memref<192x192xbf16, #tpu.memory_space<vmem>>, vector<192x192xbf16>,
    %c0_22 = arith.constant 0 : index
    %c0_23 = arith.constant 0 : index
    %34 = vector.load %arg13[%c0_22, %c0_23] : memref<192x192xbf16, #tpu.memory_space<vmem>>, vector<160x192xbf16>
    %c0_24 = arith.constant 0 : index
    %c0_25 = arith.constant 0 : index
    %c0_26 = arith.constant 0 : index
    %35 = vector.load %arg4[%c0_24, %c0_25, %c0_26] : memref<5x192x320xbf16, #tpu.memory_space<vmem>>, vector<1x192x320xbf16>
    %36 = vector.shape_cast %35 : vector<1x192x320xbf16> to vector<192x320xbf16>
    %cst_27 = arith.constant dense<0.000000e+00> : vector<160x320xf32>
    %37 = tpu.matmul %34, %36, %cst_27 {dimension_numbers = #tpu.dot_dimension_numbers<[1], [0], [0], [1], [0, 0, 1, 1], [], []>} : vector<160x192xbf16>, vector<192x320xbf16>, vector<160x320xf32> -> vector<160x320xf32>
    %c8 = arith.constant 8 : index
    %c0_28 = arith.constant 0 : index
    %38 = vector.load %arg13[%c8, %c0_28] : memref<192x192xbf16, #tpu.memory_space<vmem>>, vector<160x192xbf16>
    %c1_29 = arith.constant 1 : index
    %c0_30 = arith.constant 0 : index
    %c0_31 = arith.constant 0 : index
    %39 = vector.load %arg4[%c1_29, %c0_30, %c0_31] : memref<5x192x320xbf16, #tpu.memory_space<vmem>>, vector<1x192x320xbf16>
    %40 = vector.shape_cast %39 : vector<1x192x320xbf16> to vector<192x320xbf16>
    %cst_32 = arith.constant dense<0.000000e+00> : vector<160x320xf32>
    %41 = tpu.matmul %38, %40, %cst_32 {dimension_numbers = #tpu.dot_dimension_numbers<[1], [0], [0], [1], [0, 0, 1, 1], [], []>} : vector<160x192xbf16>, vector<192x320xbf16>, vector<160x320xf32> -> vector<160x320xf32>
    %42 = arith.addf %37, %41 : vector<160x320xf32>
    %c16 = arith.constant 16 : index
    %c0_33 = arith.constant 0 : index
    %43 = vector.load %arg13[%c16, %c0_33] : memref<192x192xbf16, #tpu.memory_space<vmem>>, vector<160x192xbf16>
    %c2_34 = arith.constant 2 : index
    %c0_35 = arith.constant 0 : index
    %c0_36 = arith.constant 0 : index
    %44 = vector.load %arg4[%c2_34, %c0_35, %c0_36] : memref<5x192x320xbf16, #tpu.memory_space<vmem>>, vector<1x192x320xbf16>
    %45 = vector.shape_cast %44 : vector<1x192x320xbf16> to vector<192x320xbf16>
    %cst_37 = arith.constant dense<0.000000e+00> : vector<160x320xf32>
    %46 = tpu.matmul %43, %45, %cst_37 {dimension_numbers = #tpu.dot_dimension_numbers<[1], [0], [0], [1], [0, 0, 1, 1], [], []>} : vector<160x192xbf16>, vector<192x320xbf16>, vector<160x320xf32> -> vector<160x320xf32>
    %47 = arith.addf %42, %46 : vector<160x320xf32>
    %c24 = arith.constant 24 : index
    %c0_38 = arith.constant 0 : index
    %48 = vector.load %arg13[%c24, %c0_38] : memref<192x192xbf16, #tpu.memory_space<vmem>>, vector<160x192xbf16>
    %c3_39 = arith.constant 3 : index
    %c0_40 = arith.constant 0 : index
    %c0_41 = arith.constant 0 : index
    %49 = vector.load %arg4[%c3_39, %c0_40, %c0_41] : memref<5x192x320xbf16, #tpu.memory_space<vmem>>, vector<1x192x320xbf16>
    %50 = vector.shape_cast %49 : vector<1x192x320xbf16> to vector<192x320xbf16>
    %cst_42 = arith.constant dense<0.000000e+00> : vector<160x320xf32>
    %51 = tpu.matmul %48, %50, %cst_42 {dimension_numbers = #tpu.dot_dimension_numbers<[1], [0], [0], [1], [0, 0, 1, 1], [], []>} : vector<160x192xbf16>, vector<192x320xbf16>, vector<160x320xf32> -> vector<160x320xf32>
    %52 = arith.addf %47, %51 : vector<160x320xf32>
    %c32 = arith.constant 32 : index
    %c0_43 = arith.constant 0 : index
    %53 = vector.load %arg13[%c32, %c0_43] : memref<192x192xbf16, #tpu.memory_space<vmem>>, vector<160x192xbf16>
    %c4_44 = arith.constant 4 : index
    %c0_45 = arith.constant 0 : index
    %c0_46 = arith.constant 0 : index
    %54 = vector.load %arg4[%c4_44, %c0_45, %c0_46] : memref<5x192x320xbf16, #tpu.memory_space<vmem>>, vector<1x192x320xbf16>
    %55 = vector.shape_cast %54 : vector<1x192x320xbf16> to vector<192x320xbf16>
    %cst_47 = arith.constant dense<0.000000e+00> : vector<160x320xf32>
    %56 = tpu.matmul %53, %55, %cst_47 {dimension_numbers = #tpu.dot_dimension_numbers<[1], [0], [0], [1], [0, 0, 1, 1], [], []>} : vector<160x192xbf16>, vector<192x320xbf16>, vector<160x320xf32> -> vector<160x320xf32>
    %57 = arith.addf %52, %56 : vector<160x320xf32>
    %c0_48 = arith.constant 0 : index
    %c0_49 = arith.constant 0 : index
    %58 = vector.load %arg5[%c0_48, %c0_49] : memref<1x320xf32, #tpu.memory_space<vmem>>, vector<1x320xf32>
    %59 = vector.broadcast %58 : vector<1x320xf32> to vector<160x320xf32>
    %60 = arith.addf %57, %59 : vector<160x320xf32>
    %cst_50 = arith.constant 0.000000e+00 : f32
    %61 = vector.broadcast %cst_50 : f32 to vector<160x320xf32>
    %62 = arith.maximumf %60, %61 : vector<160x320xf32>
    %63 = arith.truncf %62 : vector<160x320xf32> to vector<160x320xbf16>
    %c0_51 = arith.constant 0 : index
    %c0_52 = arith.constant 0 : index
    %64 = vector.load %arg14[%c0_51, %c0_52] : memref<160x320xbf16, #tpu.memory_space<vmem>>, vector<160x320xbf16>
    tpu.vector_store %arg14[%c0_51, %c0_52], %63 {strides = array<i32>} : memref<160x320xbf16, #tpu.memory_space<vmem>>, vector<160x320xbf16>,
    %c0_53 = arith.constant 0 : index
    %c0_54 = arith.constant 0 : index
    %65 = vector.load %arg14[%c0_53, %c0_54] : memref<160x320xbf16, #tpu.memory_space<vmem>>, vector<128x320xbf16>
    %c0_55 = arith.constant 0 : index
    %c0_56 = arith.constant 0 : index
    %c0_57 = arith.constant 0 : index
    %66 = vector.load %arg6[%c0_55, %c0_56, %c0_57] : memref<5x320x64xbf16, #tpu.memory_space<vmem>>, vector<1x320x64xbf16>
    %67 = vector.shape_cast %66 : vector<1x320x64xbf16> to vector<320x64xbf16>
    %cst_58 = arith.constant dense<0.000000e+00> : vector<128x64xf32>
    %68 = tpu.matmul %65, %67, %cst_58 {dimension_numbers = #tpu.dot_dimension_numbers<[1], [0], [0], [1], [0, 0, 1, 1], [], []>} : vector<128x320xbf16>, vector<320x64xbf16>, vector<128x64xf32> -> vector<128x64xf32>
    %c8_59 = arith.constant 8 : index
    %c0_60 = arith.constant 0 : index
    %69 = vector.load %arg14[%c8_59, %c0_60] : memref<160x320xbf16, #tpu.memory_space<vmem>>, vector<128x320xbf16>
    %c1_61 = arith.constant 1 : index
    %c0_62 = arith.constant 0 : index
    %c0_63 = arith.constant 0 : index
    %70 = vector.load %arg6[%c1_61, %c0_62, %c0_63] : memref<5x320x64xbf16, #tpu.memory_space<vmem>>, vector<1x320x64xbf16>
    %71 = vector.shape_cast %70 : vector<1x320x64xbf16> to vector<320x64xbf16>
    %cst_64 = arith.constant dense<0.000000e+00> : vector<128x64xf32>
    %72 = tpu.matmul %69, %71, %cst_64 {dimension_numbers = #tpu.dot_dimension_numbers<[1], [0], [0], [1], [0, 0, 1, 1], [], []>} : vector<128x320xbf16>, vector<320x64xbf16>, vector<128x64xf32> -> vector<128x64xf32>
    %73 = arith.addf %68, %72 : vector<128x64xf32>
    %c16_65 = arith.constant 16 : index
    %c0_66 = arith.constant 0 : index
    %74 = vector.load %arg14[%c16_65, %c0_66] : memref<160x320xbf16, #tpu.memory_space<vmem>>, vector<128x320xbf16>
    %c2_67 = arith.constant 2 : index
    %c0_68 = arith.constant 0 : index
    %c0_69 = arith.constant 0 : index
    %75 = vector.load %arg6[%c2_67, %c0_68, %c0_69] : memref<5x320x64xbf16, #tpu.memory_space<vmem>>, vector<1x320x64xbf16>
    %76 = vector.shape_cast %75 : vector<1x320x64xbf16> to vector<320x64xbf16>
    %cst_70 = arith.constant dense<0.000000e+00> : vector<128x64xf32>
    %77 = tpu.matmul %74, %76, %cst_70 {dimension_numbers = #tpu.dot_dimension_numbers<[1], [0], [0], [1], [0, 0, 1, 1], [], []>} : vector<128x320xbf16>, vector<320x64xbf16>, vector<128x64xf32> -> vector<128x64xf32>
    %78 = arith.addf %73, %77 : vector<128x64xf32>
    %c24_71 = arith.constant 24 : index
    %c0_72 = arith.constant 0 : index
    %79 = vector.load %arg14[%c24_71, %c0_72] : memref<160x320xbf16, #tpu.memory_space<vmem>>, vector<128x320xbf16>
    %c3_73 = arith.constant 3 : index
    %c0_74 = arith.constant 0 : index
    %c0_75 = arith.constant 0 : index
    %80 = vector.load %arg6[%c3_73, %c0_74, %c0_75] : memref<5x320x64xbf16, #tpu.memory_space<vmem>>, vector<1x320x64xbf16>
    %81 = vector.shape_cast %80 : vector<1x320x64xbf16> to vector<320x64xbf16>
    %cst_76 = arith.constant dense<0.000000e+00> : vector<128x64xf32>
    %82 = tpu.matmul %79, %81, %cst_76 {dimension_numbers = #tpu.dot_dimension_numbers<[1], [0], [0], [1], [0, 0, 1, 1], [], []>} : vector<128x320xbf16>, vector<320x64xbf16>, vector<128x64xf32> -> vector<128x64xf32>
    %83 = arith.addf %78, %82 : vector<128x64xf32>
    %c32_77 = arith.constant 32 : index
    %c0_78 = arith.constant 0 : index
    %84 = vector.load %arg14[%c32_77, %c0_78] : memref<160x320xbf16, #tpu.memory_space<vmem>>, vector<128x320xbf16>
    %c4_79 = arith.constant 4 : index
    %c0_80 = arith.constant 0 : index
    %c0_81 = arith.constant 0 : index
    %85 = vector.load %arg6[%c4_79, %c0_80, %c0_81] : memref<5x320x64xbf16, #tpu.memory_space<vmem>>, vector<1x320x64xbf16>
    %86 = vector.shape_cast %85 : vector<1x320x64xbf16> to vector<320x64xbf16>
    %cst_82 = arith.constant dense<0.000000e+00> : vector<128x64xf32>
    %87 = tpu.matmul %84, %86, %cst_82 {dimension_numbers = #tpu.dot_dimension_numbers<[1], [0], [0], [1], [0, 0, 1, 1], [], []>} : vector<128x320xbf16>, vector<320x64xbf16>, vector<128x64xf32> -> vector<128x64xf32>
    %88 = arith.addf %83, %87 : vector<128x64xf32>
    %c0_83 = arith.constant 0 : index
    %c0_84 = arith.constant 0 : index
    %89 = vector.load %arg7[%c0_83, %c0_84] : memref<1x64xf32, #tpu.memory_space<vmem>>, vector<1x64xf32>
    %90 = vector.broadcast %89 : vector<1x64xf32> to vector<128x64xf32>
    %91 = arith.addf %88, %90 : vector<128x64xf32>
    %cst_85 = arith.constant 0.000000e+00 : f32
    %92 = vector.broadcast %cst_85 : f32 to vector<128x64xf32>
    %93 = arith.maximumf %91, %92 : vector<128x64xf32>
    %94 = arith.truncf %93 : vector<128x64xf32> to vector<128x64xbf16>
    %c0_86 = arith.constant 0 : index
    %c0_87 = arith.constant 0 : index
    %95 = vector.load %arg15[%c0_86, %c0_87] : memref<128x64xbf16, #tpu.memory_space<vmem>>, vector<128x64xbf16>
    tpu.vector_store %arg15[%c0_86, %c0_87], %94 {strides = array<i32>} : memref<128x64xbf16, #tpu.memory_space<vmem>>, vector<128x64xbf16>,
    %c0_88 = arith.constant 0 : index
    %c0_89 = arith.constant 0 : index
    %96 = vector.load %arg15[%c0_88, %c0_89] : memref<128x64xbf16, #tpu.memory_space<vmem>>, vector<8x64xbf16>
    %c0_90 = arith.constant 0 : index
    %c0_91 = arith.constant 0 : index
    %97 = vector.load %arg8[%c0_90, %c0_91] : memref<1024x256xbf16, #tpu.memory_space<vmem>>, vector<64x256xbf16>
    %cst_92 = arith.constant dense<0.000000e+00> : vector<8x256xf32>
    %98 = tpu.matmul %96, %97, %cst_92 {dimension_numbers = #tpu.dot_dimension_numbers<[1], [0], [0], [1], [0, 0, 1, 1], [], []>} : vector<8x64xbf16>, vector<64x256xbf16>, vector<8x256xf32> -> vector<8x256xf32>
    %c8_93 = arith.constant 8 : index
    %c0_94 = arith.constant 0 : index
    %99 = vector.load %arg15[%c8_93, %c0_94] : memref<128x64xbf16, #tpu.memory_space<vmem>>, vector<8x64xbf16>
    %c64 = arith.constant 64 : index
    %c0_95 = arith.constant 0 : index
    %100 = vector.load %arg8[%c64, %c0_95] : memref<1024x256xbf16, #tpu.memory_space<vmem>>, vector<64x256xbf16>
    %cst_96 = arith.constant dense<0.000000e+00> : vector<8x256xf32>
    %101 = tpu.matmul %99, %100, %cst_96 {dimension_numbers = #tpu.dot_dimension_numbers<[1], [0], [0], [1], [0, 0, 1, 1], [], []>} : vector<8x64xbf16>, vector<64x256xbf16>, vector<8x256xf32> -> vector<8x256xf32>
    %102 = arith.addf %98, %101 : vector<8x256xf32>
    %c16_97 = arith.constant 16 : index
    %c0_98 = arith.constant 0 : index
    %103 = vector.load %arg15[%c16_97, %c0_98] : memref<128x64xbf16, #tpu.memory_space<vmem>>, vector<8x64xbf16>
    %c128 = arith.constant 128 : index
    %c0_99 = arith.constant 0 : index
    %104 = vector.load %arg8[%c128, %c0_99] : memref<1024x256xbf16, #tpu.memory_space<vmem>>, vector<64x256xbf16>
    %cst_100 = arith.constant dense<0.000000e+00> : vector<8x256xf32>
    %105 = tpu.matmul %103, %104, %cst_100 {dimension_numbers = #tpu.dot_dimension_numbers<[1], [0], [0], [1], [0, 0, 1, 1], [], []>} : vector<8x64xbf16>, vector<64x256xbf16>, vector<8x256xf32> -> vector<8x256xf32>
    %106 = arith.addf %102, %105 : vector<8x256xf32>
    %c24_101 = arith.constant 24 : index
    %c0_102 = arith.constant 0 : index
    %107 = vector.load %arg15[%c24_101, %c0_102] : memref<128x64xbf16, #tpu.memory_space<vmem>>, vector<8x64xbf16>
    %c192 = arith.constant 192 : index
    %c0_103 = arith.constant 0 : index
    %108 = vector.load %arg8[%c192, %c0_103] : memref<1024x256xbf16, #tpu.memory_space<vmem>>, vector<64x256xbf16>
    %cst_104 = arith.constant dense<0.000000e+00> : vector<8x256xf32>
    %109 = tpu.matmul %107, %108, %cst_104 {dimension_numbers = #tpu.dot_dimension_numbers<[1], [0], [0], [1], [0, 0, 1, 1], [], []>} : vector<8x64xbf16>, vector<64x256xbf16>, vector<8x256xf32> -> vector<8x256xf32>
    %110 = arith.addf %106, %109 : vector<8x256xf32>
    %c32_105 = arith.constant 32 : index
    %c0_106 = arith.constant 0 : index
    %111 = vector.load %arg15[%c32_105, %c0_106] : memref<128x64xbf16, #tpu.memory_space<vmem>>, vector<8x64xbf16>
    %c256 = arith.constant 256 : index
    %c0_107 = arith.constant 0 : index
    %112 = vector.load %arg8[%c256, %c0_107] : memref<1024x256xbf16, #tpu.memory_space<vmem>>, vector<64x256xbf16>
    %cst_108 = arith.constant dense<0.000000e+00> : vector<8x256xf32>
    %113 = tpu.matmul %111, %112, %cst_108 {dimension_numbers = #tpu.dot_dimension_numbers<[1], [0], [0], [1], [0, 0, 1, 1], [], []>} : vector<8x64xbf16>, vector<64x256xbf16>, vector<8x256xf32> -> vector<8x256xf32>
    %114 = arith.addf %110, %113 : vector<8x256xf32>
    %c40 = arith.constant 40 : index
    %c0_109 = arith.constant 0 : index
    %115 = vector.load %arg15[%c40, %c0_109] : memref<128x64xbf16, #tpu.memory_space<vmem>>, vector<8x64xbf16>
    %c320 = arith.constant 320 : index
    %c0_110 = arith.constant 0 : index
    %116 = vector.load %arg8[%c320, %c0_110] : memref<1024x256xbf16, #tpu.memory_space<vmem>>, vector<64x256xbf16>
    %cst_111 = arith.constant dense<0.000000e+00> : vector<8x256xf32>
    %117 = tpu.matmul %115, %116, %cst_111 {dimension_numbers = #tpu.dot_dimension_numbers<[1], [0], [0], [1], [0, 0, 1, 1], [], []>} : vector<8x64xbf16>, vector<64x256xbf16>, vector<8x256xf32> -> vector<8x256xf32>
    %118 = arith.addf %114, %117 : vector<8x256xf32>
    %c48 = arith.constant 48 : index
    %c0_112 = arith.constant 0 : index
    %119 = vector.load %arg15[%c48, %c0_112] : memref<128x64xbf16, #tpu.memory_space<vmem>>, vector<8x64xbf16>
    %c384 = arith.constant 384 : index
    %c0_113 = arith.constant 0 : index
    %120 = vector.load %arg8[%c384, %c0_113] : memref<1024x256xbf16, #tpu.memory_space<vmem>>, vector<64x256xbf16>
    %cst_114 = arith.constant dense<0.000000e+00> : vector<8x256xf32>
    %121 = tpu.matmul %119, %120, %cst_114 {dimension_numbers = #tpu.dot_dimension_numbers<[1], [0], [0], [1], [0, 0, 1, 1], [], []>} : vector<8x64xbf16>, vector<64x256xbf16>, vector<8x256xf32> -> vector<8x256xf32>
    %122 = arith.addf %118, %121 : vector<8x256xf32>
    %c56 = arith.constant 56 : index
    %c0_115 = arith.constant 0 : index
    %123 = vector.load %arg15[%c56, %c0_115] : memref<128x64xbf16, #tpu.memory_space<vmem>>, vector<8x64xbf16>
    %c448 = arith.constant 448 : index
    %c0_116 = arith.constant 0 : index
    %124 = vector.load %arg8[%c448, %c0_116] : memref<1024x256xbf16, #tpu.memory_space<vmem>>, vector<64x256xbf16>
    %cst_117 = arith.constant dense<0.000000e+00> : vector<8x256xf32>
    %125 = tpu.matmul %123, %124, %cst_117 {dimension_numbers = #tpu.dot_dimension_numbers<[1], [0], [0], [1], [0, 0, 1, 1], [], []>} : vector<8x64xbf16>, vector<64x256xbf16>, vector<8x256xf32> -> vector<8x256xf32>
    %126 = arith.addf %122, %125 : vector<8x256xf32>
    %c64_118 = arith.constant 64 : index
    %c0_119 = arith.constant 0 : index
    %127 = vector.load %arg15[%c64_118, %c0_119] : memref<128x64xbf16, #tpu.memory_space<vmem>>, vector<8x64xbf16>
    %c512 = arith.constant 512 : index
    %c0_120 = arith.constant 0 : index
    %128 = vector.load %arg8[%c512, %c0_120] : memref<1024x256xbf16, #tpu.memory_space<vmem>>, vector<64x256xbf16>
    %cst_121 = arith.constant dense<0.000000e+00> : vector<8x256xf32>
    %129 = tpu.matmul %127, %128, %cst_121 {dimension_numbers = #tpu.dot_dimension_numbers<[1], [0], [0], [1], [0, 0, 1, 1], [], []>} : vector<8x64xbf16>, vector<64x256xbf16>, vector<8x256xf32> -> vector<8x256xf32>
    %130 = arith.addf %126, %129 : vector<8x256xf32>
    %c72 = arith.constant 72 : index
    %c0_122 = arith.constant 0 : index
    %131 = vector.load %arg15[%c72, %c0_122] : memref<128x64xbf16, #tpu.memory_space<vmem>>, vector<8x64xbf16>
    %c576 = arith.constant 576 : index
    %c0_123 = arith.constant 0 : index
    %132 = vector.load %arg8[%c576, %c0_123] : memref<1024x256xbf16, #tpu.memory_space<vmem>>, vector<64x256xbf16>
    %cst_124 = arith.constant dense<0.000000e+00> : vector<8x256xf32>
    %133 = tpu.matmul %131, %132, %cst_124 {dimension_numbers = #tpu.dot_dimension_numbers<[1], [0], [0], [1], [0, 0, 1, 1], [], []>} : vector<8x64xbf16>, vector<64x256xbf16>, vector<8x256xf32> -> vector<8x256xf32>
    %134 = arith.addf %130, %133 : vector<8x256xf32>
    %c80 = arith.constant 80 : index
    %c0_125 = arith.constant 0 : index
    %135 = vector.load %arg15[%c80, %c0_125] : memref<128x64xbf16, #tpu.memory_space<vmem>>, vector<8x64xbf16>
    %c640 = arith.constant 640 : index
    %c0_126 = arith.constant 0 : index
    %136 = vector.load %arg8[%c640, %c0_126] : memref<1024x256xbf16, #tpu.memory_space<vmem>>, vector<64x256xbf16>
    %cst_127 = arith.constant dense<0.000000e+00> : vector<8x256xf32>
    %137 = tpu.matmul %135, %136, %cst_127 {dimension_numbers = #tpu.dot_dimension_numbers<[1], [0], [0], [1], [0, 0, 1, 1], [], []>} : vector<8x64xbf16>, vector<64x256xbf16>, vector<8x256xf32> -> vector<8x256xf32>
    %138 = arith.addf %134, %137 : vector<8x256xf32>
    %c88 = arith.constant 88 : index
    %c0_128 = arith.constant 0 : index
    %139 = vector.load %arg15[%c88, %c0_128] : memref<128x64xbf16, #tpu.memory_space<vmem>>, vector<8x64xbf16>
    %c704 = arith.constant 704 : index
    %c0_129 = arith.constant 0 : index
    %140 = vector.load %arg8[%c704, %c0_129] : memref<1024x256xbf16, #tpu.memory_space<vmem>>, vector<64x256xbf16>
    %cst_130 = arith.constant dense<0.000000e+00> : vector<8x256xf32>
    %141 = tpu.matmul %139, %140, %cst_130 {dimension_numbers = #tpu.dot_dimension_numbers<[1], [0], [0], [1], [0, 0, 1, 1], [], []>} : vector<8x64xbf16>, vector<64x256xbf16>, vector<8x256xf32> -> vector<8x256xf32>
    %142 = arith.addf %138, %141 : vector<8x256xf32>
    %c96 = arith.constant 96 : index
    %c0_131 = arith.constant 0 : index
    %143 = vector.load %arg15[%c96, %c0_131] : memref<128x64xbf16, #tpu.memory_space<vmem>>, vector<8x64xbf16>
    %c768 = arith.constant 768 : index
    %c0_132 = arith.constant 0 : index
    %144 = vector.load %arg8[%c768, %c0_132] : memref<1024x256xbf16, #tpu.memory_space<vmem>>, vector<64x256xbf16>
    %cst_133 = arith.constant dense<0.000000e+00> : vector<8x256xf32>
    %145 = tpu.matmul %143, %144, %cst_133 {dimension_numbers = #tpu.dot_dimension_numbers<[1], [0], [0], [1], [0, 0, 1, 1], [], []>} : vector<8x64xbf16>, vector<64x256xbf16>, vector<8x256xf32> -> vector<8x256xf32>
    %146 = arith.addf %142, %145 : vector<8x256xf32>
    %c104 = arith.constant 104 : index
    %c0_134 = arith.constant 0 : index
    %147 = vector.load %arg15[%c104, %c0_134] : memref<128x64xbf16, #tpu.memory_space<vmem>>, vector<8x64xbf16>
    %c832 = arith.constant 832 : index
    %c0_135 = arith.constant 0 : index
    %148 = vector.load %arg8[%c832, %c0_135] : memref<1024x256xbf16, #tpu.memory_space<vmem>>, vector<64x256xbf16>
    %cst_136 = arith.constant dense<0.000000e+00> : vector<8x256xf32>
    %149 = tpu.matmul %147, %148, %cst_136 {dimension_numbers = #tpu.dot_dimension_numbers<[1], [0], [0], [1], [0, 0, 1, 1], [], []>} : vector<8x64xbf16>, vector<64x256xbf16>, vector<8x256xf32> -> vector<8x256xf32>
    %150 = arith.addf %146, %149 : vector<8x256xf32>
    %c112 = arith.constant 112 : index
    %c0_137 = arith.constant 0 : index
    %151 = vector.load %arg15[%c112, %c0_137] : memref<128x64xbf16, #tpu.memory_space<vmem>>, vector<8x64xbf16>
    %c896 = arith.constant 896 : index
    %c0_138 = arith.constant 0 : index
    %152 = vector.load %arg8[%c896, %c0_138] : memref<1024x256xbf16, #tpu.memory_space<vmem>>, vector<64x256xbf16>
    %cst_139 = arith.constant dense<0.000000e+00> : vector<8x256xf32>
    %153 = tpu.matmul %151, %152, %cst_139 {dimension_numbers = #tpu.dot_dimension_numbers<[1], [0], [0], [1], [0, 0, 1, 1], [], []>} : vector<8x64xbf16>, vector<64x256xbf16>, vector<8x256xf32> -> vector<8x256xf32>
    %154 = arith.addf %150, %153 : vector<8x256xf32>
    %c120 = arith.constant 120 : index
    %c0_140 = arith.constant 0 : index
    %155 = vector.load %arg15[%c120, %c0_140] : memref<128x64xbf16, #tpu.memory_space<vmem>>, vector<8x64xbf16>
    %c960 = arith.constant 960 : index
    %c0_141 = arith.constant 0 : index
    %156 = vector.load %arg8[%c960, %c0_141] : memref<1024x256xbf16, #tpu.memory_space<vmem>>, vector<64x256xbf16>
    %cst_142 = arith.constant dense<0.000000e+00> : vector<8x256xf32>
    %157 = tpu.matmul %155, %156, %cst_142 {dimension_numbers = #tpu.dot_dimension_numbers<[1], [0], [0], [1], [0, 0, 1, 1], [], []>} : vector<8x64xbf16>, vector<64x256xbf16>, vector<8x256xf32> -> vector<8x256xf32>
    %158 = arith.addf %154, %157 : vector<8x256xf32>
    %c0_143 = arith.constant 0 : index
    %c0_144 = arith.constant 0 : index
    %159 = vector.load %arg9[%c0_143, %c0_144] : memref<1x256xf32, #tpu.memory_space<vmem>>, vector<1x256xf32>
    %160 = vector.broadcast %159 : vector<1x256xf32> to vector<8x256xf32>
    %161 = arith.addf %158, %160 : vector<8x256xf32>
    %cst_145 = arith.constant 0.000000e+00 : f32
    %162 = vector.broadcast %cst_145 : f32 to vector<8x256xf32>
    %163 = arith.maximumf %161, %162 : vector<8x256xf32>
    %164 = arith.truncf %163 : vector<8x256xf32> to vector<8x256xbf16>
    %c0_146 = arith.constant 0 : index
    %c0_147 = arith.constant 0 : index
    %165 = vector.load %arg10[%c0_146, %c0_147] : memref<256x128xbf16, #tpu.memory_space<vmem>>, vector<256x128xbf16>
    %cst_148 = arith.constant dense<0.000000e+00> : vector<8x128xf32>
    %166 = tpu.matmul %164, %165, %cst_148 {dimension_numbers = #tpu.dot_dimension_numbers<[1], [0], [0], [1], [0, 0, 1, 1], [], []>} : vector<8x256xbf16>, vector<256x128xbf16>, vector<8x128xf32> -> vector<8x128xf32>
    %c0_149 = arith.constant 0 : index
    %c0_150 = arith.constant 0 : index
    %167 = vector.load %arg11[%c0_149, %c0_150] : memref<1x128xf32, #tpu.memory_space<vmem>>, vector<1x128xf32>
    %168 = vector.broadcast %167 : vector<1x128xf32> to vector<8x128xf32>
    %169 = arith.addf %166, %168 : vector<8x128xf32>
    %c0_151 = arith.constant 0 : index
    %c0_152 = arith.constant 0 : index
    %170 = vector.load %arg12[%c0_151, %c0_152] : memref<8x128xf32, #tpu.memory_space<vmem>>, vector<8x128xf32>
    tpu.vector_store %arg12[%c0_151, %c0_152], %169 {strides = array<i32>} : memref<8x128xf32, #tpu.memory_space<vmem>>, vector<8x128xf32>,
    return
  }
  func.func @transform_0(%arg0: i32) -> (i32, i32, i32) {
    %c0_i32 = arith.constant 0 : i32
    %c0_i32_0 = arith.constant 0 : i32
    %c0_i32_1 = arith.constant 0 : i32
    return %c0_i32, %arg0, %c0_i32_0 : i32, i32, i32
  }
  func.func @transform_1(%arg0: i32) -> (i32, i32, i32) {
    %c0_i32 = arith.constant 0 : i32
    %c0_i32_0 = arith.constant 0 : i32
    %c0_i32_1 = arith.constant 0 : i32
    %c0_i32_2 = arith.constant 0 : i32
    return %c0_i32, %c0_i32_0, %c0_i32_1 : i32, i32, i32
  }
  func.func @transform_2(%arg0: i32) -> (i32, i32) {
    %c0_i32 = arith.constant 0 : i32
    %c0_i32_0 = arith.constant 0 : i32
    %c0_i32_1 = arith.constant 0 : i32
    return %c0_i32, %c0_i32_0 : i32, i32
  }
  func.func @transform_3(%arg0: i32) -> (i32, i32, i32) {
    %c0_i32 = arith.constant 0 : i32
    %c0_i32_0 = arith.constant 0 : i32
    %c0_i32_1 = arith.constant 0 : i32
    %c0_i32_2 = arith.constant 0 : i32
    return %c0_i32, %c0_i32_0, %c0_i32_1 : i32, i32, i32
  }
  func.func @transform_4(%arg0: i32) -> (i32, i32) {
    %c0_i32 = arith.constant 0 : i32
    %c0_i32_0 = arith.constant 0 : i32
    %c0_i32_1 = arith.constant 0 : i32
    return %c0_i32, %c0_i32_0 : i32, i32
  }
  func.func @transform_5(%arg0: i32) -> (i32, i32, i32) {
    %c0_i32 = arith.constant 0 : i32
    %c0_i32_0 = arith.constant 0 : i32
    %c0_i32_1 = arith.constant 0 : i32
    %c0_i32_2 = arith.constant 0 : i32
    return %c0_i32, %c0_i32_0, %c0_i32_1 : i32, i32, i32
  }
  func.func @transform_6(%arg0: i32) -> (i32, i32) {
    %c0_i32 = arith.constant 0 : i32
    %c0_i32_0 = arith.constant 0 : i32
    %c0_i32_1 = arith.constant 0 : i32
    return %c0_i32, %c0_i32_0 : i32, i32
  }
  func.func @transform_7(%arg0: i32) -> (i32, i32) {
    %c0_i32 = arith.constant 0 : i32
    %c0_i32_0 = arith.constant 0 : i32
    %c0_i32_1 = arith.constant 0 : i32
    return %c0_i32, %c0_i32_0 : i32, i32
  }
  func.func @transform_8(%arg0: i32) -> (i32, i32) {
    %c0_i32 = arith.constant 0 : i32
    %c0_i32_0 = arith.constant 0 : i32
    %c0_i32_1 = arith.constant 0 : i32
    return %c0_i32, %c0_i32_0 : i32, i32
  }
  func.func @transform_9(%arg0: i32) -> (i32, i32) {
    %c0_i32 = arith.constant 0 : i32
    %c0_i32_0 = arith.constant 0 : i32
    %c0_i32_1 = arith.constant 0 : i32
    return %c0_i32, %c0_i32_0 : i32, i32
  }
  func.func @transform_10(%arg0: i32) -> (i32, i32) {
    %c0_i32 = arith.constant 0 : i32
    %c0_i32_0 = arith.constant 0 : i32
    %c0_i32_1 = arith.constant 0 : i32
    return %c0_i32, %c0_i32_0 : i32, i32
  }
  func.func @transform_11(%arg0: i32) -> (i32, i32) {
    %c0_i32 = arith.constant 0 : i32
    %c0_i32_0 = arith.constant 0 : i32
    return %arg0, %c0_i32 : i32, i32
  }
}

</mosaic_0001>

<bundles_post_ra>
// kernel: tpu_custom_call.1
= control target key start
LH: loop header
LB: loop body
LE: loop exit
PB: predicated region body
PF: predicated region fallthrough
CT: control target
= control target key end

     0   :  { %16 = vsyncpa [#allocation6], 0  ;;  %s16098_s0 = inlined_call_operand.vmem [shape: f32[28,8,28], index: 0, kind: input, shape index: {}]   ;;  %s16099_s1 = inlined_call_operand.hbm [shape: bf16[5,28,192], index: 1, kind: input, shape index: {}]   ;;  %s16100_s2 = inlined_call_operand.vmem [shape: f32[1,192], index: 2, kind: input, shape index: {}]   ;;  %s16101_s3 = inlined_call_operand.hbm [shape: bf16[5,192,320], index: 3, kind: input, shape index: {}]   ;;  %s16102_s4 = inlined_call_operand.vmem [shape: f32[1,320], index: 4, kind: input, shape index: {}]   ;;  %s16103_s5 = inlined_call_operand.vmem [shape: bf16[5,320,64], index: 5, kind: input, shape index: {}]   ;;  %s16104_s6 = inlined_call_operand.vmem [shape: f32[1,64], index: 6, kind: input, shape index: {}]   ;;  %s16105_s7 = inlined_call_operand.vmem [shape: bf16[1024,256], index: 7, kind: input, shape index: {}]   ;;  %s16106_s8 = inlined_call_operand.vmem [shape: f32[1,256], index: 8, kind: input, shape index: {}]   ;;  %s16107_s9 = inlined_call_operand.hbm [shape: bf16[256,128], index: 9, kind: input, shape index: {}]   ;;  %s16108_s10 = inlined_call_operand.vmem [shape: f32[1,128], index: 10, kind: input, shape index: {}]   ;;  %s16109_s11 = inlined_call_operand.hbm [shape: f32[8,128], index: 11, kind: output, shape index: {}]  }
   0x1   :  { %17 = vsyncpa [#allocation9], 0 }
   0x2   :  { %18 = vsyncpa [#allocation7], 0  ;;  %s12189_s17 = smov [#allocation8]  }
   0x3   :  { %s40_s18 = sshll.u32 %s12189_s17, 4  ;;  %s41_s18 = int_to_ptr.vmem [resolvable:$true] %s40_s18 }
   0x4   :  { %s12111_s19 = scalar_lea.vmem %s41_s18, 23040  ;;  %p12116_p1 = scmp.lt.s32.totalorder %s41_s18, %s41_s18 }
   0x5   :  { %p12112_p0 = scmp.ne.s32.totalorder %s41_s18, %s12111_s19  ;;  %p12117_p2 = scmp.lt.s32.totalorder %s12111_s19, %s12111_s19 }
   0x7   :  { %p12118_p3 = por %p12117_p2, %p12116_p1 }
   0x9   :  { %p12119_p4 = pnand %p12118_p3, %p12112_p0 }
   0xb   :  { %12122 = shalt.err (!%p12119_p4)
}
   0xc   :  { %s12190_s20 = smov 192   ;;  %s12191_s21 = smov 12  }
   0xd   :  { %46 = dma.hbm_to_vmem [thread:$0]  %s16101_s3, 23040, %s41_s18, [#allocation9], %s12190_s20, %s12190_s20, %s12191_s21  }
   0xe   :  { %s12192_s24 = smov [#allocation5]  }
   0xf   :  { %s26_s25 = sshll.u32 %s12192_s24, 4  ;;  %s27_s25 = int_to_ptr.vmem [resolvable:$true] %s26_s25 }
  0x10   :  { %s12131_s26 = scalar_lea.vmem %s27_s25, 2560  ;;  %p12136_p6 = scmp.lt.s32.totalorder %s27_s25, %s27_s25 }
  0x11   :  { %p12132_p5 = scmp.ne.s32.totalorder %s27_s25, %s12131_s26  ;;  %p12137_p7 = scmp.lt.s32.totalorder %s12131_s26, %s12131_s26 }
  0x13   :  { %p12138_p8 = por %p12137_p7, %p12136_p6 }
  0x15   :  { %p12139_p9 = pnand %p12138_p8, %p12132_p5 }
  0x17   :  { %12142 = shalt.err (!%p12139_p9)
}
  0x18   :  { %s12193_s27 = smov 128   ;;  %s12194_s28 = smov 8  }
  0x19   :  { %32 = dma.hbm_to_vmem [thread:$0]  %s16099_s1, 2560, %s27_s25, [#allocation6], %s12193_s27, %s12193_s27, %s12194_s28  }
  0x1a   :  { %s12195_s12 = smov [#allocation10]  }
  0x1b   :  { %s62_s13 = sshll.u32 %s12195_s12, 4  ;;  %s63_s13 = int_to_ptr.vmem [resolvable:$true] %s62_s13 }
  0x1c   :  { %s12151_s3 = scalar_lea.vmem %s63_s13, 2048  ;;  %p12156_p11 = scmp.lt.s32.totalorder %s63_s13, %s63_s13 }
  0x1d   :  { %p12152_p10 = scmp.ne.s32.totalorder %s63_s13, %s12151_s3  ;;  %p12157_p12 = scmp.lt.s32.totalorder %s12151_s3, %s12151_s3 }
  0x1f   :  { %p12158_p13 = por %p12157_p12, %p12156_p11 }
  0x21   :  { %p12159_p0 = pnand %p12158_p13, %p12152_p10 }
  0x23   :  { %12162 = shalt.err (!%p12159_p0)
}
  0x24   :  { %s12196_s14 = smov 64   ;;  %s12197_s15 = smov 4  }
  0x25   :  { %68 = dma.hbm_to_vmem [thread:$0]  %s16107_s9, 2048, %s63_s13, [#allocation9], %s12196_s14, %s12196_s14, %s12197_s15  }
  0x26   :  { %12183 = dma.done.wait [#allocation6], 2560  }
  0x27   :  { %12184 = vsyncadd [#allocation6], 4294964736 }
  0x28   :  { %12185 = dma.done.wait [#allocation9], 25088  }
  0x29   :  { %12186 = vsyncadd [#allocation9], 4294942208  ;;  %v16110_v0 = vmov 0   ;;  %vm226_vm0 = vcmask 1045504   ;;  %v11386_v3 = vld [vmem:[#allocation5 + $0x24] ss:$8 sps:$4 sm:$0xff]  }
  0x2a   :  { %265 = vmatprep.mubr.bf16.mxu0 %v16110_v0  ;;  %365 = vmatprep.mubr.bf16.mxu1 %v16110_v0  ;;  %v11383_v1 = vld [vmem:[#allocation5 + $0x34] ss:$8 sps:$4 sm:$0x3f]   ;;  %v11385_v2 = vld [vmem:[#allocation5 + $0x30] ss:$8 sps:$4 sm:$0x3f]  }
  0x2b   :  { %9643 = vmatprep.subr.msk.bf16.mxu0 %vm226_vm0, %v11383_v1  ;;  %11368 = vmatprep.subr.msk.bf16.mxu1 %vm226_vm0, %v11383_v1  ;;  %v11388_v4 = vld [vmem:[#allocation5 + $0x20] ss:$8 sps:$4 sm:$0xff]   ;;  %v81_v5 = vld [vmem:[%s16098_s0] sm:$0xff]  ;;  %v228_v6 = vsel %vm226_vm0, %v11385_v2, 0  ;;  %v82_v7 = vld [vmem:[%s16098_s0 + $0x8] sm:$0xff]  ;;  %vm145_vm1 = vcmask 1043456  }
  0x2c   :  { %v83_v8 = vld [vmem:[%s16098_s0 + $0x10] sm:$0xff]  ;;  %v84_v9 = vld [vmem:[%s16098_s0 + $0x18] sm:$0xff]  ;;  %246 = vmatpush1.bf16.msra.mxu0 %v228_v6  ;;  %11370 = vmatpush1.bf16.msra.mxu1 %v228_v6  ;;  %v12286_v10 = vpack.c.bf16 %v82_v7, %v81_v5  ;;  %v101_v12 = vld [vmem:[%s16098_s0 + $0xa0] sm:$0xff]  ;;  %vm189_vm2 = vcmask 228352   ;;  %vm1554_vm3 = vcmask 523268   ;;  %vm1980_vm5 = vcmask 523264  }
  0x2d   :  { %v12288_v11 = vpack.c.bf16 %v84_v9, %v83_v8  ;;  %v102_v13 = vld [vmem:[%s16098_s0 + $0xa8] sm:$0xff]  ;;  %v103_v14 = vld [vmem:[%s16098_s0 + $0xb0] sm:$0xff]  ;;  %247 = vmatprep.subr.bf16.mxu0 %v11386_v3  ;;  %11369 = vmatprep.subr.bf16.mxu1 %v11386_v3  ;;  %v104_v15 = vld [vmem:[%s16098_s0 + $0xb8] sm:$0xff]  ;;  %vm5157_vm6 = vcmask 519168   ;;  %s12199_s25 = smov [#allocation11]  }
  0x2e   :  { %v12302_v16 = vpack.c.bf16 %v102_v13, %v101_v12  ;;  %v146_v17 = vrot.slane %v12286_v10, 4  ;;  %v12306_v19 = vpack.c.bf16 %v104_v15, %v103_v14  ;;  %v11389_v20 = vld [vmem:[#allocation5 + $0x54] ss:$8 sps:$4 sm:$0x3f]   ;;  %v11397_v35 = vld [vmem:[#allocation5 + $0x4] ss:$8 sps:$4 sm:$0xff]   ;;  %vm12975_vm4 = vmor %vm1554_vm3, %vm145_vm1 }
  0x2f   :  { %v147_v18 = vrot.slane %v12288_v11, 4  ;;  %v85_v21 = vld [vmem:[%s16098_s0 + $0x20] sm:$0xff]  ;;  %v86_v24 = vld [vmem:[%s16098_s0 + $0x28] sm:$0xff]  ;;  %v11395_v39 = vld [vmem:[#allocation5] ss:$8 sps:$4 sm:$0xff]   ;;  %s9629_s26 = sshll.u32 %s12199_s25, 4  ;;  %s9630_s26 = int_to_ptr.vmem [resolvable:$true] %s9629_s26 }
  0x30   :  { %v165_v22 = vrot.slane %v12302_v16, 4  ;;  %v11391_v23 = vld [vmem:[#allocation5 + $0x50] ss:$8 sps:$4 sm:$0x3f]   ;;  %248 = vmatpush1.bf16.msra.mxu0 %v11388_v4  ;;  %11371 = vmatpush1.bf16.msra.mxu1 %v11388_v4  ;;  %v167_v27 = vrot.slane %v12306_v19, 4  ;;  %v12320_v28 = vpack.c.bf16 %v86_v24, %v85_v21  ;;  %v87_v40 = vld [vmem:[%s16098_s0 + $0x30] sm:$0xff]  ;;  %p12168_p2 = scmp.lt.s32.totalorder %s9630_s26, %s9630_s26 }
  0x31   :  { %v105_v25 = vld [vmem:[%s16098_s0 + $0xc0] sm:$0xff]  ;;  %v148_v26 = vsel %vm145_vm1, %v146_v17, %v147_v18  ;;  %v106_v29 = vld [vmem:[%s16098_s0 + $0xc8] sm:$0xff]  ;;  %9677 = vmatprep.subr.msk.bf16.mxu0 %vm226_vm0, %v11389_v20  ;;  %v626_v30 = vsel %vm226_vm0, %v11391_v23, 0  ;;  %v88_v41 = vld [vmem:[%s16098_s0 + $0x38] sm:$0xff]  ;;  %s12163_s27 = scalar_lea.vmem %s9630_s26, 128 }
  0x32   :  { %v12327_v31 = vpack.c.bf16 %v106_v29, %v105_v25  ;;  %v11392_v32 = vld [vmem:[#allocation5 + $0x14] ss:$8 sps:$4 sm:$0x3f]   ;;  %v12332_v33 = vsel %vm145_vm1, %v165_v22, %v167_v27  ;;  %v11394_v34 = vld [vmem:[#allocation5 + $0x10] ss:$8 sps:$4 sm:$0x3f]   ;;  %v12357_v46 = vpack.c.bf16 %v88_v41, %v87_v40  ;;  %p12164_p1 = scmp.ne.s32.totalorder %s9630_s26, %s12163_s27  ;;  %p12169_p3 = scmp.lt.s32.totalorder %s12163_s27, %s12163_s27 }
  0x33   :  { %9644 = vmatmul.mubr.msk.bf16.vlgmr.msra.gmra.mxu0 %vm189_vm2, %v148_v26  ;;  %9654 = vmatmul.mubr.msk.bf16.vlgmr.msra.gmra.mxu1 %vm189_vm2, %v12332_v33  ;;  %v149_v36 = vrot.slane %v12320_v28, 4  ;;  %v441_v38 = vsel %vm226_vm0, %v11394_v34, 0  ;;  %v11398_v42 = vld [vmem:[#allocation5 + $0x40] ss:$8 sps:$4 sm:$0xff]   ;;  %v11400_v43 = vld [vmem:[#allocation5 + $0x44] ss:$8 sps:$4 sm:$0xff]  }
  0x34   :  { %644 = vmatpush1.bf16.msra.mxu0 %v626_v30  ;;  %275 = vmatprep.mubr.bf16.mxu0 %v16110_v0  ;;  %v169_v37 = vrot.slane %v12327_v31, 4  ;;  %v11401_v47 = vld [vmem:[#allocation5 + $0x74] ss:$8 sps:$4 sm:$0x3f]   ;;  %v151_v48 = vrot.slane %v12357_v46, 4  ;;  %v91_v57 = vld [vmem:[%s16098_s0 + $0x50] sm:$0xff]  ;;  %p12170_p4 = por %p12169_p3, %p12168_p2 }
  0x35   :  { %375 = vmatprep.mubr.bf16.mxu1 %v16110_v0  ;;  %9660 = vmatprep.subr.msk.bf16.mxu1 %vm226_vm0, %v11392_v32  ;;  %v12350_v44 = vsel %vm145_vm1, %v147_v18, %v149_v36  ;;  %v11404_v49 = vld [vmem:[#allocation5 + $0x94] ss:$8 sps:$4 sm:$0x3f]   ;;  %v11403_v52 = vld [vmem:[#allocation5 + $0x70] ss:$8 sps:$4 sm:$0x3f]  }
  0x36   :  { %459 = vmatpush1.bf16.msra.mxu1 %v441_v38  ;;  %v12355_v45 = vsel %vm145_vm1, %v167_v27, %v169_v37  ;;  %645 = vmatprep.subr.bf16.mxu0 %v11400_v43  ;;  %v89_v50 = vld [vmem:[%s16098_s0 + $0x40] sm:$0xff]  ;;  %v90_v51 = vld [vmem:[%s16098_s0 + $0x48] sm:$0xff]  ;;  %v12375_v53 = vsel %vm145_vm1, %v149_v36, %v151_v48  ;;  %v11409_v55 = vld [vmem:[#allocation5 + $0x64] ss:$8 sps:$4 sm:$0xff]   ;;  %v862_v56 = vsel %vm226_vm0, %v11403_v52, 0  ;;  %p12171_p5 = pnand %p12170_p4, %p12164_p1 }
  0x37   :  { %460 = vmatprep.subr.bf16.mxu1 %v11397_v35  ;;  %v12377_v54 = vpack.c.bf16 %v90_v51, %v89_v50  ;;  %v92_v58 = vld [vmem:[%s16098_s0 + $0x58] sm:$0xff]  ;;  %v93_v63 = vld [vmem:[%s16098_s0 + $0x60] sm:$0xff]  ;;  %v94_v1 = vld [vmem:[%s16098_s0 + $0x68] sm:$0xff] }
  0x38   :  { %646 = vmatpush1.bf16.msra.mxu0 %v11398_v42  ;;  %v11407_v59 = vld [vmem:[#allocation5 + $0x60] ss:$8 sps:$4 sm:$0xff]   ;;  %v12396_v62 = vpack.c.bf16 %v92_v58, %v91_v57  ;;  %v12414_v4 = vpack.c.bf16 %v94_v1, %v93_v63  ;;  %v98_v12 = vld [vmem:[%s16098_s0 + $0x88] sm:$0xff]  ;;  %v11412_v30 = vld [vmem:[#allocation5 + $0x84] ss:$8 sps:$4 sm:$0xff]  }
  0x39   :  { %9711 = vmatprep.subr.msk.bf16.mxu0 %vm226_vm0, %v11404_v49  ;;  %v153_v60 = vrot.slane %v12377_v54, 4  ;;  %v95_v5 = vld [vmem:[%s16098_s0 + $0x70] sm:$0xff]  ;;  %v96_v6 = vld [vmem:[%s16098_s0 + $0x78] sm:$0xff]  ;;  %v11406_v27 = vld [vmem:[#allocation5 + $0x90] ss:$8 sps:$4 sm:$0x3f]  }
  0x3a   :  { %461 = vmatpush1.bf16.msra.mxu1 %v11395_v39  ;;  %v155_v2 = vrot.slane %v12396_v62, 4  ;;  %v157_v7 = vrot.slane %v12414_v4, 4  ;;  %v12432_v9 = vpack.c.bf16 %v96_v6, %v95_v5  ;;  %v99_v17 = vld [vmem:[%s16098_s0 + $0x90] sm:$0xff]  ;;  %v100_v18 = vld [vmem:[%s16098_s0 + $0x98] sm:$0xff]  ;;  %v1095_v29 = vsel %vm226_vm0, %v11406_v27, 0 }
  0x3b   :  { %9645 = vmatmul.mubr.msk.bf16.gmra.mxu0 %vm189_vm2, %v12350_v44  ;;  %9655 = vmatmul.mubr.msk.bf16.gmra.mxu1 %vm189_vm2, %v12355_v45  ;;  %v12394_v61 = vsel %vm145_vm1, %v151_v48, %v153_v60  ;;  %v12468_v23 = vpack.c.bf16 %v100_v18, %v99_v17  ;;  %v11410_v32 = vld [vmem:[#allocation5 + $0x80] ss:$8 sps:$4 sm:$0xff]   ;;  %v11416_v34 = vld [vmem:[#allocation8 + $0x1b0] ss:$12 sps:$4 sm:$0xff]   ;;  %v11433_v17 = vld [vmem:[#allocation8 + $0xac] ss:$12 sps:$4 sm:$0xff]  }
  0x3c   :  { %285 = vmatprep.mubr.bf16.mxu0 %v16110_v0  ;;  %478 = vmatprep.mubr.bf16.mxu1 %v16110_v0  ;;  %v12412_v3 = vsel %vm145_vm1, %v153_v60, %v155_v2  ;;  %v12430_v8 = vsel %vm145_vm1, %v155_v2, %v157_v7  ;;  %v159_v13 = vrot.slane %v12432_v9, 4  ;;  %v11418_v35 = vld [vmem:[#allocation8 + $0x1b4] ss:$12 sps:$4 sm:$0xff]   ;;  %v11421_v39 = vld [vmem:[#allocation8 + $0x19c] ss:$12 sps:$4 sm:$0xff]  }
  0x3d   :  { %9694 = vmatprep.subr.msk.bf16.mxu1 %vm226_vm0, %v11401_v47  ;;  %v163_v24 = vrot.slane %v12468_v23, 4  ;;  %v107_v36 = vld [vmem:[%s16098_s0 + $0xd0] sm:$0xff]  ;;  %v11427_v60 = vld [vmem:[#allocation8 + $0x16c] ss:$12 sps:$4 sm:$0xff]  }
  0x3e   :  { %v12448_v14 = vsel %vm145_vm1, %v157_v7, %v159_v13  ;;  %v11422_v50 = vld [vmem:[#allocation8 + $0x180] ss:$12 sps:$4 sm:$0xff]   ;;  %v11424_v51 = vld [vmem:[#allocation8 + $0x184] ss:$12 sps:$4 sm:$0xff]  }
  0x3f   :  { %v166_v26 = vsel %vm145_vm1, %v163_v24, %v165_v22  ;;  %v11415_v22 = vld [vmem:[#allocation8 + $0x1cc] ss:$12 sps:$4 sm:$0xff]  }
  0x43   :  { %9646 = vmatmul.mubr.msk.bf16.gmra.mxu0 %vm189_vm2, %v12375_v53  ;;  %9661 = vmatmul.mubr.msk.bf16.vlgmr.msra.gmra.mxu1 %vm189_vm2, %v12286_v10  ;;  %v97_v10 = vld [vmem:[%s16098_s0 + $0x80] sm:$0xff] }
  0x44   :  { %295 = vmatprep.mubr.bf16.mxu0 %v16110_v0  ;;  %488 = vmatprep.mubr.bf16.mxu1 %v16110_v0  ;;  %v12450_v15 = vpack.c.bf16 %v98_v12, %v97_v10  ;;  %v11428_v12 = vld [vmem:[#allocation8 + $0x150] ss:$12 sps:$4 sm:$0xff]  }
  0x45   :  { %880 = vmatpush1.bf16.msra.mxu1 %v862_v56 }
  0x46   :  { %881 = vmatprep.subr.bf16.mxu1 %v11409_v55  ;;  %v161_v20 = vrot.slane %v12450_v15, 4 }
  0x48   :  { %v12466_v21 = vsel %vm145_vm1, %v159_v13, %v161_v20  ;;  %v164_v25 = vsel %vm145_vm1, %v161_v20, %v163_v24  ;;  %v11431_v20 = vld [vmem:[#allocation8 + $0xa8] ss:$12 sps:$4 sm:$0xff]  }
  0x49   :  { %882 = vmatpush1.bf16.msra.mxu1 %v11407_v59  ;;  %v11425_v59 = vld [vmem:[#allocation8 + $0x168] ss:$12 sps:$4 sm:$0xff]  }
  0x4a   :  { %2011 = vmatprep.subr.bf16.mxu1 %v11415_v22  ;;  %v11434_v22 = vld [vmem:[#allocation8 + $0x138] ss:$12 sps:$4 sm:$0xff]  }
  0x4b   :  { %9647 = vmatmul.mubr.msk.bf16.gmra.mxu0 %vm189_vm2, %v12394_v61  ;;  %9662 = vmatmul.mubr.msk.bf16.gmra.mxu1 %vm189_vm2, %v12288_v11 }
  0x4c   :  { %305 = vmatprep.mubr.bf16.mxu0 %v16110_v0  ;;  %498 = vmatprep.mubr.bf16.mxu1 %v16110_v0 }
  0x53   :  { %9648 = vmatmul.mubr.msk.bf16.gmra.mxu0 %vm189_vm2, %v12412_v3  ;;  %9663 = vmatmul.mubr.msk.bf16.gmra.mxu1 %vm189_vm2, %v12320_v28 }
  0x54   :  { %315 = vmatprep.mubr.bf16.mxu0 %v16110_v0  ;;  %508 = vmatprep.mubr.bf16.mxu1 %v16110_v0 }
  0x5b   :  { %9649 = vmatmul.mubr.msk.bf16.gmra.mxu0 %vm189_vm2, %v12430_v8  ;;  %9664 = vmatmul.mubr.msk.bf16.gmra.mxu1 %vm189_vm2, %v12357_v46 }
  0x5c   :  { %325 = vmatprep.mubr.bf16.mxu0 %v16110_v0  ;;  %518 = vmatprep.mubr.bf16.mxu1 %v16110_v0 }
  0x63   :  { %9650 = vmatmul.mubr.msk.bf16.gmra.mxu0 %vm189_vm2, %v12448_v14  ;;  %9665 = vmatmul.mubr.msk.bf16.gmra.mxu1 %vm189_vm2, %v12377_v54 }
  0x64   :  { %335 = vmatprep.mubr.bf16.mxu0 %v16110_v0  ;;  %528 = vmatprep.mubr.bf16.mxu1 %v16110_v0 }
  0x6b   :  { %9651 = vmatmul.mubr.msk.bf16.gmra.mxu0 %vm189_vm2, %v12466_v21  ;;  %9666 = vmatmul.mubr.msk.bf16.gmra.mxu1 %vm189_vm2, %v12396_v62 }
  0x6c   :  { %345 = vmatprep.mubr.bf16.mxu0 %v16110_v0  ;;  %538 = vmatprep.mubr.bf16.mxu1 %v16110_v0 }
  0x73   :  { %9652 = vmatmul.mubr.msk.bf16.gmra.mxu0 %vm189_vm2, %v164_v25  ;;  %9667 = vmatmul.mubr.msk.bf16.gmra.mxu1 %vm189_vm2, %v12414_v4 }
  0x74   :  { %355 = vmatprep.mubr.bf16.mxu0 %v16110_v0  ;;  %548 = vmatprep.mubr.bf16.mxu1 %v16110_v0 }
  0x7b   :  { %9653 = vmatmul.mubr.msk.bf16.gmra.mxu0 %vm189_vm2, %v166_v26  ;;  %9668 = vmatmul.mubr.msk.bf16.gmra.mxu1 %vm189_vm2, %v12432_v9 }
  0x7c   :  { %558 = vmatprep.mubr.bf16.mxu1 %v16110_v0  ;;  %663 = vmatprep.mubr.bf16.mxu0 %v16110_v0 }
  0x83   :  { %9669 = vmatmul.mubr.msk.bf16.gmra.mxu1 %vm189_vm2, %v12450_v15  ;;  %9678 = vmatmul.mubr.msk.bf16.vlgmr.msra.gmra.mxu0 %vm189_vm2, %v12288_v11  ;;  %v11413_v11 = vld [vmem:[#allocation8 + $0x1c8] ss:$12 sps:$4 sm:$0xff]  }
  0x84   :  { %1113 = vmatpush1.bf16.msra.mxu0 %v1095_v29  ;;  %568 = vmatprep.mubr.bf16.mxu1 %v16110_v0  ;;  %v11439_v29 = vld [vmem:[#allocation8 + $0x94] ss:$12 sps:$4 sm:$0xff]  }
  0x85   :  { %673 = vmatprep.mubr.bf16.mxu0 %v16110_v0  ;;  %1114 = vmatprep.subr.bf16.mxu0 %v11412_v30 }
  0x88   :  { %1115 = vmatpush1.bf16.msra.mxu0 %v11410_v32 }
  0x89   :  { %2512 = vmatprep.subr.bf16.mxu0 %v11433_v17  ;;  %v11457_v17 = vld [vmem:[#allocation8 + $0x34] ss:$12 sps:$4 sm:$0xff]  }
  0x8b   :  { %9670 = vmatmul.mubr.msk.bf16.gmra.mxu1 %vm189_vm2, %v12468_v23  ;;  %9679 = vmatmul.mubr.msk.bf16.gmra.mxu0 %vm189_vm2, %v12320_v28 }
  0x8c   :  { %578 = vmatprep.mubr.bf16.mxu1 %v16110_v0  ;;  %683 = vmatprep.mubr.bf16.mxu0 %v16110_v0 }
  0x93   :  { %9671 = vmatmul.mubr.msk.bf16.gmra.mxu1 %vm189_vm2, %v12302_v16  ;;  %9680 = vmatmul.mubr.msk.bf16.gmra.mxu0 %vm189_vm2, %v12357_v46 }
  0x94   :  { %588 = vmatprep.mubr.bf16.mxu1 %v16110_v0  ;;  %693 = vmatprep.mubr.bf16.mxu0 %v16110_v0 }
  0x9b   :  { %9672 = vmatmul.mubr.msk.bf16.gmra.mxu1 %vm189_vm2, %v12306_v19  ;;  %9681 = vmatmul.mubr.msk.bf16.gmra.mxu0 %vm189_vm2, %v12377_v54 }
  0x9c   :  { %703 = vmatprep.mubr.bf16.mxu0 %v16110_v0  ;;  %899 = vmatprep.mubr.bf16.mxu1 %v16110_v0 }
  0xa3   :  { %9682 = vmatmul.mubr.msk.bf16.gmra.mxu0 %vm189_vm2, %v12396_v62  ;;  %9695 = vmatmul.mubr.msk.bf16.vlgmr.msra.gmra.mxu1 %vm189_vm2, %v12350_v44 }
  0xa4   :  { %713 = vmatprep.mubr.bf16.mxu0 %v16110_v0  ;;  %909 = vmatprep.mubr.bf16.mxu1 %v16110_v0 }
  0xa5   :  { %2012 = vmatpush1.bf16.msra.mxu1 %v11413_v11 }
  0xa6   :  { %2013 = vmatprep.subr.bf16.mxu1 %v11418_v35 }
  0xa9   :  { %2014 = vmatpush1.bf16.msra.mxu1 %v11416_v34  ;;  %v11436_v34 = vld [vmem:[#allocation8 + $0x13c] ss:$12 sps:$4 sm:$0xff]  }
  0xaa   :  { %2015 = vmatprep.subr.bf16.mxu1 %v11421_v39  ;;  %v11440_v39 = vld [vmem:[#allocation8 + $0x78] ss:$12 sps:$4 sm:$0xff]  }
  0xab   :  { %9683 = vmatmul.mubr.msk.bf16.gmra.mxu0 %vm189_vm2, %v12414_v4  ;;  %9696 = vmatmul.mubr.msk.bf16.gmra.mxu1 %vm189_vm2, %v12375_v53 }
  0xac   :  { %723 = vmatprep.mubr.bf16.mxu0 %v16110_v0  ;;  %919 = vmatprep.mubr.bf16.mxu1 %v16110_v0 }
  0xb3   :  { %9684 = vmatmul.mubr.msk.bf16.gmra.mxu0 %vm189_vm2, %v12432_v9  ;;  %9697 = vmatmul.mubr.msk.bf16.gmra.mxu1 %vm189_vm2, %v12394_v61 }
  0xb4   :  { %733 = vmatprep.mubr.bf16.mxu0 %v16110_v0  ;;  %929 = vmatprep.mubr.bf16.mxu1 %v16110_v0 }
  0xbb   :  { %9685 = vmatmul.mubr.msk.bf16.gmra.mxu0 %vm189_vm2, %v12450_v15  ;;  %9698 = vmatmul.mubr.msk.bf16.gmra.mxu1 %vm189_vm2, %v12412_v3 }
  0xbc   :  { %743 = vmatprep.mubr.bf16.mxu0 %v16110_v0  ;;  %939 = vmatprep.mubr.bf16.mxu1 %v16110_v0 }
  0xc3   :  { %9686 = vmatmul.mubr.msk.bf16.gmra.mxu0 %vm189_vm2, %v12468_v23  ;;  %9699 = vmatmul.mubr.msk.bf16.gmra.mxu1 %vm189_vm2, %v12430_v8 }
  0xc4   :  { %753 = vmatprep.mubr.bf16.mxu0 %v16110_v0  ;;  %949 = vmatprep.mubr.bf16.mxu1 %v16110_v0 }
  0xcb   :  { %9687 = vmatmul.mubr.msk.bf16.gmra.mxu0 %vm189_vm2, %v12302_v16  ;;  %9700 = vmatmul.mubr.msk.bf16.gmra.mxu1 %vm189_vm2, %v12448_v14 }
  0xcc   :  { %763 = vmatprep.mubr.bf16.mxu0 %v16110_v0  ;;  %959 = vmatprep.mubr.bf16.mxu1 %v16110_v0 }
  0xd3   :  { %9688 = vmatmul.mubr.msk.bf16.gmra.mxu0 %vm189_vm2, %v12306_v19  ;;  %9701 = vmatmul.mubr.msk.bf16.gmra.mxu1 %vm189_vm2, %v12466_v21 }
  0xd4   :  { %773 = vmatprep.mubr.bf16.mxu0 %v16110_v0  ;;  %969 = vmatprep.mubr.bf16.mxu1 %v16110_v0 }
  0xdb   :  { %9689 = vmatmul.mubr.msk.bf16.gmra.mxu0 %vm189_vm2, %v12327_v31  ;;  %9702 = vmatmul.mubr.msk.bf16.gmra.mxu1 %vm189_vm2, %v164_v25 }
  0xdc   :  { %979 = vmatprep.mubr.bf16.mxu1 %v16110_v0  ;;  %1132 = vmatprep.mubr.bf16.mxu0 %v16110_v0 }
  0xe3   :  { %9703 = vmatmul.mubr.msk.bf16.gmra.mxu1 %vm189_vm2, %v166_v26  ;;  %9712 = vmatmul.mubr.msk.bf16.vlgmr.msra.gmra.mxu0 %vm189_vm2, %v12320_v28  ;;  %v108_v28 = vld [vmem:[%s16098_s0 + $0xd8] sm:$0xff] }
  0xe4   :  { %989 = vmatprep.mubr.bf16.mxu1 %v16110_v0  ;;  %1142 = vmatprep.mubr.bf16.mxu0 %v16110_v0  ;;  %v12580_v38 = vpack.c.bf16 %v108_v28, %v107_v36  ;;  %v11442_v28 = vld [vmem:[#allocation8 + $0x7c] ss:$12 sps:$4 sm:$0xff]  }
  0xe5   :  { %2513 = vmatpush1.bf16.msra.mxu0 %v11431_v20 }
  0xe6   :  { %v838_v42 = vrot.slane %v12580_v38, 4  ;;  %2514 = vmatprep.subr.bf16.mxu0 %v11439_v29  ;;  %v11454_v29 = vld [vmem:[#allocation8 + $0x22c] ss:$12 sps:$4 sm:$0xff]  }
  0xeb   :  { %9704 = vmatmul.mubr.msk.bf16.gmra.mxu1 %vm189_vm2, %v12332_v33  ;;  %9713 = vmatmul.mubr.msk.bf16.gmra.mxu0 %vm189_vm2, %v12357_v46  ;;  %v11419_v33 = vld [vmem:[#allocation8 + $0x198] ss:$12 sps:$4 sm:$0xff]  }
  0xec   :  { %999 = vmatprep.mubr.bf16.mxu1 %v16110_v0  ;;  %1152 = vmatprep.mubr.bf16.mxu0 %v16110_v0 }
  0xed   :  { %2016 = vmatpush1.bf16.msra.mxu1 %v11419_v33 }
  0xee   :  { %2017 = vmatprep.subr.bf16.mxu1 %v11424_v51 }
  0xf1   :  { %2018 = vmatpush1.bf16.msra.mxu1 %v11422_v50  ;;  %v11448_v50 = vld [vmem:[#allocation8 + $0x64] ss:$12 sps:$4 sm:$0xff]  }
  0xf2   :  { %2019 = vmatprep.subr.bf16.mxu1 %v11427_v60 }
  0xf3   :  { %v267_v40 = vpop.f32.mrf.mxu0  ;;  %v12582_v41 = vpop.f32.mrf.mxu1  ;;  %9705 = vmatmul.mubr.msk.bf16.gmra.mxu1 %vm189_vm2, %v12355_v45  ;;  %9714 = vmatmul.mubr.msk.bf16.gmra.mxu0 %vm189_vm2, %v12377_v54  ;;  %v839_v45 = vsel %vm145_vm1, %v169_v37, %v838_v42 }
  0xf4   :  { %1009 = vmatprep.mubr.bf16.mxu1 %v16110_v0  ;;  %1162 = vmatprep.mubr.bf16.mxu0 %v16110_v0 }
  0xf5   :  { %v269_v43 = vpop.f32.mrf.mxu0  ;;  %v12591_v44 = vpop.f32.mrf.mxu1  ;;  %2020 = vmatpush1.bf16.msra.mxu1 %v11425_v59  ;;  %v11445_v59 = vld [vmem:[#allocation8 + $0x124] ss:$12 sps:$4 sm:$0xff]  }
  0xf7   :  { %v271_v46 = vpop.f32.mrf.mxu0  ;;  %v12593_v47 = vpop.f32.mrf.mxu1 }
  0xf9   :  { %v12598_v48 = vpop.f32.mrf.mxu0  ;;  %v12600_v49 = vpop.f32.mrf.mxu1 }
  0xfa   :  { %16157 = vst [vmem:[#allocation15_spill] sm:$0xff] %v12600_v49 }
  0xfb   :  { %v277_v52 = vpop.f32.mrf.mxu0  ;;  %v12602_v53 = vpop.f32.mrf.mxu1  ;;  %9706 = vmatmul.mubr.msk.bf16.gmra.mxu1 %vm189_vm2, %v839_v45  ;;  %9715 = vmatmul.mubr.msk.bf16.gmra.mxu0 %vm189_vm2, %v12396_v62 }
  0xfc   :  { %1172 = vmatprep.mubr.bf16.mxu0 %v16110_v0 }
  0xfd   :  { %v279_v54 = vpop.f32.mrf.mxu0  ;;  %v12608_v55 = vpop.f32.mrf.mxu1 }
  0xff   :  { %v281_v37 = vpop.f32.mrf.mxu0  ;;  %v12610_v56 = vpop.f32.mrf.mxu1 }
 0x101   :  { %v12612_v57 = vpop.f32.mrf.mxu0  ;;  %v12614_v58 = vpop.f32.mrf.mxu1 }
 0x102   :  { %16158 = vst [vmem:[#allocation16_spill] sm:$0xff] %v12614_v58 }
 0x103   :  { %v287_v61 = vpop.f32.mrf.mxu0  ;;  %v480_v63 = vpop.f32.mrf.mxu1  ;;  %9716 = vmatmul.mubr.msk.bf16.gmra.mxu0 %vm189_vm2, %v12414_v4  ;;  %v11430_v4 = vld [vmem:[#allocation8 + $0x154] ss:$12 sps:$4 sm:$0xff]  }
 0x104   :  { %v12618_v62 = vadd.f32 %v480_v63, %v267_v40  ;;  %1182 = vmatprep.mubr.bf16.mxu0 %v16110_v0  ;;  %2021 = vmatprep.subr.bf16.mxu1 %v11430_v4  ;;  %v11451_v63 = vld [vmem:[#allocation8 + $0x4c] ss:$12 sps:$4 sm:$0xff]  }
 0x105   :  { %v289_v1 = vpop.f32.mrf.mxu0  ;;  %v482_v2 = vpop.f32.mrf.mxu1  ;;  %2022 = vmatpush1.bf16.msra.mxu1 %v11428_v12 }
 0x106   :  { %v12621_v3 = vadd.f32 %v482_v2, %v269_v43  ;;  %2023 = vmatprep.subr.bf16.mxu1 %v11436_v34  ;;  %v11449_v2 = vld [vmem:[#allocation8 + $0x48] ss:$12 sps:$4 sm:$0xff]  }
 0x107   :  { %v291_v5 = vpop.f32.mrf.mxu0  ;;  %v484_v6 = vpop.f32.mrf.mxu1 }
 0x108   :  { %v12623_v7 = vadd.f32 %v484_v6, %v271_v46 }
 0x109   :  { %v12625_v8 = vpop.f32.mrf.mxu0  ;;  %v12627_v10 = vpop.f32.mrf.mxu1  ;;  %2024 = vmatpush1.bf16.msra.mxu1 %v11434_v22 }
 0x10a   :  { %2025 = vmatprep.subr.bf16.mxu1 %v11445_v59 }
 0x10b   :  { %v297_v13 = vpop.f32.mrf.mxu0  ;;  %v490_v14 = vpop.f32.mrf.mxu1  ;;  %9717 = vmatmul.mubr.msk.bf16.gmra.mxu0 %vm189_vm2, %v12432_v9  ;;  %v11437_v9 = vld [vmem:[#allocation8 + $0x90] ss:$12 sps:$4 sm:$0xff]  }
 0x10c   :  { %v12631_v18 = vadd.f32 %v490_v14, %v277_v52  ;;  %1192 = vmatprep.mubr.bf16.mxu0 %v16110_v0  ;;  %2515 = vmatpush1.bf16.msra.mxu0 %v11437_v9 }
 0x10d   :  { %v299_v21 = vpop.f32.mrf.mxu0  ;;  %v492_v24 = vpop.f32.mrf.mxu1  ;;  %2516 = vmatprep.subr.bf16.mxu0 %v11442_v28 }
 0x10e   :  { %v12634_v25 = vadd.f32 %v492_v24, %v279_v54 }
 0x10f   :  { %v301_v26 = vpop.f32.mrf.mxu0  ;;  %v494_v27 = vpop.f32.mrf.mxu1 }
 0x110   :  { %v12636_v30 = vadd.f32 %v494_v27, %v281_v37  ;;  %2517 = vmatpush1.bf16.msra.mxu0 %v11440_v39  ;;  %v11443_v37 = vld [vmem:[#allocation8 + $0x120] ss:$12 sps:$4 sm:$0xff]   ;;  %v11452_v27 = vld [vmem:[#allocation8 + $0x228] ss:$12 sps:$4 sm:$0xff]  }
 0x111   :  { %v12638_v32 = vpop.f32.mrf.mxu0  ;;  %v12640_v11 = vpop.f32.mrf.mxu1  ;;  %2518 = vmatprep.subr.bf16.mxu0 %v11448_v50  ;;  %2026 = vmatpush1.bf16.msra.mxu1 %v11443_v37  ;;  %v11466_v50 = vld [vmem:[#allocation8 + $0x4] ss:$12 sps:$4 sm:$0xff]  }
 0x112   :  { %2035 = vmatprep.subr.bf16.mxu1 %v11454_v29  ;;  %v11475_v29 = vld [vmem:[#allocation8 + $0xf4] ss:$12 sps:$4 sm:$0xff]  }
 0x113   :  { %v307_v35 = vpop.f32.mrf.mxu0  ;;  %v500_v36 = vpop.f32.mrf.mxu1  ;;  %9718 = vmatmul.mubr.msk.bf16.gmra.mxu0 %vm189_vm2, %v12450_v15  ;;  %v11446_v15 = vld [vmem:[#allocation8 + $0x60] ss:$12 sps:$4 sm:$0xff]  }
 0x114   :  { %v12644_v33 = vadd.f32 %v500_v36, %v287_v61  ;;  %1202 = vmatprep.mubr.bf16.mxu0 %v16110_v0  ;;  %2519 = vmatpush1.bf16.msra.mxu0 %v11446_v15 }
 0x115   :  { %v309_v40 = vpop.f32.mrf.mxu0  ;;  %v502_v42 = vpop.f32.mrf.mxu1  ;;  %2520 = vmatprep.subr.bf16.mxu0 %v11451_v63  ;;  %2036 = vmatpush2.bf16.msra.mxu1 %v11452_v27  ;;  %v11469_v63 = vld [vmem:[#allocation8 + $0x10c] ss:$12 sps:$4 sm:$0xff]  }
 0x116   :  { %v12647_v43 = vadd.f32 %v502_v42, %v289_v1 }
 0x117   :  { %v311_v46 = vpop.f32.mrf.mxu0  ;;  %v504_v45 = vpop.f32.mrf.mxu1 }
 0x118   :  { %v12649_v51 = vadd.f32 %v504_v45, %v291_v5  ;;  %2521 = vmatpush1.bf16.msra.mxu0 %v11449_v2 }
 0x119   :  { %v12651_v52 = vpop.f32.mrf.mxu0  ;;  %v12653_v54 = vpop.f32.mrf.mxu1  ;;  %2522 = vmatprep.subr.bf16.mxu0 %v11457_v17 }
 0x11a   :  { %16159 = vst [vmem:[#allocation17_spill] sm:$0xff] %v12651_v52 }
 0x11b   :  { %v317_v60 = vpop.f32.mrf.mxu0  ;;  %v510_v61 = vpop.f32.mrf.mxu1  ;;  %9719 = vmatmul.mubr.msk.bf16.gmra.mxu0 %vm189_vm2, %v12468_v23  ;;  %v11455_v23 = vld [vmem:[#allocation8 + $0x30] ss:$12 sps:$4 sm:$0xff]  }
 0x11c   :  { %v12657_v1 = vadd.f32 %v510_v61, %v297_v13  ;;  %1212 = vmatprep.mubr.bf16.mxu0 %v16110_v0  ;;  %2523 = vmatpush1.bf16.msra.mxu0 %v11455_v23 }
 0x11d   :  { %v319_v5 = vpop.f32.mrf.mxu0  ;;  %v512_v6 = vpop.f32.mrf.mxu1 }
 0x11e   :  { %v12660_v12 = vadd.f32 %v512_v6, %v299_v21  ;;  %v11460_v21 = vld [vmem:[#allocation8 + $0x1c] ss:$12 sps:$4 sm:$0xff]  }
 0x11f   :  { %v321_v4 = vpop.f32.mrf.mxu0  ;;  %v514_v14 = vpop.f32.mrf.mxu1  ;;  %2524 = vmatprep.subr.bf16.mxu0 %v11460_v21  ;;  %v11467_v6 = vld [vmem:[#allocation8 + $0x108] ss:$12 sps:$4 sm:$0xff]   ;;  %v11461_v21 = vld [vmem:[#allocation8 + $0x210] ss:$12 sps:$4 sm:$0xff]  }
 0x120   :  { %v12662_v20 = vadd.f32 %v514_v14, %v301_v26  ;;  %v11458_v26 = vld [vmem:[#allocation8 + $0x18] ss:$12 sps:$4 sm:$0xff]  }
 0x121   :  { %v12664_v24 = vpop.f32.mrf.mxu0  ;;  %v12666_v13 = vpop.f32.mrf.mxu1  ;;  %2525 = vmatpush1.bf16.msra.mxu0 %v11458_v26  ;;  %v11463_v26 = vld [vmem:[#allocation8 + $0x214] ss:$12 sps:$4 sm:$0xff]  }
 0x122   :  { %16160 = vst [vmem:[#allocation18_spill] sm:$0xff] %v12664_v24  ;;  %16161 = vst [vmem:[#allocation19_spill] sm:$0xff] %v12666_v13  ;;  %2526 = vmatprep.subr.bf16.mxu0 %v11466_v50  ;;  %2037 = vmatprep.subr.bf16.mxu1 %v11463_v26  ;;  %v11470_v26 = vld [vmem:[#allocation8 + $0x1f8] ss:$12 sps:$4 sm:$0xff]  }
 0x123   :  { %v327_v9 = vpop.f32.mrf.mxu0  ;;  %v520_v22 = vpop.f32.mrf.mxu1  ;;  %9720 = vmatmul.mubr.msk.bf16.gmra.mxu0 %vm189_vm2, %v12302_v16  ;;  %v11464_v16 = vld [vmem:[#allocation8] ss:$12 sps:$4 sm:$0xff]   ;;  %2038 = vmatpush2.bf16.msra.mxu1 %v11461_v21 }
 0x124   :  { %v12670_v34 = vadd.f32 %v520_v22, %v307_v35  ;;  %1222 = vmatprep.mubr.bf16.mxu0 %v16110_v0 }
 0x125   :  { %v329_v36 = vpop.f32.mrf.mxu0  ;;  %v522_v28 = vpop.f32.mrf.mxu1  ;;  %2527 = vmatpush1.bf16.msra.mxu0 %v11464_v16 }
 0x126   :  { %v12673_v39 = vadd.f32 %v522_v28, %v309_v40  ;;  %2536 = vmatprep.subr.bf16.mxu0 %v11469_v63 }
 0x127   :  { %v331_v42 = vpop.f32.mrf.mxu0  ;;  %v524_v45 = vpop.f32.mrf.mxu1 }
 0x128   :  { %v12675_v15 = vadd.f32 %v524_v45, %v311_v46 }
 0x129   :  { %v12677_v37 = vpop.f32.mrf.mxu0  ;;  %v12679_v35 = vpop.f32.mrf.mxu1  ;;  %2537 = vmatpush2.bf16.msra.mxu0 %v11467_v6 }
 0x12a   :  { %16162 = vst [vmem:[#allocation20_spill] sm:$0xff] %v12677_v37  ;;  %16163 = vst [vmem:[#allocation21_spill] sm:$0xff] %v12679_v35  ;;  %2538 = vmatprep.subr.bf16.mxu0 %v11475_v29  ;;  %v11472_v29 = vld [vmem:[#allocation8 + $0x1fc] ss:$12 sps:$4 sm:$0xff]   ;;  %v11494_v37 = vld [vmem:[#allocation8 + $0x2ec] ss:$12 sps:$4 sm:$0xff]  }
 0x12b   :  { %v337_v59 = vpop.f32.mrf.mxu0  ;;  %v530_v61 = vpop.f32.mrf.mxu1  ;;  %9721 = vmatmul.mubr.msk.bf16.gmra.mxu0 %vm189_vm2, %v12306_v19  ;;  %2039 = vmatprep.subr.bf16.mxu1 %v11472_v29 }
 0x12c   :  { %v12683_v40 = vadd.f32 %v530_v61, %v317_v60  ;;  %1232 = vmatprep.mubr.bf16.mxu0 %v16110_v0  ;;  %v11473_v60 = vld [vmem:[#allocation8 + $0xf0] ss:$12 sps:$4 sm:$0xff]   ;;  %v11476_v61 = vld [vmem:[#allocation8 + $0xd8] ss:$12 sps:$4 sm:$0xff]   ;;  %2040 = vmatpush2.bf16.msra.mxu1 %v11470_v26 }
 0x12d   :  { %v339_v2 = vpop.f32.mrf.mxu0  ;;  %v532_v46 = vpop.f32.mrf.mxu1  ;;  %2539 = vmatpush2.bf16.msra.mxu0 %v11473_v60 }
 0x12e   :  { %v12686_v14 = vadd.f32 %v532_v46, %v319_v5 }
 0x12f   :  { %v341_v17 = vpop.f32.mrf.mxu0  ;;  %v534_v23 = vpop.f32.mrf.mxu1 }
 0x130   :  { %v12688_v27 = vadd.f32 %v534_v23, %v321_v4  ;;  %v11478_v4 = vld [vmem:[#allocation8 + $0xdc] ss:$12 sps:$4 sm:$0xff]  }
 0x131   :  { %v12690_v22 = vpop.f32.mrf.mxu0  ;;  %v12692_v19 = vpop.f32.mrf.mxu1  ;;  %2540 = vmatprep.subr.bf16.mxu0 %v11478_v4 }
 0x132   :  { %16164 = vst [vmem:[#allocation22_spill] sm:$0xff] %v12690_v22  ;;  %16165 = vst [vmem:[#allocation23_spill] sm:$0xff] %v12692_v19  ;;  %2541 = vmatpush2.bf16.msra.mxu0 %v11476_v61 }
 0x133   :  { %v347_v28 = vpop.f32.mrf.mxu0  ;;  %v540_v45 = vpop.f32.mrf.mxu1  ;;  %9722 = vmatmul.mubr.msk.bf16.gmra.mxu0 %vm189_vm2, %v12327_v31  ;;  %v11484_v31 = vld [vmem:[#allocation8 + $0xc4] ss:$12 sps:$4 sm:$0xff]  }
 0x134   :  { %v12696_v5 = vadd.f32 %v540_v45, %v327_v9  ;;  %1242 = vmatprep.mubr.bf16.mxu0 %v16110_v0  ;;  %v11482_v0 = vld [vmem:[#allocation8 + $0xc0] ss:$12 sps:$4 sm:$0xff]   ;;  %2542 = vmatprep.subr.bf16.mxu0 %v11484_v31  ;;  %v16168_v31 = vmov 0  }
 0x135   :  { %v349_v50 = vpop.f32.mrf.mxu0  ;;  %v542_v16 = vpop.f32.mrf.mxu1 }
 0x136   :  { %v12699_v63 = vadd.f32 %v542_v16, %v329_v36  ;;  %2543 = vmatpush2.bf16.msra.mxu0 %v11482_v0 }
 0x137   :  { %v351_v46 = vpop.f32.mrf.mxu0  ;;  %v544_v6 = vpop.f32.mrf.mxu1  ;;  %3139 = vmatprep.subr.bf16.mxu0 %v11494_v37 }
 0x138   :  { %v12701_v23 = vadd.f32 %v544_v6, %v331_v42  ;;  %v11481_v42 = vld [vmem:[#allocation8 + $0x1e4] ss:$12 sps:$4 sm:$0xff]   ;;  %v11479_v6 = vld [vmem:[#allocation8 + $0x1e0] ss:$12 sps:$4 sm:$0xff]  }
 0x139   :  { %v12703_v9 = vpop.f32.mrf.mxu0  ;;  %v12705_v45 = vpop.f32.mrf.mxu1  ;;  %2041 = vmatprep.subr.bf16.mxu1 %v11481_v42 }
 0x13a   :  { %16166 = vst [vmem:[#allocation24_spill] sm:$0xff] %v12703_v9  ;;  %16167 = vst [vmem:[#allocation25_spill] sm:$0xff] %v12705_v45  ;;  %2042 = vmatpush2.bf16.msra.mxu1 %v11479_v6 }
 0x13b   :  { %v357_v60 = vpop.f32.mrf.mxu0  ;;  %v550_v21 = vpop.f32.mrf.mxu1  ;;  %9723 = vmatmul.mubr.msk.bf16.gmra.mxu0 %vm189_vm2, %v12580_v38  ;;  %2144 = vmatprep.subr.bf16.mxu1 %v16168_v31 }
 0x13c   :  { %v12709_v36 = vadd.f32 %v550_v21, %v337_v59 }
 0x13d   :  { %v359_v4 = vpop.f32.mrf.mxu0  ;;  %v552_v16 = vpop.f32.mrf.mxu1 }
 0x13e   :  { %v12711_v58 = vadd.f32 %v552_v16, %v339_v2 }
 0x13f   :  { %v361_v61 = vpop.f32.mrf.mxu0  ;;  %v554_v49 = vpop.f32.mrf.mxu1 }
 0x140   :  { %v12713_v29 = vadd.f32 %v554_v49, %v341_v17 }
 0x141   :  { %v12716_v9 = vpop.f32.mrf.mxu0  ;;  %v12718_v38 = vpop.f32.mrf.mxu1 }
 0x142   :  { %16169 = vst [vmem:[#allocation26_spill] sm:$0xff] %v12716_v9  ;;  %16170 = vst [vmem:[#allocation27_spill] sm:$0xff] %v12718_v38 }
 0x143   :  { %v560_v59 = vpop.f32.mrf.mxu1  ;;  %v665_v26 = vpop.f32.mrf.mxu0 }
 0x144   :  { %v12720_v21 = vadd.f32 %v560_v59, %v347_v28  ;;  %v12723_v0 = vadd.f32 %v665_v26, %v12618_v62 }
 0x145   :  { %v562_v2 = vpop.f32.mrf.mxu1  ;;  %v667_v42 = vpop.f32.mrf.mxu0 }
 0x146   :  { %v12725_v16 = vadd.f32 %v562_v2, %v349_v50  ;;  %v12728_v49 = vadd.f32 %v667_v42, %v12621_v3 }
 0x147   :  { %v564_v17 = vpop.f32.mrf.mxu1  ;;  %v669_v6 = vpop.f32.mrf.mxu0 }
 0x148   :  { %v12730_v22 = vadd.f32 %v564_v17, %v351_v46  ;;  %v12733_v9 = vadd.f32 %v669_v6, %v12623_v7 }
 0x149   :  { %v12735_v38 = vpop.f32.mrf.mxu1  ;;  %v12737_v28 = vpop.f32.mrf.mxu0 }
 0x14a   :  { %16171 = vst [vmem:[#allocation28_spill] sm:$0xff] %v12735_v38 }
 0x14b   :  { %v570_v62 = vpop.f32.mrf.mxu1  ;;  %v675_v59 = vpop.f32.mrf.mxu0 }
 0x14c   :  { %v12739_v26 = vadd.f32 %v570_v62, %v357_v60  ;;  %v12742_v50 = vadd.f32 %v675_v59, %v12631_v18 }
 0x14d   :  { %v572_v3 = vpop.f32.mrf.mxu1  ;;  %v677_v2 = vpop.f32.mrf.mxu0 }
 0x14e   :  { %v12744_v42 = vadd.f32 %v572_v3, %v359_v4  ;;  %v12747_v46 = vadd.f32 %v677_v2, %v12634_v25 }
 0x14f   :  { %v574_v7 = vpop.f32.mrf.mxu1  ;;  %v679_v17 = vpop.f32.mrf.mxu0 }
 0x150   :  { %v12749_v6 = vadd.f32 %v574_v7, %v361_v61  ;;  %v12752_v38 = vadd.f32 %v679_v17, %v12636_v30 }
 0x151   :  { %v12754_v45 = vpop.f32.mrf.mxu1  ;;  %v12756_v60 = vpop.f32.mrf.mxu0 }
 0x152   :  { %16172 = vst [vmem:[#allocation29_spill] sm:$0xff] %v12754_v45 }
 0x153   :  { %v12758_v18 = vpop.f32.mrf.mxu1  ;;  %v685_v62 = vpop.f32.mrf.mxu0 }
 0x154   :  { %v12761_v4 = vadd.f32 %v685_v62, %v12644_v33 }
 0x155   :  { %v12763_v59 = vpop.f32.mrf.mxu1  ;;  %v687_v25 = vpop.f32.mrf.mxu0 }
 0x156   :  { %v12766_v3 = vadd.f32 %v687_v25, %v12647_v43 }
 0x157   :  { %v12768_v61 = vpop.f32.mrf.mxu1  ;;  %v689_v30 = vpop.f32.mrf.mxu0 }
 0x158   :  { %v12771_v2 = vadd.f32 %v689_v30, %v12649_v51 }
 0x159   :  { %v12773_v7 = vpop.f32.mrf.mxu1  ;;  %v12775_v17 = vpop.f32.mrf.mxu0 }
 0x15a   :  { %16173 = vst [vmem:[#allocation30_spill] sm:$0xff] %v12773_v7 }
 0x15b   :  { %v12777_v45 = vpop.f32.mrf.mxu1  ;;  %v695_v33 = vpop.f32.mrf.mxu0 }
 0x15c   :  { %v12780_v62 = vadd.f32 %v695_v33, %v12657_v1 }
 0x15d   :  { %v12782_v19 = vpop.f32.mrf.mxu1  ;;  %v697_v43 = vpop.f32.mrf.mxu0 }
 0x15e   :  { %16174 = vst [vmem:[#allocation31_spill] sm:$0xff] %v12780_v62  ;;  %v12785_v25 = vadd.f32 %v697_v43, %v12660_v12 }
 0x15f   :  { %v12787_v51 = vpop.f32.mrf.mxu1  ;;  %v699_v30 = vpop.f32.mrf.mxu0 }
 0x160   :  { %16175 = vst [vmem:[#allocation32_spill] sm:$0xff] %v12785_v25  ;;  %v12790_v7 = vadd.f32 %v699_v30, %v12662_v20 }
 0x161   :  { %v12792_v24 = vpop.f32.mrf.mxu1  ;;  %v12794_v31 = vpop.f32.mrf.mxu0 }
 0x162   :  { %16176 = vst [vmem:[#allocation33_spill] sm:$0xff] %v12790_v7  ;;  %16177 = vst [vmem:[#allocation34_spill] sm:$0xff] %v12792_v24 }
 0x163   :  { %16178 = vst [vmem:[#allocation35_spill] sm:$0xff] %v12794_v31  ;;  %v705_v1 = vpop.f32.mrf.mxu0  ;;  %v12796_v33 = vpop.f32.mrf.mxu1 }
 0x164   :  { %v12799_v35 = vadd.f32 %v705_v1, %v12670_v34 }
 0x165   :  { %v707_v52 = vpop.f32.mrf.mxu0  ;;  %v12801_v12 = vpop.f32.mrf.mxu1 }
 0x166   :  { %16179 = vst [vmem:[#allocation36_spill] sm:$0xff] %v12799_v35  ;;  %v12804_v37 = vadd.f32 %v707_v52, %v12673_v39 }
 0x167   :  { %v709_v43 = vpop.f32.mrf.mxu0  ;;  %v12806_v25 = vpop.f32.mrf.mxu1 }
 0x168   :  { %16180 = vst [vmem:[#allocation37_spill] sm:$0xff] %v12804_v37  ;;  %v12809_v20 = vadd.f32 %v709_v43, %v12675_v15 }
 0x169   :  { %v12811_v30 = vpop.f32.mrf.mxu0  ;;  %v12813_v24 = vpop.f32.mrf.mxu1 }
 0x16a   :  { %16181 = vst [vmem:[#allocation38_spill] sm:$0xff] %v12809_v20  ;;  %16182 = vst [vmem:[#allocation39_spill] sm:$0xff] %v12811_v30 }
 0x16b   :  { %v715_v7 = vpop.f32.mrf.mxu0  ;;  %v12815_v31 = vpop.f32.mrf.mxu1 }
 0x16c   :  { %v12818_v34 = vadd.f32 %v715_v7, %v12683_v40 }
 0x16d   :  { %v717_v1 = vpop.f32.mrf.mxu0  ;;  %v12820_v35 = vpop.f32.mrf.mxu1 }
 0x16e   :  { %16183 = vst [vmem:[#allocation40_spill] sm:$0xff] %v12818_v34  ;;  %v12823_v52 = vadd.f32 %v717_v1, %v12686_v14 }
 0x16f   :  { %v719_v39 = vpop.f32.mrf.mxu0  ;;  %v12825_v37 = vpop.f32.mrf.mxu1 }
 0x170   :  { %16184 = vst [vmem:[#allocation41_spill] sm:$0xff] %v12823_v52  ;;  %v12828_v15 = vadd.f32 %v719_v39, %v12688_v27 }
 0x171   :  { %v12830_v43 = vpop.f32.mrf.mxu0  ;;  %v12832_v20 = vpop.f32.mrf.mxu1 }
 0x172   :  { %16185 = vst [vmem:[#allocation42_spill] sm:$0xff] %v12828_v15  ;;  %16186 = vst [vmem:[#allocation43_spill] sm:$0xff] %v12830_v43 }
 0x173   :  { %v725_v30 = vpop.f32.mrf.mxu0  ;;  %v12834_v62 = vpop.f32.mrf.mxu1 }
 0x174   :  { %v12837_v40 = vadd.f32 %v725_v30, %v12696_v5 }
 0x175   :  { %v727_v7 = vpop.f32.mrf.mxu0  ;;  %v12839_v34 = vpop.f32.mrf.mxu1 }
 0x176   :  { %16187 = vst [vmem:[#allocation44_spill] sm:$0xff] %v12837_v40  ;;  %v12842_v14 = vadd.f32 %v727_v7, %v12699_v63 }
 0x177   :  { %v729_v1 = vpop.f32.mrf.mxu0  ;;  %v12844_v52 = vpop.f32.mrf.mxu1 }
 0x178   :  { %16188 = vst [vmem:[#allocation45_spill] sm:$0xff] %v12842_v14  ;;  %v12847_v27 = vadd.f32 %v729_v1, %v12701_v23 }
 0x179   :  { %v12849_v39 = vpop.f32.mrf.mxu0  ;;  %v12851_v15 = vpop.f32.mrf.mxu1 }
 0x17a   :  { %16189 = vst [vmem:[#allocation46_spill] sm:$0xff] %v12847_v27  ;;  %16190 = vst [vmem:[#allocation47_spill] sm:$0xff] %v12849_v39 }
 0x17b   :  { %v735_v43 = vpop.f32.mrf.mxu0  ;;  %v12853_v13 = vpop.f32.mrf.mxu1 }
 0x17c   :  { %16191 = vst [vmem:[#allocation48_spill] sm:$0xff] %v12853_v13  ;;  %v12856_v5 = vadd.f32 %v735_v43, %v12709_v36 }
 0x17d   :  { %v737_v30 = vpop.f32.mrf.mxu0  ;;  %v12858_v40 = vpop.f32.mrf.mxu1 }
 0x17e   :  { %16192 = vst [vmem:[#allocation49_spill] sm:$0xff] %v12856_v5  ;;  %v12861_v63 = vadd.f32 %v737_v30, %v12711_v58 }
 0x17f   :  { %v739_v7 = vpop.f32.mrf.mxu0  ;;  %v12863_v14 = vpop.f32.mrf.mxu1 }
 0x180   :  { %16193 = vst [vmem:[#allocation50_spill] sm:$0xff] %v12861_v63  ;;  %v12866_v23 = vadd.f32 %v739_v7, %v12713_v29 }
 0x181   :  { %v12868_v1 = vpop.f32.mrf.mxu0  ;;  %v12870_v27 = vpop.f32.mrf.mxu1 }
 0x182   :  { %16194 = vst [vmem:[#allocation51_spill] sm:$0xff] %v12866_v23  ;;  %16195 = vst [vmem:[#allocation52_spill] sm:$0xff] %v12868_v1 }
 0x183   :  { %v745_v39 = vpop.f32.mrf.mxu0  ;;  %v12872_v13 = vpop.f32.mrf.mxu1 }
 0x184   :  { %v12875_v36 = vadd.f32 %v745_v39, %v12720_v21 }
 0x185   :  { %v747_v43 = vpop.f32.mrf.mxu0  ;;  %v12877_v5 = vpop.f32.mrf.mxu1 }
 0x186   :  { %16196 = vst [vmem:[#allocation53_spill] sm:$0xff] %v12875_v36  ;;  %v12880_v58 = vadd.f32 %v747_v43, %v12725_v16 }
 0x187   :  { %v749_v30 = vpop.f32.mrf.mxu0  ;;  %v12885_v7 = vpop.f32.mrf.mxu1 }
 0x188   :  { %v12883_v29 = vadd.f32 %v749_v30, %v12730_v22 }
 0x189   :  { %v12887_v23 = vpop.f32.mrf.mxu0  ;;  %v12892_v21 = vpop.f32.mrf.mxu1 }
 0x18a   :  { %16197 = vst [vmem:[#allocation54_spill] sm:$0xff] %v12883_v29  ;;  %16198 = vst [vmem:[#allocation55_spill] sm:$0xff] %v12887_v23  ;;  %v581_v29 = vadd.f32 %v12758_v18, %v12582_v41 }
 0x18b   :  { %v755_v1 = vpop.f32.mrf.mxu0  ;;  %v12900_v22 = vpop.f32.mrf.mxu1 }
 0x18c   :  { %v12890_v63 = vadd.f32 %v755_v1, %v12739_v26  ;;  %v583_v26 = vadd.f32 %v12763_v59, %v12591_v44  ;;  %v591_v44 = vadd.f32 %v12777_v45, %v12602_v53  ;;  %v1301_v45 = vld [vmem:[%s16100_s2] sm:$0x3] }
 0x18d   :  { %v757_v39 = vpop.f32.mrf.mxu0 }
 0x18e   :  { %16199 = vst [vmem:[#allocation56_spill] sm:$0xff] %v12890_v63  ;;  %v12895_v36 = vadd.f32 %v757_v39, %v12744_v42  ;;  %v12910_v63 = vpop.f32.mrf.mxu1 }
 0x18f   :  { %v759_v16 = vpop.f32.mrf.mxu0 }
 0x190   :  { %16200 = vst [vmem:[#allocation57_spill] sm:$0xff] %v12895_v36  ;;  %v12898_v43 = vadd.f32 %v759_v16, %v12749_v6  ;;  %v585_v6 = vadd.f32 %v12768_v61, %v12593_v47  ;;  %v1303_v16 = vlaneseq  ;;  %v12918_v36 = vpop.f32.mrf.mxu1 }
 0x191   :  { %v12902_v30 = vpop.f32.mrf.mxu0 }
 0x192   :  { %16201 = vst [vmem:[#allocation58_spill] sm:$0xff] %v12898_v43  ;;  %16202 = vst [vmem:[#allocation59_spill] sm:$0xff] %v12902_v30  ;;  %v12924_v18 = vshrl.u32 %v1303_v16, 7  ;;  %v12930_v61 = vpop.f32.mrf.mxu1 }
 0x193   :  { %v765_v23 = vpop.f32.mrf.mxu0 }
 0x194   :  { %v12908_v1 = vadd.f32 %v765_v23, %v581_v29  ;;  %16203 = vst [vmem:[#allocation60_spill] sm:$0xff] %v12924_v18  ;;  %v593_v23 = vadd.f32 %v12782_v19, %v12608_v55  ;;  %v12945_v55 = vsub.s32 1, %v12924_v18  ;;  %v12947_v19 = vpop.f32.mrf.mxu1 }
 0x195   :  { %v767_v42 = vpop.f32.mrf.mxu0 }
 0x196   :  { %v12914_v39 = vadd.f32 %v767_v42, %v583_v26  ;;  %v12937_v42 = vsub.s32 0, %v12924_v18  ;;  %16206 = vst [vmem:[#allocation63_spill] sm:$0xff] %v12945_v55 }
 0x197   :  { %v769_v43 = vpop.f32.mrf.mxu0 }
 0x198   :  { %v12916_v30 = vadd.f32 %v769_v43, %v585_v6  ;;  %v595_v43 = vadd.f32 %v12787_v51, %v12610_v56  ;;  %16204 = vst [vmem:[#allocation61_spill] sm:$0xff] %v12937_v42  ;;  %v1020_v56 = vadd.f32 %v12796_v33, %v12723_v0  ;;  %v12954_v51 = vrot.slane %v1301_v45, %v12937_v42 }
 0x199   :  { %v12920_v41 = vpop.f32.mrf.mxu0  ;;  %v1022_v0 = vadd.f32 %v12806_v25, %v12733_v9  ;;  %v497_v25 = vadd.f32 %v12640_v11, %v12612_v57  ;;  %v11538_v9 = vld [vmem:[#allocation8 + $0x98] ss:$12 sps:$4 sm:$0xff]  }
 0x19b   :  { %v775_v59 = vpop.f32.mrf.mxu0 }
 0x19c   :  { %v12928_v47 = vadd.f32 %v775_v59, %v591_v44  ;;  %v487_v59 = vadd.f32 %v12627_v10, %v12598_v48 }
 0x19d   :  { %v777_v29 = vpop.f32.mrf.mxu0 }
 0x19e   :  { %v12934_v26 = vadd.f32 %v777_v29, %v593_v23  ;;  %v1021_v23 = vadd.f32 %v12801_v12, %v12728_v49 }
 0x19f   :  { %v779_v53 = vpop.f32.mrf.mxu0 }
 0x1a0   :  { %v12942_v6 = vadd.f32 %v779_v53, %v595_v43  ;;  %v12961_v43 = vrot.slane %v1301_v45, %v12945_v55  ;;  %v12963_v53 = vpop.f32.mrf.mxu1 }
 0x1a1   :  { %v12949_v16 = vpop.f32.mrf.mxu0 }
 0x1a2   :  { %16205 = vst [vmem:[#allocation62_spill] sm:$0xff] %v12942_v6  ;;  %16207 = vst [vmem:[#allocation64_spill] sm:$0xff] %v12949_v16  ;;  %v787_v6 = vadd.f32 %v12737_v28, %v487_v59  ;;  %v12971_v12 = vpop.f32.mrf.mxu1 }
 0x1a3   :  { %v1134_v44 = vpop.f32.mrf.mxu0 }
 0x1a4   :  { %v1253_v29 = vadd.f32 %v1134_v44, %v1020_v56  ;;  %v1023_v48 = vadd.f32 %v12813_v24, %v787_v6  ;;  %v1024_v24 = vadd.f32 %v12815_v31, %v12742_v50 }
 0x1a5   :  { %v1136_v18 = vpop.f32.mrf.mxu0 }
 0x1a6   :  { %v1313_v33 = vadd.f32 %v12954_v51, %v1253_v29  ;;  %v1254_v42 = vadd.f32 %v1136_v18, %v1021_v23  ;;  %v791_v23 = vadd.f32 %v12756_v60, %v497_v25  ;;  %v12987_v29 = vpop.f32.mrf.mxu1 }
 0x1a7   :  { %v1138_v16 = vpop.f32.mrf.mxu0 }
 0x1a8   :  { %v1314_v10 = vadd.f32 %v12961_v43, %v1254_v42  ;;  %v1255_v49 = vadd.f32 %v1138_v16, %v1022_v0  ;;  %v1361_v56 = vmax.f32 %v1313_v33, 0.0  ;;  %v1025_v42 = vadd.f32 %v12820_v35, %v12747_v46 }
 0x1a9   :  { %v1140_v45 = vpop.f32.mrf.mxu0  ;;  %v1027_v46 = vadd.f32 %v12832_v20, %v791_v23  ;;  %v1028_v20 = vadd.f32 %v12834_v62, %v12761_v4 }
 0x1aa   :  { %v1362_v44 = vmax.f32 %v1314_v10, 0.0  ;;  %v1315_v28 = vadd.f32 %v12954_v51, %v1255_v49  ;;  %v1256_v59 = vadd.f32 %v1140_v45, %v1023_v48  ;;  %v1026_v48 = vadd.f32 %v12825_v37, %v12752_v38  ;;  %v12996_v45 = vpop.f32.mrf.mxu1 }
 0x1ab   :  { %v1144_v18 = vpop.f32.mrf.mxu0 }
 0x1ac   :  { %v10766_v6 = vpack.c.bf16 %v1362_v44, %v1361_v56  ;;  %v1316_v16 = vadd.f32 %v12961_v43, %v1256_v59  ;;  %v1257_v0 = vadd.f32 %v1144_v18, %v1024_v24  ;;  %v1363_v57 = vmax.f32 %v1315_v28, 0.0 }
 0x1ad   :  { %v1146_v33 = vpop.f32.mrf.mxu0  ;;  %v507_v59 = vadd.f32 %v12653_v54, %v12625_v8  ;;  %v1029_v24 = vadd.f32 %v12839_v34, %v12766_v3 }
 0x1ae   :  { %1556 = vst.msk [vmem:[#allocation2] sm:$0xff] %vm12975_vm4, %v10766_v6  ;;  %v1364_v11 = vmax.f32 %v1316_v16, 0.0  ;;  %v1258_v31 = vadd.f32 %v1146_v33, %v1025_v42  ;;  %v1317_v35 = vadd.f32 %v12954_v51, %v1257_v0  ;;  %v13009_v16 = vpop.f32.mrf.mxu1  ;;  %v1030_v33 = vadd.f32 %v12844_v52, %v12771_v2 }
 0x1af   :  { %v1148_v50 = vpop.f32.mrf.mxu0  ;;  %v795_v6 = vadd.f32 %v12775_v17, %v507_v59  ;;  %v11492_v59 = vld [vmem:[#allocation8 + $0x2e8] ss:$12 sps:$4 sm:$0xff]  }
 0x1b0   :  { %v10767_v10 = vpack.c.bf16 %v1364_v11, %v1363_v57  ;;  %v1318_v60 = vadd.f32 %v12961_v43, %v1258_v31  ;;  %v1259_v49 = vadd.f32 %v1148_v50, %v1026_v48  ;;  %v1365_v38 = vmax.f32 %v1317_v35, 0.0  ;;  %v13018_v11 = vpop.f32.mrf.mxu1 }
 0x1b1   :  { %v1150_v56 = vpop.f32.mrf.mxu0  ;;  %v1031_v34 = vadd.f32 %v12851_v15, %v795_v6  ;;  %v16210_v15 = vld [vmem:[#allocation19_spill] sm:$0xff] }
 0x1b2   :  { %1557 = vst.msk [vmem:[#allocation2 + $0x8] sm:$0xff] %vm12975_vm4, %v10767_v10  ;;  %v1366_v37 = vmax.f32 %v1318_v60, 0.0  ;;  %v1319_v44 = vadd.f32 %v12954_v51, %v1259_v49  ;;  %v1260_v28 = vadd.f32 %v1150_v56, %v1027_v46  ;;  %v517_v60 = vadd.f32 %v16210_v15, %v12638_v32  ;;  %v16211_v49 = vld [vmem:[#allocation31_spill] sm:$0xff]  ;;  %v16212_v56 = vld [vmem:[#allocation48_spill] sm:$0xff] }
 0x1b3   :  { %v1154_v25 = vpop.f32.mrf.mxu0  ;;  %v16217_v15 = vld [vmem:[#allocation36_spill] sm:$0xff] }
 0x1b4   :  { %v10768_v18 = vpack.c.bf16 %v1366_v37, %v1365_v38  ;;  %v1320_v42 = vadd.f32 %v12961_v43, %v1260_v28  ;;  %v1261_v23 = vadd.f32 %v1154_v25, %v1028_v20  ;;  %v1367_v8 = vmax.f32 %v1319_v44, 0.0  ;;  %v16214_v20 = vld [vmem:[#allocation32_spill] sm:$0xff] }
 0x1b5   :  { %v1156_v0 = vpop.f32.mrf.mxu0  ;;  %v1580_v10 = vld [vmem:[#allocation2] sm:$0xff]  ;;  %v1032_v38 = vadd.f32 %v16212_v56, %v16211_v49  ;;  %v1033_v25 = vadd.f32 %v12858_v40, %v16214_v20  ;;  %v11488_v20 = vld [vmem:[#allocation8 + $0x1b8] ss:$12 sps:$4 sm:$0xff]  }
 0x1b6   :  { %1558 = vst.msk [vmem:[#allocation2 + $0x10] sm:$0xff] %vm12975_vm4, %v10768_v18  ;;  %v1368_v54 = vmax.f32 %v1320_v42, 0.0  ;;  %v1262_v4 = vadd.f32 %v1156_v0, %v1029_v24  ;;  %v1321_v3 = vadd.f32 %v12954_v51, %v1261_v23  ;;  %v16215_v42 = vld [vmem:[#allocation35_spill] sm:$0xff]  ;;  %v16216_v23 = vld [vmem:[#allocation33_spill] sm:$0xff]  ;;  %v13037_v0 = vpop.f32.mrf.mxu1 }
 0x1b7   :  { %v1158_v62 = vpop.f32.mrf.mxu0  ;;  %v799_v6 = vadd.f32 %v16215_v42, %v517_v60  ;;  %v1034_v32 = vadd.f32 %v12863_v14, %v16216_v23  ;;  %v11487_v14 = vld [vmem:[#allocation8 + $0x1d0] ss:$12 sps:$4 sm:$0xff]   ;;  %v1036_v60 = vadd.f32 %v12872_v13, %v16217_v15  ;;  %v16220_v23 = vmov 0  }
 0x1b8   :  { %v10769_v48 = vpack.c.bf16 %v1368_v54, %v1367_v8  ;;  %v1322_v17 = vadd.f32 %v12961_v43, %v1262_v4  ;;  %v1263_v57 = vadd.f32 %v1158_v62, %v1030_v33  ;;  %v1369_v2 = vmax.f32 %v1321_v3, 0.0  ;;  %v11497_v4 = vld [vmem:[#allocation8 + $0x2d4] ss:$12 sps:$4 sm:$0xff]   ;;  %v13055_v49 = vpop.f32.mrf.mxu1 }
 0x1b9   :  { %v1160_v31 = vpop.f32.mrf.mxu0  ;;  %v1581_v35 = vld [vmem:[#allocation2 + $0x8] sm:$0xff] }
 0x1ba   :  { %1559 = vst.msk [vmem:[#allocation2 + $0x18] sm:$0xff] %vm12975_vm4, %v10769_v48  ;;  %v1370_v52 = vmax.f32 %v1322_v17, 0.0  ;;  %v1323_v50 = vadd.f32 %v12954_v51, %v1263_v57  ;;  %v1264_v46 = vadd.f32 %v1160_v31, %v1031_v34  ;;  %v13027_v44 = vcombine.low %v1580_v10, %v1581_v35  ;;  %v11495_v31 = vld [vmem:[#allocation8 + $0x2d0] ss:$12 sps:$4 sm:$0xff]  }
 0x1bb   :  { %v1164_v37 = vpop.f32.mrf.mxu0  ;;  %v13029_v28 = vcombine.high %v1580_v10, %v1581_v35  ;;  %v11501_v10 = vld [vmem:[#allocation8 + $0x2bc] ss:$12 sps:$4 sm:$0xff]  }
 0x1bc   :  { %16213 = vst [vmem:[#allocation19_spill] sm:$0xff] %v13027_v44  ;;  %v10770_v24 = vpack.c.bf16 %v1370_v52, %v1369_v2  ;;  %v1324_v18 = vadd.f32 %v12961_v43, %v1264_v46  ;;  %v1265_v33 = vadd.f32 %v1164_v37, %v1032_v38  ;;  %v1371_v40 = vmax.f32 %v1323_v50, 0.0 }
 0x1bd   :  { %9880 = vmatprep.mubr.msk.bf16.mxu0 %vm1980_vm5, %v13029_v28  ;;  %v1166_v8 = vpop.f32.mrf.mxu0  ;;  %v1582_v54 = vld [vmem:[#allocation2 + $0x10] sm:$0xff]  ;;  %v1035_v2 = vadd.f32 %v12870_v27, %v799_v6 }
 0x1be   :  { %1560 = vst.msk [vmem:[#allocation2 + $0x20] sm:$0xff] %vm12975_vm4, %v10770_v24  ;;  %v1372_v3 = vmax.f32 %v1324_v18, 0.0  ;;  %v1266_v62 = vadd.f32 %v1166_v8, %v1033_v25  ;;  %2545 = vmatmul.mubr.bf16.vlgmr.msra.gmra.mxu0 %v13027_v44  ;;  %v13044_v34 = vcombine.high %v1581_v35, %v1582_v54  ;;  %v1325_v48 = vadd.f32 %v12954_v51, %v1265_v33  ;;  %v16218_v25 = vld [vmem:[#allocation17_spill] sm:$0xff] }
 0x1bf   :  { %v1168_v17 = vpop.f32.mrf.mxu0  ;;  %v13047_v57 = vcombine.low %v1581_v35, %v1582_v54  ;;  %3140 = vmatpush1.bf16.msra.mxu0 %v11492_v59  ;;  %v16219_v24 = vld [vmem:[#allocation21_spill] sm:$0xff] }
 0x1c0   :  { %v10771_v52 = vpack.c.bf16 %v1372_v3, %v1371_v40  ;;  %v1326_v46 = vadd.f32 %v12961_v43, %v1266_v62  ;;  %v1267_v50 = vadd.f32 %v1168_v17, %v1034_v32  ;;  %9804 = vmatprep.mubr.msk.bf16.mxu1 %vm1980_vm5, %v13044_v34  ;;  %3141 = vmatprep.subr.bf16.mxu0 %v11497_v4  ;;  %v1373_v27 = vmax.f32 %v1325_v48, 0.0  ;;  %v11499_v32 = vld [vmem:[#allocation8 + $0x2b8] ss:$12 sps:$4 sm:$0xff]  }
 0x1c1   :  { %v1170_v56 = vpop.f32.mrf.mxu0  ;;  %2044 = vmatmul.mubr.bf16.vlgmr.msra.gmra.mxu1 %v13047_v57  ;;  %v1583_v35 = vld [vmem:[#allocation2 + $0x18] sm:$0xff]  ;;  %v527_v13 = vadd.f32 %v16219_v24, %v16218_v25  ;;  %v16221_v33 = vld [vmem:[#allocation37_spill] sm:$0xff]  ;;  %v11504_v62 = vld [vmem:[#allocation8 + $0x2a4] ss:$12 sps:$4 sm:$0xff]  }
 0x1c2   :  { %1561 = vst.msk [vmem:[#allocation2 + $0x28] sm:$0xff] %vm12975_vm4, %v10771_v52  ;;  %v1374_v38 = vmax.f32 %v1326_v46, 0.0  ;;  %v1327_v37 = vadd.f32 %v12954_v51, %v1267_v50  ;;  %v1268_v59 = vadd.f32 %v1170_v56, %v1035_v2  ;;  %2145 = vmatpush1.bf16.msra.mxu1 %v11487_v14  ;;  %v13063_v42 = vcombine.high %v1582_v54, %v1583_v35  ;;  %v16222_v14 = vld [vmem:[#allocation39_spill] sm:$0xff]  ;;  %v16223_v17 = vld [vmem:[#allocation38_spill] sm:$0xff] }
 0x1c3   :  { %v1174_v18 = vpop.f32.mrf.mxu0  ;;  %v13065_v6 = vcombine.low %v1582_v54, %v1583_v35  ;;  %2146 = vmatprep.subr.bf16.mxu1 %v16220_v23  ;;  %3142 = vmatpush1.bf16.msra.mxu0 %v11495_v31  ;;  %v1037_v8 = vadd.f32 %v12877_v5, %v16221_v33  ;;  %v803_v48 = vadd.f32 %v16222_v14, %v527_v13  ;;  %v13074_v54 = vpop.f32.mrf.mxu1  ;;  %v11508_v24 = vld [vmem:[#allocation8 + $0x28c] ss:$12 sps:$4 sm:$0xff]  }
 0x1c4   :  { %v10772_v4 = vpack.c.bf16 %v1374_v38, %v1373_v27  ;;  %v1328_v40 = vadd.f32 %v12961_v43, %v1268_v59  ;;  %v1269_v3 = vadd.f32 %v1174_v18, %v1036_v60  ;;  %3143 = vmatprep.subr.bf16.mxu0 %v11501_v10  ;;  %v1038_v2 = vadd.f32 %v12885_v7, %v16223_v17  ;;  %v11489_v7 = vld [vmem:[#allocation8 + $0x1a0] ss:$12 sps:$4 sm:$0xff]   ;;  %v16227_v33 = vld [vmem:[#allocation41_spill] sm:$0xff] }
 0x1c5   :  { %v1375_v52 = vmax.f32 %v1327_v37, 0.0  ;;  %9881 = vmatprep.mubr.msk.bf16.mxu0 %vm1980_vm5, %v13063_v42  ;;  %v1176_v31 = vpop.f32.mrf.mxu0  ;;  %v1584_v46 = vld [vmem:[#allocation2 + $0x20] sm:$0xff]  ;;  %v1039_v60 = vadd.f32 %v12892_v21, %v803_v48  ;;  %v11502_v38 = vld [vmem:[#allocation8 + $0x2a0] ss:$12 sps:$4 sm:$0xff]  }
 0x1c6   :  { %1562 = vst.msk [vmem:[#allocation2 + $0x30] sm:$0xff] %vm12975_vm4, %v10772_v4  ;;  %v1376_v5 = vmax.f32 %v1328_v40, 0.0  ;;  %v1329_v50 = vadd.f32 %v12954_v51, %v1269_v3  ;;  %v1270_v10 = vadd.f32 %v1176_v31, %v1037_v8  ;;  %2555 = vmatmul.mubr.bf16.gmra.mxu0 %v13065_v6  ;;  %v13082_v15 = vcombine.high %v1583_v35, %v1584_v46  ;;  %v16225_v13 = vld [vmem:[#allocation23_spill] sm:$0xff]  ;;  %v16226_v21 = vld [vmem:[#allocation40_spill] sm:$0xff] }
 0x1c7   :  { %2147 = vmatpush1.bf16.msra.mxu1 %v11488_v20  ;;  %v1178_v56 = vpop.f32.mrf.mxu0  ;;  %v13085_v27 = vcombine.low %v1583_v35, %v1584_v46  ;;  %3144 = vmatpush1.bf16.msra.mxu0 %v11499_v32  ;;  %v16224_v20 = vld [vmem:[#allocation18_spill] sm:$0xff]  ;;  %v1040_v35 = vadd.f32 %v12900_v22, %v16226_v21  ;;  %v1041_v8 = vadd.f32 %v12910_v63, %v16227_v33  ;;  %v13097_v32 = vpop.f32.mrf.mxu1  ;;  %v11490_v63 = vld [vmem:[#allocation8 + $0x188] ss:$12 sps:$4 sm:$0xff]  }
 0x1c8   :  { %2148 = vmatprep.subr.bf16.mxu1 %v16220_v23  ;;  %v10773_v37 = vpack.c.bf16 %v1376_v5, %v1375_v52  ;;  %v1330_v59 = vadd.f32 %v12961_v43, %v1270_v10  ;;  %v1271_v25 = vadd.f32 %v1178_v56, %v1038_v2  ;;  %9805 = vmatprep.mubr.msk.bf16.mxu1 %vm1980_vm5, %v13082_v15  ;;  %v1377_v4 = vmax.f32 %v1329_v50, 0.0  ;;  %v13107_v2 = vld [vmem:[#allocation2 + $0x20] sm:$0xff] }
 0x1c9   :  { %3145 = vmatprep.subr.bf16.mxu0 %v11504_v62  ;;  %v537_v18 = vadd.f32 %v16225_v13, %v16224_v20  ;;  %v1180_v40 = vpop.f32.mrf.mxu0  ;;  %2054 = vmatmul.mubr.bf16.gmra.mxu1 %v13085_v27  ;;  %v1585_v3 = vld [vmem:[#allocation2 + $0x28] sm:$0xff]  ;;  %v11506_v5 = vld [vmem:[#allocation8 + $0x288] ss:$12 sps:$4 sm:$0xff]   ;;  %v13126_v20 = vpop.f32.mrf.mxu1 }
 0x1ca   :  { %v13100_v14 = vld [vmem:[#allocation2 + $0x28] sm:$0xff]  ;;  %1563 = vst.msk [vmem:[#allocation2 + $0x38] sm:$0xff] %vm12975_vm4, %v10773_v37  ;;  %v1378_v62 = vmax.f32 %v1330_v59, 0.0  ;;  %v1331_v48 = vadd.f32 %v12954_v51, %v1271_v25  ;;  %v1272_v17 = vadd.f32 %v1180_v40, %v1039_v60  ;;  %v13105_v22 = vcombine.high %v1584_v46, %v1585_v3  ;;  %v16231_v37 = vld [vmem:[#allocation43_spill] sm:$0xff]  ;;  %v16232_v59 = vld [vmem:[#allocation42_spill] sm:$0xff] }
 0x1cb   :  { %16228 = vst [vmem:[#allocation31_spill] sm:$0xff] %v13100_v14  ;;  %2149 = vmatpush1.bf16.msra.mxu1 %v11489_v7  ;;  %v1184_v52 = vpop.f32.mrf.mxu0  ;;  %v13109_v31 = vcombine.low %v1584_v46, %v1585_v3  ;;  %3146 = vmatpush1.bf16.msra.mxu0 %v11502_v38  ;;  %v13114_v50 = vcombine.low %v13107_v2, %v13100_v14  ;;  %v11512_v46 = vld [vmem:[#allocation8 + $0x274] ss:$12 sps:$4 sm:$0xff]  }
 0x1cc   :  { %2150 = vmatprep.subr.bf16.mxu1 %v16220_v23  ;;  %v13118_v10 = vcombine.high %v13107_v2, %v13100_v14  ;;  %v10774_v60 = vpack.c.bf16 %v1378_v62, %v1377_v4  ;;  %v1332_v7 = vadd.f32 %v12961_v43, %v1272_v17  ;;  %v1273_v56 = vadd.f32 %v1184_v52, %v1040_v35 }
 0x1cd   :  { %16229 = vst [vmem:[#allocation48_spill] sm:$0xff] %v13114_v50  ;;  %9882 = vmatprep.mubr.msk.bf16.mxu0 %vm1980_vm5, %v13105_v22  ;;  %3147 = vmatprep.subr.bf16.mxu0 %v11508_v24  ;;  %v807_v38 = vadd.f32 %v16231_v37, %v537_v18  ;;  %v1042_v25 = vadd.f32 %v12918_v36, %v16232_v59  ;;  %v1379_v13 = vmax.f32 %v1331_v48, 0.0  ;;  %v1186_v21 = vpop.f32.mrf.mxu0  ;;  %v1586_v33 = vld [vmem:[#allocation2 + $0x30] sm:$0xff]  ;;  %v11491_v18 = vld [vmem:[#allocation8 + $0x170] ss:$12 sps:$4 sm:$0xff]  }
 0x1ce   :  { %16230 = vst [vmem:[#allocation32_spill] sm:$0xff] %v13118_v10  ;;  %1564 = vst.msk [vmem:[#allocation2 + $0x40] sm:$0xff] %vm12975_vm4, %v10774_v60  ;;  %v1380_v4 = vmax.f32 %v1332_v7, 0.0  ;;  %v1333_v35 = vadd.f32 %v12954_v51, %v1273_v56  ;;  %v1274_v40 = vadd.f32 %v1186_v21, %v1041_v8  ;;  %2565 = vmatmul.mubr.bf16.gmra.mxu0 %v13109_v31  ;;  %v11510_v48 = vld [vmem:[#allocation8 + $0x270] ss:$12 sps:$4 sm:$0xff]  }
 0x1cf   :  { %v13132_v24 = vcombine.high %v1585_v3, %v1586_v33  ;;  %2151 = vmatpush1.bf16.msra.mxu1 %v11490_v63  ;;  %v1043_v36 = vadd.f32 %v12930_v61, %v807_v38  ;;  %v1188_v62 = vpop.f32.mrf.mxu0  ;;  %v13135_v17 = vcombine.low %v1585_v3, %v1586_v33  ;;  %3148 = vmatpush1.bf16.msra.mxu0 %v11506_v5  ;;  %v11515_v8 = vld [vmem:[#allocation8 + $0x25c] ss:$12 sps:$4 sm:$0xff]   ;;  %v16233_v63 = vld [vmem:[#allocation20_spill] sm:$0xff]  ;;  %v13147_v5 = vpop.f32.mrf.mxu1 }
 0x1d0   :  { %2152 = vmatprep.subr.bf16.mxu1 %v16220_v23  ;;  %v10775_v52 = vpack.c.bf16 %v1380_v4, %v1379_v13  ;;  %v1334_v60 = vadd.f32 %v12961_v43, %v1274_v40  ;;  %v1275_v7 = vadd.f32 %v1188_v62, %v1042_v25  ;;  %3149 = vmatprep.subr.bf16.mxu0 %v11512_v46  ;;  %v16234_v56 = vld [vmem:[#allocation25_spill] sm:$0xff]  ;;  %v16235_v61 = vld [vmem:[#allocation44_spill] sm:$0xff]  ;;  %v1381_v13 = vmax.f32 %v1333_v35, 0.0 }
 0x1d1   :  { %9806 = vmatprep.mubr.msk.bf16.mxu1 %vm1980_vm5, %v13132_v24  ;;  %v547_v37 = vadd.f32 %v16234_v56, %v16233_v63  ;;  %v1044_v3 = vadd.f32 %v12947_v19, %v16235_v61  ;;  %v16236_v38 = vld [vmem:[#allocation45_spill] sm:$0xff]  ;;  %v1190_v21 = vpop.f32.mrf.mxu0  ;;  %v1587_v25 = vld [vmem:[#allocation2 + $0x38] sm:$0xff]  ;;  %v13157_v63 = vld [vmem:[#allocation2 + $0x30] sm:$0xff]  ;;  %v13176_v50 = vpop.f32.mrf.mxu1 }
 0x1d2   :  { %v1045_v59 = vadd.f32 %v12963_v53, %v16236_v38  ;;  %2064 = vmatmul.mubr.bf16.gmra.mxu1 %v13135_v17  ;;  %v13150_v4 = vld [vmem:[#allocation2 + $0x38] sm:$0xff]  ;;  %1565 = vst.msk [vmem:[#allocation2 + $0x48] sm:$0xff] %vm12975_vm4, %v10775_v52  ;;  %v1382_v46 = vmax.f32 %v1334_v60, 0.0  ;;  %v1335_v40 = vadd.f32 %v12954_v51, %v1275_v7  ;;  %v1276_v62 = vadd.f32 %v1190_v21, %v1043_v36  ;;  %v11498_v53 = vld [vmem:[#allocation8 + $0x158] ss:$12 sps:$4 sm:$0xff]  }
 0x1d3   :  { %16237 = vst [vmem:[#allocation35_spill] sm:$0xff] %v13150_v4  ;;  %v13155_v19 = vcombine.high %v1586_v33, %v1587_v25  ;;  %2153 = vmatpush1.bf16.msra.mxu1 %v11491_v18  ;;  %16238 = vst [vmem:[#allocation33_spill] sm:$0xff] %v13157_v63  ;;  %v1194_v35 = vpop.f32.mrf.mxu0  ;;  %v13159_v56 = vcombine.low %v1586_v33, %v1587_v25  ;;  %3150 = vmatpush1.bf16.msra.mxu0 %v11510_v48  ;;  %v11513_v61 = vld [vmem:[#allocation8 + $0x258] ss:$12 sps:$4 sm:$0xff]   ;;  %v16241_v38 = vld [vmem:[#allocation47_spill] sm:$0xff] }
 0x1d4   :  { %2154 = vmatprep.subr.bf16.mxu1 %v16220_v23  ;;  %v13164_v52 = vcombine.high %v13157_v63, %v13150_v4  ;;  %v13168_v36 = vcombine.low %v13157_v63, %v13150_v4  ;;  %v10776_v60 = vpack.c.bf16 %v1382_v46, %v1381_v13  ;;  %v1336_v18 = vadd.f32 %v12961_v43, %v1276_v62  ;;  %v11519_v33 = vld [vmem:[#allocation8 + $0x244] ss:$12 sps:$4 sm:$0xff]  }
 0x1d5   :  { %v1277_v7 = vadd.f32 %v1194_v35, %v1044_v3  ;;  %9883 = vmatprep.mubr.msk.bf16.mxu0 %vm1980_vm5, %v13155_v19  ;;  %3151 = vmatprep.subr.bf16.mxu0 %v11515_v8  ;;  %v811_v48 = vadd.f32 %v16241_v38, %v547_v37  ;;  %v16242_v21 = vld [vmem:[#allocation46_spill] sm:$0xff]  ;;  %v1196_v10 = vpop.f32.mrf.mxu0  ;;  %v1588_v4 = vld [vmem:[#allocation2 + $0x40] sm:$0xff] }
 0x1d6   :  { %16239 = vst [vmem:[#allocation36_spill] sm:$0xff] %v13164_v52  ;;  %16240 = vst [vmem:[#allocation17_spill] sm:$0xff] %v13168_v36  ;;  %v1046_v55 = vadd.f32 %v12971_v12, %v16242_v21  ;;  %v1383_v52 = vmax.f32 %v1335_v40, 0.0  ;;  %v1384_v13 = vmax.f32 %v1336_v18, 0.0  ;;  %v1278_v46 = vadd.f32 %v1196_v10, %v1045_v59  ;;  %2575 = vmatmul.mubr.bf16.gmra.mxu0 %v13159_v56  ;;  %v11505_v37 = vld [vmem:[#allocation8 + $0x140] ss:$12 sps:$4 sm:$0xff]  }
 0x1d7   :  { %1566 = vst.msk [vmem:[#allocation2 + $0x50] sm:$0xff] %vm12975_vm4, %v10776_v60  ;;  %v1337_v3 = vadd.f32 %v12954_v51, %v1277_v7  ;;  %v13182_v8 = vcombine.high %v1587_v25, %v1588_v4  ;;  %2155 = vmatpush1.bf16.msra.mxu1 %v11498_v53  ;;  %v1047_v12 = vadd.f32 %v12987_v29, %v811_v48  ;;  %v1198_v62 = vpop.f32.mrf.mxu0  ;;  %v11517_v40 = vld [vmem:[#allocation8 + $0x240] ss:$12 sps:$4 sm:$0xff]   ;;  %v16243_v59 = vld [vmem:[#allocation49_spill] sm:$0xff]  ;;  %v13193_v29 = vpop.f32.mrf.mxu1 }
 0x1d8   :  { %v13185_v35 = vcombine.low %v1587_v25, %v1588_v4  ;;  %2156 = vmatprep.subr.bf16.mxu1 %v16220_v23  ;;  %3152 = vmatpush1.bf16.msra.mxu0 %v11513_v61  ;;  %v10777_v60 = vpack.c.bf16 %v1384_v13, %v1383_v52  ;;  %v1338_v18 = vadd.f32 %v12961_v43, %v1278_v46  ;;  %v11522_v10 = vld [vmem:[#allocation8 + $0x34c] ss:$12 sps:$4 sm:$0xff]   ;;  %v16244_v13 = vld [vmem:[#allocation22_spill] sm:$0xff] }
 0x1d9   :  { %v1279_v7 = vadd.f32 %v1198_v62, %v1046_v55  ;;  %9807 = vmatprep.mubr.msk.bf16.mxu1 %vm1980_vm5, %v13182_v8  ;;  %3153 = vmatprep.subr.bf16.mxu0 %v11519_v33  ;;  %v1048_v53 = vadd.f32 %v12996_v45, %v16243_v59  ;;  %v1385_v25 = vmax.f32 %v1337_v3, 0.0  ;;  %v1200_v38 = vpop.f32.mrf.mxu0  ;;  %v1589_v61 = vld [vmem:[#allocation2 + $0x48] sm:$0xff]  ;;  %v11509_v33 = vld [vmem:[#allocation8 + $0x128] ss:$12 sps:$4 sm:$0xff]   ;;  %v16246_v62 = vld [vmem:[#allocation50_spill] sm:$0xff] }
 0x1da   :  { %2074 = vmatmul.mubr.bf16.gmra.mxu1 %v13185_v35  ;;  %1567 = vst.msk [vmem:[#allocation2 + $0x58] sm:$0xff] %vm12975_vm4, %v10777_v60  ;;  %v1386_v52 = vmax.f32 %v1338_v18, 0.0  ;;  %v1280_v48 = vadd.f32 %v1200_v38, %v1047_v12  ;;  %v13199_v21 = vcombine.high %v1588_v4, %v1589_v61  ;;  %v16245_v45 = vld [vmem:[#allocation27_spill] sm:$0xff]  ;;  %v1049_v3 = vadd.f32 %v13009_v16, %v16246_v62  ;;  %v16247_v38 = vld [vmem:[#allocation52_spill] sm:$0xff] }
 0x1db   :  { %v1339_v55 = vadd.f32 %v12954_v51, %v1279_v7  ;;  %2157 = vmatpush1.bf16.msra.mxu1 %v11505_v37  ;;  %v557_v46 = vadd.f32 %v16245_v45, %v16244_v13  ;;  %v1204_v59 = vpop.f32.mrf.mxu0  ;;  %v13205_v36 = vcombine.low %v1588_v4, %v1589_v61  ;;  %v11520_v60 = vld [vmem:[#allocation8 + $0x348] ss:$12 sps:$4 sm:$0xff]   ;;  %v13214_v4 = vpop.f32.mrf.mxu1 }
 0x1dc   :  { %2158 = vmatprep.subr.bf16.mxu1 %v16220_v23  ;;  %3154 = vmatpush1.bf16.msra.mxu0 %v11517_v40  ;;  %v10778_v18 = vpack.c.bf16 %v1386_v52, %v1385_v25  ;;  %v1340_v12 = vadd.f32 %v12961_v43, %v1280_v48  ;;  %v1281_v7 = vadd.f32 %v1204_v59, %v1048_v53  ;;  %v11526_v37 = vld [vmem:[#allocation8 + $0x334] ss:$12 sps:$4 sm:$0xff]   ;;  %v16248_v45 = vld [vmem:[#allocation51_spill] sm:$0xff]  ;;  %v11516_v48 = vld [vmem:[#allocation8 + $0x230] ss:$12 sps:$4 sm:$0xff]  }
 0x1dd   :  { %9884 = vmatprep.mubr.msk.bf16.mxu0 %vm1980_vm5, %v13199_v21  ;;  %3163 = vmatprep.subr.bf16.mxu0 %v11522_v10  ;;  %v815_v13 = vadd.f32 %v16247_v38, %v557_v46  ;;  %v1050_v16 = vadd.f32 %v13018_v11, %v16248_v45  ;;  %v1387_v62 = vmax.f32 %v1339_v55, 0.0  ;;  %v1206_v44 = vpop.f32.mrf.mxu0  ;;  %v11524_v55 = vld [vmem:[#allocation8 + $0x330] ss:$12 sps:$4 sm:$0xff]  }
 0x1de   :  { %v1590_v40 = vld [vmem:[#allocation2 + $0x50] sm:$0xff]  ;;  %1568 = vst.msk [vmem:[#allocation2 + $0x60] sm:$0xff] %vm12975_vm4, %v10778_v18  ;;  %v1388_v25 = vmax.f32 %v1340_v12, 0.0  ;;  %v1341_v53 = vadd.f32 %v12954_v51, %v1281_v7  ;;  %v1282_v52 = vadd.f32 %v1206_v44, %v1049_v3  ;;  %2585 = vmatmul.mubr.bf16.gmra.mxu0 %v13205_v36  ;;  %v11530_v44 = vld [vmem:[#allocation8 + $0x31c] ss:$12 sps:$4 sm:$0xff]  }
 0x1df   :  { %v13220_v10 = vcombine.high %v1589_v61, %v1590_v40  ;;  %2159 = vmatpush1.bf16.msra.mxu1 %v11509_v33  ;;  %v1051_v11 = vadd.f32 %v13037_v0, %v815_v13  ;;  %v1208_v46 = vpop.f32.mrf.mxu0  ;;  %v13223_v59 = vcombine.low %v1589_v61, %v1590_v40  ;;  %v16251_v33 = vld [vmem:[#allocation53_spill] sm:$0xff]  ;;  %v13231_v0 = vpop.f32.mrf.mxu1 }
 0x1e0   :  { %2168 = vmatprep.subr.bf16.mxu1 %v16220_v23  ;;  %3164 = vmatpush2.bf16.msra.mxu0 %v11520_v60  ;;  %v10779_v18 = vpack.c.bf16 %v1388_v25, %v1387_v62  ;;  %v1342_v12 = vadd.f32 %v12961_v43, %v1282_v52  ;;  %v1283_v7 = vadd.f32 %v1208_v46, %v1050_v16  ;;  %v1389_v61 = vmax.f32 %v1341_v53, 0.0  ;;  %v16252_v25 = vld [vmem:[#allocation24_spill] sm:$0xff] }
 0x1e1   :  { %16249 = vst [vmem:[#allocation21_spill] sm:$0xff] %v13220_v10  ;;  %16250 = vst [vmem:[#allocation37_spill] sm:$0xff] %v13223_v59  ;;  %9808 = vmatprep.mubr.msk.bf16.mxu1 %vm1980_vm5, %v13220_v10  ;;  %3165 = vmatprep.subr.bf16.mxu0 %v11526_v37  ;;  %v1052_v3 = vadd.f32 %v13055_v49, %v16251_v33  ;;  %v1210_v38 = vpop.f32.mrf.mxu0  ;;  %v1591_v60 = vld [vmem:[#allocation2 + $0x58] sm:$0xff]  ;;  %v11523_v37 = vld [vmem:[#allocation8 + $0x218] ss:$12 sps:$4 sm:$0xff]   ;;  %v1053_v53 = vadd.f32 %v13074_v54, %v12880_v58  ;;  %v13252_v54 = vpop.f32.mrf.mxu1 }
 0x1e2   :  { %2084 = vmatmul.mubr.bf16.gmra.mxu1 %v13223_v59  ;;  %1569 = vst.msk [vmem:[#allocation2 + $0x68] sm:$0xff] %vm12975_vm4, %v10779_v18  ;;  %v1390_v13 = vmax.f32 %v1342_v12, 0.0  ;;  %v1343_v45 = vadd.f32 %v12954_v51, %v1283_v7  ;;  %v1284_v16 = vadd.f32 %v1210_v38, %v1051_v11  ;;  %v13237_v62 = vcombine.high %v1590_v40, %v1591_v60  ;;  %v16253_v49 = vld [vmem:[#allocation28_spill] sm:$0xff]  ;;  %v11528_v18 = vld [vmem:[#allocation8 + $0x318] ss:$12 sps:$4 sm:$0xff]   ;;  %v16254_v38 = vld [vmem:[#allocation55_spill] sm:$0xff] }
 0x1e3   :  { %2169 = vmatpush2.bf16.msra.mxu1 %v11516_v48  ;;  %v567_v52 = vadd.f32 %v16253_v49, %v16252_v25  ;;  %v1214_v46 = vpop.f32.mrf.mxu0  ;;  %v13243_v33 = vcombine.low %v1590_v40, %v1591_v60  ;;  %v11535_v48 = vld [vmem:[#allocation8 + $0x304] ss:$12 sps:$4 sm:$0xff]  }
 0x1e4   :  { %2170 = vmatprep.subr.bf16.mxu1 %v16220_v23  ;;  %3166 = vmatpush2.bf16.msra.mxu0 %v11524_v55  ;;  %v10780_v12 = vpack.c.bf16 %v1390_v13, %v1389_v61  ;;  %v1344_v11 = vadd.f32 %v12961_v43, %v1284_v16  ;;  %v1285_v7 = vadd.f32 %v1214_v46, %v1052_v3  ;;  %v16255_v49 = vld [vmem:[#allocation54_spill] sm:$0xff]  ;;  %v1391_v40 = vmax.f32 %v1343_v45, 0.0 }
 0x1e5   :  { %9885 = vmatprep.mubr.msk.bf16.mxu0 %vm1980_vm5, %v13237_v62  ;;  %3167 = vmatprep.subr.bf16.mxu0 %v11530_v44  ;;  %v819_v25 = vadd.f32 %v16254_v38, %v567_v52  ;;  %v1054_v58 = vadd.f32 %v13097_v32, %v16255_v49  ;;  %v1216_v14 = vpop.f32.mrf.mxu0  ;;  %v1592_v55 = vld [vmem:[#allocation2 + $0x60] sm:$0xff]  ;;  %v11527_v16 = vld [vmem:[#allocation8 + $0x200] ss:$12 sps:$4 sm:$0xff]  }
 0x1e6   :  { %1570 = vst.msk [vmem:[#allocation2 + $0x70] sm:$0xff] %vm12975_vm4, %v10780_v12  ;;  %v1392_v61 = vmax.f32 %v1344_v11, 0.0  ;;  %v1345_v3 = vadd.f32 %v12954_v51, %v1285_v7  ;;  %v1286_v13 = vadd.f32 %v1216_v14, %v1053_v53  ;;  %2595 = vmatmul.mubr.bf16.gmra.mxu0 %v13243_v33  ;;  %v13258_v44 = vcombine.high %v1591_v60, %v1592_v55  ;;  %v11533_v45 = vld [vmem:[#allocation8 + $0x300] ss:$12 sps:$4 sm:$0xff]  }
 0x1e7   :  { %2171 = vmatpush2.bf16.msra.mxu1 %v11523_v37  ;;  %v1055_v32 = vadd.f32 %v13126_v20, %v819_v25  ;;  %v1218_v52 = vpop.f32.mrf.mxu0  ;;  %v13261_v46 = vcombine.low %v1591_v60, %v1592_v55  ;;  %v11544_v14 = vld [vmem:[#allocation8 + $0x40c] ss:$12 sps:$4 sm:$0xff]   ;;  %v16258_v37 = vld [vmem:[#allocation56_spill] sm:$0xff]  ;;  %v13269_v20 = vpop.f32.mrf.mxu1 }
 0x1e8   :  { %16256 = vst [vmem:[#allocation39_spill] sm:$0xff] %v13258_v44  ;;  %2172 = vmatprep.subr.bf16.mxu1 %v16220_v23  ;;  %3168 = vmatpush2.bf16.msra.mxu0 %v11528_v18  ;;  %v10781_v12 = vpack.c.bf16 %v1392_v61, %v1391_v40  ;;  %v1346_v11 = vadd.f32 %v12961_v43, %v1286_v13  ;;  %v1393_v60 = vmax.f32 %v1345_v3, 0.0  ;;  %v16259_v61 = vld [vmem:[#allocation26_spill] sm:$0xff] }
 0x1e9   :  { %16257 = vst [vmem:[#allocation38_spill] sm:$0xff] %v13261_v46  ;;  %v1287_v7 = vadd.f32 %v1218_v52, %v1054_v58  ;;  %9809 = vmatprep.mubr.msk.bf16.mxu1 %vm1980_vm5, %v13258_v44  ;;  %3169 = vmatprep.subr.bf16.mxu0 %v11535_v48  ;;  %v1056_v53 = vadd.f32 %v13147_v5, %v16258_v37  ;;  %v1220_v38 = vpop.f32.mrf.mxu0  ;;  %v1593_v18 = vld [vmem:[#allocation2 + $0x68] sm:$0xff]  ;;  %v11536_v48 = vld [vmem:[#allocation8 + $0x1e8] ss:$12 sps:$4 sm:$0xff]  }
 0x1ea   :  { %2094 = vmatmul.mubr.bf16.gmra.mxu1 %v13261_v46  ;;  %1571 = vst.msk [vmem:[#allocation2 + $0x78] sm:$0xff] %vm12975_vm4, %v10781_v12  ;;  %v1394_v25 = vmax.f32 %v1346_v11, 0.0  ;;  %v1288_v58 = vadd.f32 %v1220_v38, %v1055_v32  ;;  %v13275_v40 = vcombine.high %v1592_v55, %v1593_v18  ;;  %v16260_v5 = vld [vmem:[#allocation29_spill] sm:$0xff]  ;;  %v13281_v63 = vcombine.low %v1592_v55, %v1593_v18  ;;  %v16263_v38 = vld [vmem:[#allocation58_spill] sm:$0xff] }
 0x1eb   :  { %v1347_v49 = vadd.f32 %v12954_v51, %v1287_v7  ;;  %2173 = vmatpush2.bf16.msra.mxu1 %v11527_v16  ;;  %v577_v13 = vadd.f32 %v16260_v5, %v16259_v61  ;;  %v16261_v52 = vld [vmem:[#allocation57_spill] sm:$0xff]  ;;  %v1224_v37 = vpop.f32.mrf.mxu0  ;;  %v16262_v16 = vld [vmem:[#allocation59_spill] sm:$0xff]  ;;  %v1058_v61 = vadd.f32 %v13193_v29, %v16263_v38 }
 0x1ec   :  { %v1057_v3 = vadd.f32 %v13176_v50, %v16261_v52  ;;  %3170 = vmatpush2.bf16.msra.mxu0 %v11533_v45  ;;  %2174 = vmatprep.subr.bf16.mxu1 %v16220_v23  ;;  %v10782_v12 = vpack.c.bf16 %v1394_v25, %v1393_v60  ;;  %v1348_v11 = vadd.f32 %v12961_v43, %v1288_v58  ;;  %v1007_v50 = vpop.f32.mrf.mxu1  ;;  %v16266_v38 = vld [vmem:[#allocation15_spill] sm:$0xff] }
 0x1ed   :  { %v1289_v32 = vadd.f32 %v1224_v37, %v1056_v53  ;;  %9886 = vmatprep.mubr.msk.bf16.mxu0 %vm1980_vm5, %v13275_v40  ;;  %3826 = vmatprep.subr.bf16.mxu0 %v11544_v14  ;;  %v823_v7 = vadd.f32 %v16262_v16, %v577_v13  ;;  %v1395_v5 = vmax.f32 %v1347_v49, 0.0  ;;  %v1226_v55 = vpop.f32.mrf.mxu0  ;;  %v1594_v52 = vld [vmem:[#allocation2 + $0x70] sm:$0xff] }
 0x1ee   :  { %1572 = vst.msk [vmem:[#allocation2 + $0x80] sm:$0xff] %vm12975_vm4, %v10782_v12  ;;  %v1396_v45 = vmax.f32 %v1348_v11, 0.0  ;;  %v1290_v53 = vadd.f32 %v1226_v55, %v1057_v3  ;;  %2605 = vmatmul.mubr.bf16.gmra.mxu0 %v13281_v63  ;;  %v13294_v25 = vcombine.high %v1593_v18, %v1594_v52  ;;  %v13296_v58 = vcombine.low %v1593_v18, %v1594_v52  ;;  %v1011_v12 = vpop.f32.mrf.mxu1 }
 0x1ef   :  { %v1349_v60 = vadd.f32 %v12954_v51, %v1289_v32  ;;  %2175 = vmatpush2.bf16.msra.mxu1 %v11536_v48  ;;  %v1228_v14 = vpop.f32.mrf.mxu0  ;;  %v1059_v29 = vadd.f32 %v13214_v4, %v823_v7  ;;  %v1060_v3 = vadd.f32 %v13231_v0, %v12908_v1  ;;  %v1061_v0 = vadd.f32 %v13252_v54, %v12914_v39 }
 0x1f0   :  { %16264 = vst [vmem:[#allocation18_spill] sm:$0xff] %v13294_v25  ;;  %16265 = vst [vmem:[#allocation23_spill] sm:$0xff] %v13296_v58  ;;  %2645 = vmatprep.subr.bf16.mxu1 %v16220_v23  ;;  %v10783_v49 = vpack.c.bf16 %v1396_v45, %v1395_v5  ;;  %v1350_v13 = vadd.f32 %v12961_v43, %v1290_v53  ;;  %v1291_v37 = vadd.f32 %v1228_v14, %v1058_v61  ;;  %v16267_v61 = vld [vmem:[#allocation30_spill] sm:$0xff] }
 0x1f1   :  { %9810 = vmatprep.mubr.msk.bf16.mxu1 %vm1980_vm5, %v13294_v25  ;;  %v1397_v11 = vmax.f32 %v1349_v60, 0.0  ;;  %v1230_v48 = vpop.f32.mrf.mxu0  ;;  %v1595_v18 = vld [vmem:[#allocation2 + $0x78] sm:$0xff]  ;;  %v587_v5 = vadd.f32 %v16267_v61, %v16266_v38 }
 0x1f2   :  { %2104 = vmatmul.mubr.bf16.gmra.mxu1 %v13296_v58  ;;  %1573 = vst.msk [vmem:[#allocation2 + $0x88] sm:$0xff] %vm12975_vm4, %v10783_v49  ;;  %v1398_v4 = vmax.f32 %v1350_v13, 0.0  ;;  %v1351_v32 = vadd.f32 %v12954_v51, %v1291_v37  ;;  %v1292_v16 = vadd.f32 %v1230_v48, %v1059_v29  ;;  %v13309_v7 = vcombine.high %v1594_v52, %v1595_v18  ;;  %v1013_v49 = vpop.f32.mrf.mxu1 }
 0x1f3   :  { %v1234_v55 = vpop.f32.mrf.mxu0  ;;  %v13313_v1 = vcombine.low %v1594_v52, %v1595_v18  ;;  %v827_v14 = vadd.f32 %v12920_v41, %v587_v5  ;;  %v1062_v29 = vadd.f32 %v13269_v20, %v12916_v30 }
 0x1f4   :  { %v10784_v45 = vpack.c.bf16 %v1398_v4, %v1397_v11  ;;  %v1352_v60 = vadd.f32 %v12961_v43, %v1292_v16  ;;  %v1293_v53 = vadd.f32 %v1234_v55, %v1060_v3  ;;  %9887 = vmatprep.mubr.msk.bf16.mxu0 %vm1980_vm5, %v13309_v7  ;;  %v1399_v13 = vmax.f32 %v1351_v32, 0.0  ;;  %v1015_v38 = vpop.f32.mrf.mxu1 }
 0x1f5   :  { %v1236_v37 = vpop.f32.mrf.mxu0  ;;  %v1596_v52 = vld [vmem:[#allocation2 + $0x80] sm:$0xff]  ;;  %v1063_v4 = vadd.f32 %v1007_v50, %v827_v14  ;;  %v1064_v16 = vadd.f32 %v1011_v12, %v12928_v47  ;;  %v1065_v12 = vadd.f32 %v1013_v49, %v12934_v26 }
 0x1f6   :  { %1574 = vst.msk [vmem:[#allocation2 + $0x90] sm:$0xff] %vm12975_vm4, %v10784_v45  ;;  %v1400_v39 = vmax.f32 %v1352_v60, 0.0  ;;  %v1353_v54 = vadd.f32 %v12954_v51, %v1293_v53  ;;  %v1294_v11 = vadd.f32 %v1236_v37, %v1061_v0  ;;  %2615 = vmatmul.mubr.bf16.gmra.mxu0 %v13313_v1  ;;  %v13327_v3 = vcombine.high %v1595_v18, %v1596_v52  ;;  %v16270_v60 = vld [vmem:[#allocation16_spill] sm:$0xff]  ;;  %v16271_v53 = vld [vmem:[#allocation34_spill] sm:$0xff] }
 0x1f7   :  { %v1238_v48 = vpop.f32.mrf.mxu0  ;;  %v13329_v41 = vcombine.low %v1595_v18, %v1596_v52  ;;  %v597_v14 = vadd.f32 %v16271_v53, %v16270_v60 }
 0x1f8   :  { %16268 = vst [vmem:[#allocation40_spill] sm:$0xff] %v13327_v3  ;;  %v10785_v30 = vpack.c.bf16 %v1400_v39, %v1399_v13  ;;  %v1354_v20 = vadd.f32 %v12961_v43, %v1294_v11  ;;  %v1295_v32 = vadd.f32 %v1238_v48, %v1062_v29  ;;  %9811 = vmatprep.mubr.msk.bf16.mxu1 %vm1980_vm5, %v13327_v3  ;;  %v1401_v61 = vmax.f32 %v1353_v54, 0.0  ;;  %v16272_v54 = vld [vmem:[#allocation64_spill] sm:$0xff]  ;;  %v16273_v48 = vld [vmem:[#allocation62_spill] sm:$0xff] }
 0x1f9   :  { %16269 = vst [vmem:[#allocation41_spill] sm:$0xff] %v13329_v41  ;;  %v1240_v5 = vpop.f32.mrf.mxu0  ;;  %v1597_v55 = vld [vmem:[#allocation2 + $0x88] sm:$0xff]  ;;  %v831_v11 = vadd.f32 %v16272_v54, %v597_v14 }
 0x1fa   :  { %2114 = vmatmul.mubr.bf16.gmra.mxu1 %v13329_v41  ;;  %1575 = vst.msk [vmem:[#allocation2 + $0x98] sm:$0xff] %vm12975_vm4, %v10785_v30  ;;  %v1402_v18 = vmax.f32 %v1354_v20, 0.0  ;;  %v1355_v50 = vadd.f32 %v12954_v51, %v1295_v32  ;;  %v1296_v0 = vadd.f32 %v1240_v5, %v1063_v4  ;;  %v13339_v45 = vcombine.high %v1596_v52, %v1597_v55  ;;  %v1017_v30 = vpop.f32.mrf.mxu1 }
 0x1fb   :  { %v1244_v29 = vpop.f32.mrf.mxu0  ;;  %v13343_v47 = vcombine.low %v1596_v52, %v1597_v55  ;;  %v1066_v4 = vadd.f32 %v1015_v38, %v16273_v48 }
 0x1fc   :  { %v10786_v13 = vpack.c.bf16 %v1402_v18, %v1401_v61  ;;  %v1356_v37 = vadd.f32 %v12961_v43, %v1296_v0  ;;  %v1297_v39 = vadd.f32 %v1244_v29, %v1064_v16  ;;  %9888 = vmatprep.mubr.msk.bf16.mxu0 %vm1980_vm5, %v13339_v45  ;;  %v1403_v20 = vmax.f32 %v1355_v50, 0.0 }
 0x1fd   :  { %v1246_v32 = vpop.f32.mrf.mxu0  ;;  %v1598_v5 = vld [vmem:[#allocation2 + $0x90] sm:$0xff]  ;;  %v1067_v0 = vadd.f32 %v1017_v30, %v831_v11 }
 0x1fe   :  { %1576 = vst.msk [vmem:[#allocation2 + $0xa0] sm:$0xff] %vm12975_vm4, %v10786_v13  ;;  %v1404_v52 = vmax.f32 %v1356_v37, 0.0  ;;  %v1357_v26 = vadd.f32 %v12954_v51, %v1297_v39  ;;  %v1298_v49 = vadd.f32 %v1246_v32, %v1065_v12  ;;  %2625 = vmatmul.mubr.bf16.gmra.mxu0 %v13343_v47  ;;  %v13355_v16 = vcombine.high %v1597_v55, %v1598_v5  ;;  %v11542_v32 = vld [vmem:[#allocation8 + $0x408] ss:$12 sps:$4 sm:$0xff]  }
 0x1ff   :  { %v1248_v61 = vpop.f32.mrf.mxu0  ;;  %v13357_v18 = vcombine.low %v1597_v55, %v1598_v5 }
 0x200   :  { %16274 = vst [vmem:[#allocation43_spill] sm:$0xff] %v13355_v16  ;;  %v10787_v38 = vpack.c.bf16 %v1404_v52, %v1403_v20  ;;  %v1358_v50 = vadd.f32 %v12961_v43, %v1298_v49  ;;  %v1299_v60 = vadd.f32 %v1248_v61, %v1066_v4  ;;  %9812 = vmatprep.mubr.msk.bf16.mxu1 %vm1980_vm5, %v13355_v16  ;;  %v1405_v53 = vmax.f32 %v1357_v26, 0.0  ;;  %v11537_v52 = vld [vmem:[#allocation8 + $0xb0] ss:$12 sps:$4 sm:$0xff]  }
 0x201   :  { %16275 = vst [vmem:[#allocation42_spill] sm:$0xff] %v13357_v18  ;;  %v1250_v14 = vpop.f32.mrf.mxu0  ;;  %v1599_v29 = vld [vmem:[#allocation2 + $0x98] sm:$0xff]  ;;  %v11545_v26 = vld [vmem:[#allocation8 + $0x3f0] ss:$12 sps:$4 sm:$0xff]  }
 0x202   :  { %2124 = vmatmul.mubr.bf16.gmra.mxu1 %v13357_v18  ;;  %1577 = vst.msk [vmem:[#allocation2 + $0xa8] sm:$0xff] %vm12975_vm4, %v10787_v38  ;;  %v1406_v12 = vmax.f32 %v1358_v50, 0.0  ;;  %v1359_v55 = vadd.f32 %v12954_v51, %v1299_v60  ;;  %v1300_v13 = vadd.f32 %v1250_v14, %v1067_v0  ;;  %v13366_v37 = vcombine.high %v1598_v5, %v1599_v29  ;;  %v11551_v49 = vld [vmem:[#allocation8 + $0x3dc] ss:$12 sps:$4 sm:$0xff]   ;;  %v11554_v61 = vld [vmem:[#allocation8 + $0x3c4] ss:$12 sps:$4 sm:$0xff]  }
 0x203   :  { %v13368_v39 = vcombine.low %v1598_v5, %v1599_v29  ;;  %v11547_v5 = vld [vmem:[#allocation8 + $0x3f4] ss:$12 sps:$4 sm:$0xff]   ;;  %v11548_v14 = vld [vmem:[#allocation8 + $0x38] ss:$12 sps:$4 sm:$0xff]  }
 0x204   :  { %v10788_v54 = vpack.c.bf16 %v1406_v12, %v1405_v53  ;;  %v1360_v11 = vadd.f32 %v12961_v43, %v1300_v13  ;;  %9889 = vmatprep.mubr.msk.bf16.mxu0 %vm1980_vm5, %v13366_v37  ;;  %v1407_v4 = vmax.f32 %v1359_v55, 0.0  ;;  %v11539_v0 = vld [vmem:[#allocation8 + $0x80] ss:$12 sps:$4 sm:$0xff]   ;;  %v11540_v38 = vld [vmem:[#allocation8 + $0x68] ss:$12 sps:$4 sm:$0xff]  }
 0x205   :  { %v13373_v48 = vld [vmem:[#allocation2 + $0xa0] sm:$0xff]  ;;  %v11555_v55 = vld [vmem:[#allocation8 + $0x20] ss:$12 sps:$4 sm:$0xff]  }
 0x206   :  { %1578 = vst.msk [vmem:[#allocation2 + $0xb0] sm:$0xff] %vm12975_vm4, %v10788_v54  ;;  %v1408_v30 = vmax.f32 %v1360_v11, 0.0  ;;  %2635 = vmatmul.mubr.bf16.gmra.mxu0 %v13368_v39  ;;  %v13379_v51 = vcombine.high %v1599_v29, %v13373_v48  ;;  %v13382_v20 = vcombine.low %v1599_v29, %v13373_v48  ;;  %v11556_v50 = vld [vmem:[#allocation8 + $0x3a8] ss:$12 sps:$4 sm:$0xff]   ;;  %v11541_v53 = vld [vmem:[#allocation8 + $0x50] ss:$12 sps:$4 sm:$0xff]  }
 0x207   :  { %9956 = vmatprep.mubr.msk.bf16.mxu0 %vm1980_vm5, %v13063_v42  ;;  %v11562_v60 = vld [vmem:[#allocation8 + $0x394] ss:$12 sps:$4 sm:$0xff]   ;;  %v11563_v29 = vld [vmem:[#allocation8 + $0x378] ss:$12 sps:$4 sm:$0xff]  }
 0x208   :  { %16276 = vst [vmem:[#allocation20_spill] sm:$0xff] %v13379_v51  ;;  %16277 = vst [vmem:[#allocation25_spill] sm:$0xff] %v13382_v20  ;;  %v10789_v43 = vpack.c.bf16 %v1408_v30, %v1407_v4  ;;  %9813 = vmatprep.mubr.msk.bf16.mxu1 %vm1980_vm5, %v13379_v51  ;;  %v11569_v12 = vld [vmem:[#allocation8 + $0x364] ss:$12 sps:$4 sm:$0xff]   ;;  %v11559_v13 = vld [vmem:[#allocation8 + $0x8] ss:$12 sps:$4 sm:$0xff]  }
 0x209   :  { %v11570_v54 = vld [vmem:[#allocation8 + $0x468] ss:$12 sps:$4 sm:$0xff]   ;;  %v11566_v4 = vld [vmem:[#allocation8 + $0x110] ss:$12 sps:$4 sm:$0xff]  }
 0x20a   :  { %2134 = vmatmul.mubr.bf16.gmra.mxu1 %v13382_v20  ;;  %1579 = vst.msk [vmem:[#allocation2 + $0xb8] sm:$0xff] %vm12975_vm4, %v10789_v43  ;;  %v11577_v11 = vld [vmem:[#allocation8 + $0x454] ss:$12 sps:$4 sm:$0xff]   ;;  %v11582_v30 = vld [vmem:[#allocation8 + $0x43c] ss:$12 sps:$4 sm:$0xff]  }
 0x20b   :  { %9814 = vmatprep.mubr.msk.bf16.mxu1 %vm1980_vm5, %v13044_v34  ;;  %v11549_v34 = vld [vmem:[#allocation8 + $0x3d8] ss:$12 sps:$4 sm:$0xff]  }
 0x20c   :  { %v11573_v43 = vld [vmem:[#allocation8 + $0xf8] ss:$12 sps:$4 sm:$0xff]  }
 0x20e   :  { %3172 = vmatmul.mubr.bf16.vlgmr.msra.gmra.mxu0 %v13065_v6 }
 0x20f   :  { %9957 = vmatprep.mubr.msk.bf16.mxu0 %vm1980_vm5, %v13105_v22  ;;  %3827 = vmatpush1.bf16.msra.mxu0 %v11542_v32  ;;  %v11580_v32 = vld [vmem:[#allocation8 + $0x438] ss:$12 sps:$4 sm:$0xff]  }
 0x210   :  { %3828 = vmatprep.subr.bf16.mxu0 %v11547_v5  ;;  %v11587_v5 = vld [vmem:[#allocation8 + $0x424] ss:$12 sps:$4 sm:$0xff]  }
 0x212   :  { %2177 = vmatmul.mubr.bf16.vlgmr.msra.gmra.mxu1 %v13047_v57  ;;  %v11552_v57 = vld [vmem:[#allocation8 + $0x3c0] ss:$12 sps:$4 sm:$0xff]  }
 0x213   :  { %9815 = vmatprep.mubr.msk.bf16.mxu1 %vm1980_vm5, %v13082_v15  ;;  %2646 = vmatpush1.bf16.msra.mxu1 %v11537_v52  ;;  %v11558_v15 = vld [vmem:[#allocation8 + $0x3ac] ss:$12 sps:$4 sm:$0xff]  }
 0x214   :  { %2647 = vmatprep.subr.bf16.mxu1 %v16220_v23  ;;  %3829 = vmatpush1.bf16.msra.mxu0 %v11545_v26  ;;  %v11578_v52 = vld [vmem:[#allocation8 + $0xe0] ss:$12 sps:$4 sm:$0xff]  }
 0x215   :  { %3830 = vmatprep.subr.bf16.mxu0 %v11551_v49  ;;  %v11585_v26 = vld [vmem:[#allocation8 + $0x420] ss:$12 sps:$4 sm:$0xff]  }
 0x216   :  { %3182 = vmatmul.mubr.bf16.gmra.mxu0 %v13109_v31  ;;  %v11600_v49 = vld [vmem:[#allocation8 + $0x52c] ss:$12 sps:$4 sm:$0xff]  }
 0x217   :  { %2648 = vmatpush1.bf16.msra.mxu1 %v11538_v9  ;;  %9958 = vmatprep.mubr.msk.bf16.mxu0 %vm1980_vm5, %v13155_v19  ;;  %v11588_v9 = vld [vmem:[#allocation8 + $0xc8] ss:$12 sps:$4 sm:$0xff]  }
 0x218   :  { %2649 = vmatprep.subr.bf16.mxu1 %v16220_v23  ;;  %3831 = vmatpush1.bf16.msra.mxu0 %v11549_v34  ;;  %v13453_v34 = vld [vmem:[#allocation2 + $0xa8] sm:$0xff] }
 0x219   :  { %3832 = vmatprep.subr.bf16.mxu0 %v11554_v61  ;;  %v13457_v61 = vcombine.high %v13373_v48, %v13453_v34 }
 0x21a   :  { %2185 = vmatmul.mubr.bf16.gmra.mxu1 %v13085_v27  ;;  %v11560_v27 = vld [vmem:[#allocation8 + $0x390] ss:$12 sps:$4 sm:$0xff]  }
 0x21b   :  { %9816 = vmatprep.mubr.msk.bf16.mxu1 %vm1980_vm5, %v13132_v24  ;;  %2650 = vmatpush1.bf16.msra.mxu1 %v11539_v0  ;;  %v11565_v24 = vld [vmem:[#allocation8 + $0x37c] ss:$12 sps:$4 sm:$0xff]   ;;  %v13467_v0 = vcombine.low %v13373_v48, %v13453_v34  ;;  %v11603_v48 = vld [vmem:[#allocation8 + $0x514] ss:$12 sps:$4 sm:$0xff]  }
 0x21c   :  { %2651 = vmatprep.subr.bf16.mxu1 %v16220_v23  ;;  %3833 = vmatpush1.bf16.msra.mxu0 %v11552_v57  ;;  %v3445_v57 = vld [vmem:[#allocation2 + $0x18] sm:$0xff] }
 0x21d   :  { %3834 = vmatprep.subr.bf16.mxu0 %v11558_v15  ;;  %v13470_v15 = vcombine.high %v3445_v57, %v13107_v2 }
 0x21e   :  { %3192 = vmatmul.mubr.bf16.gmra.mxu0 %v13159_v56 }
 0x21f   :  { %2652 = vmatpush1.bf16.msra.mxu1 %v11540_v38  ;;  %9959 = vmatprep.mubr.msk.bf16.mxu0 %vm1980_vm5, %v13199_v21  ;;  %v11598_v38 = vld [vmem:[#allocation8 + $0x528] ss:$12 sps:$4 sm:$0xff]  }
 0x220   :  { %2653 = vmatprep.subr.bf16.mxu1 %v16220_v23  ;;  %3835 = vmatpush1.bf16.msra.mxu0 %v11556_v50  ;;  %v13479_v50 = vcombine.low %v3445_v57, %v13107_v2  ;;  %v13491_v2 = vld [vmem:[#allocation2 + $0x40] sm:$0xff]  ;;  %v11604_v57 = vld [vmem:[#allocation8 + $0x278] ss:$12 sps:$4 sm:$0xff]  }
 0x221   :  { %3836 = vmatprep.subr.bf16.mxu0 %v11562_v60  ;;  %v16278_v60 = vld [vmem:[#allocation33_spill] sm:$0xff] }
 0x222   :  { %2193 = vmatmul.mubr.bf16.gmra.mxu1 %v13135_v17  ;;  %v11567_v17 = vld [vmem:[#allocation8 + $0x360] ss:$12 sps:$4 sm:$0xff]  }
 0x223   :  { %9817 = vmatprep.mubr.msk.bf16.mxu1 %vm1980_vm5, %v13182_v8  ;;  %2654 = vmatpush1.bf16.msra.mxu1 %v11541_v53  ;;  %v11572_v8 = vld [vmem:[#allocation8 + $0x46c] ss:$12 sps:$4 sm:$0xff]  }
 0x224   :  { %2655 = vmatprep.subr.bf16.mxu1 %v16220_v23  ;;  %3837 = vmatpush1.bf16.msra.mxu0 %v11560_v27  ;;  %v16279_v53 = vld [vmem:[#allocation31_spill] sm:$0xff] }
 0x225   :  { %3838 = vmatprep.subr.bf16.mxu0 %v11565_v24  ;;  %v13483_v27 = vcombine.high %v16279_v53, %v16278_v60  ;;  %v11590_v24 = vld [vmem:[#allocation8 + $0x2f0] ss:$12 sps:$4 sm:$0xff]   ;;  %v11623_v53 = vld [vmem:[#allocation8 + $0x480] ss:$12 sps:$4 sm:$0xff]  }
 0x226   :  { %3202 = vmatmul.mubr.bf16.gmra.mxu0 %v13205_v36 }
 0x227   :  { %2656 = vmatpush1.bf16.msra.mxu1 %v11548_v14  ;;  %9960 = vmatprep.mubr.msk.bf16.mxu0 %vm1980_vm5, %v13237_v62  ;;  %v11601_v14 = vld [vmem:[#allocation8 + $0x510] ss:$12 sps:$4 sm:$0xff]  }
 0x228   :  { %2657 = vmatprep.subr.bf16.mxu1 %v16220_v23  ;;  %3839 = vmatpush1.bf16.msra.mxu0 %v11563_v29  ;;  %v11607_v29 = vld [vmem:[#allocation8 + $0x4fc] ss:$12 sps:$4 sm:$0xff]  }
 0x229   :  { %3840 = vmatprep.subr.bf16.mxu0 %v11569_v12  ;;  %v11593_v12 = vld [vmem:[#allocation8 + $0x2d8] ss:$12 sps:$4 sm:$0xff]  }
 0x22a   :  { %2201 = vmatmul.mubr.bf16.gmra.mxu1 %v13185_v35  ;;  %v11575_v35 = vld [vmem:[#allocation8 + $0x450] ss:$12 sps:$4 sm:$0xff]  }
 0x22b   :  { %9818 = vmatprep.mubr.msk.bf16.mxu1 %vm1980_vm5, %v13220_v10  ;;  %2658 = vmatpush1.bf16.msra.mxu1 %v11555_v55  ;;  %v12070_v55 = vld [vmem:[#allocation2 + $0x28] sm:$0xff] }
 0x22c   :  { %2659 = vmatprep.subr.bf16.mxu1 %v16220_v23  ;;  %3841 = vmatpush1.bf16.msra.mxu0 %v11567_v17  ;;  %v13495_v17 = vcombine.low %v12070_v55, %v16278_v60  ;;  %v11611_v60 = vld [vmem:[#allocation8 + $0x260] ss:$12 sps:$4 sm:$0xff]   ;;  %v11622_v55 = vld [vmem:[#allocation8 + $0x350] ss:$12 sps:$4 sm:$0xff]  }
 0x22d   :  { %3850 = vmatprep.subr.bf16.mxu0 %v11572_v8  ;;  %v11605_v8 = vld [vmem:[#allocation8 + $0x4f8] ss:$12 sps:$4 sm:$0xff]  }
 0x22e   :  { %3212 = vmatmul.mubr.bf16.gmra.mxu0 %v13243_v33 }
 0x22f   :  { %2660 = vmatpush1.bf16.msra.mxu1 %v11559_v13  ;;  %9961 = vmatprep.mubr.msk.bf16.mxu0 %vm1980_vm5, %v13275_v40  ;;  %v16281_v13 = vld [vmem:[#allocation35_spill] sm:$0xff] }
 0x230   :  { %2669 = vmatprep.subr.bf16.mxu1 %v16220_v23  ;;  %3851 = vmatpush2.bf16.msra.mxu0 %v11570_v54  ;;  %v13499_v54 = vcombine.high %v16281_v13, %v13491_v2 }
 0x231   :  { %3852 = vmatprep.subr.bf16.mxu0 %v11577_v11  ;;  %v11610_v11 = vld [vmem:[#allocation8 + $0x4e4] ss:$12 sps:$4 sm:$0xff]  }
 0x232   :  { %2209 = vmatmul.mubr.bf16.gmra.mxu1 %v13223_v59 }
 0x233   :  { %9819 = vmatprep.mubr.msk.bf16.mxu1 %vm1980_vm5, %v13258_v44  ;;  %2670 = vmatpush2.bf16.msra.mxu1 %v11566_v4  ;;  %v11595_v4 = vld [vmem:[#allocation8 + $0x2c0] ss:$12 sps:$4 sm:$0xff]  }
 0x234   :  { %2671 = vmatprep.subr.bf16.mxu1 %v16220_v23  ;;  %3853 = vmatpush2.bf16.msra.mxu0 %v11575_v35  ;;  %v11608_v35 = vld [vmem:[#allocation8 + $0x4e0] ss:$12 sps:$4 sm:$0xff]  }
 0x235   :  { %3854 = vmatprep.subr.bf16.mxu0 %v11582_v30  ;;  %v11614_v30 = vld [vmem:[#allocation8 + $0x4cc] ss:$12 sps:$4 sm:$0xff]  }
 0x236   :  { %3222 = vmatmul.mubr.bf16.gmra.mxu0 %v13281_v63 }
 0x237   :  { %2672 = vmatpush2.bf16.msra.mxu1 %v11573_v43  ;;  %9962 = vmatprep.mubr.msk.bf16.mxu0 %vm1980_vm5, %v13309_v7  ;;  %v11596_v43 = vld [vmem:[#allocation8 + $0x2a8] ss:$12 sps:$4 sm:$0xff]  }
 0x238   :  { %2673 = vmatprep.subr.bf16.mxu1 %v16220_v23  ;;  %3855 = vmatpush2.bf16.msra.mxu0 %v11580_v32  ;;  %v13511_v32 = vcombine.low %v16281_v13, %v13491_v2  ;;  %v11631_v13 = vld [vmem:[#allocation8 + $0x570] ss:$12 sps:$4 sm:$0xff]  }
 0x239   :  { %3856 = vmatprep.subr.bf16.mxu0 %v11587_v5  ;;  %v11612_v5 = vld [vmem:[#allocation8 + $0x4c8] ss:$12 sps:$4 sm:$0xff]  }
 0x23a   :  { %2217 = vmatmul.mubr.bf16.gmra.mxu1 %v13261_v46 }
 0x23b   :  { %9820 = vmatprep.mubr.msk.bf16.mxu1 %vm1980_vm5, %v13294_v25  ;;  %2674 = vmatpush2.bf16.msra.mxu1 %v11578_v52  ;;  %v11618_v52 = vld [vmem:[#allocation8 + $0x4b4] ss:$12 sps:$4 sm:$0xff]  }
 0x23c   :  { %2675 = vmatprep.subr.bf16.mxu1 %v16220_v23  ;;  %3857 = vmatpush2.bf16.msra.mxu0 %v11585_v26  ;;  %v11597_v26 = vld [vmem:[#allocation8 + $0x290] ss:$12 sps:$4 sm:$0xff]  }
 0x23d   :  { %4513 = vmatprep.subr.bf16.mxu0 %v11600_v49  ;;  %v11616_v49 = vld [vmem:[#allocation8 + $0x4b0] ss:$12 sps:$4 sm:$0xff]  }
 0x23e   :  { %3232 = vmatmul.mubr.bf16.gmra.mxu0 %v13313_v1 }
 0x23f   :  { %2676 = vmatpush2.bf16.msra.mxu1 %v11588_v9  ;;  %9963 = vmatprep.mubr.msk.bf16.mxu0 %vm1980_vm5, %v13339_v45  ;;  %v11621_v9 = vld [vmem:[#allocation8 + $0x49c] ss:$12 sps:$4 sm:$0xff]  }
 0x240   :  { %3272 = vmatprep.subr.bf16.mxu1 %v16220_v23 }
 0x242   :  { %2225 = vmatmul.mubr.bf16.gmra.mxu1 %v13296_v58 }
 0x243   :  { %9821 = vmatprep.mubr.msk.bf16.mxu1 %vm1980_vm5, %v13327_v3 }
 0x246   :  { %3242 = vmatmul.mubr.bf16.gmra.mxu0 %v13343_v47 }
 0x247   :  { %9964 = vmatprep.mubr.msk.bf16.mxu0 %vm1980_vm5, %v13366_v37 }
 0x24a   :  { %2233 = vmatmul.mubr.bf16.gmra.mxu1 %v13329_v41 }
 0x24b   :  { %9822 = vmatprep.mubr.msk.bf16.mxu1 %vm1980_vm5, %v13355_v16 }
 0x24e   :  { %3252 = vmatmul.mubr.bf16.gmra.mxu0 %v13368_v39 }
 0x24f   :  { %9965 = vmatprep.mubr.msk.bf16.mxu0 %vm1980_vm5, %v13457_v61 }
 0x252   :  { %2241 = vmatmul.mubr.bf16.gmra.mxu1 %v13357_v18 }
 0x253   :  { %9823 = vmatprep.mubr.msk.bf16.mxu1 %vm1980_vm5, %v13379_v51 }
 0x256   :  { %3262 = vmatmul.mubr.bf16.gmra.mxu0 %v13467_v0 }
 0x257   :  { %10032 = vmatprep.mubr.msk.bf16.mxu0 %vm1980_vm5, %v13470_v15 }
 0x25a   :  { %2249 = vmatmul.mubr.bf16.gmra.mxu1 %v13382_v20 }
 0x25b   :  { %9890 = vmatprep.mubr.msk.bf16.mxu1 %vm1980_vm5, %v13029_v28  ;;  %v16280_v28 = vld [vmem:[#allocation19_spill] sm:$0xff] }
 0x25e   :  { %3859 = vmatmul.mubr.bf16.vlgmr.msra.gmra.mxu0 %v13479_v50 }
 0x25f   :  { %10033 = vmatprep.mubr.msk.bf16.mxu0 %vm1980_vm5, %v13483_v27  ;;  %4514 = vmatpush1.bf16.msra.mxu0 %v11598_v38  ;;  %v11619_v38 = vld [vmem:[#allocation8 + $0x498] ss:$12 sps:$4 sm:$0xff]  }
 0x260   :  { %4515 = vmatprep.subr.bf16.mxu0 %v11603_v48  ;;  %v11625_v48 = vld [vmem:[#allocation8 + $0x484] ss:$12 sps:$4 sm:$0xff]  }
 0x262   :  { %2678 = vmatmul.mubr.bf16.vlgmr.msra.gmra.mxu1 %v16280_v28  ;;  %v11633_v28 = vld [vmem:[#allocation8 + $0x574] ss:$12 sps:$4 sm:$0xff]  }
 0x263   :  { %9891 = vmatprep.mubr.msk.bf16.mxu1 %vm1980_vm5, %v13063_v42  ;;  %3273 = vmatpush1.bf16.msra.mxu1 %v11590_v24  ;;  %v11628_v24 = vld [vmem:[#allocation8 + $0x58c] ss:$12 sps:$4 sm:$0xff]  }
 0x264   :  { %3274 = vmatprep.subr.bf16.mxu1 %v16220_v23  ;;  %4516 = vmatpush1.bf16.msra.mxu0 %v11601_v14  ;;  %v11615_v14 = vld [vmem:[#allocation8 + $0x248] ss:$12 sps:$4 sm:$0xff]  }
 0x265   :  { %4517 = vmatprep.subr.bf16.mxu0 %v11607_v29  ;;  %v11626_v29 = vld [vmem:[#allocation8 + $0x588] ss:$12 sps:$4 sm:$0xff]  }
 0x266   :  { %3869 = vmatmul.mubr.bf16.gmra.mxu0 %v13495_v17 }
 0x267   :  { %3275 = vmatpush1.bf16.msra.mxu1 %v11593_v12  ;;  %10034 = vmatprep.mubr.msk.bf16.mxu0 %vm1980_vm5, %v13499_v54 }
 0x268   :  { %3276 = vmatprep.subr.bf16.mxu1 %v16220_v23  ;;  %4518 = vmatpush1.bf16.msra.mxu0 %v11605_v8 }
 0x269   :  { %4519 = vmatprep.subr.bf16.mxu0 %v11610_v11 }
 0x26a   :  { %2686 = vmatmul.mubr.bf16.gmra.mxu1 %v13065_v6 }
 0x26b   :  { %9892 = vmatprep.mubr.msk.bf16.mxu1 %vm1980_vm5, %v13105_v22  ;;  %3277 = vmatpush1.bf16.msra.mxu1 %v11595_v4  ;;  %v11638_v4 = vld [vmem:[#allocation8 + $0x55c] ss:$12 sps:$4 sm:$0xff]  }
 0x26c   :  { %3278 = vmatprep.subr.bf16.mxu1 %v16220_v23  ;;  %4520 = vmatpush1.bf16.msra.mxu0 %v11608_v35 }
 0x26d   :  { %4521 = vmatprep.subr.bf16.mxu0 %v11614_v30 }
 0x26e   :  { %3879 = vmatmul.mubr.bf16.gmra.mxu0 %v13511_v32 }
 0x26f   :  { %3279 = vmatpush1.bf16.msra.mxu1 %v11596_v43  ;;  %10035 = vmatprep.mubr.msk.bf16.mxu0 %vm1980_vm5, %v13220_v10  ;;  %v11629_v43 = vld [vmem:[#allocation8 + $0x338] ss:$12 sps:$4 sm:$0xff]  }
 0x270   :  { %3280 = vmatprep.subr.bf16.mxu1 %v16220_v23  ;;  %4522 = vmatpush1.bf16.msra.mxu0 %v11612_v5 }
 0x271   :  { %4523 = vmatprep.subr.bf16.mxu0 %v11618_v52 }
 0x272   :  { %2694 = vmatmul.mubr.bf16.gmra.mxu1 %v13109_v31 }
 0x273   :  { %9893 = vmatprep.mubr.msk.bf16.mxu1 %vm1980_vm5, %v13155_v19  ;;  %3281 = vmatpush1.bf16.msra.mxu1 %v11597_v26 }
 0x274   :  { %3282 = vmatprep.subr.bf16.mxu1 %v16220_v23  ;;  %4524 = vmatpush1.bf16.msra.mxu0 %v11616_v49  ;;  %v11636_v49 = vld [vmem:[#allocation8 + $0x558] ss:$12 sps:$4 sm:$0xff]  }
 0x275   :  { %4525 = vmatprep.subr.bf16.mxu0 %v11621_v9 }
 0x276   :  { %3889 = vmatmul.mubr.bf16.gmra.mxu0 %v13223_v59 }
 0x277   :  { %3283 = vmatpush1.bf16.msra.mxu1 %v11604_v57  ;;  %10036 = vmatprep.mubr.msk.bf16.mxu0 %vm1980_vm5, %v13258_v44  ;;  %v11643_v57 = vld [vmem:[#allocation8 + $0x544] ss:$12 sps:$4 sm:$0xff]  }
 0x278   :  { %3284 = vmatprep.subr.bf16.mxu1 %v16220_v23  ;;  %4526 = vmatpush1.bf16.msra.mxu0 %v11619_v38 }
 0x279   :  { %4527 = vmatprep.subr.bf16.mxu0 %v11625_v48 }
 0x27a   :  { %2702 = vmatmul.mubr.bf16.gmra.mxu1 %v13159_v56 }
 0x27b   :  { %9894 = vmatprep.mubr.msk.bf16.mxu1 %vm1980_vm5, %v13199_v21  ;;  %3285 = vmatpush1.bf16.msra.mxu1 %v11611_v60  ;;  %v11634_v60 = vld [vmem:[#allocation8 + $0x320] ss:$12 sps:$4 sm:$0xff]  }
 0x27c   :  { %3286 = vmatprep.subr.bf16.mxu1 %v16220_v23  ;;  %4528 = vmatpush1.bf16.msra.mxu0 %v11623_v53 }
 0x27d   :  { %4537 = vmatprep.subr.bf16.mxu0 %v11628_v24 }
 0x27e   :  { %v2546_v12 = vpop.f32.mrf.mxu0  ;;  %3899 = vmatmul.mubr.bf16.gmra.mxu0 %v13261_v46 }
 0x27f   :  { %3287 = vmatpush1.bf16.msra.mxu1 %v11615_v14  ;;  %10037 = vmatprep.mubr.msk.bf16.mxu0 %vm1980_vm5, %v13294_v25 }
 0x280   :  { %3296 = vmatprep.subr.bf16.mxu1 %v16220_v23  ;;  %v2548_v8 = vpop.f32.mrf.mxu0  ;;  %4538 = vmatpush2.bf16.msra.mxu0 %v11626_v29  ;;  %v11641_v29 = vld [vmem:[#allocation8 + $0x540] ss:$12 sps:$4 sm:$0xff]  }
 0x281   :  { %v2045_v11 = vpop.f32.mrf.mxu1  ;;  %4539 = vmatprep.subr.bf16.mxu0 %v11633_v28 }
 0x282   :  { %2710 = vmatmul.mubr.bf16.gmra.mxu1 %v13205_v36  ;;  %v13534_v35 = vadd.f32 %v2546_v12, %v2045_v11  ;;  %v2550_v30 = vpop.f32.mrf.mxu0 }
 0x283   :  { %9895 = vmatprep.mubr.msk.bf16.mxu1 %vm1980_vm5, %v13237_v62  ;;  %3297 = vmatpush2.bf16.msra.mxu1 %v11622_v55  ;;  %v2047_v5 = vpop.f32.mrf.mxu1 }
 0x284   :  { %3298 = vmatprep.subr.bf16.mxu1 %v16220_v23  ;;  %v13539_v52 = vadd.f32 %v2548_v8, %v2047_v5  ;;  %v2552_v26 = vpop.f32.mrf.mxu0  ;;  %4540 = vmatpush2.bf16.msra.mxu0 %v11631_v13  ;;  %v11644_v8 = vld [vmem:[#allocation8 + $0x308] ss:$12 sps:$4 sm:$0xff]  }
 0x285   :  { %v2049_v9 = vpop.f32.mrf.mxu1  ;;  %4541 = vmatprep.subr.bf16.mxu0 %v11638_v4 }
 0x286   :  { %v13541_v38 = vadd.f32 %v2550_v30, %v2049_v9  ;;  %v2556_v48 = vpop.f32.mrf.mxu0  ;;  %3909 = vmatmul.mubr.bf16.gmra.mxu0 %v13296_v58 }
 0x287   :  { %3299 = vmatpush2.bf16.msra.mxu1 %v11629_v43  ;;  %10038 = vmatprep.mubr.msk.bf16.mxu0 %vm1980_vm5, %v13327_v3  ;;  %v2051_v53 = vpop.f32.mrf.mxu1 }
 0x288   :  { %3300 = vmatprep.subr.bf16.mxu1 %v16220_v23  ;;  %v13547_v24 = vadd.f32 %v2552_v26, %v2051_v53  ;;  %v2558_v14 = vpop.f32.mrf.mxu0  ;;  %4542 = vmatpush2.bf16.msra.mxu0 %v11636_v49 }
 0x289   :  { %v2055_v28 = vpop.f32.mrf.mxu1  ;;  %4543 = vmatprep.subr.bf16.mxu0 %v11643_v57 }
 0x28a   :  { %2718 = vmatmul.mubr.bf16.gmra.mxu1 %v13243_v33  ;;  %v13550_v12 = vadd.f32 %v2556_v48, %v2055_v28  ;;  %v2560_v55 = vpop.f32.mrf.mxu0 }
 0x28b   :  { %9896 = vmatprep.mubr.msk.bf16.mxu1 %vm1980_vm5, %v13275_v40  ;;  %3301 = vmatpush2.bf16.msra.mxu1 %v11634_v60  ;;  %v2057_v13 = vpop.f32.mrf.mxu1 }
 0x28c   :  { %3302 = vmatprep.subr.bf16.mxu1 %v16220_v23  ;;  %v13555_v11 = vadd.f32 %v2558_v14, %v2057_v13  ;;  %v2562_v4 = vpop.f32.mrf.mxu0  ;;  %4544 = vmatpush2.bf16.msra.mxu0 %v11641_v29 }
 0x28d   :  { %v2059_v30 = vpop.f32.mrf.mxu1 }
 0x28e   :  { %v13557_v43 = vadd.f32 %v2560_v55, %v2059_v30  ;;  %v2566_v5 = vpop.f32.mrf.mxu0  ;;  %3919 = vmatmul.mubr.bf16.gmra.mxu0 %v13329_v41 }
 0x28f   :  { %3303 = vmatpush2.bf16.msra.mxu1 %v11644_v8  ;;  %10039 = vmatprep.mubr.msk.bf16.mxu0 %vm1980_vm5, %v13355_v16  ;;  %v2061_v26 = vpop.f32.mrf.mxu1 }
 0x290   :  { %3959 = vmatprep.subr.bf16.mxu1 %v16220_v23  ;;  %v13563_v49 = vadd.f32 %v2562_v4, %v2061_v26  ;;  %v2568_v9 = vpop.f32.mrf.mxu0 }
 0x292   :  { %v2065_v57 = vpop.f32.mrf.mxu1  ;;  %2726 = vmatmul.mubr.bf16.gmra.mxu1 %v13281_v63  ;;  %v2570_v60 = vpop.f32.mrf.mxu0 }
 0x293   :  { %v13566_v48 = vadd.f32 %v2566_v5, %v2065_v57  ;;  %9897 = vmatprep.mubr.msk.bf16.mxu1 %vm1980_vm5, %v13309_v7  ;;  %v13584_v57 = vld [vmem:[#allocation2 + $0xb0] sm:$0xff] }
 0x294   :  { %v2067_v53 = vpop.f32.mrf.mxu1  ;;  %v2572_v29 = vpop.f32.mrf.mxu0 }
 0x295   :  { %v13570_v14 = vadd.f32 %v2568_v9, %v2067_v53 }
 0x296   :  { %v2069_v28 = vpop.f32.mrf.mxu1  ;;  %v2576_v8 = vpop.f32.mrf.mxu0  ;;  %3929 = vmatmul.mubr.bf16.gmra.mxu0 %v13357_v18 }
 0x297   :  { %v13572_v55 = vadd.f32 %v2570_v60, %v2069_v28  ;;  %10040 = vmatprep.mubr.msk.bf16.mxu0 %vm1980_vm5, %v13379_v51 }
 0x298   :  { %v2071_v13 = vpop.f32.mrf.mxu1  ;;  %v2578_v30 = vpop.f32.mrf.mxu0 }
 0x299   :  { %v13577_v4 = vadd.f32 %v2572_v29, %v2071_v13  ;;  %v13590_v29 = vcombine.high %v13453_v34, %v13584_v57 }
 0x29a   :  { %v2075_v5 = vpop.f32.mrf.mxu1  ;;  %2734 = vmatmul.mubr.bf16.gmra.mxu1 %v13313_v1  ;;  %v2580_v9 = vpop.f32.mrf.mxu0 }
 0x29b   :  { %16282 = vst [vmem:[#allocation44_spill] sm:$0xff] %v13577_v4  ;;  %v13580_v26 = vadd.f32 %v2576_v8, %v2075_v5  ;;  %9898 = vmatprep.mubr.msk.bf16.mxu1 %vm1980_vm5, %v13339_v45  ;;  %16283 = vst [vmem:[#allocation45_spill] sm:$0xff] %v13590_v29 }
 0x29c   :  { %v2077_v60 = vpop.f32.mrf.mxu1  ;;  %v2582_v28 = vpop.f32.mrf.mxu0 }
 0x29d   :  { %v13586_v53 = vadd.f32 %v2578_v30, %v2077_v60 }
 0x29e   :  { %v2079_v51 = vpop.f32.mrf.mxu1  ;;  %v2586_v4 = vpop.f32.mrf.mxu0  ;;  %3939 = vmatmul.mubr.bf16.gmra.mxu0 %v13382_v20 }
 0x29f   :  { %v13592_v13 = vadd.f32 %v2580_v9, %v2079_v51  ;;  %10041 = vmatprep.mubr.msk.bf16.mxu0 %vm1980_vm5, %v13590_v29  ;;  %v13608_v29 = vcombine.low %v13453_v34, %v13584_v57 }
 0x2a0   :  { %v2081_v8 = vpop.f32.mrf.mxu1  ;;  %v2588_v18 = vpop.f32.mrf.mxu0 }
 0x2a1   :  { %v13597_v5 = vadd.f32 %v2582_v28, %v2081_v8  ;;  %16285 = vst [vmem:[#allocation46_spill] sm:$0xff] %v13608_v29 }
 0x2a2   :  { %v2085_v30 = vpop.f32.mrf.mxu1  ;;  %2742 = vmatmul.mubr.bf16.gmra.mxu1 %v13343_v47  ;;  %v2590_v16 = vpop.f32.mrf.mxu0 }
 0x2a3   :  { %16284 = vst [vmem:[#allocation47_spill] sm:$0xff] %v13597_v5  ;;  %v13600_v60 = vadd.f32 %v2586_v4, %v2085_v30  ;;  %9899 = vmatprep.mubr.msk.bf16.mxu1 %vm1980_vm5, %v13366_v37  ;;  %v16286_v4 = vld [vmem:[#allocation32_spill] sm:$0xff] }
 0x2a4   :  { %v2087_v51 = vpop.f32.mrf.mxu1  ;;  %v2592_v20 = vpop.f32.mrf.mxu0 }
 0x2a5   :  { %v13604_v9 = vadd.f32 %v2588_v18, %v2087_v51 }
 0x2a6   :  { %v2089_v28 = vpop.f32.mrf.mxu1  ;;  %v2596_v5 = vpop.f32.mrf.mxu0  ;;  %3949 = vmatmul.mubr.bf16.gmra.mxu0 %v13608_v29 }
 0x2a7   :  { %v13610_v8 = vadd.f32 %v2590_v16, %v2089_v28  ;;  %10108 = vmatprep.mubr.msk.bf16.mxu0 %vm1980_vm5, %v16286_v4 }
 0x2a8   :  { %v2091_v30 = vpop.f32.mrf.mxu1  ;;  %v2598_v3 = vpop.f32.mrf.mxu0 }
 0x2a9   :  { %v13615_v41 = vadd.f32 %v2592_v20, %v2091_v30  ;;  %v16288_v20 = vld [vmem:[#allocation48_spill] sm:$0xff] }
 0x2aa   :  { %v2095_v18 = vpop.f32.mrf.mxu1  ;;  %2750 = vmatmul.mubr.bf16.gmra.mxu1 %v13368_v39  ;;  %v2600_v58 = vpop.f32.mrf.mxu0  ;;  %v11646_v30 = vld [vmem:[#allocation8 + $0x410] ss:$12 sps:$4 sm:$0xff]  }
 0x2ab   :  { %16287 = vst [vmem:[#allocation49_spill] sm:$0xff] %v13615_v41  ;;  %v13618_v51 = vadd.f32 %v2596_v5, %v2095_v18  ;;  %9966 = vmatprep.mubr.msk.bf16.mxu1 %vm1980_vm5, %v13063_v42  ;;  %v16289_v41 = vld [vmem:[#allocation36_spill] sm:$0xff] }
 0x2ac   :  { %v2097_v16 = vpop.f32.mrf.mxu1  ;;  %v2602_v29 = vpop.f32.mrf.mxu0 }
 0x2ad   :  { %v13622_v28 = vadd.f32 %v2598_v3, %v2097_v16 }
 0x2ae   :  { %v2099_v25 = vpop.f32.mrf.mxu1  ;;  %v2606_v4 = vpop.f32.mrf.mxu0  ;;  %4546 = vmatmul.mubr.bf16.vlgmr.msra.gmra.mxu0 %v16288_v20 }
 0x2af   :  { %v13624_v46 = vadd.f32 %v2600_v58, %v2099_v25  ;;  %10109 = vmatprep.mubr.msk.bf16.mxu0 %vm1980_vm5, %v16289_v41  ;;  %v4137_v25 = vld [vmem:[#allocation2 + $0x48] sm:$0xff] }
 0x2b0   :  { %v2101_v5 = vpop.f32.mrf.mxu1  ;;  %v2608_v44 = vpop.f32.mrf.mxu0  ;;  %v11649_v58 = vld [vmem:[#allocation8 + $0x3f8] ss:$12 sps:$4 sm:$0xff]  }
 0x2b1   :  { %v13629_v18 = vadd.f32 %v2602_v29, %v2101_v5 }
 0x2b2   :  { %v2105_v59 = vpop.f32.mrf.mxu1  ;;  %3305 = vmatmul.mubr.bf16.vlgmr.msra.gmra.mxu1 %v13065_v6  ;;  %v2610_v3 = vpop.f32.mrf.mxu0 }
 0x2b3   :  { %16290 = vst [vmem:[#allocation22_spill] sm:$0xff] %v13629_v18  ;;  %v13632_v42 = vadd.f32 %v2606_v4, %v2105_v59  ;;  %9967 = vmatprep.mubr.msk.bf16.mxu1 %vm1980_vm5, %v13105_v22  ;;  %3960 = vmatpush1.bf16.msra.mxu1 %v11646_v30  ;;  %v13640_v18 = vcombine.high %v13491_v2, %v4137_v25  ;;  %v16292_v4 = vld [vmem:[#allocation17_spill] sm:$0xff]  ;;  %v11653_v22 = vld [vmem:[#allocation8 + $0x3e0] ss:$12 sps:$4 sm:$0xff]  }
 0x2b4   :  { %v2107_v16 = vpop.f32.mrf.mxu1  ;;  %3961 = vmatprep.subr.bf16.mxu1 %v16220_v23  ;;  %v2612_v29 = vpop.f32.mrf.mxu0 }
 0x2b5   :  { %v13637_v41 = vadd.f32 %v2608_v44, %v2107_v16  ;;  %16291 = vst [vmem:[#allocation27_spill] sm:$0xff] %v13640_v18 }
 0x2b6   :  { %v2109_v5 = vpop.f32.mrf.mxu1  ;;  %v2616_v59 = vpop.f32.mrf.mxu0  ;;  %4556 = vmatmul.mubr.bf16.gmra.mxu0 %v16292_v4 }
 0x2b7   :  { %v13642_v6 = vadd.f32 %v2610_v3, %v2109_v5  ;;  %3962 = vmatpush1.bf16.msra.mxu1 %v11649_v58  ;;  %10110 = vmatprep.mubr.msk.bf16.mxu0 %vm1980_vm5, %v13640_v18  ;;  %v11655_v58 = vld [vmem:[#allocation8 + $0x3c8] ss:$12 sps:$4 sm:$0xff]  }
 0x2b8   :  { %v2111_v30 = vpop.f32.mrf.mxu1  ;;  %3963 = vmatprep.subr.bf16.mxu1 %v16220_v23  ;;  %v2618_v16 = vpop.f32.mrf.mxu0 }
 0x2b9   :  { %v13648_v44 = vadd.f32 %v2612_v29, %v2111_v30  ;;  %v13659_v29 = vcombine.low %v13491_v2, %v4137_v25 }
 0x2ba   :  { %v2115_v20 = vpop.f32.mrf.mxu1  ;;  %3313 = vmatmul.mubr.bf16.gmra.mxu1 %v13109_v31  ;;  %v2620_v3 = vpop.f32.mrf.mxu0 }
 0x2bb   :  { %16293 = vst [vmem:[#allocation50_spill] sm:$0xff] %v13648_v44  ;;  %v13651_v10 = vadd.f32 %v2616_v59, %v2115_v20  ;;  %9968 = vmatprep.mubr.msk.bf16.mxu1 %vm1980_vm5, %v13155_v19  ;;  %3964 = vmatpush1.bf16.msra.mxu1 %v11653_v22  ;;  %16294 = vst [vmem:[#allocation52_spill] sm:$0xff] %v13659_v29  ;;  %v13661_v44 = vld [vmem:[#allocation2 + $0x54] ss:$8 sps:$4 sm:$0xff]   ;;  %v11658_v19 = vld [vmem:[#allocation8 + $0x3b0] ss:$12 sps:$4 sm:$0xff]  }
 0x2bc   :  { %v2117_v5 = vpop.f32.mrf.mxu1  ;;  %3965 = vmatprep.subr.bf16.mxu1 %v16220_v23  ;;  %v2622_v4 = vpop.f32.mrf.mxu0  ;;  %16295 = vst [vmem:[#allocation51_spill] sm:$0xff] %v13661_v44 }
 0x2bd   :  { %v13656_v18 = vadd.f32 %v2618_v16, %v2117_v5 }
 0x2be   :  { %v2119_v30 = vpop.f32.mrf.mxu1  ;;  %v2626_v20 = vpop.f32.mrf.mxu0  ;;  %4566 = vmatmul.mubr.bf16.gmra.mxu0 %v13659_v29 }
 0x2bf   :  { %v13663_v31 = vadd.f32 %v2620_v3, %v2119_v30  ;;  %3966 = vmatpush1.bf16.msra.mxu1 %v11655_v58  ;;  %10111 = vmatprep.mubr.msk.bf16.mxu0 %vm1980_vm5, %v13661_v44  ;;  %v11662_v58 = vld [vmem:[#allocation8 + $0x398] ss:$12 sps:$4 sm:$0xff]  }
 0x2c0   :  { %v2121_v59 = vpop.f32.mrf.mxu1  ;;  %3967 = vmatprep.subr.bf16.mxu1 %v16220_v23  ;;  %v2628_v2 = vpop.f32.mrf.mxu0 }
 0x2c1   :  { %v13669_v22 = vadd.f32 %v2622_v4, %v2121_v59  ;;  %v13679_v4 = vld [vmem:[#allocation2 + $0x50] ss:$8 sps:$4 sm:$0xff]  }
 0x2c2   :  { %v2125_v25 = vpop.f32.mrf.mxu1  ;;  %3321 = vmatmul.mubr.bf16.gmra.mxu1 %v13159_v56  ;;  %v2630_v3 = vpop.f32.mrf.mxu0  ;;  %16297 = vst [vmem:[#allocation24_spill] sm:$0xff] %v13679_v4 }
 0x2c3   :  { %16296 = vst [vmem:[#allocation53_spill] sm:$0xff] %v13669_v22  ;;  %v13672_v16 = vadd.f32 %v2626_v20, %v2125_v25  ;;  %9969 = vmatprep.mubr.msk.bf16.mxu1 %vm1980_vm5, %v13199_v21  ;;  %3968 = vmatpush1.bf16.msra.mxu1 %v11658_v19  ;;  %v13681_v22 = vld [vmem:[#allocation2 + $0x64] ss:$8 sps:$4 sm:$0xff]   ;;  %v11666_v21 = vld [vmem:[#allocation8 + $0x380] ss:$12 sps:$4 sm:$0xff]  }
 0x2c4   :  { %v2127_v5 = vpop.f32.mrf.mxu1  ;;  %3969 = vmatprep.subr.bf16.mxu1 %v16220_v23  ;;  %v2632_v44 = vpop.f32.mrf.mxu0  ;;  %16298 = vst [vmem:[#allocation28_spill] sm:$0xff] %v13681_v22 }
 0x2c5   :  { %v13677_v30 = vadd.f32 %v2628_v2, %v2127_v5 }
 0x2c6   :  { %v2129_v59 = vpop.f32.mrf.mxu1  ;;  %v2636_v20 = vpop.f32.mrf.mxu0  ;;  %4576 = vmatmul.mubr.bf16.gmra.mxu0 %v13679_v4 }
 0x2c7   :  { %v13683_v56 = vadd.f32 %v2630_v3, %v2129_v59  ;;  %3970 = vmatpush1.bf16.msra.mxu1 %v11662_v58  ;;  %10112 = vmatprep.mubr.msk.bf16.mxu0 %vm1980_vm5, %v13681_v22  ;;  %v11670_v58 = vld [vmem:[#allocation8 + $0x368] ss:$12 sps:$4 sm:$0xff]  }
 0x2c8   :  { %v2131_v19 = vpop.f32.mrf.mxu1  ;;  %3971 = vmatprep.subr.bf16.mxu1 %v16220_v23  ;;  %v2638_v25 = vpop.f32.mrf.mxu0 }
 0x2c9   :  { %v13689_v2 = vadd.f32 %v2632_v44, %v2131_v19  ;;  %v13699_v44 = vld [vmem:[#allocation2 + $0x60] ss:$8 sps:$4 sm:$0xff]  }
 0x2ca   :  { %v2135_v5 = vpop.f32.mrf.mxu1  ;;  %3329 = vmatmul.mubr.bf16.gmra.mxu1 %v13205_v36  ;;  %v2640_v3 = vpop.f32.mrf.mxu0 }
 0x2cb   :  { %16299 = vst [vmem:[#allocation55_spill] sm:$0xff] %v13689_v2  ;;  %v13692_v29 = vadd.f32 %v2636_v20, %v2135_v5  ;;  %9970 = vmatprep.mubr.msk.bf16.mxu1 %vm1980_vm5, %v13237_v62  ;;  %3972 = vmatpush1.bf16.msra.mxu1 %v11666_v21  ;;  %v13701_v2 = vld [vmem:[#allocation2 + $0x74] ss:$8 sps:$4 sm:$0xff]   ;;  %v11673_v62 = vld [vmem:[#allocation8 + $0x470] ss:$12 sps:$4 sm:$0xff]  }
 0x2cc   :  { %v2137_v59 = vpop.f32.mrf.mxu1  ;;  %3973 = vmatprep.subr.bf16.mxu1 %v16220_v23  ;;  %v2642_v4 = vpop.f32.mrf.mxu0  ;;  %16300 = vst [vmem:[#allocation54_spill] sm:$0xff] %v13701_v2 }
 0x2cd   :  { %v13697_v22 = vadd.f32 %v2638_v25, %v2137_v59 }
 0x2ce   :  { %v2139_v19 = vpop.f32.mrf.mxu1  ;;  %v3173_v20 = vpop.f32.mrf.mxu0  ;;  %4586 = vmatmul.mubr.bf16.gmra.mxu0 %v13699_v44 }
 0x2cf   :  { %v13703_v36 = vadd.f32 %v2640_v3, %v2139_v19  ;;  %3974 = vmatpush1.bf16.msra.mxu1 %v11670_v58  ;;  %v13707_v21 = vadd.f32 %v3173_v20, %v13534_v35  ;;  %10113 = vmatprep.mubr.msk.bf16.mxu0 %vm1980_vm5, %v13701_v2  ;;  %v11675_v35 = vld [vmem:[#allocation8 + $0x458] ss:$12 sps:$4 sm:$0xff]  }
 0x2d0   :  { %v2141_v25 = vpop.f32.mrf.mxu1  ;;  %3983 = vmatprep.subr.bf16.mxu1 %v16220_v23  ;;  %v3175_v59 = vpop.f32.mrf.mxu0 }
 0x2d1   :  { %v13712_v5 = vadd.f32 %v2642_v4, %v2141_v25  ;;  %v13715_v3 = vadd.f32 %v3175_v59, %v13539_v52  ;;  %v13726_v25 = vld [vmem:[#allocation2 + $0x70] ss:$8 sps:$4 sm:$0xff]  }
 0x2d2   :  { %v13717_v19 = vpop.f32.mrf.mxu1  ;;  %3337 = vmatmul.mubr.bf16.gmra.mxu1 %v13243_v33  ;;  %v3177_v58 = vpop.f32.mrf.mxu0  ;;  %16302 = vst [vmem:[#allocation26_spill] sm:$0xff] %v13726_v25  ;;  %v13733_v33 = vld [vmem:[#allocation2 + $0x84] ss:$8 sps:$4 sm:$0xff]  }
 0x2d3   :  { %16301 = vst [vmem:[#allocation56_spill] sm:$0xff] %v13712_v5  ;;  %9971 = vmatprep.mubr.msk.bf16.mxu1 %vm1980_vm5, %v13275_v40  ;;  %3984 = vmatpush2.bf16.msra.mxu1 %v11673_v62  ;;  %v13723_v20 = vadd.f32 %v3177_v58, %v13541_v38  ;;  %16303 = vst [vmem:[#allocation29_spill] sm:$0xff] %v13733_v33  ;;  %v11677_v40 = vld [vmem:[#allocation8 + $0x440] ss:$12 sps:$4 sm:$0xff]  }
 0x2d4   :  { %v2180_v2 = vpop.f32.mrf.mxu1  ;;  %3985 = vmatprep.subr.bf16.mxu1 %v16220_v23  ;;  %v3179_v4 = vpop.f32.mrf.mxu0 }
 0x2d5   :  { %v13729_v52 = vadd.f32 %v3179_v4, %v13547_v24 }
 0x2d6   :  { %v13731_v59 = vpop.f32.mrf.mxu1  ;;  %v3183_v5 = vpop.f32.mrf.mxu0  ;;  %4596 = vmatmul.mubr.bf16.gmra.mxu0 %v13726_v25 }
 0x2d7   :  { %3986 = vmatpush2.bf16.msra.mxu1 %v11675_v35  ;;  %v13737_v38 = vadd.f32 %v3183_v5, %v13550_v12  ;;  %10114 = vmatprep.mubr.msk.bf16.mxu0 %vm1980_vm5, %v13733_v33  ;;  %v11679_v12 = vld [vmem:[#allocation8 + $0x428] ss:$12 sps:$4 sm:$0xff]   ;;  %v13754_v33 = vld [vmem:[#allocation2 + $0x80] ss:$8 sps:$4 sm:$0xff]  }
 0x2d8   :  { %v2183_v2 = vpop.f32.mrf.mxu1  ;;  %3987 = vmatprep.subr.bf16.mxu1 %v16220_v23  ;;  %v3185_v24 = vpop.f32.mrf.mxu0 }
 0x2d9   :  { %v13743_v62 = vadd.f32 %v3185_v24, %v13555_v11 }
 0x2da   :  { %v13745_v58 = vpop.f32.mrf.mxu1  ;;  %3345 = vmatmul.mubr.bf16.gmra.mxu1 %v13281_v63  ;;  %v3187_v4 = vpop.f32.mrf.mxu0  ;;  %v13761_v63 = vld [vmem:[#allocation2 + $0x94] ss:$8 sps:$4 sm:$0xff]  }
 0x2db   :  { %9972 = vmatprep.mubr.msk.bf16.mxu1 %vm1980_vm5, %v13309_v7  ;;  %3988 = vmatpush2.bf16.msra.mxu1 %v11677_v40  ;;  %v13751_v5 = vadd.f32 %v3187_v4, %v13557_v43  ;;  %16304 = vst [vmem:[#allocation57_spill] sm:$0xff] %v13761_v63 }
 0x2dc   :  { %v2188_v35 = vpop.f32.mrf.mxu1  ;;  %3989 = vmatprep.subr.bf16.mxu1 %v16220_v23  ;;  %v3189_v2 = vpop.f32.mrf.mxu0 }
 0x2dd   :  { %v13757_v11 = vadd.f32 %v3189_v2, %v13563_v49 }
 0x2de   :  { %v13759_v24 = vpop.f32.mrf.mxu1  ;;  %v3193_v25 = vpop.f32.mrf.mxu0  ;;  %4606 = vmatmul.mubr.bf16.gmra.mxu0 %v13754_v33 }
 0x2df   :  { %3990 = vmatpush2.bf16.msra.mxu1 %v11679_v12  ;;  %v13765_v7 = vadd.f32 %v3193_v25, %v13566_v48  ;;  %10115 = vmatprep.mubr.msk.bf16.mxu0 %vm1980_vm5, %v13761_v63  ;;  %v11692_v48 = vld [vmem:[%s16103_s5 + $0x118] sm:$0xff]  }
 0x2e0   :  { %v2191_v43 = vpop.f32.mrf.mxu1  ;;  %4646 = vmatprep.subr.bf16.mxu1 %v16220_v23  ;;  %v3195_v40 = vpop.f32.mrf.mxu0  ;;  %10846 = vmatprep.subr.bf16.mxu0 %v11692_v48 }
 0x2e1   :  { %v13771_v49 = vadd.f32 %v3195_v40, %v13570_v14  ;;  %v11693_v14 = vld [vmem:[%s16103_s5 + $0xd8] sm:$0xff]  }
 0x2e2   :  { %v13773_v4 = vpop.f32.mrf.mxu1  ;;  %3353 = vmatmul.mubr.bf16.gmra.mxu1 %v13313_v1  ;;  %v3197_v35 = vpop.f32.mrf.mxu0  ;;  %v13789_v43 = vld [vmem:[#allocation2 + $0x90] ss:$8 sps:$4 sm:$0xff]   ;;  %v4148_v1 = vld [vmem:[#allocation2 + $0xa0] sm:$0xff]  ;;  %10847 = vmatpush3.bf16.msra.mxu0 %v11693_v14 }
 0x2e3   :  { %9973 = vmatprep.mubr.msk.bf16.mxu1 %vm1980_vm5, %v13339_v45  ;;  %v13782_v25 = vadd.f32 %v3197_v35, %v13572_v55  ;;  %16305 = vst [vmem:[#allocation59_spill] sm:$0xff] %v13789_v43  ;;  %v13794_v45 = vcombine.high %v4148_v1, %v13453_v34  ;;  %v11694_v55 = vld [vmem:[%s16103_s5 + $0x110] sm:$0xff]  }
 0x2e4   :  { %v2196_v12 = vpop.f32.mrf.mxu1  ;;  %v13787_v2 = vpop.f32.mrf.mxu0  ;;  %10848 = vmatprep.subr.bf16.mxu0 %v11694_v55 }
 0x2e5   :  { %16307 = vst [vmem:[#allocation15_spill] sm:$0xff] %v13794_v45  ;;  %v11695_v12 = vld [vmem:[%s16103_s5 + $0xd0] sm:$0xff]  }
 0x2e6   :  { %v13791_v40 = vpop.f32.mrf.mxu1  ;;  %v3203_v63 = vpop.f32.mrf.mxu0  ;;  %4616 = vmatmul.mubr.bf16.gmra.mxu0 %v13789_v43 }
 0x2e7   :  { %16306 = vst [vmem:[#allocation58_spill] sm:$0xff] %v13791_v40  ;;  %v13801_v35 = vadd.f32 %v3203_v63, %v13580_v26  ;;  %10116 = vmatprep.mubr.msk.bf16.mxu0 %vm1980_vm5, %v13794_v45  ;;  %10849 = vmatpush3.bf16.msra.mxu0 %v11695_v12  ;;  %v4151_v63 = vld [vmem:[#allocation2 + $0xb8] sm:$0xff] }
 0x2e8   :  { %v2199_v48 = vpop.f32.mrf.mxu1  ;;  %v3205_v40 = vpop.f32.mrf.mxu0  ;;  %v13833_v12 = vcombine.high %v13584_v57, %v4151_v63 }
 0x2e9   :  { %v13809_v14 = vadd.f32 %v3205_v40, %v13586_v53  ;;  %v11696_v48 = vld [vmem:[%s16103_s5 + $0x108] sm:$0xff]  }
 0x2ea   :  { %v13811_v43 = vpop.f32.mrf.mxu1  ;;  %3361 = vmatmul.mubr.bf16.gmra.mxu1 %v13343_v47  ;;  %v3207_v26 = vpop.f32.mrf.mxu0  ;;  %v11697_v53 = vld [vmem:[%s16103_s5 + $0xc8] sm:$0xff]   ;;  %v13828_v47 = vcombine.low %v4148_v1, %v13453_v34  ;;  %10850 = vmatprep.subr.bf16.mxu0 %v11696_v48  ;;  %16311 = vst [vmem:[#allocation64_spill] sm:$0xff] %v13833_v12  ;;  %v11699_v1 = vld [vmem:[%s16103_s5 + $0xc0] sm:$0xff]  }
 0x2eb   :  { %16308 = vst [vmem:[#allocation30_spill] sm:$0xff] %v13811_v43  ;;  %9974 = vmatprep.mubr.msk.bf16.mxu1 %vm1980_vm5, %v13366_v37  ;;  %v13820_v45 = vadd.f32 %v3207_v26, %v13592_v13  ;;  %10851 = vmatpush3.bf16.msra.mxu0 %v11697_v53  ;;  %v11698_v13 = vld [vmem:[%s16103_s5 + $0x100] sm:$0xff]  }
 0x2ec   :  { %v2204_v55 = vpop.f32.mrf.mxu1  ;;  %v13825_v40 = vpop.f32.mrf.mxu0  ;;  %16309 = vst [vmem:[#allocation16_spill] sm:$0xff] %v13828_v47  ;;  %10852 = vmatprep.subr.bf16.mxu0 %v11698_v13 }
 0x2ee   :  { %v13830_v37 = vpop.f32.mrf.mxu1  ;;  %v3213_v43 = vpop.f32.mrf.mxu0  ;;  %4626 = vmatmul.mubr.bf16.gmra.mxu0 %v13828_v47 }
 0x2ef   :  { %16310 = vst [vmem:[#allocation34_spill] sm:$0xff] %v13830_v37  ;;  %v13840_v26 = vadd.f32 %v3213_v43, %v13600_v60  ;;  %10117 = vmatprep.mubr.msk.bf16.mxu0 %vm1980_vm5, %v13833_v12  ;;  %10853 = vmatpush3.bf16.msra.mxu0 %v11699_v1  ;;  %v11700_v43 = vld [vmem:[%s16103_s5 + $0xf8] sm:$0xff]  }
 0x2f0   :  { %v2207_v34 = vpop.f32.mrf.mxu1  ;;  %v3215_v48 = vpop.f32.mrf.mxu0  ;;  %10854 = vmatprep.subr.bf16.mxu0 %v11700_v43 }
 0x2f1   :  { %v13848_v55 = vadd.f32 %v3215_v48, %v13604_v9  ;;  %v11701_v9 = vld [vmem:[%s16103_s5 + $0xb8] sm:$0xff]  }
 0x2f2   :  { %v13850_v53 = vpop.f32.mrf.mxu1  ;;  %3369 = vmatmul.mubr.bf16.gmra.mxu1 %v13368_v39  ;;  %v3217_v60 = vpop.f32.mrf.mxu0  ;;  %v13867_v39 = vcombine.low %v13584_v57, %v4151_v63  ;;  %v11703_v57 = vld [vmem:[%s16103_s5 + $0xb0] sm:$0xff]  }
 0x2f3   :  { %16312 = vst [vmem:[#allocation62_spill] sm:$0xff] %v13850_v53  ;;  %9975 = vmatprep.mubr.msk.bf16.mxu1 %vm1980_vm5, %v13457_v61  ;;  %v13859_v34 = vadd.f32 %v3217_v60, %v13610_v8  ;;  %10855 = vmatpush3.bf16.msra.mxu0 %v11701_v9  ;;  %v11702_v8 = vld [vmem:[%s16103_s5 + $0xf0] sm:$0xff]  }
 0x2f4   :  { %v2212_v13 = vpop.f32.mrf.mxu1  ;;  %v13864_v48 = vpop.f32.mrf.mxu0  ;;  %16314 = vst [vmem:[#allocation31_spill] sm:$0xff] %v13867_v39  ;;  %10856 = vmatprep.subr.bf16.mxu0 %v11702_v8 }
 0x2f5   :  { %16313 = vst [vmem:[#allocation33_spill] sm:$0xff] %v13864_v48 }
 0x2f6   :  { %v13869_v1 = vpop.f32.mrf.mxu1  ;;  %v3223_v61 = vpop.f32.mrf.mxu0  ;;  %4636 = vmatmul.mubr.bf16.gmra.mxu0 %v13867_v39 }
 0x2f7   :  { %16315 = vst [vmem:[#allocation19_spill] sm:$0xff] %v13869_v1  ;;  %v13876_v60 = vadd.f32 %v3223_v61, %v13618_v51  ;;  %10857 = vmatpush3.bf16.msra.mxu0 %v11703_v57  ;;  %v11706_v51 = vld [vmem:[%s16103_s5 + $0xe8] sm:$0xff]  }
 0x2f8   :  { %v2215_v13 = vpop.f32.mrf.mxu1  ;;  %v3225_v63 = vpop.f32.mrf.mxu0  ;;  %10858 = vmatprep.subr.bf16.mxu0 %v11706_v51 }
 0x2f9   :  { %v13882_v43 = vadd.f32 %v3225_v63, %v13622_v28  ;;  %v11707_v28 = vld [vmem:[%s16103_s5 + $0xa8] sm:$0xff]   ;;  %v11710_v63 = vld [vmem:[%s16103_s5 + $0xe0] sm:$0xff]  }
 0x2fa   :  { %v13884_v9 = vpop.f32.mrf.mxu1  ;;  %3377 = vmatmul.mubr.bf16.gmra.mxu1 %v13467_v0  ;;  %v3227_v39 = vpop.f32.mrf.mxu0 }
 0x2fb   :  { %16316 = vst [vmem:[#allocation35_spill] sm:$0xff] %v13884_v9  ;;  %10042 = vmatprep.mubr.msk.bf16.mxu1 %vm1980_vm5, %v13470_v15  ;;  %v13893_v61 = vadd.f32 %v3227_v39, %v13624_v46  ;;  %10859 = vmatpush3.bf16.msra.mxu0 %v11707_v28  ;;  %v11680_v15 = vld [vmem:[#allocation8 + $0x530] ss:$12 sps:$4 sm:$0xff]  }
 0x2fc   :  { %v2220_v8 = vpop.f32.mrf.mxu1  ;;  %v13898_v13 = vpop.f32.mrf.mxu0  ;;  %10860 = vmatprep.subr.bf16.mxu0 %v11710_v63 }
 0x2fd   :  { %16317 = vst [vmem:[#allocation65_spill] sm:$0xff] %v13898_v13  ;;  %v11711_v8 = vld [vmem:[%s16103_s5 + $0xa0] sm:$0xff]   ;;  %v16339_v13 = vld [vmem:[#allocation43_spill] sm:$0xff] }
 0x2fe   :  { %v13900_v0 = vpop.f32.mrf.mxu1  ;;  %v3233_v57 = vpop.f32.mrf.mxu0 }
 0x2ff   :  { %16318 = vst [vmem:[#allocation66_spill] sm:$0xff] %v13900_v0  ;;  %v13906_v46 = vadd.f32 %v3233_v57, %v13632_v42  ;;  %10861 = vmatpush3.bf16.msra.mxu0 %v11711_v8  ;;  %v11681_v42 = vld [vmem:[#allocation8 + $0x518] ss:$12 sps:$4 sm:$0xff]  }
 0x300   :  { %v2223_v39 = vpop.f32.mrf.mxu1  ;;  %v3235_v9 = vpop.f32.mrf.mxu0 }
 0x301   :  { %v13912_v51 = vadd.f32 %v3235_v9, %v13637_v41 }
 0x302   :  { %v13914_v28 = vpop.f32.mrf.mxu1  ;;  %3992 = vmatmul.mubr.bf16.vlgmr.msra.gmra.mxu1 %v13479_v50  ;;  %v3237_v0 = vpop.f32.mrf.mxu0  ;;  %v11682_v50 = vld [vmem:[#allocation8 + $0x500] ss:$12 sps:$4 sm:$0xff]  }
 0x303   :  { %16319 = vst [vmem:[#allocation67_spill] sm:$0xff] %v13914_v28  ;;  %10043 = vmatprep.mubr.msk.bf16.mxu1 %vm1980_vm5, %v13483_v27  ;;  %4647 = vmatpush1.bf16.msra.mxu1 %v11680_v15  ;;  %v13920_v57 = vadd.f32 %v3237_v0, %v13642_v6 }
 0x304   :  { %v2228_v39 = vpop.f32.mrf.mxu1  ;;  %4648 = vmatprep.subr.bf16.mxu1 %v16220_v23  ;;  %v13923_v63 = vpop.f32.mrf.mxu0 }
 0x305   :  { %16320 = vst [vmem:[#allocation68_spill] sm:$0xff] %v13923_v63 }
 0x306   :  { %v13925_v41 = vpop.f32.mrf.mxu1  ;;  %v3243_v9 = vpop.f32.mrf.mxu0 }
 0x307   :  { %16321 = vst [vmem:[#allocation69_spill] sm:$0xff] %v13925_v41  ;;  %4649 = vmatpush1.bf16.msra.mxu1 %v11681_v42  ;;  %v13928_v8 = vadd.f32 %v3243_v9, %v13651_v10  ;;  %v11683_v42 = vld [vmem:[#allocation8 + $0x4e8] ss:$12 sps:$4 sm:$0xff]  }
 0x308   :  { %v2231_v28 = vpop.f32.mrf.mxu1  ;;  %4650 = vmatprep.subr.bf16.mxu1 %v16220_v23  ;;  %v3245_v27 = vpop.f32.mrf.mxu0  ;;  %v16337_v41 = vld [vmem:[#allocation40_spill] sm:$0xff] }
 0x309   :  { %v13932_v6 = vadd.f32 %v3245_v27, %v13656_v18  ;;  %v11684_v27 = vld [vmem:[#allocation8 + $0x4d0] ss:$12 sps:$4 sm:$0xff]  }
 0x30a   :  { %v13934_v0 = vpop.f32.mrf.mxu1  ;;  %4000 = vmatmul.mubr.bf16.gmra.mxu1 %v13495_v17  ;;  %v3247_v15 = vpop.f32.mrf.mxu0 }
 0x30b   :  { %16322 = vst [vmem:[#allocation70_spill] sm:$0xff] %v13934_v0  ;;  %10044 = vmatprep.mubr.msk.bf16.mxu1 %vm1980_vm5, %v13499_v54  ;;  %4651 = vmatpush1.bf16.msra.mxu1 %v11682_v50  ;;  %v13940_v10 = vadd.f32 %v3247_v15, %v13663_v31 }
 0x30c   :  { %v2236_v28 = vpop.f32.mrf.mxu1  ;;  %4652 = vmatprep.subr.bf16.mxu1 %v16220_v23  ;;  %v13943_v39 = vpop.f32.mrf.mxu0 }
 0x30d   :  { %16323 = vst [vmem:[#allocation71_spill] sm:$0xff] %v13943_v39  ;;  %v16326_v28 = vld [vmem:[#allocation21_spill] sm:$0xff] }
 0x30e   :  { %v13945_v18 = vpop.f32.mrf.mxu1  ;;  %v3253_v9 = vpop.f32.mrf.mxu0 }
 0x30f   :  { %16324 = vst [vmem:[#allocation72_spill] sm:$0xff] %v13945_v18  ;;  %4653 = vmatpush1.bf16.msra.mxu1 %v11683_v42  ;;  %v13948_v17 = vadd.f32 %v3253_v9, %v13672_v16  ;;  %v11685_v42 = vld [vmem:[#allocation8 + $0x4b8] ss:$12 sps:$4 sm:$0xff]  }
 0x310   :  { %v2239_v0 = vpop.f32.mrf.mxu1  ;;  %4654 = vmatprep.subr.bf16.mxu1 %v16220_v23  ;;  %v3255_v54 = vpop.f32.mrf.mxu0 }
 0x311   :  { %v13952_v31 = vadd.f32 %v3255_v54, %v13677_v30 }
 0x312   :  { %v13954_v50 = vpop.f32.mrf.mxu1  ;;  %4008 = vmatmul.mubr.bf16.gmra.mxu1 %v13511_v32  ;;  %v3257_v15 = vpop.f32.mrf.mxu0 }
 0x313   :  { %16325 = vst [vmem:[#allocation73_spill] sm:$0xff] %v13954_v50  ;;  %10045 = vmatprep.mubr.msk.bf16.mxu1 %vm1980_vm5, %v16326_v28  ;;  %4655 = vmatpush1.bf16.msra.mxu1 %v11684_v27  ;;  %v13960_v16 = vadd.f32 %v3257_v15, %v13683_v56  ;;  %v11686_v50 = vld [vmem:[#allocation8 + $0x4a0] ss:$12 sps:$4 sm:$0xff]   ;;  %v16330_v28 = vld [vmem:[#allocation37_spill] sm:$0xff] }
 0x314   :  { %v2244_v0 = vpop.f32.mrf.mxu1  ;;  %4656 = vmatprep.subr.bf16.mxu1 %v16220_v23  ;;  %v13963_v9 = vpop.f32.mrf.mxu0 }
 0x315   :  { %16327 = vst [vmem:[#allocation21_spill] sm:$0xff] %v13963_v9  ;;  %v16331_v9 = vld [vmem:[#allocation39_spill] sm:$0xff] }
 0x316   :  { %v13965_v30 = vpop.f32.mrf.mxu1  ;;  %v3263_v54 = vpop.f32.mrf.mxu0 }
 0x317   :  { %16328 = vst [vmem:[#allocation74_spill] sm:$0xff] %v13965_v30  ;;  %4657 = vmatpush1.bf16.msra.mxu1 %v11685_v42  ;;  %v13968_v32 = vadd.f32 %v3263_v54, %v13692_v29  ;;  %v11687_v42 = vld [vmem:[#allocation8 + $0x488] ss:$12 sps:$4 sm:$0xff]  }
 0x318   :  { %v2247_v18 = vpop.f32.mrf.mxu1  ;;  %4658 = vmatprep.subr.bf16.mxu1 %v16220_v23  ;;  %v3265_v27 = vpop.f32.mrf.mxu0 }
 0x319   :  { %v13972_v56 = vadd.f32 %v3265_v27, %v13697_v22 }
 0x31a   :  { %v13974_v15 = vpop.f32.mrf.mxu1  ;;  %4016 = vmatmul.mubr.bf16.gmra.mxu1 %v16330_v28  ;;  %v3267_v0 = vpop.f32.mrf.mxu0 }
 0x31b   :  { %16329 = vst [vmem:[#allocation75_spill] sm:$0xff] %v13974_v15  ;;  %10046 = vmatprep.mubr.msk.bf16.mxu1 %vm1980_vm5, %v16331_v9  ;;  %4659 = vmatpush1.bf16.msra.mxu1 %v11686_v50  ;;  %v13980_v29 = vadd.f32 %v3267_v0, %v13703_v36  ;;  %v11688_v15 = vld [vmem:[#allocation8 + $0x590] ss:$12 sps:$4 sm:$0xff]   ;;  %v16334_v0 = vld [vmem:[#allocation38_spill] sm:$0xff] }
 0x31c   :  { %v2252_v18 = vpop.f32.mrf.mxu1  ;;  %4660 = vmatprep.subr.bf16.mxu1 %v16220_v23  ;;  %v13983_v54 = vpop.f32.mrf.mxu0 }
 0x31d   :  { %16332 = vst [vmem:[#allocation37_spill] sm:$0xff] %v13983_v54  ;;  %v16335_v54 = vld [vmem:[#allocation18_spill] sm:$0xff] }
 0x31e   :  { %v13985_v22 = vpop.f32.mrf.mxu1  ;;  %v3860_v27 = vpop.f32.mrf.mxu0 }
 0x31f   :  { %16333 = vst [vmem:[#allocation39_spill] sm:$0xff] %v13985_v22  ;;  %4661 = vmatpush1.bf16.msra.mxu1 %v11687_v42  ;;  %v13988_v28 = vadd.f32 %v3860_v27, %v13707_v21  ;;  %v11689_v42 = vld [vmem:[#allocation8 + $0x578] ss:$12 sps:$4 sm:$0xff]   ;;  %v11690_v22 = vld [vmem:[#allocation8 + $0x560] ss:$12 sps:$4 sm:$0xff]  }
 0x320   :  { %v2255_v30 = vpop.f32.mrf.mxu1  ;;  %4670 = vmatprep.subr.bf16.mxu1 %v16220_v23  ;;  %v3862_v50 = vpop.f32.mrf.mxu0 }
 0x321   :  { %v13992_v36 = vadd.f32 %v3862_v50, %v13715_v3 }
 0x322   :  { %v13994_v9 = vpop.f32.mrf.mxu1  ;;  %4024 = vmatmul.mubr.bf16.gmra.mxu1 %v16334_v0  ;;  %v3864_v18 = vpop.f32.mrf.mxu0 }
 0x323   :  { %10047 = vmatprep.mubr.msk.bf16.mxu1 %vm1980_vm5, %v16335_v54  ;;  %4671 = vmatpush2.bf16.msra.mxu1 %v11688_v15  ;;  %v14000_v21 = vadd.f32 %v3864_v18, %v13723_v20  ;;  %v16336_v18 = vld [vmem:[#allocation23_spill] sm:$0xff] }
 0x324   :  { %v2681_v30 = vpop.f32.mrf.mxu1  ;;  %4672 = vmatprep.subr.bf16.mxu1 %v16220_v23  ;;  %v14003_v27 = vpop.f32.mrf.mxu0 }
 0x326   :  { %v14005_v3 = vpop.f32.mrf.mxu1  ;;  %v3870_v50 = vpop.f32.mrf.mxu0 }
 0x327   :  { %4673 = vmatpush2.bf16.msra.mxu1 %v11689_v42  ;;  %v14008_v0 = vadd.f32 %v3870_v50, %v13737_v38  ;;  %v11691_v42 = vld [vmem:[#allocation8 + $0x548] ss:$12 sps:$4 sm:$0xff]  }
 0x328   :  { %v2684_v39 = vpop.f32.mrf.mxu1  ;;  %4674 = vmatprep.subr.bf16.mxu1 %v16220_v23  ;;  %v3872_v15 = vpop.f32.mrf.mxu0 }
 0x329   :  { %v14012_v20 = vadd.f32 %v3872_v15, %v13743_v62  ;;  %v11704_v62 = vld [vmem:[%s16103_s5 + $0x78] sm:$0xff]  }
 0x32a   :  { %v14014_v54 = vpop.f32.mrf.mxu1  ;;  %4032 = vmatmul.mubr.bf16.gmra.mxu1 %v16336_v18  ;;  %v3874_v30 = vpop.f32.mrf.mxu0 }
 0x32b   :  { %10048 = vmatprep.mubr.msk.bf16.mxu1 %vm1980_vm5, %v16337_v41  ;;  %4675 = vmatpush2.bf16.msra.mxu1 %v11690_v22  ;;  %v14020_v38 = vadd.f32 %v3874_v30, %v13751_v5 }
 0x32c   :  { %v2689_v39 = vpop.f32.mrf.mxu1  ;;  %4676 = vmatprep.subr.bf16.mxu1 %v16220_v23  ;;  %v14026_v50 = vpop.f32.mrf.mxu0  ;;  %v16338_v23 = vld [vmem:[#allocation41_spill] sm:$0xff] }
 0x32e   :  { %v14028_v15 = vpop.f32.mrf.mxu1  ;;  %v3880_v18 = vpop.f32.mrf.mxu0 }
 0x32f   :  { %4677 = vmatpush2.bf16.msra.mxu1 %v11691_v42  ;;  %v14031_v41 = vadd.f32 %v3880_v18, %v13765_v7 }
 0x330   :  { %v2692_v22 = vpop.f32.mrf.mxu1  ;;  %10922 = vmatprep.subr.bf16.mxu1 %v11704_v62  ;;  %v3882_v5 = vpop.f32.mrf.mxu0 }
 0x331   :  { %v14034_v30 = vadd.f32 %v3882_v5, %v13771_v49 }
 0x332   :  { %v14036_v39 = vpop.f32.mrf.mxu1  ;;  %4040 = vmatmul.mubr.bf16.gmra.mxu1 %v16338_v23  ;;  %v3884_v63 = vpop.f32.mrf.mxu0 }
 0x333   :  { %10049 = vmatprep.mubr.msk.bf16.mxu1 %vm1980_vm5, %v16339_v13  ;;  %v14042_v1 = vadd.f32 %v3884_v63, %v13782_v25  ;;  %v16340_v13 = vld [vmem:[#allocation42_spill] sm:$0xff]  ;;  %v16341_v63 = vld [vmem:[#allocation20_spill] sm:$0xff] }
 0x334   :  { %v2697_v42 = vpop.f32.mrf.mxu1  ;;  %v14044_v7 = vpop.f32.mrf.mxu0 }
 0x336   :  { %v14046_v18 = vpop.f32.mrf.mxu1  ;;  %v3890_v62 = vpop.f32.mrf.mxu0 }
 0x337   :  { %v14049_v49 = vadd.f32 %v3890_v62, %v13801_v35 }
 0x338   :  { %v2700_v22 = vpop.f32.mrf.mxu1  ;;  %v3892_v5 = vpop.f32.mrf.mxu0 }
 0x339   :  { %v14052_v23 = vadd.f32 %v3892_v5, %v13809_v14 }
 0x33a   :  { %v14054_v12 = vpop.f32.mrf.mxu1  ;;  %4048 = vmatmul.mubr.bf16.gmra.mxu1 %v16340_v13  ;;  %v3894_v25 = vpop.f32.mrf.mxu0 }
 0x33b   :  { %10050 = vmatprep.mubr.msk.bf16.mxu1 %vm1980_vm5, %v16341_v63  ;;  %v14060_v42 = vadd.f32 %v3894_v25, %v13820_v45  ;;  %v16344_v63 = vld [vmem:[#allocation25_spill] sm:$0xff] }
 0x33c   :  { %v2705_v47 = vpop.f32.mrf.mxu1  ;;  %v14062_v53 = vpop.f32.mrf.mxu0  ;;  %v16345_v25 = vld [vmem:[#allocation45_spill] sm:$0xff] }
 0x33e   :  { %v14064_v35 = vpop.f32.mrf.mxu1  ;;  %v3900_v62 = vpop.f32.mrf.mxu0 }
 0x33f   :  { %16342 = vst [vmem:[#allocation38_spill] sm:$0xff] %v14064_v35  ;;  %v14067_v14 = vadd.f32 %v3900_v62, %v13840_v26 }
 0x340   :  { %v2708_v22 = vpop.f32.mrf.mxu1  ;;  %v3902_v5 = vpop.f32.mrf.mxu0 }
 0x341   :  { %v14070_v13 = vadd.f32 %v3902_v5, %v13848_v55 }
 0x342   :  { %v14072_v48 = vpop.f32.mrf.mxu1  ;;  %4056 = vmatmul.mubr.bf16.gmra.mxu1 %v16344_v63  ;;  %v3904_v45 = vpop.f32.mrf.mxu0 }
 0x343   :  { %16343 = vst [vmem:[#allocation18_spill] sm:$0xff] %v14070_v13  ;;  %10051 = vmatprep.mubr.msk.bf16.mxu1 %vm1980_vm5, %v16345_v25  ;;  %v14078_v47 = vadd.f32 %v3904_v45, %v13859_v34  ;;  %v16348_v25 = vld [vmem:[#allocation46_spill] sm:$0xff]  ;;  %v16349_v45 = vld [vmem:[#allocation32_spill] sm:$0xff] }
 0x344   :  { %v2713_v35 = vpop.f32.mrf.mxu1  ;;  %v14080_v37 = vpop.f32.mrf.mxu0 }
 0x345   :  { %16346 = vst [vmem:[#allocation23_spill] sm:$0xff] %v14078_v47 }
 0x346   :  { %v14082_v26 = vpop.f32.mrf.mxu1  ;;  %v3910_v62 = vpop.f32.mrf.mxu0 }
 0x347   :  { %16347 = vst [vmem:[#allocation40_spill] sm:$0xff] %v14082_v26  ;;  %v14085_v55 = vadd.f32 %v3910_v62, %v13876_v60 }
 0x348   :  { %v2716_v22 = vpop.f32.mrf.mxu1  ;;  %v3912_v5 = vpop.f32.mrf.mxu0 }
 0x349   :  { %v14088_v63 = vadd.f32 %v3912_v5, %v13882_v43  ;;  %v11705_v43 = vld [vmem:[%s16103_s5 + $0x38] sm:$0xff]  }
 0x34a   :  { %v14090_v13 = vpop.f32.mrf.mxu1  ;;  %4064 = vmatmul.mubr.bf16.gmra.mxu1 %v16348_v25  ;;  %v3914_v34 = vpop.f32.mrf.mxu0  ;;  %v11708_v25 = vld [vmem:[%s16103_s5 + $0x70] sm:$0xff]  }
 0x34b   :  { %10118 = vmatprep.mubr.msk.bf16.mxu1 %vm1980_vm5, %v16349_v45  ;;  %v14096_v35 = vadd.f32 %v3914_v34, %v13893_v61  ;;  %v16353_v45 = vld [vmem:[#allocation48_spill] sm:$0xff] }
 0x34c   :  { %v2721_v26 = vpop.f32.mrf.mxu1  ;;  %v14098_v47 = vpop.f32.mrf.mxu0 }
 0x34d   :  { %16350 = vst [vmem:[#allocation41_spill] sm:$0xff] %v14096_v35  ;;  %v16354_v35 = vld [vmem:[#allocation36_spill] sm:$0xff] }
 0x34e   :  { %v14100_v60 = vpop.f32.mrf.mxu1  ;;  %v3920_v62 = vpop.f32.mrf.mxu0 }
 0x34f   :  { %16351 = vst [vmem:[#allocation43_spill] sm:$0xff] %v14100_v60  ;;  %v14106_v22 = vadd.f32 %v3920_v62, %v13906_v46  ;;  %v11709_v46 = vld [vmem:[%s16103_s5 + $0x30] sm:$0xff]  }
 0x350   :  { %v2724_v5 = vpop.f32.mrf.mxu1  ;;  %v3922_v61 = vpop.f32.mrf.mxu0 }
 0x351   :  { %v14112_v26 = vadd.f32 %v3922_v61, %v13912_v51  ;;  %v11712_v51 = vld [vmem:[%s16103_s5 + $0x68] sm:$0xff]  }
 0x352   :  { %v14114_v34 = vpop.f32.mrf.mxu1  ;;  %4679 = vmatmul.mubr.bf16.vlgmr.msra.gmra.mxu1 %v16353_v45  ;;  %v3924_v60 = vpop.f32.mrf.mxu0 }
 0x353   :  { %16352 = vst [vmem:[#allocation42_spill] sm:$0xff] %v14112_v26  ;;  %10119 = vmatprep.mubr.msk.bf16.mxu1 %vm1980_vm5, %v16354_v35  ;;  %10923 = vmatpush3.bf16.msra.mxu1 %v11705_v43  ;;  %v14123_v62 = vadd.f32 %v3924_v60, %v13920_v57  ;;  %v11713_v35 = vld [vmem:[%s16103_s5 + $0x28] sm:$0xff]   ;;  %v11714_v60 = vld [vmem:[%s16103_s5 + $0x60] sm:$0xff]  }
 0x354   :  { %v2729_v5 = vpop.f32.mrf.mxu1  ;;  %10924 = vmatprep.subr.bf16.mxu1 %v11708_v25  ;;  %v14128_v61 = vpop.f32.mrf.mxu0 }
 0x355   :  { %16355 = vst [vmem:[#allocation20_spill] sm:$0xff] %v14123_v62  ;;  %16356 = vst [vmem:[#allocation25_spill] sm:$0xff] %v14128_v61  ;;  %v16359_v61 = vld [vmem:[#allocation27_spill] sm:$0xff] }
 0x356   :  { %v14130_v45 = vpop.f32.mrf.mxu1  ;;  %v3930_v26 = vpop.f32.mrf.mxu0 }
 0x357   :  { %16357 = vst [vmem:[#allocation45_spill] sm:$0xff] %v14130_v45  ;;  %10925 = vmatpush3.bf16.msra.mxu1 %v11709_v46  ;;  %v14136_v43 = vadd.f32 %v3930_v26, %v13928_v8  ;;  %v16358_v46 = vld [vmem:[#allocation17_spill] sm:$0xff]  ;;  %v11715_v8 = vld [vmem:[%s16103_s5 + $0x20] sm:$0xff]  }
 0x358   :  { %v2732_v57 = vpop.f32.mrf.mxu1  ;;  %10926 = vmatprep.subr.bf16.mxu1 %v11712_v51  ;;  %v3932_v25 = vpop.f32.mrf.mxu0 }
 0x359   :  { %v14142_v5 = vadd.f32 %v3932_v25, %v13932_v6  ;;  %v11716_v6 = vld [vmem:[%s16103_s5 + $0x58] sm:$0xff]  }
 0x35a   :  { %v14144_v45 = vpop.f32.mrf.mxu1  ;;  %4687 = vmatmul.mubr.bf16.gmra.mxu1 %v16358_v46  ;;  %v3934_v62 = vpop.f32.mrf.mxu0 }
 0x35b   :  { %10120 = vmatprep.mubr.msk.bf16.mxu1 %vm1980_vm5, %v16359_v61  ;;  %10927 = vmatpush3.bf16.msra.mxu1 %v11713_v35  ;;  %v14153_v26 = vadd.f32 %v3934_v62, %v13940_v10  ;;  %v11717_v61 = vld [vmem:[%s16103_s5 + $0x18] sm:$0xff]   ;;  %v11718_v62 = vld [vmem:[%s16103_s5 + $0x50] sm:$0xff]  }
 0x35c   :  { %v2737_v51 = vpop.f32.mrf.mxu1  ;;  %10928 = vmatprep.subr.bf16.mxu1 %v11714_v60  ;;  %v14158_v57 = vpop.f32.mrf.mxu0 }
 0x35d   :  { %16360 = vst [vmem:[#allocation46_spill] sm:$0xff] %v14153_v26  ;;  %16361 = vst [vmem:[#allocation32_spill] sm:$0xff] %v14158_v57  ;;  %v16365_v57 = vld [vmem:[#allocation51_spill] sm:$0xff] }
 0x35e   :  { %v14160_v25 = vpop.f32.mrf.mxu1  ;;  %v3940_v46 = vpop.f32.mrf.mxu0 }
 0x35f   :  { %16362 = vst [vmem:[#allocation48_spill] sm:$0xff] %v14160_v25  ;;  %10929 = vmatpush3.bf16.msra.mxu1 %v11715_v8  ;;  %v14166_v35 = vadd.f32 %v3940_v46, %v13948_v17  ;;  %v16364_v8 = vld [vmem:[#allocation52_spill] sm:$0xff]  ;;  %v11719_v17 = vld [vmem:[%s16103_s5 + $0x10] sm:$0xff]  }
 0x360   :  { %v2740_v10 = vpop.f32.mrf.mxu1  ;;  %10930 = vmatprep.subr.bf16.mxu1 %v11716_v6  ;;  %v3942_v60 = vpop.f32.mrf.mxu0 }
 0x361   :  { %v14172_v51 = vadd.f32 %v3942_v60, %v13952_v31  ;;  %v11720_v31 = vld [vmem:[%s16103_s5 + $0x48] sm:$0xff]  }
 0x362   :  { %v14174_v25 = vpop.f32.mrf.mxu1  ;;  %4695 = vmatmul.mubr.bf16.gmra.mxu1 %v16364_v8  ;;  %v3944_v26 = vpop.f32.mrf.mxu0 }
 0x363   :  { %16363 = vst [vmem:[#allocation36_spill] sm:$0xff] %v14172_v51  ;;  %10121 = vmatprep.mubr.msk.bf16.mxu1 %vm1980_vm5, %v16365_v57  ;;  %10931 = vmatpush3.bf16.msra.mxu1 %v11717_v61  ;;  %v14183_v6 = vadd.f32 %v3944_v26, %v13960_v16  ;;  %v11721_v57 = vld [vmem:[%s16103_s5 + $0x8] sm:$0xff]   ;;  %v11722_v26 = vld [vmem:[%s16103_s5 + $0x40] sm:$0xff]  }
 0x364   :  { %v2745_v46 = vpop.f32.mrf.mxu1  ;;  %10932 = vmatprep.subr.bf16.mxu1 %v11718_v62  ;;  %v14188_v10 = vpop.f32.mrf.mxu0 }
 0x365   :  { %16366 = vst [vmem:[#allocation17_spill] sm:$0xff] %v14183_v6  ;;  %16367 = vst [vmem:[#allocation27_spill] sm:$0xff] %v14188_v10  ;;  %v16373_v10 = vld [vmem:[#allocation28_spill] sm:$0xff] }
 0x366   :  { %v14190_v60 = vpop.f32.mrf.mxu1  ;;  %v3950_v8 = vpop.f32.mrf.mxu0 }
 0x367   :  { %16368 = vst [vmem:[#allocation52_spill] sm:$0xff] %v14190_v60  ;;  %10933 = vmatpush3.bf16.msra.mxu1 %v11719_v17  ;;  %v14196_v61 = vadd.f32 %v3950_v8, %v13968_v32  ;;  %v16372_v17 = vld [vmem:[#allocation24_spill] sm:$0xff] }
 0x368   :  { %v2748_v16 = vpop.f32.mrf.mxu1  ;;  %10934 = vmatprep.subr.bf16.mxu1 %v11720_v31  ;;  %v3952_v62 = vpop.f32.mrf.mxu0  ;;  %v14212_v32 = vld [vmem:[%s16102_s4] sm:$0x7] }
 0x369   :  { %16369 = vst [vmem:[#allocation51_spill] sm:$0xff] %v14196_v61  ;;  %v14202_v46 = vadd.f32 %v3952_v62, %v13972_v56  ;;  %16374 = vst [vmem:[#allocation24_spill] sm:$0xff] %v14212_v32  ;;  %v11723_v31 = vld [vmem:[%s16103_s5] sm:$0xff]   ;;  %v16377_v61 = vld [vmem:[#allocation63_spill] sm:$0xff] }
 0x36a   :  { %v14204_v60 = vpop.f32.mrf.mxu1  ;;  %4703 = vmatmul.mubr.bf16.gmra.mxu1 %v16372_v17  ;;  %v3954_v6 = vpop.f32.mrf.mxu0  ;;  %v14231_v51 = vrot.slane %v14212_v32, %v16377_v61 }
 0x36b   :  { %16370 = vst [vmem:[#allocation76_spill] sm:$0xff] %v14202_v46  ;;  %16371 = vst [vmem:[#allocation77_spill] sm:$0xff] %v14204_v60  ;;  %10122 = vmatprep.mubr.msk.bf16.mxu1 %vm1980_vm5, %v16373_v10  ;;  %10935 = vmatpush3.bf16.msra.mxu1 %v11721_v57  ;;  %v14218_v56 = vadd.f32 %v3954_v6, %v13980_v29  ;;  %v16376_v10 = vld [vmem:[#allocation61_spill] sm:$0xff]  ;;  %v2680_v29 = vadd.f32 %v13994_v9, %v13717_v19 }
 0x36c   :  { %v2753_v8 = vpop.f32.mrf.mxu1  ;;  %10936 = vmatprep.subr.bf16.mxu1 %v11722_v26  ;;  %v14220_v16 = vpop.f32.mrf.mxu0  ;;  %v14226_v17 = vrot.slane %v14212_v32, %v16376_v10 }
 0x36e   :  { %v14222_v62 = vpop.f32.mrf.mxu1  ;;  %v4547_v46 = vpop.f32.mrf.mxu0 }
 0x36f   :  { %16375 = vst [vmem:[#allocation28_spill] sm:$0xff] %v14222_v62  ;;  %10937 = vmatpush3.bf16.msra.mxu1 %v11723_v31  ;;  %v4759_v57 = vadd.f32 %v4547_v46, %v13988_v28  ;;  %v16378_v28 = vld [vmem:[#allocation54_spill] sm:$0xff] }
 0x370   :  { %v2756_v60 = vpop.f32.mrf.mxu1  ;;  %v4549_v6 = vpop.f32.mrf.mxu0 }
 0x371   :  { %v4836_v26 = vadd.f32 %v14226_v17, %v4759_v57  ;;  %v4760_v8 = vadd.f32 %v4549_v6, %v13992_v36  ;;  %v4076_v60 = vadd.f32 %v14003_v27, %v13729_v52  ;;  %v2683_v36 = vadd.f32 %v14005_v3, %v13731_v59 }
 0x372   :  { %v3306_v62 = vpop.f32.mrf.mxu1  ;;  %4711 = vmatmul.mubr.bf16.gmra.mxu1 %v13699_v44  ;;  %v4551_v31 = vpop.f32.mrf.mxu0 }
 0x373   :  { %v14238_v10 = vadd.f32 %v3306_v62, %v2680_v29  ;;  %10123 = vmatprep.mubr.msk.bf16.mxu1 %vm1980_vm5, %v16378_v28  ;;  %v4837_v46 = vadd.f32 %v14231_v51, %v4760_v8  ;;  %v4762_v19 = vadd.f32 %v4551_v31, %v14000_v21  ;;  %v4896_v6 = vmax.f32 %v4836_v26, 0.0 }
 0x374   :  { %v3308_v9 = vpop.f32.mrf.mxu1  ;;  %v4553_v57 = vpop.f32.mrf.mxu0  ;;  %v2688_v21 = vadd.f32 %v14014_v54, %v13745_v58 }
 0x375   :  { %v4897_v44 = vmax.f32 %v4837_v46, 0.0  ;;  %v4839_v62 = vadd.f32 %v14226_v17, %v4762_v19  ;;  %v4763_v29 = vadd.f32 %v4553_v57, %v4076_v60  ;;  %v16379_v19 = vld [vmem:[#allocation26_spill] sm:$0xff] }
 0x376   :  { %v3309_v61 = vpop.f32.mrf.mxu1  ;;  %v4557_v28 = vpop.f32.mrf.mxu0 }
 0x377   :  { %v14249_v32 = vadd.f32 %v3309_v61, %v2683_v36  ;;  %v4840_v52 = vadd.f32 %v14231_v51, %v4763_v29  ;;  %v4765_v27 = vadd.f32 %v4557_v28, %v14008_v0  ;;  %v4899_v59 = vmax.f32 %v4839_v62, 0.0  ;;  %v16380_v36 = vld [vmem:[#allocation29_spill] sm:$0xff] }
 0x378   :  { %v3311_v8 = vpop.f32.mrf.mxu1  ;;  %v4559_v31 = vpop.f32.mrf.mxu0  ;;  %v4082_v0 = vadd.f32 %v14026_v50, %v13757_v11 }
 0x379   :  { %v4900_v3 = vmax.f32 %v4840_v52, 0.0  ;;  %v4842_v26 = vadd.f32 %v14226_v17, %v4765_v27  ;;  %v4766_v46 = vadd.f32 %v4559_v31, %v14012_v20  ;;  %v2691_v20 = vadd.f32 %v14028_v15, %v13759_v24 }
 0x37a   :  { %v3314_v60 = vpop.f32.mrf.mxu1  ;;  %4719 = vmatmul.mubr.bf16.gmra.mxu1 %v16379_v19  ;;  %v4561_v9 = vpop.f32.mrf.mxu0 }
 0x37b   :  { %v14258_v61 = vadd.f32 %v3314_v60, %v2688_v21  ;;  %10124 = vmatprep.mubr.msk.bf16.mxu1 %vm1980_vm5, %v16380_v36  ;;  %v4843_v58 = vadd.f32 %v14231_v51, %v4766_v46  ;;  %v4768_v54 = vadd.f32 %v4561_v9, %v14020_v38  ;;  %v14268_v62 = vmax.f32 %v4842_v26, 0.0  ;;  %v16381_v46 = vld [vmem:[#allocation44_spill] sm:$0xff] }
 0x37c   :  { %v3316_v57 = vpop.f32.mrf.mxu1  ;;  %v4563_v29 = vpop.f32.mrf.mxu0  ;;  %v14273_v21 = vpack.c.bf16 %v4899_v59, %v4896_v6  ;;  %v14277_v31 = vpack.c.bf16 %v4900_v3, %v4897_v44  ;;  %v3401_v60 = vadd.f32 %v13787_v2, %v16381_v46  ;;  %v2696_v6 = vadd.f32 %v14036_v39, %v13773_v4 }
 0x37d   :  { %v14270_v28 = vmax.f32 %v4843_v58, 0.0  ;;  %v4845_v52 = vadd.f32 %v14226_v17, %v4768_v54  ;;  %v4769_v27 = vadd.f32 %v4563_v29, %v4082_v0  ;;  %v16382_v57 = vld [vmem:[#allocation57_spill] sm:$0xff] }
 0x37e   :  { %v3317_v8 = vpop.f32.mrf.mxu1  ;;  %v4567_v50 = vpop.f32.mrf.mxu0  ;;  %v4088_v39 = vadd.f32 %v14044_v7, %v3401_v60 }
 0x37f   :  { %v14275_v11 = vadd.f32 %v3317_v8, %v2691_v20  ;;  %v10794_v38 = vpack.c.bf16 %v14270_v28, %v14268_v62  ;;  %v4846_v24 = vadd.f32 %v14231_v51, %v4769_v27  ;;  %v4771_v15 = vadd.f32 %v4567_v50, %v14031_v41 }
 0x380   :  { %v3319_v26 = vpop.f32.mrf.mxu1  ;;  %v14287_v19 = vmax.f32 %v4845_v52, 0.0  ;;  %v4569_v9 = vpop.f32.mrf.mxu0  ;;  %v12073_v41 = vpack.c.bf16 %v14268_v62, %v4899_v59  ;;  %v12074_v4 = vpack.c.bf16 %v14270_v28, %v4900_v3  ;;  %v16383_v52 = vld [vmem:[#allocation58_spill] sm:$0xff] }
 0x381   :  { %5161 = vst [vmem:[#allocation3 + $0x18] sm:$0xff] %v10794_v38  ;;  %v14289_v44 = vmax.f32 %v4846_v24, 0.0  ;;  %v4848_v36 = vadd.f32 %v14226_v17, %v4771_v15  ;;  %v4772_v0 = vadd.f32 %v4569_v9, %v14034_v30  ;;  %v2699_v59 = vadd.f32 %v14046_v18, %v16383_v52  ;;  %v16384_v9 = vld [vmem:[#allocation47_spill] sm:$0xff] }
 0x382   :  { %v3322_v58 = vpop.f32.mrf.mxu1  ;;  %4727 = vmatmul.mubr.bf16.gmra.mxu1 %v13754_v33  ;;  %v4571_v2 = vpop.f32.mrf.mxu0  ;;  %5608 = vmatprep.mubr.bf16.mxu0 %v12074_v4  ;;  %v12076_v18 = vpack.c.bf16 %v14287_v19, %v14268_v62 }
 0x383   :  { %v14295_v54 = vadd.f32 %v3322_v58, %v2696_v6  ;;  %10125 = vmatprep.mubr.msk.bf16.mxu1 %vm1980_vm5, %v16382_v57  ;;  %v10796_v20 = vpack.c.bf16 %v14289_v44, %v14287_v19  ;;  %v4849_v30 = vadd.f32 %v14231_v51, %v4772_v0  ;;  %v4774_v29 = vadd.f32 %v4571_v2, %v14042_v1  ;;  %v16385_v0 = vld [vmem:[#allocation30_spill] sm:$0xff] }
 0x384   :  { %v3324_v33 = vpop.f32.mrf.mxu1  ;;  %v14307_v27 = vmax.f32 %v4848_v36, 0.0  ;;  %v4573_v8 = vpop.f32.mrf.mxu0  ;;  %5609 = vmatmul.mubr.bf16.vlgmr.msra.gmra.mxu0 %v12073_v41  ;;  %v12075_v24 = vpack.c.bf16 %v14289_v44, %v14270_v28  ;;  %v3407_v36 = vadd.f32 %v13825_v40, %v16384_v9  ;;  %v2704_v58 = vadd.f32 %v14054_v12, %v16385_v0  ;;  %v16387_v12 = vld [vmem:[#allocation15_spill] sm:$0xff]  ;;  %v16412_v28 = vld [vmem:[#allocation69_spill] sm:$0xff] }
 0x385   :  { %5163 = vst [vmem:[#allocation3 + $0x24] sm:$0xff] %v10796_v20  ;;  %v14309_v50 = vmax.f32 %v4849_v30, 0.0  ;;  %v4851_v7 = vadd.f32 %v14226_v17, %v4774_v29  ;;  %v4775_v3 = vadd.f32 %v4573_v8, %v4088_v39  ;;  %v16386_v30 = vld [vmem:[#allocation59_spill] sm:$0xff] }
 0x386   :  { %v3325_v38 = vpop.f32.mrf.mxu1  ;;  %v4577_v15 = vpop.f32.mrf.mxu0  ;;  %v12078_v33 = vpack.c.bf16 %v14307_v27, %v14287_v19  ;;  %v4094_v52 = vadd.f32 %v14062_v53, %v3407_v36 }
 0x387   :  { %v14314_v1 = vadd.f32 %v3325_v38, %v2699_v59  ;;  %v10798_v26 = vpack.c.bf16 %v14309_v50, %v14307_v27  ;;  %v4852_v46 = vadd.f32 %v14231_v51, %v4775_v3  ;;  %v4777_v60 = vadd.f32 %v4577_v15, %v14049_v49  ;;  %v11724_v3 = vld [vmem:[%s16103_s5 + $0x138] sm:$0xff]   ;;  %v16388_v38 = vld [vmem:[#allocation34_spill] sm:$0xff] }
 0x388   :  { %v3327_v6 = vpop.f32.mrf.mxu1  ;;  %v14326_v41 = vmax.f32 %v4851_v7, 0.0  ;;  %v4579_v2 = vpop.f32.mrf.mxu0  ;;  %v12077_v49 = vpack.c.bf16 %v14309_v50, %v14289_v44  ;;  %v16389_v15 = vld [vmem:[#allocation38_spill] sm:$0xff]  ;;  %11248 = vmatprep.subr.bf16.mxu0 %v11724_v3  ;;  %v16413_v44 = vld [vmem:[#allocation45_spill] sm:$0xff] }
 0x389   :  { %5165 = vst [vmem:[#allocation3 + $0x30] sm:$0xff] %v10798_v26  ;;  %v14328_v57 = vmax.f32 %v4852_v46, 0.0  ;;  %v4854_v4 = vadd.f32 %v14226_v17, %v4777_v60  ;;  %v4778_v39 = vadd.f32 %v4579_v2, %v14052_v23  ;;  %v2707_v26 = vadd.f32 %v16389_v15, %v16388_v38  ;;  %11249 = vmatpush3.bf16.msra.mxu0 %v11724_v3  ;;  %v16393_v3 = vld [vmem:[#allocation18_spill] sm:$0xff] }
 0x38a   :  { %v3330_v20 = vpop.f32.mrf.mxu1  ;;  %4735 = vmatmul.mubr.bf16.gmra.mxu1 %v16386_v30  ;;  %v4581_v29 = vpop.f32.mrf.mxu0  ;;  %5616 = vmatprep.mubr.bf16.mxu0 %v12077_v49  ;;  %v12080_v2 = vpack.c.bf16 %v14326_v41, %v14307_v27  ;;  %v16390_v49 = vld [vmem:[#allocation49_spill] sm:$0xff] }
 0x38b   :  { %v14335_v40 = vadd.f32 %v3330_v20, %v2704_v58  ;;  %10126 = vmatprep.mubr.msk.bf16.mxu1 %vm1980_vm5, %v16387_v12  ;;  %v10800_v23 = vpack.c.bf16 %v14328_v57, %v14326_v41  ;;  %v4855_v59 = vadd.f32 %v14231_v51, %v4778_v39  ;;  %v4780_v8 = vadd.f32 %v4581_v29, %v14060_v42  ;;  %v16391_v29 = vld [vmem:[#allocation33_spill] sm:$0xff] }
 0x38c   :  { %v3332_v7 = vpop.f32.mrf.mxu1  ;;  %v14351_v46 = vmax.f32 %v4854_v4, 0.0  ;;  %v4583_v60 = vpop.f32.mrf.mxu0  ;;  %5617 = vmatmul.mubr.bf16.gmra.mxu0 %v12078_v33  ;;  %v12079_v42 = vpack.c.bf16 %v14328_v57, %v14309_v50  ;;  %v3413_v12 = vadd.f32 %v16391_v29, %v16390_v49  ;;  %v16392_v33 = vld [vmem:[#allocation62_spill] sm:$0xff]  ;;  %v16397_v49 = vld [vmem:[#allocation19_spill] sm:$0xff]  ;;  %v16398_v29 = vld [vmem:[#allocation40_spill] sm:$0xff] }
 0x38d   :  { %5167 = vst [vmem:[#allocation3 + $0x3c] sm:$0xff] %v10800_v23  ;;  %v14353_v53 = vmax.f32 %v4855_v59, 0.0  ;;  %v4857_v6 = vadd.f32 %v14226_v17, %v4780_v8  ;;  %v4781_v9 = vadd.f32 %v4583_v60, %v4094_v52  ;;  %v2712_v52 = vadd.f32 %v14072_v48, %v16392_v33  ;;  %v16395_v48 = vld [vmem:[#allocation64_spill] sm:$0xff]  ;;  %v11731_v50 = vld [vmem:[%s16103_s5 + $0x1d0] sm:$0xff]  }
 0x38e   :  { %v3333_v36 = vpop.f32.mrf.mxu1  ;;  %v4587_v58 = vpop.f32.mrf.mxu0  ;;  %v2715_v33 = vadd.f32 %v16398_v29, %v16397_v49 }
 0x38f   :  { %v14358_v0 = vadd.f32 %v3333_v36, %v2707_v26  ;;  %v10802_v4 = vpack.c.bf16 %v14353_v53, %v14351_v46  ;;  %v4858_v39 = vadd.f32 %v14231_v51, %v4781_v9  ;;  %v4783_v20 = vadd.f32 %v4587_v58, %v14067_v14  ;;  %v16394_v26 = vld [vmem:[#allocation16_spill] sm:$0xff] }
 0x390   :  { %v3335_v30 = vpop.f32.mrf.mxu1  ;;  %v14370_v23 = vmax.f32 %v4857_v6, 0.0  ;;  %v4589_v59 = vpop.f32.mrf.mxu0  ;;  %v12081_v14 = vpack.c.bf16 %v14353_v53, %v14328_v57  ;;  %v12082_v6 = vpack.c.bf16 %v14351_v46, %v14326_v41  ;;  %v4100_v36 = vadd.f32 %v14080_v37, %v3413_v12  ;;  %v16419_v57 = vld [vmem:[#allocation72_spill] sm:$0xff] }
 0x391   :  { %5169 = vst [vmem:[#allocation3 + $0x48] sm:$0xff] %v10802_v4  ;;  %v14372_v8 = vmax.f32 %v4858_v39, 0.0  ;;  %v4860_v7 = vadd.f32 %v14226_v17, %v4783_v20  ;;  %v4784_v38 = vadd.f32 %v4589_v59, %v16393_v3  ;;  %v16396_v39 = vld [vmem:[#allocation23_spill] sm:$0xff] }
 0x392   :  { %v3338_v15 = vpop.f32.mrf.mxu1  ;;  %4743 = vmatmul.mubr.bf16.gmra.mxu1 %v16394_v26  ;;  %v4591_v9 = vpop.f32.mrf.mxu0  ;;  %5624 = vmatprep.mubr.bf16.mxu0 %v12081_v14 }
 0x393   :  { %v14379_v60 = vadd.f32 %v3338_v15, %v2712_v52  ;;  %10127 = vmatprep.mubr.msk.bf16.mxu1 %vm1980_vm5, %v16395_v48  ;;  %v10804_v58 = vpack.c.bf16 %v14372_v8, %v14370_v23  ;;  %v4861_v4 = vadd.f32 %v14231_v51, %v4784_v38  ;;  %v4786_v20 = vadd.f32 %v4591_v9, %v16396_v39  ;;  %v16400_v39 = vld [vmem:[#allocation65_spill] sm:$0xff]  ;;  %v16402_v9 = vld [vmem:[#allocation31_spill] sm:$0xff] }
 0x394   :  { %v3340_v30 = vpop.f32.mrf.mxu1  ;;  %v14392_v52 = vmax.f32 %v4860_v7, 0.0  ;;  %v4593_v59 = vpop.f32.mrf.mxu0  ;;  %5625 = vmatmul.mubr.bf16.gmra.mxu0 %v12082_v6 }
 0x395   :  { %5171 = vst [vmem:[#allocation3 + $0x54] sm:$0xff] %v10804_v58  ;;  %v14394_v3 = vmax.f32 %v4861_v4, 0.0  ;;  %v4863_v37 = vadd.f32 %v14226_v17, %v4786_v20  ;;  %v4787_v12 = vadd.f32 %v4593_v59, %v4100_v36  ;;  %v16399_v36 = vld [vmem:[#allocation22_spill] sm:$0xff]  ;;  %v16401_v20 = vld [vmem:[#allocation35_spill] sm:$0xff] }
 0x396   :  { %v3341_v15 = vpop.f32.mrf.mxu1  ;;  %v4597_v14 = vpop.f32.mrf.mxu0  ;;  %v3419_v6 = vadd.f32 %v16400_v39, %v16399_v36  ;;  %v2720_v30 = vadd.f32 %v14090_v13, %v16401_v20  ;;  %v12086_v13 = vpack.c.bf16 %v14392_v52, %v14370_v23  ;;  %v16404_v36 = vld [vmem:[#allocation66_spill] sm:$0xff]  ;;  %v16405_v39 = vld [vmem:[#allocation43_spill] sm:$0xff] }
 0x397   :  { %v14399_v26 = vadd.f32 %v3341_v15, %v2715_v33  ;;  %v10806_v7 = vpack.c.bf16 %v14394_v3, %v14392_v52  ;;  %v4864_v48 = vadd.f32 %v14231_v51, %v4787_v12  ;;  %v4789_v58 = vadd.f32 %v4597_v14, %v14085_v55 }
 0x398   :  { %v3343_v4 = vpop.f32.mrf.mxu1  ;;  %v14411_v49 = vmax.f32 %v4863_v37, 0.0  ;;  %v4599_v29 = vpop.f32.mrf.mxu0  ;;  %v12085_v55 = vpack.c.bf16 %v14394_v3, %v14372_v8  ;;  %v4106_v37 = vadd.f32 %v14098_v47, %v3419_v6  ;;  %v2723_v20 = vadd.f32 %v16405_v39, %v16404_v36  ;;  %v16408_v36 = vld [vmem:[#allocation67_spill] sm:$0xff] }
 0x399   :  { %5173 = vst [vmem:[#allocation3 + $0x60] sm:$0xff] %v10806_v7  ;;  %v14413_v33 = vmax.f32 %v4864_v48, 0.0  ;;  %v4866_v59 = vadd.f32 %v14226_v17, %v4789_v58  ;;  %v4790_v15 = vadd.f32 %v4599_v29, %v14088_v63  ;;  %v16403_v48 = vld [vmem:[#allocation41_spill] sm:$0xff]  ;;  %v2728_v39 = vadd.f32 %v14114_v34, %v16408_v36 }
 0x39a   :  { %v3346_v12 = vpop.f32.mrf.mxu1  ;;  %4751 = vmatmul.mubr.bf16.gmra.mxu1 %v16402_v9  ;;  %v4601_v4 = vpop.f32.mrf.mxu0  ;;  %5632 = vmatprep.mubr.bf16.mxu0 %v12085_v55 }
 0x39b   :  { %v14420_v14 = vadd.f32 %v3346_v12, %v2720_v30  ;;  %5991 = vmatprep.mubr.bf16.mxu1 %v14277_v31  ;;  %v10808_v7 = vpack.c.bf16 %v14413_v33, %v14411_v49  ;;  %v4867_v63 = vadd.f32 %v14231_v51, %v4790_v15  ;;  %v4792_v9 = vadd.f32 %v4601_v4, %v16403_v48  ;;  %v16409_v15 = vld [vmem:[#allocation42_spill] sm:$0xff] }
 0x39c   :  { %v3348_v58 = vpop.f32.mrf.mxu1  ;;  %v14432_v30 = vmax.f32 %v4866_v59, 0.0  ;;  %v4603_v31 = vpop.f32.mrf.mxu0  ;;  %5633 = vmatmul.mubr.bf16.gmra.mxu0 %v12086_v13 }
 0x39d   :  { %5175 = vst [vmem:[#allocation3 + $0x6c] sm:$0xff] %v10808_v7  ;;  %v14434_v29 = vmax.f32 %v4867_v63, 0.0  ;;  %v4869_v47 = vadd.f32 %v14226_v17, %v4792_v9  ;;  %v4793_v6 = vadd.f32 %v4603_v31, %v4106_v37  ;;  %v16406_v37 = vld [vmem:[#allocation50_spill] sm:$0xff]  ;;  %v16407_v58 = vld [vmem:[#allocation68_spill] sm:$0xff] }
 0x39e   :  { %v3349_v12 = vpop.f32.mrf.mxu1  ;;  %v4607_v55 = vpop.f32.mrf.mxu0  ;;  %v3425_v13 = vadd.f32 %v16407_v58, %v16406_v37  ;;  %v12090_v34 = vpack.c.bf16 %v14432_v30, %v14411_v49 }
 0x39f   :  { %v14439_v4 = vadd.f32 %v3349_v12, %v2723_v20  ;;  %v10810_v59 = vpack.c.bf16 %v14434_v29, %v14432_v30  ;;  %v4870_v7 = vadd.f32 %v14231_v51, %v4793_v6  ;;  %v4795_v63 = vadd.f32 %v4607_v55, %v14106_v22 }
 0x3a0   :  { %v3351_v9 = vpop.f32.mrf.mxu1  ;;  %v14451_v20 = vmax.f32 %v4869_v47, 0.0  ;;  %v4609_v31 = vpop.f32.mrf.mxu0  ;;  %v12089_v22 = vpack.c.bf16 %v14434_v29, %v14413_v33  ;;  %v11725_v47 = vld [vmem:[%s16103_s5 + $0x130] sm:$0xff]  }
 0x3a1   :  { %5177 = vst [vmem:[#allocation3 + $0x78] sm:$0xff] %v10810_v59  ;;  %v14453_v12 = vmax.f32 %v4870_v7, 0.0  ;;  %v4872_v48 = vadd.f32 %v14226_v17, %v4795_v63  ;;  %v4796_v38 = vadd.f32 %v4609_v31, %v16409_v15  ;;  %v16410_v15 = vld [vmem:[#allocation25_spill] sm:$0xff]  ;;  %v16411_v63 = vld [vmem:[#allocation20_spill] sm:$0xff]  ;;  %11250 = vmatprep.subr.bf16.mxu0 %v11725_v47 }
 0x3a2   :  { %v3354_v6 = vpop.f32.mrf.mxu1  ;;  %5992 = vmatmul.mubr.bf16.vlgmr.msra.gmra.mxu1 %v14273_v21  ;;  %v4611_v9 = vpop.f32.mrf.mxu0  ;;  %v4112_v59 = vadd.f32 %v16410_v15, %v3425_v13  ;;  %5640 = vmatprep.mubr.bf16.mxu0 %v12089_v22 }
 0x3a3   :  { %v14460_v55 = vadd.f32 %v3354_v6, %v2728_v39  ;;  %5999 = vmatprep.mubr.bf16.mxu1 %v12075_v24  ;;  %v10812_v21 = vpack.c.bf16 %v14453_v12, %v14451_v20  ;;  %v4873_v7 = vadd.f32 %v14231_v51, %v4796_v38  ;;  %v4798_v37 = vadd.f32 %v4611_v9, %v16411_v63 }
 0x3a4   :  { %v3356_v58 = vpop.f32.mrf.mxu1  ;;  %v2731_v24 = vadd.f32 %v16413_v44, %v16412_v28  ;;  %v14477_v36 = vmax.f32 %v4872_v48, 0.0  ;;  %v4613_v39 = vpop.f32.mrf.mxu0  ;;  %5641 = vmatmul.mubr.bf16.gmra.mxu0 %v12090_v34  ;;  %v11726_v34 = vld [vmem:[%s16103_s5 + $0x1d8] sm:$0xff]   ;;  %v16416_v44 = vld [vmem:[#allocation70_spill] sm:$0xff] }
 0x3a5   :  { %5179 = vst [vmem:[#allocation3 + $0x84] sm:$0xff] %v10812_v21  ;;  %v14479_v31 = vmax.f32 %v4873_v7, 0.0  ;;  %v4875_v13 = vadd.f32 %v14226_v17, %v4798_v37  ;;  %v4799_v6 = vadd.f32 %v4613_v39, %v4112_v59  ;;  %11251 = vmatpush3.bf16.msra.mxu0 %v11725_v47  ;;  %v16414_v37 = vld [vmem:[#allocation53_spill] sm:$0xff]  ;;  %v16415_v58 = vld [vmem:[#allocation71_spill] sm:$0xff]  ;;  %11296 = vmatprep.subr.bf16.mxu1 %v11726_v34 }
 0x3a6   :  { %v3357_v15 = vpop.f32.mrf.mxu1  ;;  %v4617_v22 = vpop.f32.mrf.mxu0  ;;  %v3431_v28 = vadd.f32 %v16415_v58, %v16414_v37  ;;  %11297 = vmatpush3.bf16.msra.mxu1 %v11726_v34 }
 0x3a7   :  { %v14484_v9 = vadd.f32 %v3357_v15, %v2731_v24  ;;  %v10814_v21 = vpack.c.bf16 %v14479_v31, %v14477_v36  ;;  %v4876_v7 = vadd.f32 %v14231_v51, %v4799_v6  ;;  %v4801_v63 = vadd.f32 %v4617_v22, %v14136_v43  ;;  %11298 = vmatprep.subr.bf16.mxu1 %v11731_v50 }
 0x3a8   :  { %v3359_v59 = vpop.f32.mrf.mxu1  ;;  %v2736_v24 = vadd.f32 %v14144_v45, %v16416_v44  ;;  %v14499_v39 = vmax.f32 %v4875_v13, 0.0  ;;  %v4619_v47 = vpop.f32.mrf.mxu0 }
 0x3a9   :  { %5181 = vst [vmem:[#allocation3 + $0x90] sm:$0xff] %v10814_v21  ;;  %v14501_v15 = vmax.f32 %v4876_v7, 0.0  ;;  %v4878_v6 = vadd.f32 %v14226_v17, %v4801_v63  ;;  %v4802_v43 = vadd.f32 %v4619_v47, %v14142_v5  ;;  %v12093_v59 = vpack.c.bf16 %v14479_v31, %v14453_v12  ;;  %v16417_v5 = vld [vmem:[#allocation32_spill] sm:$0xff] }
 0x3aa   :  { %v3362_v22 = vpop.f32.mrf.mxu1  ;;  %6000 = vmatmul.mubr.bf16.gmra.mxu1 %v12076_v18  ;;  %v4621_v13 = vpop.f32.mrf.mxu0  ;;  %v12094_v21 = vpack.c.bf16 %v14477_v36, %v14451_v20  ;;  %v4118_v7 = vadd.f32 %v16417_v5, %v3431_v28  ;;  %v16418_v18 = vld [vmem:[#allocation46_spill] sm:$0xff]  ;;  %v11727_v28 = vld [vmem:[%s16103_s5 + $0x128] sm:$0xff]  }
 0x3ab   :  { %v14510_v45 = vadd.f32 %v3362_v22, %v2736_v24  ;;  %6007 = vmatprep.mubr.bf16.mxu1 %v12079_v42  ;;  %v10816_v62 = vpack.c.bf16 %v14501_v15, %v14499_v39  ;;  %v4879_v19 = vadd.f32 %v14231_v51, %v4802_v43  ;;  %v4804_v63 = vadd.f32 %v4621_v13, %v16418_v18  ;;  %v16420_v42 = vld [vmem:[#allocation48_spill] sm:$0xff]  ;;  %v11733_v18 = vld [vmem:[%s16103_s5 + $0x1c8] sm:$0xff]  }
 0x3ac   :  { %v3364_v37 = vpop.f32.mrf.mxu1  ;;  %5648 = vmatprep.mubr.bf16.mxu0 %v12093_v59  ;;  %v2739_v58 = vadd.f32 %v16420_v42, %v16419_v57  ;;  %v14527_v44 = vmax.f32 %v4878_v6, 0.0  ;;  %v4623_v34 = vpop.f32.mrf.mxu0  ;;  %11252 = vmatprep.subr.bf16.mxu0 %v11727_v28  ;;  %v16423_v42 = vld [vmem:[#allocation73_spill] sm:$0xff] }
 0x3ad   :  { %5183 = vst [vmem:[#allocation3 + $0x9c] sm:$0xff] %v10816_v62  ;;  %v14532_v24 = vmax.f32 %v4879_v19, 0.0  ;;  %v4881_v47 = vadd.f32 %v14226_v17, %v4804_v63  ;;  %v4805_v43 = vadd.f32 %v4623_v34, %v4118_v7  ;;  %5649 = vmatmul.mubr.bf16.gmra.mxu0 %v12094_v21  ;;  %11299 = vmatpush3.bf16.msra.mxu1 %v11731_v50  ;;  %v16421_v63 = vld [vmem:[#allocation55_spill] sm:$0xff]  ;;  %v16422_v37 = vld [vmem:[#allocation21_spill] sm:$0xff] }
 0x3ae   :  { %v3365_v22 = vpop.f32.mrf.mxu1  ;;  %v4627_v6 = vpop.f32.mrf.mxu0  ;;  %11253 = vmatpush3.bf16.msra.mxu0 %v11727_v28  ;;  %v3437_v57 = vadd.f32 %v16422_v37, %v16421_v63  ;;  %11300 = vmatprep.subr.bf16.mxu1 %v11733_v18 }
 0x3af   :  { %v14537_v13 = vadd.f32 %v3365_v22, %v2739_v58  ;;  %v10818_v62 = vpack.c.bf16 %v14532_v24, %v14527_v44  ;;  %v4882_v19 = vadd.f32 %v14231_v51, %v4805_v43  ;;  %v4807_v7 = vadd.f32 %v4627_v6, %v14166_v35  ;;  %v11732_v43 = vld [vmem:[%s16103_s5 + $0x120] sm:$0xff]  }
 0x3b0   :  { %v3367_v21 = vpop.f32.mrf.mxu1  ;;  %v2744_v58 = vadd.f32 %v14174_v25, %v16423_v42  ;;  %v14552_v50 = vmax.f32 %v4881_v47, 0.0  ;;  %v4629_v34 = vpop.f32.mrf.mxu0  ;;  %v16424_v22 = vld [vmem:[#allocation36_spill] sm:$0xff]  ;;  %v12097_v25 = vpack.c.bf16 %v14532_v24, %v14501_v15  ;;  %v16425_v47 = vld [vmem:[#allocation27_spill] sm:$0xff]  ;;  %11254 = vmatprep.subr.bf16.mxu0 %v11732_v43 }
 0x3b1   :  { %5185 = vst [vmem:[#allocation3 + $0xa8] sm:$0xff] %v10818_v62  ;;  %v14557_v35 = vmax.f32 %v4882_v19, 0.0  ;;  %v4884_v28 = vadd.f32 %v14226_v17, %v4807_v7  ;;  %v4808_v6 = vadd.f32 %v4629_v34, %v16424_v22  ;;  %v4124_v63 = vadd.f32 %v16425_v47, %v3437_v57  ;;  %v11735_v57 = vld [vmem:[%s16103_s5 + $0x1c0] sm:$0xff]   ;;  %11301 = vmatpush3.bf16.msra.mxu1 %v11733_v18 }
 0x3b2   :  { %v3370_v21 = vpop.f32.mrf.mxu1  ;;  %6008 = vmatmul.mubr.bf16.gmra.mxu1 %v12080_v2  ;;  %v4631_v62 = vpop.f32.mrf.mxu0  ;;  %v16426_v19 = vpack.c.bf16 %v14372_v8, %v14353_v53  ;;  %v12098_v7 = vpack.c.bf16 %v14527_v44, %v14499_v39  ;;  %v16427_v2 = vld [vmem:[#allocation17_spill] sm:$0xff]  ;;  %5656 = vmatprep.mubr.bf16.mxu0 %v12097_v25  ;;  %v16428_v53 = vld [vmem:[#allocation74_spill] sm:$0xff]  ;;  %v16429_v8 = vld [vmem:[#allocation52_spill] sm:$0xff] }
 0x3b3   :  { %v14567_v37 = vadd.f32 %v3370_v21, %v2744_v58  ;;  %v10820_v27 = vpack.c.bf16 %v14557_v35, %v14552_v50  ;;  %v4885_v41 = vadd.f32 %v14231_v51, %v4808_v6  ;;  %v4810_v42 = vadd.f32 %v4631_v62, %v16427_v2  ;;  %11255 = vmatpush3.bf16.msra.mxu0 %v11732_v43  ;;  %v16435_v2 = vld [vmem:[#allocation76_spill] sm:$0xff] }
 0x3b4   :  { %6015 = vmatprep.mubr.bf16.mxu1 %v16426_v19  ;;  %v3372_v34 = vpop.f32.mrf.mxu1  ;;  %v2747_v58 = vadd.f32 %v16429_v8, %v16428_v53  ;;  %v4944_v22 = vmax.f32 %v4884_v28, 0.0  ;;  %v4633_v21 = vpop.f32.mrf.mxu0  ;;  %11302 = vmatprep.subr.bf16.mxu1 %v11735_v57  ;;  %v16434_v8 = vld [vmem:[#allocation77_spill] sm:$0xff] }
 0x3b5   :  { %5187 = vst [vmem:[#allocation3 + $0xb4] sm:$0xff] %v10820_v27  ;;  %v4945_v47 = vmax.f32 %v4885_v41, 0.0  ;;  %v4887_v19 = vadd.f32 %v14226_v17, %v4810_v42  ;;  %v4811_v6 = vadd.f32 %v4633_v21, %v4124_v63  ;;  %5657 = vmatmul.mubr.bf16.gmra.mxu0 %v12098_v7  ;;  %v16430_v27 = vld [vmem:[#allocation51_spill] sm:$0xff]  ;;  %v16431_v42 = vld [vmem:[#allocation56_spill] sm:$0xff]  ;;  %v16432_v63 = vld [vmem:[#allocation37_spill] sm:$0xff]  ;;  %11303 = vmatpush3.bf16.msra.mxu1 %v11735_v57 }
 0x3b6   :  { %v3373_v5 = vpop.f32.mrf.mxu1  ;;  %v4637_v62 = vpop.f32.mrf.mxu0  ;;  %v3443_v53 = vadd.f32 %v16432_v63, %v16431_v42  ;;  %v16433_v7 = vld [vmem:[#allocation75_spill] sm:$0xff] }
 0x3b7   :  { %v14586_v25 = vadd.f32 %v3373_v5, %v2747_v58  ;;  %v10822_v28 = vpack.c.bf16 %v4945_v47, %v4944_v22  ;;  %v4888_v18 = vadd.f32 %v14231_v51, %v4811_v6  ;;  %v4813_v41 = vadd.f32 %v4637_v62, %v16430_v27 }
 0x3b8   :  { %v3375_v34 = vpop.f32.mrf.mxu1  ;;  %v2752_v21 = vadd.f32 %v16434_v8, %v16433_v7  ;;  %v4947_v43 = vmax.f32 %v4887_v19, 0.0  ;;  %v4639_v59 = vpop.f32.mrf.mxu0  ;;  %v16436_v6 = vpack.c.bf16 %v14370_v23, %v14351_v46  ;;  %v12101_v62 = vpack.c.bf16 %v4944_v22, %v14552_v50  ;;  %v16438_v23 = vld [vmem:[#allocation39_spill] sm:$0xff] }
 0x3b9   :  { %5189 = vst [vmem:[#allocation3 + $0xc0] sm:$0xff] %v10822_v28  ;;  %v4948_v5 = vmax.f32 %v4888_v18, 0.0  ;;  %v4890_v58 = vadd.f32 %v14226_v17, %v4813_v41  ;;  %v4814_v48 = vadd.f32 %v4639_v59, %v16435_v2  ;;  %v16437_v19 = vpack.c.bf16 %v14413_v33, %v14394_v3  ;;  %v16439_v41 = vld [vmem:[#allocation28_spill] sm:$0xff] }
 0x3ba   :  { %v3378_v38 = vpop.f32.mrf.mxu1  ;;  %6016 = vmatmul.mubr.bf16.gmra.mxu1 %v16436_v6  ;;  %v4641_v34 = vpop.f32.mrf.mxu0  ;;  %v12102_v57 = vpack.c.bf16 %v4945_v47, %v14557_v35  ;;  %v4130_v28 = vadd.f32 %v14220_v16, %v3443_v53  ;;  %v2755_v22 = vadd.f32 %v16439_v41, %v16438_v23 }
 0x3bb   :  { %v14602_v27 = vadd.f32 %v3378_v38, %v2752_v21  ;;  %6023 = vmatprep.mubr.bf16.mxu1 %v16437_v19  ;;  %v10824_v18 = vpack.c.bf16 %v4948_v5, %v4947_v43  ;;  %v4891_v59 = vadd.f32 %v14231_v51, %v4814_v48  ;;  %v4816_v2 = vadd.f32 %v4641_v34, %v14218_v56 }
 0x3bc   :  { %v3380_v46 = vpop.f32.mrf.mxu1  ;;  %v4643_v38 = vpop.f32.mrf.mxu0  ;;  %5664 = vmatprep.mubr.bf16.mxu0 %v12102_v57  ;;  %v4950_v42 = vmax.f32 %v4890_v58, 0.0  ;;  %v16440_v21 = vpack.c.bf16 %v14411_v49, %v14392_v52  ;;  %v16442_v52 = vpack.c.bf16 %v14451_v20, %v14432_v30  ;;  %v16443_v49 = vpack.c.bf16 %v14501_v15, %v14479_v31 }
 0x3bd   :  { %5191 = vst [vmem:[#allocation3 + $0xcc] sm:$0xff] %v10824_v18  ;;  %v4951_v63 = vmax.f32 %v4891_v59, 0.0  ;;  %v4893_v3 = vadd.f32 %v14226_v17, %v4816_v2  ;;  %v4817_v33 = vadd.f32 %v4643_v38, %v4130_v28  ;;  %5665 = vmatmul.mubr.bf16.gmra.mxu0 %v12101_v62  ;;  %v16441_v17 = vpack.c.bf16 %v14453_v12, %v14434_v29  ;;  %v11747_v28 = vld [vmem:[%s16103_s5 + $0x258] sm:$0xff]  }
 0x3be   :  { %v3381_v47 = vpop.f32.mrf.mxu1  ;;  %v16444_v30 = vpack.c.bf16 %v14499_v39, %v14477_v36  ;;  %11074 = vmatprep.subr.bf16.mxu1 %v11747_v28  ;;  %v16445_v20 = vpack.c.bf16 %v14557_v35, %v14532_v24 }
 0x3bf   :  { %v14614_v16 = vadd.f32 %v3381_v47, %v2755_v22  ;;  %v10826_v43 = vpack.c.bf16 %v4951_v63, %v4950_v42  ;;  %v4894_v48 = vadd.f32 %v14231_v51, %v4817_v33  ;;  %v4953_v53 = vmax.f32 %v4893_v3, 0.0 }
 0x3c0   :  { %v3383_v56 = vpop.f32.mrf.mxu1 }
 0x3c1   :  { %5193 = vst [vmem:[#allocation3 + $0xd8] sm:$0xff] %v10826_v43  ;;  %v4954_v7 = vmax.f32 %v4894_v48, 0.0 }
 0x3c2   :  { %v3993_v8 = vpop.f32.mrf.mxu1  ;;  %6024 = vmatmul.mubr.bf16.gmra.mxu1 %v16440_v21 }
 0x3c3   :  { %v14621_v5 = vadd.f32 %v3993_v8, %v14238_v10  ;;  %6031 = vmatprep.mubr.bf16.mxu1 %v16441_v17  ;;  %v10828_v58 = vpack.c.bf16 %v4954_v7, %v4953_v53 }
 0x3c4   :  { %v3995_v6 = vpop.f32.mrf.mxu1 }
 0x3c5   :  { %5195 = vst [vmem:[#allocation3 + $0xe4] sm:$0xff] %v10828_v58 }
 0x3c6   :  { %v3996_v51 = vpop.f32.mrf.mxu1 }
 0x3c7   :  { %v14627_v62 = vadd.f32 %v3996_v51, %v14249_v32 }
 0x3c8   :  { %v3998_v34 = vpop.f32.mrf.mxu1 }
 0x3ca   :  { %v4001_v19 = vpop.f32.mrf.mxu1  ;;  %6032 = vmatmul.mubr.bf16.gmra.mxu1 %v16442_v52  ;;  %v16447_v52 = vld [vmem:[#allocation60_spill] sm:$0xff] }
 0x3cb   :  { %v14633_v10 = vadd.f32 %v4001_v19, %v14258_v61  ;;  %6039 = vmatprep.mubr.bf16.mxu1 %v16443_v49  ;;  %v4831_v49 = vsub.s32 2, %v16447_v52 }
 0x3cc   :  { %v4003_v29 = vpop.f32.mrf.mxu1 }
 0x3ce   :  { %v4004_v12 = vpop.f32.mrf.mxu1 }
 0x3cf   :  { %v14639_v57 = vadd.f32 %v4004_v12, %v14275_v11  ;;  %v14656_v11 = vld [vmem:[%s16103_s5 + $0x98] sm:$0xff]  }
 0x3d0   :  { %v4006_v32 = vpop.f32.mrf.mxu1  ;;  %11272 = vmatprep.subr.bf16.mxu0 %v14656_v11 }
 0x3d2   :  { %v4009_v18 = vpop.f32.mrf.mxu1  ;;  %6040 = vmatmul.mubr.bf16.gmra.mxu1 %v16444_v30 }
 0x3d3   :  { %v14648_v61 = vadd.f32 %v4009_v18, %v14295_v54  ;;  %6047 = vmatprep.mubr.bf16.mxu1 %v16445_v20  ;;  %v16446_v54 = vpack.c.bf16 %v14552_v50, %v14527_v44 }
 0x3d4   :  { %v4011_v31 = vpop.f32.mrf.mxu1 }
 0x3d6   :  { %v4012_v15 = vpop.f32.mrf.mxu1 }
 0x3d7   :  { %v14660_v36 = vadd.f32 %v4012_v15, %v14314_v1 }
 0x3d8   :  { %v4014_v39 = vpop.f32.mrf.mxu1 }
 0x3da   :  { %v4017_v59 = vpop.f32.mrf.mxu1  ;;  %6048 = vmatmul.mubr.bf16.gmra.mxu1 %v16446_v54 }
 0x3db   :  { %v14666_v24 = vadd.f32 %v4017_v59, %v14335_v40 }
 0x3dc   :  { %v4019_v35 = vpop.f32.mrf.mxu1 }
 0x3de   :  { %v4020_v2 = vpop.f32.mrf.mxu1 }
 0x3df   :  { %v14669_v46 = vadd.f32 %v4020_v2, %v14358_v0 }
 0x3e0   :  { %v4022_v23 = vpop.f32.mrf.mxu1 }
 0x3e2   :  { %v4025_v41 = vpop.f32.mrf.mxu1 }
 0x3e3   :  { %v14672_v22 = vadd.f32 %v4025_v41, %v14379_v60 }
 0x3e4   :  { %v4027_v1 = vpop.f32.mrf.mxu1 }
 0x3e6   :  { %v4028_v38 = vpop.f32.mrf.mxu1 }
 0x3e7   :  { %v14675_v42 = vadd.f32 %v4028_v38, %v14399_v26 }
 0x3e8   :  { %v4030_v44 = vpop.f32.mrf.mxu1 }
 0x3ea   :  { %v4033_v50 = vpop.f32.mrf.mxu1 }
 0x3eb   :  { %v14678_v40 = vadd.f32 %v4033_v50, %v14420_v14 }
 0x3ec   :  { %v4035_v63 = vpop.f32.mrf.mxu1 }
 0x3ee   :  { %v4036_v3 = vpop.f32.mrf.mxu1 }
 0x3ef   :  { %v14681_v0 = vadd.f32 %v4036_v3, %v14439_v4 }
 0x3f0   :  { %v4038_v33 = vpop.f32.mrf.mxu1 }
 0x3f2   :  { %v4041_v47 = vpop.f32.mrf.mxu1 }
 0x3f3   :  { %v14684_v60 = vadd.f32 %v4041_v47, %v14460_v55 }
 0x3f4   :  { %v4043_v43 = vpop.f32.mrf.mxu1 }
 0x3f6   :  { %v4044_v48 = vpop.f32.mrf.mxu1 }
 0x3f7   :  { %v14687_v26 = vadd.f32 %v4044_v48, %v14484_v9 }
 0x3f8   :  { %v4046_v56 = vpop.f32.mrf.mxu1 }
 0x3fa   :  { %v4049_v53 = vpop.f32.mrf.mxu1 }
 0x3fb   :  { %v14690_v14 = vadd.f32 %v4049_v53, %v14510_v45 }
 0x3fc   :  { %v4051_v7 = vpop.f32.mrf.mxu1 }
 0x3fe   :  { %v4052_v8 = vpop.f32.mrf.mxu1 }
 0x3ff   :  { %v14693_v4 = vadd.f32 %v4052_v8, %v14537_v13 }
 0x400   :  { %v4054_v21 = vpop.f32.mrf.mxu1 }
 0x402   :  { %v4057_v17 = vpop.f32.mrf.mxu1 }
 0x403   :  { %v14696_v55 = vadd.f32 %v4057_v17, %v14567_v37  ;;  %v16448_v37 = vld [vmem:[#allocation24_spill] sm:$0xff] }
 0x404   :  { %v4059_v58 = vpop.f32.mrf.mxu1  ;;  %v14709_v32 = vrot.slane %v16448_v37, %v4831_v49 }
 0x406   :  { %v4060_v6 = vpop.f32.mrf.mxu1 }
 0x407   :  { %v14699_v9 = vadd.f32 %v4060_v6, %v14586_v25 }
 0x408   :  { %v4062_v51 = vpop.f32.mrf.mxu1 }
 0x40a   :  { %v4065_v34 = vpop.f32.mrf.mxu1 }
 0x40b   :  { %v14702_v45 = vadd.f32 %v4065_v34, %v14602_v27 }
 0x40c   :  { %v4067_v19 = vpop.f32.mrf.mxu1 }
 0x40e   :  { %v4068_v13 = vpop.f32.mrf.mxu1 }
 0x40f   :  { %v14706_v29 = vadd.f32 %v4068_v13, %v14614_v16 }
 0x410   :  { %v4070_v12 = vpop.f32.mrf.mxu1 }
 0x412   :  { %v4680_v28 = vpop.f32.mrf.mxu1 }
 0x413   :  { %v4761_v25 = vadd.f32 %v4680_v28, %v14621_v5 }
 0x414   :  { %v4682_v18 = vpop.f32.mrf.mxu1 }
 0x415   :  { %v4838_v30 = vadd.f32 %v14709_v32, %v4761_v25 }
 0x416   :  { %v4683_v20 = vpop.f32.mrf.mxu1 }
 0x417   :  { %v4898_v27 = vmax.f32 %v4838_v30, 0.0  ;;  %v4764_v31 = vadd.f32 %v4683_v20, %v14627_v62 }
 0x418   :  { %v4685_v15 = vpop.f32.mrf.mxu1 }
 0x419   :  { %v10791_v39 = vpack.c.bf16 %v4898_v27, %v4898_v27  ;;  %v4841_v16 = vadd.f32 %v14709_v32, %v4764_v31 }
 0x41a   :  { %v4688_v59 = vpop.f32.mrf.mxu1 }
 0x41b   :  { %5158 = vst.msk [vmem:[#allocation3 + $0x8] sm:$0xf] %vm5157_vm6, %v10791_v39  ;;  %v4901_v54 = vmax.f32 %v4841_v16, 0.0  ;;  %v4767_v35 = vadd.f32 %v4688_v59, %v14633_v10  ;;  %v11748_v59 = vld [vmem:[%s16103_s5 + $0x218] sm:$0xff]  }
 0x41c   :  { %v4690_v2 = vpop.f32.mrf.mxu1 }
 0x41d   :  { %v10793_v5 = vpack.c.bf16 %v4901_v54, %v4901_v54  ;;  %v4844_v23 = vadd.f32 %v14709_v32, %v4767_v35 }
 0x41e   :  { %v4691_v41 = vpop.f32.mrf.mxu1 }
 0x41f   :  { %5160 = vst.msk [vmem:[#allocation3 + $0x14] sm:$0xf] %vm5157_vm6, %v10793_v5  ;;  %v4904_v1 = vmax.f32 %v4844_v23, 0.0  ;;  %v4770_v62 = vadd.f32 %v4691_v41, %v14639_v57  ;;  %v11758_v23 = vld [vmem:[%s16103_s5 + $0x88] sm:$0xff]  }
 0x420   :  { %v4693_v38 = vpop.f32.mrf.mxu1 }
 0x421   :  { %v10795_v44 = vpack.c.bf16 %v4904_v1, %v4904_v1  ;;  %v4847_v50 = vadd.f32 %v14709_v32, %v4770_v62  ;;  %v11751_v38 = vld [vmem:[%s16103_s5 + $0x210] sm:$0xff]  }
 0x422   :  { %v4696_v63 = vpop.f32.mrf.mxu1 }
 0x423   :  { %5162 = vst.msk [vmem:[#allocation3 + $0x20] sm:$0xf] %vm5157_vm6, %v10795_v44  ;;  %v4907_v3 = vmax.f32 %v4847_v50, 0.0  ;;  %v4773_v10 = vadd.f32 %v4696_v63, %v14648_v61 }
 0x424   :  { %v4698_v33 = vpop.f32.mrf.mxu1 }
 0x425   :  { %v10797_v47 = vpack.c.bf16 %v4907_v3, %v4907_v3  ;;  %v4850_v43 = vadd.f32 %v14709_v32, %v4773_v10  ;;  %v11764_v33 = vld [vmem:[%s16103_s5 + $0x80] sm:$0xff]  }
 0x426   :  { %v4699_v48 = vpop.f32.mrf.mxu1  ;;  %v14727_v17 = vld [vmem:[#allocation3 + $0x14] sm:$0xf] }
 0x427   :  { %5164 = vst.msk [vmem:[#allocation3 + $0x2c] sm:$0xf] %vm5157_vm6, %v10797_v47  ;;  %v4910_v56 = vmax.f32 %v4850_v43, 0.0  ;;  %v4776_v57 = vadd.f32 %v4699_v48, %v14660_v36 }
 0x428   :  { %v4701_v53 = vpop.f32.mrf.mxu1 }
 0x429   :  { %v10799_v7 = vpack.c.bf16 %v4910_v56, %v4910_v56  ;;  %v4853_v8 = vadd.f32 %v14709_v32, %v4776_v57  ;;  %v11754_v56 = vld [vmem:[%s16103_s5 + $0x208] sm:$0xff]   ;;  %v11759_v53 = vld [vmem:[%s16103_s5 + $0x240] sm:$0xff]  }
 0x42a   :  { %v4704_v21 = vpop.f32.mrf.mxu1  ;;  %v14729_v58 = vld [vmem:[#allocation3 + $0x20] sm:$0xf] }
 0x42b   :  { %5166 = vst.msk [vmem:[#allocation3 + $0x38] sm:$0xf] %vm5157_vm6, %v10799_v7  ;;  %v4913_v61 = vmax.f32 %v4853_v8, 0.0  ;;  %v4779_v6 = vadd.f32 %v4704_v21, %v14666_v24  ;;  %v10210_v51 = vcombine.low %v14727_v17, %v14729_v58  ;;  %v11772_v21 = vld [vmem:[%s16103_s5 + $0x1b8] sm:$0xff]  }
 0x42c   :  { %v4706_v34 = vpop.f32.mrf.mxu1 }
 0x42d   :  { %v10801_v19 = vpack.c.bf16 %v4913_v61, %v4913_v61  ;;  %v4856_v36 = vadd.f32 %v14709_v32, %v4779_v6  ;;  %11256 = vmatprep.mubr.msk.bf16.mxu0 %vm1980_vm5, %v10210_v51 }
 0x42e   :  { %v4707_v52 = vpop.f32.mrf.mxu1  ;;  %v11734_v49 = vld [vmem:[#allocation3 + $0x20] ss:$12 sps:$4 sm:$0xff]  }
 0x42f   :  { %5168 = vst.msk [vmem:[#allocation3 + $0x44] sm:$0xf] %vm5157_vm6, %v10801_v19  ;;  %v4916_v13 = vmax.f32 %v4856_v36, 0.0  ;;  %v4782_v12 = vadd.f32 %v4707_v52, %v14669_v46  ;;  %11304 = vmatprep.mubr.msk.bf16.mxu1 %vm1980_vm5, %v11734_v49  ;;  %v14740_v28 = vld [vmem:[#allocation3 + $0x2c] sm:$0xf]  ;;  %v11749_v46 = vld [vmem:[%s16103_s5 + $0x90] sm:$0xff]  }
 0x430   :  { %v4709_v37 = vpop.f32.mrf.mxu1  ;;  %v11760_v19 = vld [vmem:[%s16103_s5 + $0x200] sm:$0xff]  }
 0x431   :  { %v10803_v24 = vpack.c.bf16 %v4916_v13, %v4916_v13  ;;  %v4859_v25 = vadd.f32 %v14709_v32, %v4782_v12 }
 0x432   :  { %v14743_v18 = vld [vmem:[#allocation3 + $0x38] sm:$0xf]  ;;  %v4712_v30 = vpop.f32.mrf.mxu1 }
 0x433   :  { %5170 = vst.msk [vmem:[#allocation3 + $0x50] sm:$0xf] %vm5157_vm6, %v10803_v24  ;;  %v10213_v20 = vcombine.low %v14740_v28, %v14743_v18  ;;  %v4919_v27 = vmax.f32 %v4859_v25, 0.0  ;;  %v4785_v31 = vadd.f32 %v4712_v30, %v14672_v22  ;;  %v11750_v22 = vld [vmem:[%s16103_s5 + $0x250] sm:$0xff]   ;;  %v11763_v30 = vld [vmem:[%s16103_s5 + $0x1f8] sm:$0xff]  }
 0x434   :  { %v4714_v15 = vpop.f32.mrf.mxu1 }
 0x435   :  { %v10805_v39 = vpack.c.bf16 %v4919_v27, %v4919_v27  ;;  %v4862_v16 = vadd.f32 %v14709_v32, %v4785_v31  ;;  %11257 = vmatmul.mubr.msk.bf16.vlgmr.msra.gmra.mxu0 %vm1980_vm5, %v10213_v20 }
 0x436   :  { %v4715_v54 = vpop.f32.mrf.mxu1  ;;  %v11736_v35 = vld [vmem:[#allocation3 + $0x38] ss:$12 sps:$4 sm:$0xff]   ;;  %11273 = vmatpush3.bf16.msra.mxu0 %v14656_v11 }
 0x437   :  { %5172 = vst.msk [vmem:[#allocation3 + $0x5c] sm:$0xf] %vm5157_vm6, %v10805_v39  ;;  %v4922_v2 = vmax.f32 %v4862_v16, 0.0  ;;  %v4788_v5 = vadd.f32 %v4715_v54, %v14675_v42  ;;  %11274 = vmatprep.subr.bf16.mxu0 %v11749_v46  ;;  %11305 = vmatmul.mubr.msk.bf16.vlgmr.msra.gmra.mxu1 %vm1980_vm5, %v11736_v35  ;;  %v14768_v62 = vld [vmem:[#allocation3 + $0x44] sm:$0xf]  ;;  %v11753_v42 = vld [vmem:[%s16103_s5 + $0x248] sm:$0xff]  }
 0x438   :  { %v4717_v41 = vpop.f32.mrf.mxu1  ;;  %11075 = vmatpush3.bf16.msra.mxu1 %v11748_v59 }
 0x439   :  { %v10807_v1 = vpack.c.bf16 %v4922_v2, %v4922_v2  ;;  %v4865_v11 = vadd.f32 %v14709_v32, %v4788_v5  ;;  %11076 = vmatprep.subr.bf16.mxu1 %v11750_v22  ;;  %v11766_v2 = vld [vmem:[%s16103_s5 + $0x1f0] sm:$0xff]  }
 0x43a   :  { %v4720_v44 = vpop.f32.mrf.mxu1  ;;  %v14776_v50 = vld [vmem:[#allocation3 + $0x50] sm:$0xf]  ;;  %11275 = vmatpush3.bf16.msra.mxu0 %v11749_v46 }
 0x43b   :  { %5174 = vst.msk [vmem:[#allocation3 + $0x68] sm:$0xf] %vm5157_vm6, %v10807_v1  ;;  %v4925_v63 = vmax.f32 %v4865_v11, 0.0  ;;  %v4791_v3 = vadd.f32 %v4720_v44, %v14678_v40  ;;  %v10216_v10 = vcombine.low %v14768_v62, %v14776_v50  ;;  %11276 = vmatprep.subr.bf16.mxu0 %v11758_v23 }
 0x43c   :  { %v4722_v47 = vpop.f32.mrf.mxu1  ;;  %11077 = vmatpush3.bf16.msra.mxu1 %v11751_v38 }
 0x43d   :  { %v10809_v43 = vpack.c.bf16 %v4925_v63, %v4925_v63  ;;  %v4868_v48 = vadd.f32 %v14709_v32, %v4791_v3  ;;  %11260 = vmatprep.mubr.msk.bf16.mxu0 %vm1980_vm5, %v10216_v10  ;;  %11078 = vmatprep.subr.bf16.mxu1 %v11753_v42  ;;  %v11769_v10 = vld [vmem:[%s16103_s5 + $0x1e8] sm:$0xff]  }
 0x43e   :  { %v4723_v40 = vpop.f32.mrf.mxu1  ;;  %v11740_v57 = vld [vmem:[#allocation3 + $0x50] ss:$12 sps:$4 sm:$0xff]   ;;  %11277 = vmatpush3.bf16.msra.mxu0 %v11758_v23 }
 0x43f   :  { %5176 = vst.msk [vmem:[#allocation3 + $0x74] sm:$0xf] %vm5157_vm6, %v10809_v43  ;;  %v4928_v7 = vmax.f32 %v4868_v48, 0.0  ;;  %v4794_v8 = vadd.f32 %v4723_v40, %v14681_v0  ;;  %11278 = vmatprep.subr.bf16.mxu0 %v11764_v33  ;;  %11308 = vmatprep.mubr.msk.bf16.mxu1 %vm1980_vm5, %v11740_v57  ;;  %v14799_v51 = vld [vmem:[#allocation3 + $0x5c] sm:$0xf] }
 0x440   :  { %v4725_v61 = vpop.f32.mrf.mxu1  ;;  %11079 = vmatpush3.bf16.msra.mxu1 %v11754_v56  ;;  %v11762_v0 = vld [vmem:[%s16103_s5 + $0x238] sm:$0xff]  }
 0x441   :  { %v10811_v6 = vpack.c.bf16 %v4928_v7, %v4928_v7  ;;  %v4871_v34 = vadd.f32 %v14709_v32, %v4794_v8  ;;  %11080 = vmatprep.subr.bf16.mxu1 %v11759_v53  ;;  %v11775_v61 = vld [vmem:[%s16103_s5 + $0x1e0] sm:$0xff]  }
 0x442   :  { %v14808_v36 = vld [vmem:[#allocation3 + $0x68] sm:$0xf]  ;;  %v4728_v52 = vpop.f32.mrf.mxu1  ;;  %11279 = vmatpush3.bf16.msra.mxu0 %v11764_v33 }
 0x443   :  { %5178 = vst.msk [vmem:[#allocation3 + $0x80] sm:$0xf] %vm5157_vm6, %v10811_v6  ;;  %v10219_v49 = vcombine.low %v14799_v51, %v14808_v36  ;;  %v4931_v13 = vmax.f32 %v4871_v34, 0.0  ;;  %v4797_v12 = vadd.f32 %v4728_v52, %v14684_v60  ;;  %10998 = vmatprep.subr.bf16.mxu0 %v11772_v21  ;;  %v11765_v60 = vld [vmem:[%s16103_s5 + $0x230] sm:$0xff]  }
 0x444   :  { %v4730_v37 = vpop.f32.mrf.mxu1  ;;  %11081 = vmatpush3.bf16.msra.mxu1 %v11760_v19  ;;  %v10862_v31 = vpop.f32.mrf.mxu0 }
 0x445   :  { %v10813_v24 = vpack.c.bf16 %v4931_v13, %v4931_v13  ;;  %v4874_v25 = vadd.f32 %v14709_v32, %v4797_v12  ;;  %11261 = vmatmul.mubr.msk.bf16.gmra.mxu0 %vm1980_vm5, %v10219_v49  ;;  %11082 = vmatprep.subr.bf16.mxu1 %v11762_v0 }
 0x446   :  { %v4731_v20 = vpop.f32.mrf.mxu1  ;;  %v11741_v27 = vld [vmem:[#allocation3 + $0x68] ss:$12 sps:$4 sm:$0xff]   ;;  %v10863_v16 = vpop.f32.mrf.mxu0 }
 0x447   :  { %5180 = vst.msk [vmem:[#allocation3 + $0x8c] sm:$0xf] %vm5157_vm6, %v10813_v24  ;;  %v4934_v46 = vmax.f32 %v4874_v25, 0.0  ;;  %v4800_v15 = vadd.f32 %v4731_v20, %v14687_v26  ;;  %11309 = vmatmul.mubr.msk.bf16.gmra.mxu1 %vm1980_vm5, %v11741_v27  ;;  %v14826_v35 = vld [vmem:[#allocation3 + $0x74] sm:$0xf]  ;;  %v14828_v22 = vadd.f32 %v10863_v16, %v10862_v31  ;;  %v11768_v26 = vld [vmem:[%s16103_s5 + $0x228] sm:$0xff]  }
 0x448   :  { %v4733_v39 = vpop.f32.mrf.mxu1  ;;  %11083 = vmatpush3.bf16.msra.mxu1 %v11763_v30  ;;  %v14838_v41 = vpop.f32.mrf.mxu0 }
 0x449   :  { %v10815_v59 = vpack.c.bf16 %v4934_v46, %v4934_v46  ;;  %v4877_v54 = vadd.f32 %v14709_v32, %v4800_v15  ;;  %11084 = vmatprep.subr.bf16.mxu1 %v11765_v60 }
 0x44a   :  { %v4736_v5 = vpop.f32.mrf.mxu1  ;;  %v14836_v23 = vld [vmem:[#allocation3 + $0x80] sm:$0xf]  ;;  %v14844_v44 = vpop.f32.mrf.mxu0 }
 0x44b   :  { %5182 = vst.msk [vmem:[#allocation3 + $0x98] sm:$0xf] %vm5157_vm6, %v10815_v59  ;;  %v4937_v1 = vmax.f32 %v4877_v54, 0.0  ;;  %v4803_v11 = vadd.f32 %v4736_v5, %v14690_v14  ;;  %v10222_v38 = vcombine.low %v14826_v35, %v14836_v23  ;;  %v11773_v14 = vld [vmem:[%s16103_s5 + $0x220] sm:$0xff]  }
 0x44c   :  { %v4738_v42 = vpop.f32.mrf.mxu1  ;;  %11085 = vmatpush3.bf16.msra.mxu1 %v11766_v2  ;;  %v10868_v43 = vpop.f32.mrf.mxu0 }
 0x44d   :  { %v10817_v63 = vpack.c.bf16 %v4937_v1, %v4937_v1  ;;  %v4880_v3 = vadd.f32 %v14709_v32, %v4803_v11  ;;  %11264 = vmatprep.mubr.msk.bf16.mxu0 %vm1980_vm5, %v10222_v38  ;;  %11086 = vmatprep.subr.bf16.mxu1 %v11768_v26 }
 0x44e   :  { %v4739_v33 = vpop.f32.mrf.mxu1  ;;  %v11746_v47 = vld [vmem:[#allocation3 + $0x80] ss:$12 sps:$4 sm:$0xff]   ;;  %v10869_v57 = vpop.f32.mrf.mxu0 }
 0x44f   :  { %5184 = vst.msk [vmem:[#allocation3 + $0xa4] sm:$0xf] %vm5157_vm6, %v10817_v63  ;;  %v4940_v48 = vmax.f32 %v4880_v3, 0.0  ;;  %v4806_v56 = vadd.f32 %v4739_v33, %v14693_v4  ;;  %11312 = vmatprep.mubr.msk.bf16.mxu1 %vm1980_vm5, %v11746_v47  ;;  %v14857_v7 = vld [vmem:[#allocation3 + $0x8c] sm:$0xf]  ;;  %v14860_v21 = vadd.f32 %v10869_v57, %v10868_v43  ;;  %v14868_v4 = vld [vmem:[%s16103_s5 + $0x318] sm:$0xff]  }
 0x450   :  { %v4741_v40 = vpop.f32.mrf.mxu1  ;;  %11087 = vmatpush3.bf16.msra.mxu1 %v11769_v10  ;;  %v14872_v19 = vpop.f32.mrf.mxu0 }
 0x451   :  { %v10819_v53 = vpack.c.bf16 %v4940_v48, %v4940_v48  ;;  %v4883_v8 = vadd.f32 %v14709_v32, %v4806_v56  ;;  %11088 = vmatprep.subr.bf16.mxu1 %v11773_v14 }
 0x452   :  { %v14870_v6 = vld [vmem:[#allocation3 + $0x98] sm:$0xf]  ;;  %v4744_v34 = vpop.f32.mrf.mxu1  ;;  %v14878_v12 = vpop.f32.mrf.mxu0 }
 0x453   :  { %5186 = vst.msk [vmem:[#allocation3 + $0xb0] sm:$0xf] %vm5157_vm6, %v10819_v53  ;;  %v10225_v0 = vcombine.low %v14857_v7, %v14870_v6  ;;  %v4943_v52 = vmax.f32 %v4883_v8, 0.0  ;;  %v4809_v49 = vadd.f32 %v4744_v34, %v14696_v55  ;;  %v5198_v34 = vld [vmem:[#allocation3 + $0x8] sm:$0xf] }
 0x454   :  { %v4746_v13 = vpop.f32.mrf.mxu1  ;;  %11089 = vmatpush3.bf16.msra.mxu1 %v11775_v61  ;;  %v10874_v20 = vpop.f32.mrf.mxu0 }
 0x455   :  { %v10821_v37 = vpack.c.bf16 %v4943_v52, %v4943_v52  ;;  %v4886_v24 = vadd.f32 %v14709_v32, %v4809_v49  ;;  %11265 = vmatmul.mubr.msk.bf16.gmra.mxu0 %vm1980_vm5, %v10225_v0  ;;  %11344 = vmatprep.subr.bf16.mxu1 %v14868_v4  ;;  %v10262_v52 = vcombine.low %v5198_v34, %v14727_v17  ;;  %v14918_v13 = vld [vmem:[#allocation3 + $0x30] sm:$0xff] }
 0x456   :  { %v4747_v25 = vpop.f32.mrf.mxu1  ;;  %v11752_v30 = vld [vmem:[#allocation3 + $0x98] ss:$12 sps:$4 sm:$0xff]   ;;  %v10875_v60 = vpop.f32.mrf.mxu0  ;;  %v10274_v34 = vcombine.low %v14808_v36, %v14826_v35 }
 0x457   :  { %5188 = vst.msk [vmem:[#allocation3 + $0xbc] sm:$0xf] %vm5157_vm6, %v10821_v37  ;;  %v4946_v27 = vmax.f32 %v4886_v24, 0.0  ;;  %v4812_v31 = vadd.f32 %v4747_v25, %v14699_v9  ;;  %11313 = vmatmul.mubr.msk.bf16.gmra.mxu1 %vm1980_vm5, %v11752_v30  ;;  %v14887_v39 = vld [vmem:[#allocation3 + $0xa4] sm:$0xf]  ;;  %v14889_v16 = vadd.f32 %v10875_v60, %v10874_v20  ;;  %v15008_v35 = vld [vmem:[#allocation3 + $0x54] sm:$0xff] }
 0x458   :  { %v4749_v55 = vpop.f32.mrf.mxu1  ;;  %v14893_v2 = vpop.f32.mrf.mxu0  ;;  %v14923_v24 = vld [vmem:[#allocation3 + $0x24] sm:$0xff] }
 0x459   :  { %v10823_v46 = vpack.c.bf16 %v4946_v27, %v4946_v27  ;;  %v4889_v15 = vadd.f32 %v14709_v32, %v4812_v31  ;;  %v10445_v17 = vcombine.high %v14923_v24, %v14918_v13  ;;  %v11783_v36 = vld [vmem:[%s16103_s5 + $0x160] sm:$0xff]  }
 0x45a   :  { %v4752_v59 = vpop.f32.mrf.mxu1  ;;  %v14891_v54 = vld [vmem:[#allocation3 + $0xb0] sm:$0xf]  ;;  %v14899_v11 = vpop.f32.mrf.mxu0 }
 0x45b   :  { %5190 = vst.msk [vmem:[#allocation3 + $0xc8] sm:$0xf] %vm5157_vm6, %v10823_v46  ;;  %v4949_v26 = vmax.f32 %v4889_v15, 0.0  ;;  %v4815_v9 = vadd.f32 %v4752_v59, %v14702_v45  ;;  %v10228_v5 = vcombine.low %v14887_v39, %v14891_v54  ;;  %v11774_v46 = vld [vmem:[%s16103_s5 + $0x178] sm:$0xff]   ;;  %v10265_v59 = vcombine.low %v14729_v58, %v14740_v28 }
 0x45c   :  { %v4754_v1 = vpop.f32.mrf.mxu1  ;;  %v10880_v10 = vpop.f32.mrf.mxu0  ;;  %v10444_v58 = vcombine.low %v14923_v24, %v14918_v13 }
 0x45d   :  { %v10825_v38 = vpack.c.bf16 %v4949_v26, %v4949_v26  ;;  %v4892_v42 = vadd.f32 %v14709_v32, %v4815_v9  ;;  %11268 = vmatprep.mubr.msk.bf16.mxu0 %vm1980_vm5, %v10228_v5  ;;  %v11776_v26 = vld [vmem:[%s16103_s5 + $0x1b0] sm:$0xff]   ;;  %v10268_v5 = vcombine.low %v14743_v18, %v14768_v62 }
 0x45e   :  { %v4755_v63 = vpop.f32.mrf.mxu1  ;;  %v11761_v3 = vld [vmem:[#allocation3 + $0xb0] ss:$12 sps:$4 sm:$0xff]   ;;  %v10881_v43 = vpop.f32.mrf.mxu0 }
 0x45f   :  { %5192 = vst.msk [vmem:[#allocation3 + $0xd4] sm:$0xf] %vm5157_vm6, %v10825_v38  ;;  %v4952_v33 = vmax.f32 %v4892_v42, 0.0  ;;  %v4818_v47 = vadd.f32 %v4755_v63, %v14706_v29  ;;  %11316 = vmatprep.mubr.msk.bf16.mxu1 %vm1980_vm5, %v11761_v3  ;;  %v14906_v48 = vld [vmem:[#allocation3 + $0xbc] sm:$0xf]  ;;  %v14909_v40 = vadd.f32 %v10881_v43, %v10880_v10  ;;  %v14950_v38 = vld [vmem:[#allocation3 + $0x48] sm:$0xff] }
 0x460   :  { %v4757_v45 = vpop.f32.mrf.mxu1  ;;  %v14911_v8 = vpop.f32.mrf.mxu0  ;;  %v14955_v63 = vld [vmem:[#allocation3 + $0x3c] sm:$0xff]  ;;  %v11777_v18 = vld [vmem:[%s16103_s5 + $0x170] sm:$0xff]  }
 0x461   :  { %v10827_v14 = vpack.c.bf16 %v4952_v33, %v4952_v33  ;;  %v4895_v56 = vadd.f32 %v14709_v32, %v4818_v47  ;;  %v11815_v3 = vld [vmem:[%s16103_s5 + $0x310] sm:$0xff]   ;;  %v10448_v10 = vcombine.high %v14955_v63, %v14950_v38  ;;  %v11780_v33 = vld [vmem:[%s16103_s5 + $0x1a8] sm:$0xff]  }
 0x462   :  { %v5270_v57 = vld [vmem:[#allocation3 + $0xc8] sm:$0xf]  ;;  %v10938_v53 = vpop.f32.mrf.mxu1  ;;  %v14916_v49 = vpop.f32.mrf.mxu0 }
 0x463   :  { %5194 = vst.msk [vmem:[#allocation3 + $0xe0] sm:$0xf] %vm5157_vm6, %v10827_v14  ;;  %v10231_v61 = vcombine.low %v14906_v48, %v5270_v57  ;;  %v4955_v29 = vmax.f32 %v4895_v56, 0.0  ;;  %v11781_v56 = vld [vmem:[%s16103_s5 + $0x168] sm:$0xff]  }
 0x464   :  { %v10939_v0 = vpop.f32.mrf.mxu1  ;;  %v10886_v20 = vpop.f32.mrf.mxu0 }
 0x465   :  { %v10829_v32 = vpack.c.bf16 %v4955_v29, %v4955_v29  ;;  %v14920_v37 = vadd.f32 %v10939_v0, %v10938_v53  ;;  %11269 = vmatmul.mubr.msk.bf16.gmra.mxu0 %vm1980_vm5, %v10231_v61  ;;  %v10271_v53 = vcombine.low %v14776_v50, %v14799_v51  ;;  %v11782_v61 = vld [vmem:[%s16103_s5 + $0x1a0] sm:$0xff]   ;;  %v10447_v50 = vcombine.low %v14955_v63, %v14950_v38 }
 0x466   :  { %v14925_v25 = vpop.f32.mrf.mxu1  ;;  %11280 = vmatprep.mubr.msk.bf16.mxu0 %vm1980_vm5, %v10262_v52  ;;  %v11767_v30 = vld [vmem:[#allocation3 + $0xc8] ss:$12 sps:$4 sm:$0xff]   ;;  %v10887_v31 = vpop.f32.mrf.mxu0  ;;  %v14995_v52 = vld [vmem:[#allocation3 + $0x60] sm:$0xff] }
 0x467   :  { %5196 = vst.msk [vmem:[#allocation3 + $0xec] sm:$0xf] %vm5157_vm6, %v10829_v32  ;;  %11317 = vmatmul.mubr.msk.bf16.gmra.mxu1 %vm1980_vm5, %v11767_v30  ;;  %v14934_v55 = vadd.f32 %v10887_v31, %v10886_v20  ;;  %v11821_v20 = vld [vmem:[%s16103_s5 + $0x300] sm:$0xff]   ;;  %v11786_v31 = vld [vmem:[%s16103_s5 + $0x198] sm:$0xff]  }
 0x468   :  { %v14931_v27 = vpop.f32.mrf.mxu1  ;;  %7069 = vmatprep.mubr.bf16.mxu1 %v10445_v17  ;;  %v14939_v15 = vpop.f32.mrf.mxu0  ;;  %v10451_v17 = vcombine.high %v15008_v35, %v14995_v52 }
 0x46a   :  { %v10944_v60 = vpop.f32.mrf.mxu1  ;;  %v14948_v1 = vpop.f32.mrf.mxu0 }
 0x46c   :  { %v10945_v9 = vpop.f32.mrf.mxu1 }
 0x46d   :  { %v14952_v42 = vadd.f32 %v10945_v9, %v10944_v60  ;;  %11281 = vmatmul.mubr.msk.bf16.vlgmr.msra.gmra.mxu0 %vm1980_vm5, %v10265_v59  ;;  %v10892_v62 = vpop.f32.mrf.mxu0  ;;  %v11787_v9 = vld [vmem:[%s16103_s5 + $0x158] sm:$0xff]  }
 0x46e   :  { %v14959_v28 = vpop.f32.mrf.mxu1  ;;  %11284 = vmatprep.mubr.msk.bf16.mxu0 %vm1980_vm5, %v10268_v5  ;;  %10999 = vmatpush3.bf16.msra.mxu0 %v11774_v46 }
 0x46f   :  { %11000 = vmatprep.subr.bf16.mxu0 %v11776_v26  ;;  %7070 = vmatmul.mubr.bf16.vlgmr.msra.gmra.mxu1 %v10444_v58  ;;  %v10893_v45 = vpop.f32.mrf.mxu0  ;;  %v10277_v58 = vcombine.low %v14836_v23, %v14857_v7  ;;  %v10450_v23 = vcombine.low %v15008_v35, %v14995_v52 }
 0x470   :  { %v14973_v47 = vpop.f32.mrf.mxu1  ;;  %7077 = vmatprep.mubr.bf16.mxu1 %v10448_v10  ;;  %v14975_v43 = vadd.f32 %v10893_v45, %v10892_v62  ;;  %11345 = vmatpush3.bf16.msra.mxu1 %v14868_v4  ;;  %v11818_v4 = vld [vmem:[%s16103_s5 + $0x308] sm:$0xff]  }
 0x471   :  { %v14981_v57 = vpop.f32.mrf.mxu0  ;;  %11346 = vmatprep.subr.bf16.mxu1 %v11815_v3 }
 0x472   :  { %v10950_v14 = vpop.f32.mrf.mxu1  ;;  %11001 = vmatpush3.bf16.msra.mxu0 %v11777_v18  ;;  %v11788_v18 = vld [vmem:[%s16103_s5 + $0x190] sm:$0xff]  }
 0x473   :  { %11002 = vmatprep.subr.bf16.mxu0 %v11780_v33  ;;  %v14993_v0 = vpop.f32.mrf.mxu0  ;;  %v15036_v33 = vld [vmem:[#allocation3 + $0x78] sm:$0xff] }
 0x474   :  { %v10951_v29 = vpop.f32.mrf.mxu1  ;;  %11347 = vmatpush3.bf16.msra.mxu1 %v11815_v3  ;;  %v10280_v3 = vcombine.low %v14870_v6, %v14887_v39  ;;  %v11789_v6 = vld [vmem:[%s16103_s5 + $0x150] sm:$0xff]  }
 0x475   :  { %v14997_v32 = vadd.f32 %v10951_v29, %v10950_v14  ;;  %11285 = vmatmul.mubr.msk.bf16.gmra.mxu0 %vm1980_vm5, %v10271_v53  ;;  %v10898_v30 = vpop.f32.mrf.mxu0  ;;  %11348 = vmatprep.subr.bf16.mxu1 %v11818_v4  ;;  %v15049_v39 = vld [vmem:[#allocation3 + $0x6c] sm:$0xff] }
 0x476   :  { %v15002_v51 = vpop.f32.mrf.mxu1  ;;  %11288 = vmatprep.mubr.msk.bf16.mxu0 %vm1980_vm5, %v10274_v34  ;;  %11003 = vmatpush3.bf16.msra.mxu0 %v11781_v56  ;;  %v10454_v56 = vcombine.high %v15049_v39, %v15036_v33  ;;  %v11792_v53 = vld [vmem:[%s16103_s5 + $0x188] sm:$0xff]  }
 0x477   :  { %11004 = vmatprep.subr.bf16.mxu0 %v11782_v61  ;;  %7078 = vmatmul.mubr.bf16.gmra.mxu1 %v10447_v50  ;;  %v10899_v46 = vpop.f32.mrf.mxu0  ;;  %v11793_v50 = vld [vmem:[%s16103_s5 + $0x148] sm:$0xff]  }
 0x478   :  { %v15018_v60 = vpop.f32.mrf.mxu1  ;;  %7085 = vmatprep.mubr.bf16.mxu1 %v10451_v17  ;;  %v15020_v59 = vadd.f32 %v10899_v46, %v10898_v30  ;;  %11349 = vmatpush3.bf16.msra.mxu1 %v11818_v4  ;;  %v6153_v30 = vld [vmem:[#allocation3 + $0x18] sm:$0xff]  ;;  %v15069_v46 = vld [vmem:[#allocation3 + $0x90] sm:$0xff] }
 0x479   :  { %v15025_v5 = vpop.f32.mrf.mxu0  ;;  %11350 = vmatprep.subr.bf16.mxu1 %v11821_v20 }
 0x47a   :  { %v10956_v26 = vpop.f32.mrf.mxu1  ;;  %11005 = vmatpush3.bf16.msra.mxu0 %v11783_v36  ;;  %16449 = vst [vmem:[#allocation54_spill] sm:$0xff] %v15025_v5  ;;  %v10283_v36 = vcombine.low %v14891_v54, %v14906_v48  ;;  %v11797_v54 = vld [vmem:[%s16103_s5 + $0x140] sm:$0xff]  }
 0x47b   :  { %11006 = vmatprep.subr.bf16.mxu0 %v11786_v31  ;;  %v15034_v10 = vpop.f32.mrf.mxu0  ;;  %v10353_v31 = vcombine.high %v6153_v30, %v14923_v24  ;;  %v15081_v48 = vld [vmem:[#allocation3 + $0x84] sm:$0xff] }
 0x47c   :  { %v10957_v62 = vpop.f32.mrf.mxu1  ;;  %16450 = vst [vmem:[#allocation26_spill] sm:$0xff] %v15034_v10  ;;  %11351 = vmatpush3.bf16.msra.mxu1 %v11821_v20  ;;  %v11796_v20 = vld [vmem:[%s16103_s5 + $0x180] sm:$0xff]   ;;  %v15140_v10 = vld [vmem:[#allocation3 + $0xd8] sm:$0xff] }
 0x47d   :  { %v15038_v45 = vadd.f32 %v10957_v62, %v10956_v26  ;;  %11289 = vmatmul.mubr.msk.bf16.gmra.mxu0 %vm1980_vm5, %v10277_v58  ;;  %v10904_v14 = vpop.f32.mrf.mxu0  ;;  %v11800_v62 = vld [vmem:[%s16103_s5 + $0x278] sm:$0xff]  }
 0x47e   :  { %v15043_v7 = vpop.f32.mrf.mxu1  ;;  %11292 = vmatprep.mubr.msk.bf16.mxu0 %vm1980_vm5, %v10280_v3  ;;  %11007 = vmatpush3.bf16.msra.mxu0 %v11787_v9  ;;  %v10453_v9 = vcombine.low %v15049_v39, %v15036_v33 }
 0x47f   :  { %11008 = vmatprep.subr.bf16.mxu0 %v11788_v18  ;;  %7086 = vmatmul.mubr.bf16.gmra.mxu1 %v10450_v23  ;;  %v10905_v4 = vpop.f32.mrf.mxu0  ;;  %v10457_v18 = vcombine.high %v15081_v48, %v15069_v46 }
 0x480   :  { %v15056_v61 = vpop.f32.mrf.mxu1  ;;  %7093 = vmatprep.mubr.bf16.mxu1 %v10454_v56  ;;  %v15058_v29 = vadd.f32 %v10905_v4, %v10904_v14  ;;  %v11809_v14 = vld [vmem:[%s16103_s5 + $0x270] sm:$0xff]   ;;  %v15098_v4 = vld [vmem:[#allocation3 + $0xa8] sm:$0xff] }
 0x482   :  { %v10962_v34 = vpop.f32.mrf.mxu1  ;;  %11009 = vmatpush3.bf16.msra.mxu0 %v11789_v6  ;;  %v10352_v6 = vcombine.low %v6153_v30, %v14923_v24  ;;  %v6720_v24 = vld [vmem:[#allocation3 + $0x9c] sm:$0xff] }
 0x483   :  { %11010 = vmatprep.subr.bf16.mxu0 %v11792_v53  ;;  %v15096_v53 = vcombine.high %v14918_v13, %v14955_v63  ;;  %v10460_v30 = vcombine.high %v6720_v24, %v15098_v4 }
 0x484   :  { %v10963_v17 = vpop.f32.mrf.mxu1 }
 0x485   :  { %v15071_v26 = vadd.f32 %v10963_v17, %v10962_v34  ;;  %11293 = vmatmul.mubr.msk.bf16.gmra.mxu0 %vm1980_vm5, %v10283_v36 }
 0x486   :  { %v15076_v58 = vpop.f32.mrf.mxu1  ;;  %11011 = vmatpush3.bf16.msra.mxu0 %v11793_v50  ;;  %6522 = vmatprep.mubr.bf16.mxu0 %v10353_v31  ;;  %v10456_v50 = vcombine.low %v15081_v48, %v15069_v46 }
 0x487   :  { %11012 = vmatprep.subr.bf16.mxu0 %v11796_v20  ;;  %7094 = vmatmul.mubr.bf16.gmra.mxu1 %v10453_v9  ;;  %v11820_v20 = vld [vmem:[%s16103_s5 + $0x268] sm:$0xff]  }
 0x488   :  { %v15088_v3 = vpop.f32.mrf.mxu1  ;;  %7101 = vmatprep.mubr.bf16.mxu1 %v10457_v18  ;;  %v11830_v18 = vld [vmem:[%s16103_s5 + $0x260] sm:$0xff]  }
 0x48a   :  { %v10968_v23 = vpop.f32.mrf.mxu1  ;;  %11013 = vmatpush3.bf16.msra.mxu0 %v11797_v54  ;;  %v15113_v54 = vcombine.low %v14918_v13, %v14955_v63  ;;  %v6724_v13 = vld [vmem:[#allocation3 + $0xb4] sm:$0xff] }
 0x48b   :  { %11320 = vmatprep.subr.bf16.mxu0 %v11800_v62 }
 0x48c   :  { %v10969_v56 = vpop.f32.mrf.mxu1 }
 0x48d   :  { %v15100_v34 = vadd.f32 %v10969_v56, %v10968_v23  ;;  %6523 = vmatmul.mubr.bf16.vlgmr.msra.gmra.mxu0 %v10352_v6  ;;  %v15120_v23 = vcombine.high %v14950_v38, %v15008_v35  ;;  %v6726_v6 = vld [vmem:[#allocation3 + $0xc0] sm:$0xff] }
 0x48e   :  { %v10971_v36 = vpop.f32.mrf.mxu1  ;;  %6530 = vmatprep.mubr.bf16.mxu0 %v15096_v53  ;;  %11321 = vmatpush3.bf16.msra.mxu0 %v11800_v62  ;;  %v10463_v63 = vcombine.high %v6724_v13, %v6726_v6 }
 0x48f   :  { %11322 = vmatprep.subr.bf16.mxu0 %v11809_v14  ;;  %7102 = vmatmul.mubr.bf16.gmra.mxu1 %v10456_v50 }
 0x490   :  { %v10972_v17 = vpop.f32.mrf.mxu1  ;;  %7109 = vmatprep.mubr.bf16.mxu1 %v10460_v30 }
 0x491   :  { %v15109_v31 = vadd.f32 %v10972_v17, %v10971_v36  ;;  %v11838_v36 = vld [vmem:[%s16103_s5 + $0x2f8] sm:$0xff]  }
 0x492   :  { %v10974_v9 = vpop.f32.mrf.mxu1  ;;  %11323 = vmatpush3.bf16.msra.mxu0 %v11809_v14  ;;  %v10459_v14 = vcombine.low %v6720_v24, %v15098_v4 }
 0x493   :  { %11324 = vmatprep.subr.bf16.mxu0 %v11820_v20 }
 0x494   :  { %v10975_v62 = vpop.f32.mrf.mxu1 }
 0x495   :  { %v15122_v56 = vadd.f32 %v10975_v62, %v10974_v9  ;;  %6531 = vmatmul.mubr.bf16.gmra.mxu0 %v15113_v54  ;;  %v15134_v62 = vcombine.low %v14950_v38, %v15008_v35  ;;  %v15149_v38 = vcombine.low %v14995_v52, %v15049_v39  ;;  %v15153_v35 = vcombine.high %v15036_v33, %v15081_v48 }
 0x496   :  { %v10977_v50 = vpop.f32.mrf.mxu1  ;;  %6538 = vmatprep.mubr.bf16.mxu0 %v15120_v23  ;;  %11325 = vmatpush3.bf16.msra.mxu0 %v11820_v20  ;;  %v15138_v20 = vcombine.high %v14995_v52, %v15049_v39  ;;  %v15164_v52 = vcombine.high %v15069_v46, %v6720_v24  ;;  %v11824_v39 = vld [vmem:[#allocation3 + $0x50] ss:$12 sps:$4 sm:$0xff]  }
 0x497   :  { %16451 = vst [vmem:[#allocation29_spill] sm:$0xff] %v15122_v56  ;;  %11326 = vmatprep.subr.bf16.mxu0 %v11830_v18  ;;  %7110 = vmatmul.mubr.bf16.gmra.mxu1 %v10459_v14  ;;  %v10462_v14 = vcombine.low %v6724_v13, %v6726_v6 }
 0x498   :  { %v10978_v30 = vpop.f32.mrf.mxu1  ;;  %7117 = vmatprep.mubr.bf16.mxu1 %v10463_v63  ;;  %v11819_v63 = vld [vmem:[#allocation3 + $0x38] ss:$12 sps:$4 sm:$0xff]  }
 0x499   :  { %v15130_v17 = vadd.f32 %v10978_v30, %v10977_v50  ;;  %v11825_v30 = vld [vmem:[#allocation3 + $0x68] ss:$12 sps:$4 sm:$0xff]  }
 0x49a   :  { %v10980_v9 = vpop.f32.mrf.mxu1  ;;  %11327 = vmatpush3.bf16.msra.mxu0 %v11830_v18  ;;  %v6728_v18 = vld [vmem:[#allocation3 + $0xcc] sm:$0xff] }
 0x49b   :  { %11150 = vmatprep.subr.bf16.mxu0 %v11838_v36  ;;  %v10466_v50 = vcombine.high %v6728_v18, %v15140_v10  ;;  %v15161_v36 = vcombine.low %v15036_v33, %v15081_v48  ;;  %v11828_v33 = vld [vmem:[#allocation3 + $0x80] ss:$12 sps:$4 sm:$0xff]   ;;  %v11829_v48 = vld [vmem:[#allocation3 + $0x98] ss:$12 sps:$4 sm:$0xff]  }
 0x49c   :  { %v10981_v56 = vpop.f32.mrf.mxu1 }
 0x49d   :  { %v15142_v5 = vadd.f32 %v10981_v56, %v10980_v9  ;;  %6539 = vmatmul.mubr.bf16.gmra.mxu0 %v15134_v62  ;;  %v10465_v56 = vcombine.low %v6728_v18, %v15140_v10  ;;  %v15171_v9 = vcombine.low %v15069_v46, %v6720_v24  ;;  %v11833_v46 = vld [vmem:[#allocation3 + $0xb0] ss:$12 sps:$4 sm:$0xff]   ;;  %v11834_v24 = vld [vmem:[#allocation3 + $0xc8] ss:$12 sps:$4 sm:$0xff]  }
 0x49e   :  { %6546 = vmatprep.mubr.bf16.mxu0 %v15138_v20 }
 0x49f   :  { %7118 = vmatmul.mubr.bf16.gmra.mxu1 %v10462_v14  ;;  %v15174_v14 = vcombine.high %v15098_v4, %v6724_v13 }
 0x4a0   :  { %7125 = vmatprep.mubr.bf16.mxu1 %v10466_v50  ;;  %v15181_v50 = vcombine.low %v15098_v4, %v6724_v13  ;;  %v11836_v4 = vld [vmem:[#allocation3 + $0xe0] ss:$12 sps:$4 sm:$0xff]   ;;  %v16452_v13 = vmov 0  }
 0x4a5   :  { %6547 = vmatmul.mubr.bf16.gmra.mxu0 %v15149_v38 }
 0x4a6   :  { %6554 = vmatprep.mubr.bf16.mxu0 %v15153_v35 }
 0x4a7   :  { %7126 = vmatmul.mubr.bf16.gmra.mxu1 %v10465_v56  ;;  %v15183_v56 = vcombine.high %v6726_v6, %v6728_v18 }
 0x4a8   :  { %11352 = vmatprep.mubr.msk.bf16.mxu1 %vm1980_vm5, %v11819_v63  ;;  %v15189_v63 = vcombine.low %v6726_v6, %v6728_v18  ;;  %v11841_v6 = vld [vmem:[%s16103_s5 + $0x2f0] sm:$0xff]   ;;  %v11839_v18 = vld [vmem:[#allocation3 + $0x5c] ss:$12 sps:$4 sm:$0xff]  }
 0x4ad   :  { %6555 = vmatmul.mubr.bf16.gmra.mxu0 %v15161_v36 }
 0x4ae   :  { %6562 = vmatprep.mubr.bf16.mxu0 %v15164_v52 }
 0x4af   :  { %11353 = vmatmul.mubr.msk.bf16.vlgmr.msra.gmra.mxu1 %vm1980_vm5, %v11824_v39  ;;  %v11835_v39 = vld [vmem:[#allocation3 + $0x2c] ss:$12 sps:$4 sm:$0xff]  }
 0x4b0   :  { %11356 = vmatprep.mubr.msk.bf16.mxu1 %vm1980_vm5, %v11825_v30  ;;  %v11840_v30 = vld [vmem:[%s16103_s5 + $0x2b8] sm:$0xff]  }
 0x4b5   :  { %6563 = vmatmul.mubr.bf16.gmra.mxu0 %v15171_v9 }
 0x4b6   :  { %6570 = vmatprep.mubr.bf16.mxu0 %v15174_v14 }
 0x4b7   :  { %11357 = vmatmul.mubr.msk.bf16.gmra.mxu1 %vm1980_vm5, %v11828_v33  ;;  %v11837_v33 = vld [vmem:[#allocation3 + $0x44] ss:$12 sps:$4 sm:$0xff]  }
 0x4b8   :  { %11360 = vmatprep.mubr.msk.bf16.mxu1 %vm1980_vm5, %v11829_v48  ;;  %v11842_v48 = vld [vmem:[%s16103_s5 + $0x2b0] sm:$0xff]  }
 0x4bd   :  { %6571 = vmatmul.mubr.bf16.gmra.mxu0 %v15181_v50 }
 0x4be   :  { %6578 = vmatprep.mubr.bf16.mxu0 %v15183_v56 }
 0x4bf   :  { %11361 = vmatmul.mubr.msk.bf16.gmra.mxu1 %vm1980_vm5, %v11833_v46  ;;  %v11844_v46 = vld [vmem:[%s16103_s5 + $0x2e8] sm:$0xff]  }
 0x4c0   :  { %11364 = vmatprep.mubr.msk.bf16.mxu1 %vm1980_vm5, %v11834_v24  ;;  %v11846_v24 = vld [vmem:[%s16103_s5 + $0x2a8] sm:$0xff]  }
 0x4c5   :  { %6579 = vmatmul.mubr.bf16.gmra.mxu0 %v15189_v63 }
 0x4c6   :  { %11328 = vmatprep.mubr.msk.bf16.mxu0 %vm1980_vm5, %v11835_v39  ;;  %v11843_v39 = vld [vmem:[#allocation3 + $0x74] ss:$12 sps:$4 sm:$0xff]  }
 0x4c7   :  { %11365 = vmatmul.mubr.msk.bf16.gmra.mxu1 %vm1980_vm5, %v11836_v4  ;;  %v11847_v4 = vld [vmem:[%s16103_s5 + $0x2e0] sm:$0xff]  }
 0x4c8   :  { %8006 = vmatprep.mubr.bf16.mxu1 %v16452_v13 }
 0x4cd   :  { %11329 = vmatmul.mubr.msk.bf16.vlgmr.msra.gmra.mxu0 %vm1980_vm5, %v11837_v33  ;;  %v11848_v33 = vld [vmem:[%s16103_s5 + $0x2a0] sm:$0xff]  }
 0x4ce   :  { %11332 = vmatprep.mubr.msk.bf16.mxu0 %vm1980_vm5, %v11839_v18  ;;  %11151 = vmatpush3.bf16.msra.mxu0 %v11840_v30  ;;  %v11845_v30 = vld [vmem:[#allocation3 + $0x8c] ss:$12 sps:$4 sm:$0xff]  }
 0x4cf   :  { %11152 = vmatprep.subr.bf16.mxu0 %v11841_v6  ;;  %v11850_v6 = vld [vmem:[%s16103_s5 + $0x2d8] sm:$0xff]  }
 0x4d0   :  { %v11852_v18 = vld [vmem:[%s16103_s5 + $0x298] sm:$0xff]  }
 0x4d2   :  { %11153 = vmatpush3.bf16.msra.mxu0 %v11842_v48  ;;  %v11849_v48 = vld [vmem:[#allocation3 + $0xa4] ss:$12 sps:$4 sm:$0xff]  }
 0x4d3   :  { %11154 = vmatprep.subr.bf16.mxu0 %v11844_v46  ;;  %v11853_v46 = vld [vmem:[%s16103_s5 + $0x2d0] sm:$0xff]  }
 0x4d5   :  { %11333 = vmatmul.mubr.msk.bf16.gmra.mxu0 %vm1980_vm5, %v11843_v39  ;;  %v11854_v39 = vld [vmem:[%s16103_s5 + $0x290] sm:$0xff]  }
 0x4d6   :  { %11336 = vmatprep.mubr.msk.bf16.mxu0 %vm1980_vm5, %v11845_v30  ;;  %11155 = vmatpush3.bf16.msra.mxu0 %v11846_v24  ;;  %v11851_v24 = vld [vmem:[#allocation3 + $0xbc] ss:$12 sps:$4 sm:$0xff]  }
 0x4d7   :  { %11156 = vmatprep.subr.bf16.mxu0 %v11847_v4  ;;  %v11856_v4 = vld [vmem:[%s16103_s5 + $0x2c8] sm:$0xff]  }
 0x4d8   :  { %v11857_v30 = vld [vmem:[%s16103_s5 + $0x288] sm:$0xff]  }
 0x4da   :  { %11157 = vmatpush3.bf16.msra.mxu0 %v11848_v33  ;;  %v11855_v33 = vld [vmem:[#allocation3 + $0xd4] ss:$12 sps:$4 sm:$0xff]  }
 0x4db   :  { %11158 = vmatprep.subr.bf16.mxu0 %v11850_v6  ;;  %v11858_v6 = vld [vmem:[%s16103_s5 + $0x2c0] sm:$0xff]  }
 0x4dd   :  { %11337 = vmatmul.mubr.msk.bf16.gmra.mxu0 %vm1980_vm5, %v11849_v48  ;;  %v15250_v48 = vpop.f32.mrf.mxu0 }
 0x4de   :  { %11340 = vmatprep.mubr.msk.bf16.mxu0 %vm1980_vm5, %v11851_v24  ;;  %11159 = vmatpush3.bf16.msra.mxu0 %v11852_v18  ;;  %v11859_v18 = vld [vmem:[%s16103_s5 + $0x280] sm:$0xff]  }
 0x4df   :  { %11160 = vmatprep.subr.bf16.mxu0 %v11853_v46  ;;  %v15252_v46 = vpop.f32.mrf.mxu0 }
 0x4e2   :  { %11161 = vmatpush3.bf16.msra.mxu0 %v11854_v39 }
 0x4e3   :  { %11162 = vmatprep.subr.bf16.mxu0 %v11856_v4  ;;  %v10873_v4 = vadd.f32 %v14878_v12, %v14872_v19  ;;  %v10943_v19 = vadd.f32 %v14931_v27, %v14925_v25 }
 0x4e5   :  { %11341 = vmatmul.mubr.msk.bf16.gmra.mxu0 %vm1980_vm5, %v11855_v33 }
 0x4e6   :  { %11163 = vmatpush3.bf16.msra.mxu0 %v11857_v30  ;;  %7616 = vmatprep.mubr.bf16.mxu0 %v15096_v53  ;;  %v15259_v30 = vpop.f32.mrf.mxu1 }
 0x4e7   :  { %11164 = vmatprep.subr.bf16.mxu0 %v11858_v6  ;;  %v10867_v6 = vadd.f32 %v14844_v44, %v14838_v41 }
 0x4e8   :  { %v15274_v12 = vpop.f32.mrf.mxu1 }
 0x4ea   :  { %11165 = vmatpush3.bf16.msra.mxu0 %v11859_v18 }
 0x4ed   :  { %7617 = vmatmul.mubr.bf16.vlgmr.msra.gmra.mxu0 %v15113_v54 }
 0x4ee   :  { %7624 = vmatprep.mubr.bf16.mxu0 %v15120_v23 }
 0x4f5   :  { %v11258_v24 = vpop.f32.mrf.mxu0  ;;  %7625 = vmatmul.mubr.bf16.gmra.mxu0 %v15134_v62 }
 0x4f6   :  { %v5716_v39 = vadd.f32 %v11258_v24, %v14860_v21  ;;  %7632 = vmatprep.mubr.bf16.mxu0 %v15138_v20  ;;  %v10949_v21 = vadd.f32 %v14973_v47, %v14959_v28  ;;  %v10885_v47 = vadd.f32 %v14916_v49, %v14911_v8 }
 0x4f7   :  { %v5707_v53 = vpop.f32.mrf.mxu0  ;;  %v15279_v24 = vpop.f32.mrf.mxu1 }
 0x4f8   :  { %v5708_v54 = vadd.f32 %v14828_v22, %v5707_v53  ;;  %v15263_v23 = vadd.f32 %v14952_v42, %v5716_v39  ;;  %v10879_v53 = vadd.f32 %v14899_v11, %v14893_v2 }
 0x4f9   :  { %v11259_v33 = vpop.f32.mrf.mxu0  ;;  %v15284_v44 = vpop.f32.mrf.mxu1 }
 0x4fa   :  { %v5719_v62 = vadd.f32 %v11259_v33, %v10873_v4  ;;  %v15270_v20 = vadd.f32 %v14920_v37, %v5708_v54 }
 0x4fb   :  { %v5710_v18 = vpop.f32.mrf.mxu0  ;;  %v15287_v28 = vpop.f32.mrf.mxu1 }
 0x4fc   :  { %v5711_v22 = vadd.f32 %v10867_v6, %v5710_v18  ;;  %v15276_v42 = vadd.f32 %v10949_v21, %v5719_v62  ;;  %v7277_v21 = vld [vmem:[#allocation3 + $0xe4] sm:$0xff] }
 0x4fd   :  { %7633 = vmatmul.mubr.bf16.gmra.mxu0 %v15149_v38  ;;  %v15301_v4 = vpop.f32.mrf.mxu1 }
 0x4fe   :  { %7640 = vmatprep.mubr.bf16.mxu0 %v15153_v35  ;;  %v15282_v41 = vadd.f32 %v10943_v19, %v5711_v22 }
 0x505   :  { %v11262_v37 = vpop.f32.mrf.mxu0  ;;  %7641 = vmatmul.mubr.bf16.gmra.mxu0 %v15161_v36  ;;  %v10961_v36 = vadd.f32 %v15056_v61, %v15043_v7  ;;  %v10897_v61 = vadd.f32 %v14993_v0, %v14981_v57  ;;  %v10967_v57 = vadd.f32 %v15088_v3, %v15076_v58 }
 0x506   :  { %v5732_v25 = vadd.f32 %v11262_v37, %v14909_v40  ;;  %7648 = vmatprep.mubr.bf16.mxu0 %v15164_v52 }
 0x507   :  { %v5723_v27 = vpop.f32.mrf.mxu0  ;;  %v15308_v8 = vpop.f32.mrf.mxu1 }
 0x508   :  { %v5724_v38 = vadd.f32 %v14889_v16, %v5723_v27  ;;  %v15295_v35 = vadd.f32 %v15038_v45, %v5732_v25  ;;  %v10955_v16 = vadd.f32 %v15018_v60, %v15002_v51 }
 0x509   :  { %v11263_v39 = vpop.f32.mrf.mxu0  ;;  %v15316_v11 = vpop.f32.mrf.mxu1 }
 0x50a   :  { %v5735_v40 = vadd.f32 %v11263_v39, %v10885_v47  ;;  %v15304_v52 = vadd.f32 %v14997_v32, %v5724_v38  ;;  %v16453_v38 = vld [vmem:[#allocation54_spill] sm:$0xff] }
 0x50b   :  { %v5726_v54 = vpop.f32.mrf.mxu0  ;;  %v15318_v7 = vpop.f32.mrf.mxu1  ;;  %v16454_v39 = vld [vmem:[#allocation26_spill] sm:$0xff] }
 0x50c   :  { %v5727_v49 = vadd.f32 %v10879_v53, %v5726_v54  ;;  %v15310_v45 = vadd.f32 %v10961_v36, %v5735_v40  ;;  %v10903_v53 = vadd.f32 %v16454_v39, %v16453_v38  ;;  %v11865_v40 = vld [vmem:[%s16105_s7 + $0x70] ss:$8 sps:$4 sm:$0xff]   ;;  %v11867_v54 = vld [vmem:[%s16105_s7 + $0x74] ss:$8 sps:$4 sm:$0xff]   ;;  %v11873_v38 = vld [vmem:[%s16105_s7 + $0xa4] ss:$8 sps:$4 sm:$0xff]  }
 0x50d   :  { %7649 = vmatmul.mubr.bf16.gmra.mxu0 %v15171_v9  ;;  %v15325_v9 = vpop.f32.mrf.mxu1  ;;  %7982 = vmatprep.subr.bf16.mxu1 %v11867_v54  ;;  %v11879_v54 = vld [vmem:[%s16105_s7 + $0x44] ss:$8 sps:$4 sm:$0xff]  }
 0x50e   :  { %7656 = vmatprep.mubr.bf16.mxu0 %v15174_v14  ;;  %v15314_v2 = vadd.f32 %v10955_v16, %v5727_v49  ;;  %7983 = vmatpush1.bf16.msra.mxu1 %v11865_v40 }
 0x515   :  { %v11266_v32 = vpop.f32.mrf.mxu0  ;;  %7657 = vmatmul.mubr.bf16.gmra.mxu0 %v15181_v50  ;;  %v10891_v50 = vadd.f32 %v14948_v1, %v14939_v15 }
 0x516   :  { %v5748_v51 = vadd.f32 %v11266_v32, %v14975_v43  ;;  %7664 = vmatprep.mubr.bf16.mxu0 %v15183_v56 }
 0x517   :  { %v5739_v60 = vpop.f32.mrf.mxu0  ;;  %v15333_v43 = vpop.f32.mrf.mxu1 }
 0x518   :  { %v5740_v14 = vadd.f32 %v14934_v55, %v5739_v60  ;;  %v15329_v33 = vadd.f32 %v15100_v34, %v5748_v51  ;;  %v10558_v55 = vcombine.high %v15140_v10, %v7277_v21 }
 0x519   :  { %v11267_v6 = vpop.f32.mrf.mxu0  ;;  %v15345_v19 = vpop.f32.mrf.mxu1 }
 0x51a   :  { %v5751_v62 = vadd.f32 %v11267_v6, %v10897_v61  ;;  %v15336_v56 = vadd.f32 %v15071_v26, %v5740_v14  ;;  %v10557_v26 = vcombine.low %v15140_v10, %v7277_v21  ;;  %v11862_v10 = vld [vmem:[%s16105_s7 + $0xb0] ss:$8 sps:$4 sm:$0xff]  }
 0x51b   :  { %v5742_v18 = vpop.f32.mrf.mxu0  ;;  %v15349_v1 = vpop.f32.mrf.mxu1 }
 0x51c   :  { %v5743_v0 = vadd.f32 %v10891_v50, %v5742_v18  ;;  %v15342_v34 = vadd.f32 %v15109_v31, %v5751_v62 }
 0x51d   :  { %7665 = vmatmul.mubr.bf16.gmra.mxu0 %v15189_v63  ;;  %v15352_v58 = vpop.f32.mrf.mxu1  ;;  %v10909_v63 = vadd.f32 %v15252_v46, %v15250_v48 }
 0x51e   :  { %7672 = vmatprep.mubr.bf16.mxu0 %v10558_v55  ;;  %v15347_v15 = vadd.f32 %v10967_v57, %v5743_v0 }
 0x525   :  { %v11270_v22 = vpop.f32.mrf.mxu0  ;;  %7673 = vmatmul.mubr.bf16.gmra.mxu0 %v10557_v26 }
 0x526   :  { %v5764_v3 = vadd.f32 %v11270_v22, %v15058_v29  ;;  %8183 = vmatprep.mubr.bf16.mxu0 %v16452_v13  ;;  %v11864_v29 = vld [vmem:[%s16105_s7 + $0xb4] ss:$8 sps:$4 sm:$0xff]  }
 0x527   :  { %v5755_v31 = vpop.f32.mrf.mxu0  ;;  %v15359_v25 = vpop.f32.mrf.mxu1  ;;  %8159 = vmatprep.subr.bf16.mxu0 %v11864_v29 }
 0x528   :  { %v5756_v37 = vadd.f32 %v15020_v59, %v5755_v31  ;;  %v15362_v27 = vadd.f32 %v15142_v5, %v5764_v3  ;;  %v10985_v59 = vadd.f32 %v15274_v12, %v15259_v30  ;;  %v16455_v5 = vld [vmem:[#allocation29_spill] sm:$0xff]  ;;  %8160 = vmatpush1.bf16.msra.mxu0 %v11862_v10 }
 0x529   :  { %v11271_v47 = vpop.f32.mrf.mxu0  ;;  %v15374_v46 = vpop.f32.mrf.mxu1  ;;  %8161 = vmatprep.subr.bf16.mxu0 %v11873_v38 }
 0x52a   :  { %v5767_v48 = vadd.f32 %v11271_v47, %v10909_v63  ;;  %v15377_v36 = vadd.f32 %v16455_v5, %v5756_v37  ;;  %v11868_v63 = vld [vmem:[%s16105_s7 + $0x60] ss:$8 sps:$4 sm:$0xff]  }
 0x52b   :  { %v5758_v16 = vpop.f32.mrf.mxu0  ;;  %v15385_v32 = vpop.f32.mrf.mxu1  ;;  %v11871_v47 = vld [vmem:[%s16105_s7 + $0xa0] ss:$8 sps:$4 sm:$0xff]  }
 0x52c   :  { %v5759_v49 = vadd.f32 %v10903_v53, %v5758_v16  ;;  %v6053_v30 = vadd.f32 %v10985_v59, %v5767_v48  ;;  %8162 = vmatpush1.bf16.msra.mxu0 %v11871_v47  ;;  %v11894_v47 = vld [vmem:[%s16105_s7 + $0x134] ss:$8 sps:$4 sm:$0xff]  }
 0x52d   :  { %v11282_v12 = vpop.f32.mrf.mxu0  ;;  %v15390_v60 = vpop.f32.mrf.mxu1 }
 0x52e   :  { %v15388_v51 = vadd.f32 %v11282_v12, %v15263_v23  ;;  %v15393_v61 = vadd.f32 %v15130_v17, %v5759_v49  ;;  %v11877_v49 = vld [vmem:[%s16105_s7 + $0x40] ss:$8 sps:$4 sm:$0xff]   ;;  %v11880_v12 = vld [vmem:[%s16105_s7 + $0x90] ss:$8 sps:$4 sm:$0xff]  }
 0x52f   :  { %v6090_v14 = vpop.f32.mrf.mxu0  ;;  %v15398_v21 = vpop.f32.mrf.mxu1 }
 0x530   :  { %v15396_v6 = vadd.f32 %v6090_v14, %v15270_v20 }
 0x531   :  { %v11283_v50 = vpop.f32.mrf.mxu0  ;;  %v15403_v18 = vpop.f32.mrf.mxu1 }
 0x532   :  { %v15401_v62 = vadd.f32 %v11283_v50, %v15276_v42 }
 0x533   :  { %v15405_v57 = vpop.f32.mrf.mxu0  ;;  %v15407_v23 = vpop.f32.mrf.mxu1 }
 0x535   :  { %v11286_v0 = vpop.f32.mrf.mxu0  ;;  %v15412_v55 = vpop.f32.mrf.mxu1 }
 0x536   :  { %v15410_v17 = vadd.f32 %v11286_v0, %v15295_v35  ;;  %v11870_v35 = vld [vmem:[%s16105_s7 + $0x64] ss:$8 sps:$4 sm:$0xff]  }
 0x537   :  { %v6106_v20 = vpop.f32.mrf.mxu0  ;;  %v15417_v3 = vpop.f32.mrf.mxu1  ;;  %7984 = vmatprep.subr.bf16.mxu1 %v11870_v35 }
 0x538   :  { %v15415_v26 = vadd.f32 %v6106_v20, %v15304_v52  ;;  %7985 = vmatpush1.bf16.msra.mxu1 %v11868_v63  ;;  %v11885_v20 = vld [vmem:[%s16105_s7 + $0x34] ss:$8 sps:$4 sm:$0xff]  }
 0x539   :  { %v11287_v22 = vpop.f32.mrf.mxu0  ;;  %v15430_v37 = vpop.f32.mrf.mxu1 }
 0x53a   :  { %v15420_v42 = vadd.f32 %v11287_v22, %v15310_v45  ;;  %v11888_v22 = vld [vmem:[%s16105_s7 + $0x84] ss:$8 sps:$4 sm:$0xff]  }
 0x53b   :  { %v15422_v31 = vpop.f32.mrf.mxu0  ;;  %v15444_v39 = vpop.f32.mrf.mxu1 }
 0x53d   :  { %v11290_v52 = vpop.f32.mrf.mxu0  ;;  %v15457_v5 = vpop.f32.mrf.mxu1 }
 0x53e   :  { %v15433_v10 = vadd.f32 %v11290_v52, %v15329_v33  ;;  %v11876_v33 = vld [vmem:[%s16105_s7 + $0x54] ss:$8 sps:$4 sm:$0xff]  }
 0x53f   :  { %v6122_v29 = vpop.f32.mrf.mxu0  ;;  %7986 = vmatprep.subr.bf16.mxu1 %v11876_v33  ;;  %v15477_v0 = vpop.f32.mrf.mxu1 }
 0x540   :  { %v15436_v45 = vadd.f32 %v6122_v29, %v15336_v56  ;;  %v11874_v56 = vld [vmem:[%s16105_s7 + $0x50] ss:$8 sps:$4 sm:$0xff]  }
 0x541   :  { %v11291_v53 = vpop.f32.mrf.mxu0  ;;  %7987 = vmatpush1.bf16.msra.mxu1 %v11874_v56  ;;  %v15492_v52 = vpop.f32.mrf.mxu1 }
 0x542   :  { %v15450_v59 = vadd.f32 %v11291_v53, %v15342_v34  ;;  %v11882_v34 = vld [vmem:[%s16105_s7 + $0x94] ss:$8 sps:$4 sm:$0xff]   ;;  %7988 = vmatprep.subr.bf16.mxu1 %v11879_v54 }
 0x543   :  { %v15455_v48 = vpop.f32.mrf.mxu0  ;;  %8163 = vmatprep.subr.bf16.mxu0 %v11882_v34  ;;  %v15497_v53 = vpop.f32.mrf.mxu1 }
 0x544   :  { %8164 = vmatpush1.bf16.msra.mxu0 %v11880_v12 }
 0x545   :  { %v11294_v40 = vpop.f32.mrf.mxu0  ;;  %7989 = vmatpush1.bf16.msra.mxu1 %v11877_v49  ;;  %8165 = vmatprep.subr.bf16.mxu0 %v11888_v22  ;;  %v15503_v49 = vpop.f32.mrf.mxu1 }
 0x546   :  { %v15466_v16 = vadd.f32 %v11294_v40, %v15362_v27  ;;  %8066 = vmatprep.subr.bf16.mxu1 %v11885_v20 }
 0x547   :  { %v6138_v14 = vpop.f32.mrf.mxu0 }
 0x548   :  { %v15475_v50 = vadd.f32 %v6138_v14, %v15377_v36  ;;  %v11886_v36 = vld [vmem:[%s16105_s7 + $0x80] ss:$8 sps:$4 sm:$0xff]   ;;  %v6094_v14 = vadd.f32 %v15405_v57, %v15282_v41 }
 0x549   :  { %v11295_v27 = vpop.f32.mrf.mxu0  ;;  %8166 = vmatpush1.bf16.msra.mxu0 %v11886_v36 }
 0x54a   :  { %v15485_v63 = vadd.f32 %v11295_v27, %v6053_v30  ;;  %8349 = vmatprep.subr.bf16.mxu0 %v11894_v47 }
 0x54b   :  { %v15490_v35 = vpop.f32.mrf.mxu0 }
 0x54d   :  { %v11014_v29 = vpop.f32.mrf.mxu0 }
 0x54f   :  { %v11015_v38 = vpop.f32.mrf.mxu0 }
 0x550   :  { %v11016_v30 = vadd.f32 %v11015_v38, %v11014_v29  ;;  %v15510_v29 = vpop.f32.mrf.mxu1 }
 0x551   :  { %v11017_v33 = vpop.f32.mrf.mxu0 }
 0x552   :  { %v6622_v56 = vadd.f32 %v11016_v30, %v15284_v44 }
 0x553   :  { %v11018_v40 = vpop.f32.mrf.mxu0 }
 0x554   :  { %v11019_v54 = vadd.f32 %v11018_v40, %v11017_v33  ;;  %v15501_v34 = vadd.f32 %v6622_v56, %v15396_v6  ;;  %v15516_v33 = vpop.f32.mrf.mxu1 }
 0x555   :  { %v11020_v12 = vpop.f32.mrf.mxu0 }
 0x556   :  { %v6625_v27 = vadd.f32 %v11019_v54, %v15301_v4  ;;  %v15522_v54 = vpop.f32.mrf.mxu1 }
 0x557   :  { %v11021_v20 = vpop.f32.mrf.mxu0 }
 0x558   :  { %v11022_v22 = vadd.f32 %v11021_v20, %v11020_v12  ;;  %v15508_v36 = vadd.f32 %v6625_v27, %v6094_v14  ;;  %v15528_v20 = vpop.f32.mrf.mxu1 }
 0x559   :  { %v11023_v44 = vpop.f32.mrf.mxu0 }
 0x55a   :  { %v6630_v47 = vadd.f32 %v15279_v24, %v11022_v22 }
 0x55b   :  { %v11024_v38 = vpop.f32.mrf.mxu0 }
 0x55c   :  { %v11025_v6 = vadd.f32 %v11024_v38, %v11023_v44  ;;  %v15514_v30 = vadd.f32 %v6630_v47, %v15388_v51 }
 0x55d   :  { %v11026_v56 = vpop.f32.mrf.mxu0 }
 0x55e   :  { %v6633_v41 = vadd.f32 %v15287_v28, %v11025_v6  ;;  %v6110_v28 = vadd.f32 %v15422_v31, %v15314_v2  ;;  %v15535_v6 = vpop.f32.mrf.mxu1 }
 0x55f   :  { %v11027_v4 = vpop.f32.mrf.mxu0 }
 0x560   :  { %v11028_v57 = vadd.f32 %v11027_v4, %v11026_v56  ;;  %v15520_v40 = vadd.f32 %v6633_v41, %v15401_v62 }
 0x561   :  { %v11029_v12 = vpop.f32.mrf.mxu0 }
 0x562   :  { %v6638_v24 = vadd.f32 %v11028_v57, %v15316_v11  ;;  %v15541_v57 = vpop.f32.mrf.mxu1 }
 0x563   :  { %v11030_v14 = vpop.f32.mrf.mxu0 }
 0x564   :  { %v11031_v27 = vadd.f32 %v11030_v14, %v11029_v12  ;;  %v15526_v51 = vadd.f32 %v6638_v24, %v15415_v26  ;;  %v15547_v14 = vpop.f32.mrf.mxu1 }
 0x565   :  { %v11032_v22 = vpop.f32.mrf.mxu0 }
 0x566   :  { %v6641_v44 = vadd.f32 %v11031_v27, %v15325_v9 }
 0x567   :  { %v11033_v62 = vpop.f32.mrf.mxu0 }
 0x568   :  { %v11034_v47 = vadd.f32 %v11033_v62, %v11032_v22  ;;  %v15533_v38 = vadd.f32 %v6641_v44, %v6110_v28  ;;  %v15553_v44 = vpop.f32.mrf.mxu1 }
 0x569   :  { %v11035_v11 = vpop.f32.mrf.mxu0 }
 0x56a   :  { %v6646_v56 = vadd.f32 %v15308_v8, %v11034_v47 }
 0x56b   :  { %v11036_v41 = vpop.f32.mrf.mxu0 }
 0x56c   :  { %v11037_v26 = vadd.f32 %v11036_v41, %v11035_v11  ;;  %v15539_v4 = vadd.f32 %v6646_v56, %v15410_v17  ;;  %v15560_v41 = vpop.f32.mrf.mxu1 }
 0x56d   :  { %v11038_v12 = vpop.f32.mrf.mxu0 }
 0x56e   :  { %v6649_v2 = vadd.f32 %v15318_v7, %v11037_v26  ;;  %v6126_v7 = vadd.f32 %v15455_v48, %v15347_v15 }
 0x56f   :  { %v11039_v9 = vpop.f32.mrf.mxu0 }
 0x570   :  { %v11040_v31 = vadd.f32 %v11039_v9, %v11038_v12  ;;  %v15545_v24 = vadd.f32 %v6649_v2, %v15420_v42  ;;  %v15566_v9 = vpop.f32.mrf.mxu1 }
 0x571   :  { %v11041_v27 = vpop.f32.mrf.mxu0 }
 0x572   :  { %v6654_v8 = vadd.f32 %v11040_v31, %v15345_v19 }
 0x573   :  { %v11042_v22 = vpop.f32.mrf.mxu0 }
 0x574   :  { %v11043_v28 = vadd.f32 %v11042_v22, %v11041_v27  ;;  %v15551_v17 = vadd.f32 %v6654_v8, %v15436_v45  ;;  %v15572_v8 = vpop.f32.mrf.mxu1 }
 0x575   :  { %v11044_v62 = vpop.f32.mrf.mxu0  ;;  %16458 = vst [vmem:[#allocation58_spill] sm:$0xff] %v15572_v8 }
 0x576   :  { %v6657_v47 = vadd.f32 %v11043_v28, %v15352_v58 }
 0x577   :  { %v11045_v42 = vpop.f32.mrf.mxu0 }
 0x578   :  { %v11046_v11 = vadd.f32 %v11045_v42, %v11044_v62  ;;  %v15558_v56 = vadd.f32 %v6657_v47, %v6126_v7  ;;  %v15578_v7 = vpop.f32.mrf.mxu1 }
 0x579   :  { %v11047_v19 = vpop.f32.mrf.mxu0  ;;  %16460 = vst [vmem:[#allocation30_spill] sm:$0xff] %v15578_v7 }
 0x57a   :  { %v6662_v26 = vadd.f32 %v15333_v43, %v11046_v11 }
 0x57b   :  { %v11048_v12 = vpop.f32.mrf.mxu0 }
 0x57c   :  { %v11049_v45 = vadd.f32 %v11048_v12, %v11047_v19  ;;  %v15564_v2 = vadd.f32 %v6662_v26, %v15433_v10  ;;  %v15585_v26 = vpop.f32.mrf.mxu1 }
 0x57d   :  { %v11050_v31 = vpop.f32.mrf.mxu0  ;;  %16462 = vst [vmem:[#allocation15_spill] sm:$0xff] %v15585_v26 }
 0x57e   :  { %16456 = vst [vmem:[#allocation44_spill] sm:$0xff] %v15564_v2  ;;  %v6665_v15 = vadd.f32 %v15349_v1, %v11049_v45  ;;  %v6142_v1 = vadd.f32 %v15490_v35, %v15393_v61  ;;  %v11092_v2 = vadd.f32 %v15403_v18, %v15398_v21  ;;  %v15631_v21 = vld [vmem:[%s16104_s6] ss:$0 sm:$0xff] }
 0x57f   :  { %v11051_v58 = vpop.f32.mrf.mxu0 }
 0x580   :  { %v11052_v48 = vadd.f32 %v11051_v58, %v11050_v31  ;;  %v15570_v27 = vadd.f32 %v6665_v15, %v15450_v59  ;;  %v15589_v15 = vpop.f32.mrf.mxu1 }
 0x581   :  { %v11053_v22 = vpop.f32.mrf.mxu0  ;;  %16463 = vst [vmem:[#allocation34_spill] sm:$0xff] %v15589_v15 }
 0x582   :  { %16457 = vst [vmem:[#allocation57_spill] sm:$0xff] %v15570_v27  ;;  %v6670_v43 = vadd.f32 %v11052_v48, %v15374_v46  ;;  %v15593_v48 = vpop.f32.mrf.mxu1 }
 0x583   :  { %v11054_v28 = vpop.f32.mrf.mxu0  ;;  %16464 = vst [vmem:[#allocation38_spill] sm:$0xff] %v15593_v48 }
 0x584   :  { %v11055_v62 = vadd.f32 %v11054_v28, %v11053_v22  ;;  %v15576_v10 = vadd.f32 %v6670_v43, %v15475_v50  ;;  %v15595_v28 = vpop.f32.mrf.mxu1 }
 0x585   :  { %v11056_v47 = vpop.f32.mrf.mxu0  ;;  %16465 = vst [vmem:[#allocation49_spill] sm:$0xff] %v15595_v28 }
 0x586   :  { %16459 = vst [vmem:[#allocation47_spill] sm:$0xff] %v15576_v10  ;;  %v6673_v42 = vadd.f32 %v11055_v62, %v15390_v60 }
 0x587   :  { %v11057_v59 = vpop.f32.mrf.mxu0 }
 0x588   :  { %v11058_v11 = vadd.f32 %v11057_v59, %v11056_v47  ;;  %v15583_v19 = vadd.f32 %v6673_v42, %v6142_v1  ;;  %v11132_v47 = vpop.f32.mrf.mxu1 }
 0x589   :  { %v11059_v46 = vpop.f32.mrf.mxu0 }
 0x58a   :  { %16461 = vst [vmem:[#allocation59_spill] sm:$0xff] %v15583_v19  ;;  %v6678_v12 = vadd.f32 %v15359_v25, %v11058_v11  ;;  %v11133_v42 = vpop.f32.mrf.mxu1 }
 0x58b   :  { %v11060_v45 = vpop.f32.mrf.mxu0 }
 0x58c   :  { %v11061_v50 = vadd.f32 %v11060_v45, %v11059_v46  ;;  %v6698_v31 = vadd.f32 %v6678_v12, %v15466_v16  ;;  %v11134_v12 = vadd.f32 %v11133_v42, %v11132_v47 }
 0x58d   :  { %v11330_v58 = vpop.f32.mrf.mxu0 }
 0x58e   :  { %v6681_v61 = vadd.f32 %v15385_v32, %v11061_v50 }
 0x58f   :  { %v7168_v35 = vpop.f32.mrf.mxu0 }
 0x590   :  { %v6699_v60 = vadd.f32 %v6681_v61, %v15485_v63  ;;  %v11135_v63 = vpop.f32.mrf.mxu1  ;;  %v7169_v42 = vadd.f32 %v11092_v2, %v7168_v35 }
 0x591   :  { %v11331_v22 = vpop.f32.mrf.mxu0 }
 0x592   :  { %v11136_v45 = vpop.f32.mrf.mxu1 }
 0x593   :  { %v7171_v43 = vpop.f32.mrf.mxu0  ;;  %v11137_v10 = vadd.f32 %v11136_v45, %v11135_v63 }
 0x594   :  { %v11354_v48 = vpop.f32.mrf.mxu1 }
 0x595   :  { %v15597_v62 = vpop.f32.mrf.mxu0 }
 0x596   :  { %v7715_v7 = vpop.f32.mrf.mxu1 }
 0x597   :  { %v15599_v25 = vpop.f32.mrf.mxu0 }
 0x599   :  { %v15601_v16 = vpop.f32.mrf.mxu0 }
 0x59b   :  { %v15603_v1 = vpop.f32.mrf.mxu0 }
 0x59d   :  { %v15605_v32 = vpop.f32.mrf.mxu0 }
 0x59f   :  { %v15607_v59 = vpop.f32.mrf.mxu0 }
 0x5a1   :  { %v15609_v11 = vpop.f32.mrf.mxu0 }
 0x5a2   :  { %16466 = vst [vmem:[#allocation33_spill] sm:$0xff] %v15609_v11 }
 0x5a3   :  { %v15611_v46 = vpop.f32.mrf.mxu0 }
 0x5a5   :  { %v11342_v50 = vpop.f32.mrf.mxu0 }
 0x5a6   :  { %v7225_v61 = vadd.f32 %v11342_v50, %v11134_v12  ;;  %v11095_v12 = vadd.f32 %v15412_v55, %v15407_v23  ;;  %v7231_v50 = vadd.f32 %v7169_v42, %v15501_v34 }
 0x5a7   :  { %v15613_v19 = vpop.f32.mrf.mxu0 }
 0x5a8   :  { %v15615_v28 = vadd.f32 %v7225_v61, %v6698_v31  ;;  %v11355_v31 = vpop.f32.mrf.mxu1  ;;  %v11098_v61 = vadd.f32 %v15430_v37, %v15417_v3  ;;  %v11101_v3 = vadd.f32 %v15457_v5, %v15444_v39 }
 0x5a9   :  { %v11343_v27 = vpop.f32.mrf.mxu0 }
 0x5aa   :  { %v7228_v15 = vadd.f32 %v11343_v27, %v11137_v10  ;;  %v7172_v27 = vadd.f32 %v11095_v12, %v7171_v43  ;;  %v7718_v35 = vpop.f32.mrf.mxu1  ;;  %v7177_v23 = vadd.f32 %v11330_v58, %v11098_v61 }
 0x5ab   :  { %v15617_v26 = vpop.f32.mrf.mxu0 }
 0x5ac   :  { %v15621_v11 = vadd.f32 %v7228_v15, %v6699_v60  ;;  %v15637_v42 = vpop.f32.mrf.mxu1  ;;  %v7233_v12 = vadd.f32 %v7177_v23, %v15514_v30 }
 0x5ad   :  { %v11166_v47 = vpop.f32.mrf.mxu0 }
 0x5af   :  { %v11167_v8 = vpop.f32.mrf.mxu0 }
 0x5b0   :  { %v11168_v63 = vadd.f32 %v11167_v8, %v11166_v47  ;;  %v7232_v8 = vadd.f32 %v7172_v27, %v15508_v36  ;;  %v11104_v27 = vadd.f32 %v15492_v52, %v15477_v0  ;;  %v11107_v0 = vadd.f32 %v15503_v49, %v15497_v53 }
 0x5b1   :  { %v11169_v45 = vpop.f32.mrf.mxu0 }
 0x5b2   :  { %v7716_v10 = vadd.f32 %v11168_v63, %v7715_v7 }
 0x5b3   :  { %v11170_v18 = vpop.f32.mrf.mxu0 }
 0x5b4   :  { %v7778_v2 = vadd.f32 %v7716_v10, %v7231_v50  ;;  %v11171_v15 = vadd.f32 %v11170_v18, %v11169_v45  ;;  %v7180_v45 = vadd.f32 %v11331_v22, %v11101_v3  ;;  %v7731_v18 = vpop.f32.mrf.mxu1 }
 0x5b5   :  { %v11172_v55 = vpop.f32.mrf.mxu0 }
 0x5b6   :  { %v7801_v34 = vadd.f32 %v15631_v21, %v7778_v2  ;;  %v7719_v60 = vadd.f32 %v11171_v15, %v7718_v35  ;;  %v7185_v2 = vadd.f32 %v11104_v27, %v15599_v25  ;;  %v7234_v30 = vadd.f32 %v7180_v45, %v15520_v40 }
 0x5b7   :  { %v11173_v7 = vpop.f32.mrf.mxu0 }
 0x5b8   :  { %v7817_v37 = vmax.f32 %v7801_v34, 0.0  ;;  %v7779_v43 = vadd.f32 %v7719_v60, %v7232_v8  ;;  %v11174_v47 = vadd.f32 %v11173_v7, %v11172_v55  ;;  %v11359_v34 = vpop.f32.mrf.mxu1  ;;  %v7235_v60 = vadd.f32 %v7185_v2, %v15526_v51  ;;  %v11889_v2 = vld [vmem:[%s16105_s7 + $0x20] ss:$8 sps:$4 sm:$0xff]  }
 0x5b9   :  { %v11175_v63 = vpop.f32.mrf.mxu0  ;;  %v7188_v7 = vadd.f32 %v11107_v0, %v15603_v1  ;;  %v11883_v1 = vld [vmem:[%s16105_s7 + $0x30] ss:$8 sps:$4 sm:$0xff]  }
 0x5ba   :  { %v10830_v58 = vpack.c.bf16 %v7817_v37, %v7817_v37  ;;  %v7802_v50 = vadd.f32 %v15631_v21, %v7779_v43  ;;  %v7724_v36 = vadd.f32 %v11354_v48, %v11174_v47 }
 0x5bb   :  { %v11176_v10 = vpop.f32.mrf.mxu0  ;;  %v7236_v45 = vadd.f32 %v7188_v7, %v15533_v38 }
 0x5bc   :  { %7897 = vst.msk [vmem:[#allocation4] sm:$0xf] %vm5157_vm6, %v10830_v58  ;;  %v7818_v39 = vmax.f32 %v7802_v50, 0.0  ;;  %v7780_v5 = vadd.f32 %v7724_v36, %v7233_v12  ;;  %v11177_v61 = vadd.f32 %v11176_v10, %v11175_v63  ;;  %v7734_v12 = vpop.f32.mrf.mxu1  ;;  %v11113_v36 = vadd.f32 %v15528_v20, %v15522_v54  ;;  %v11892_v54 = vld [vmem:[%s16105_s7 + $0x130] ss:$8 sps:$4 sm:$0xff]  }
 0x5bd   :  { %v11178_v15 = vpop.f32.mrf.mxu0 }
 0x5be   :  { %v10831_v22 = vpack.c.bf16 %v7818_v39, %v7818_v39  ;;  %v7803_v35 = vadd.f32 %v15631_v21, %v7780_v5  ;;  %v7727_v23 = vadd.f32 %v11355_v31, %v11177_v61  ;;  %v11110_v31 = vadd.f32 %v15516_v33, %v15510_v29  ;;  %v11891_v33 = vld [vmem:[%s16105_s7 + $0x24] ss:$8 sps:$4 sm:$0xff]   ;;  %v15669_v38 = vpop.f32.mrf.mxu1 }
 0x5bf   :  { %v11179_v48 = vpop.f32.mrf.mxu0  ;;  %v7196_v61 = vadd.f32 %v15601_v16, %v11113_v36  ;;  %v11897_v16 = vld [vmem:[%s16105_s7 + $0x14] ss:$8 sps:$4 sm:$0xff]  }
 0x5c0   :  { %7898 = vst.msk [vmem:[#allocation4 + $0x4] sm:$0xf] %vm5157_vm6, %v10831_v22  ;;  %v7819_v52 = vmax.f32 %v7803_v35, 0.0  ;;  %v7781_v55 = vadd.f32 %v7727_v23, %v7234_v30  ;;  %v11180_v8 = vadd.f32 %v11179_v48, %v11178_v15  ;;  %v7193_v63 = vadd.f32 %v15597_v62, %v11110_v31  ;;  %v11900_v35 = vld [vmem:[%s16105_s7 + $0x124] ss:$8 sps:$4 sm:$0xff]  }
 0x5c1   :  { %v11181_v25 = vpop.f32.mrf.mxu0  ;;  %v11116_v23 = vadd.f32 %v15541_v57, %v15535_v6  ;;  %v11895_v6 = vld [vmem:[%s16105_s7 + $0x10] ss:$8 sps:$4 sm:$0xff]   ;;  %v11898_v57 = vld [vmem:[%s16105_s7 + $0x120] ss:$8 sps:$4 sm:$0xff]  }
 0x5c2   :  { %v10832_v40 = vpack.c.bf16 %v7819_v52, %v7819_v52  ;;  %v7804_v3 = vadd.f32 %v15631_v21, %v7781_v55  ;;  %v7732_v37 = vadd.f32 %v11180_v8, %v7731_v18  ;;  %v7237_v20 = vadd.f32 %v7193_v63, %v15539_v4 }
 0x5c3   :  { %v11182_v43 = vpop.f32.mrf.mxu0  ;;  %v7238_v8 = vadd.f32 %v7196_v61, %v15545_v24  ;;  %v11903_v24 = vld [vmem:[%s16105_s7 + $0x4] ss:$8 sps:$4 sm:$0xff]  }
 0x5c4   :  { %7899 = vst.msk [vmem:[#allocation4 + $0x8] sm:$0xf] %vm5157_vm6, %v10832_v40  ;;  %v7820_v53 = vmax.f32 %v7804_v3, 0.0  ;;  %v7782_v49 = vadd.f32 %v7732_v37, %v7235_v60  ;;  %v11183_v47 = vadd.f32 %v11182_v43, %v11181_v25  ;;  %v7201_v60 = vadd.f32 %v11116_v23, %v15607_v59  ;;  %v11906_v59 = vld [vmem:[%s16105_s7 + $0x114] ss:$8 sps:$4 sm:$0xff]  }
 0x5c5   :  { %v11184_v51 = vpop.f32.mrf.mxu0  ;;  %v11119_v37 = vadd.f32 %v15553_v44, %v15547_v14  ;;  %v11901_v14 = vld [vmem:[%s16105_s7] ss:$8 sps:$4 sm:$0xff]   ;;  %v11904_v44 = vld [vmem:[%s16105_s7 + $0x110] ss:$8 sps:$4 sm:$0xff]  }
 0x5c6   :  { %v10833_v58 = vpack.c.bf16 %v7820_v53, %v7820_v53  ;;  %v7805_v50 = vadd.f32 %v15631_v21, %v7782_v49  ;;  %v7735_v29 = vadd.f32 %v11183_v47, %v7734_v12  ;;  %v7239_v47 = vadd.f32 %v7201_v60, %v15551_v17  ;;  %v11909_v17 = vld [vmem:[%s16105_s7 + $0xf4] ss:$8 sps:$4 sm:$0xff]  }
 0x5c7   :  { %v11185_v27 = vpop.f32.mrf.mxu0  ;;  %v7922_v62 = vld [vmem:[#allocation4 + $0x4] sm:$0xf]  ;;  %v7204_v12 = vadd.f32 %v11119_v37, %v15611_v46  ;;  %v11912_v46 = vld [vmem:[%s16105_s7 + $0x104] ss:$8 sps:$4 sm:$0xff]  }
 0x5c8   :  { %7900 = vst.msk [vmem:[#allocation4 + $0xc] sm:$0xf] %vm5157_vm6, %v10833_v58  ;;  %v7821_v10 = vmax.f32 %v7805_v50, 0.0  ;;  %v7783_v39 = vadd.f32 %v7735_v29, %v7236_v45  ;;  %v11186_v5 = vadd.f32 %v11185_v27, %v11184_v51  ;;  %10613 = vmatmul.mubr.msk.bf16.vlgmr.msra.gmra.mxu1 %vm1980_vm5, %v7922_v62  ;;  %v11122_v58 = vadd.f32 %v15566_v9, %v15560_v41  ;;  %v11910_v41 = vld [vmem:[%s16105_s7 + $0x100] ss:$8 sps:$4 sm:$0xff]  }
 0x5c9   :  { %8067 = vmatpush1.bf16.msra.mxu1 %v11883_v1  ;;  %v11187_v18 = vpop.f32.mrf.mxu0  ;;  %8090 = vmatprep.mubr.bf16.mxu1 %v16452_v13 }
 0x5ca   :  { %v10834_v15 = vpack.c.bf16 %v7821_v10, %v7821_v10  ;;  %v7806_v30 = vadd.f32 %v15631_v21, %v7783_v39  ;;  %v7740_v22 = vadd.f32 %v15637_v42, %v11186_v5  ;;  %8068 = vmatprep.subr.bf16.mxu1 %v11891_v33  ;;  %v7747_v42 = vpop.f32.mrf.mxu1  ;;  %v7209_v62 = vadd.f32 %v15605_v32, %v11122_v58  ;;  %v11907_v5 = vld [vmem:[%s16105_s7 + $0xf0] ss:$8 sps:$4 sm:$0xff]   ;;  %v11918_v32 = vld [vmem:[%s16105_s7 + $0x1b4] ss:$8 sps:$4 sm:$0xff]   ;;  %v16475_v58 = vld [vmem:[#allocation49_spill] sm:$0xff] }
 0x5cb   :  { %v11188_v48 = vpop.f32.mrf.mxu0  ;;  %v8099_v0 = vld [vmem:[#allocation4 + $0x8] sm:$0xf]  ;;  %v7240_v10 = vadd.f32 %v7204_v12, %v15558_v56  ;;  %v11915_v56 = vld [vmem:[%s16105_s7 + $0xe4] ss:$8 sps:$4 sm:$0xff]  }
 0x5cc   :  { %7901 = vst.msk [vmem:[#allocation4 + $0x10] sm:$0xf] %vm5157_vm6, %v10834_v15  ;;  %v7822_v4 = vmax.f32 %v7806_v30, 0.0  ;;  %v7784_v52 = vadd.f32 %v7740_v22, %v7237_v20  ;;  %v11189_v55 = vadd.f32 %v11188_v48, %v11187_v18  ;;  %10631 = vmatmul.mubr.msk.bf16.vlgmr.msra.gmra.mxu0 %vm1980_vm5, %v8099_v0  ;;  %v15711_v49 = vpop.f32.mrf.mxu1  ;;  %v7913_v30 = vld [vmem:[#allocation4] sm:$0xf]  ;;  %v16469_v48 = vld [vmem:[#allocation44_spill] sm:$0xff] }
 0x5cd   :  { %8069 = vmatpush1.bf16.msra.mxu1 %v11889_v2  ;;  %8350 = vmatpush1.bf16.msra.mxu0 %v11892_v54  ;;  %v11190_v25 = vpop.f32.mrf.mxu0  ;;  %v16467_v2 = vld [vmem:[#allocation58_spill] sm:$0xff]  ;;  %v7241_v0 = vadd.f32 %v7209_v62, %v16469_v48  ;;  %v16476_v62 = vld [vmem:[#allocation47_spill] sm:$0xff] }
 0x5ce   :  { %v10835_v7 = vpack.c.bf16 %v7822_v4, %v7822_v4  ;;  %v7807_v40 = vadd.f32 %v15631_v21, %v7784_v52  ;;  %v7743_v3 = vadd.f32 %v11359_v34, %v11189_v55  ;;  %8070 = vmatprep.subr.bf16.mxu1 %v11897_v16  ;;  %8351 = vmatprep.subr.bf16.mxu0 %v11900_v35  ;;  %v7750_v27 = vpop.f32.mrf.mxu1  ;;  %v16468_v54 = vld [vmem:[#allocation30_spill] sm:$0xff]  ;;  %v16470_v4 = vld [vmem:[#allocation33_spill] sm:$0xff] }
 0x5cf   :  { %v11191_v31 = vpop.f32.mrf.mxu0  ;;  %8373 = vmatprep.mubr.bf16.mxu0 %v16452_v13  ;;  %v11125_v20 = vadd.f32 %v16468_v54, %v16467_v2  ;;  %v11931_v48 = vld [vmem:[%s16105_s7 + $0x170] ss:$8 sps:$4 sm:$0xff]  }
 0x5d0   :  { %7902 = vst.msk [vmem:[#allocation4 + $0x14] sm:$0xf] %vm5157_vm6, %v10835_v7  ;;  %v7823_v43 = vmax.f32 %v7807_v40, 0.0  ;;  %v7785_v34 = vadd.f32 %v7743_v3, %v7238_v8  ;;  %v11192_v53 = vadd.f32 %v11191_v31, %v11190_v25  ;;  %v15750_v23 = vpop.f32.mrf.mxu1  ;;  %v11916_v8 = vld [vmem:[%s16105_s7 + $0x1b0] ss:$8 sps:$4 sm:$0xff]  }
 0x5d1   :  { %8071 = vmatpush1.bf16.msra.mxu1 %v11895_v6  ;;  %8352 = vmatpush1.bf16.msra.mxu0 %v11898_v57  ;;  %v11193_v63 = vpop.f32.mrf.mxu0  ;;  %v7212_v52 = vadd.f32 %v16470_v4, %v11125_v20  ;;  %v11921_v57 = vld [vmem:[%s16105_s7 + $0xd4] ss:$8 sps:$4 sm:$0xff]   ;;  %v11924_v7 = vld [vmem:[%s16105_s7 + $0x1a4] ss:$8 sps:$4 sm:$0xff]  }
 0x5d2   :  { %v10836_v51 = vpack.c.bf16 %v7823_v43, %v7823_v43  ;;  %v7808_v1 = vadd.f32 %v15631_v21, %v7785_v34  ;;  %v7748_v45 = vadd.f32 %v11192_v53, %v7747_v42  ;;  %8072 = vmatprep.subr.bf16.mxu1 %v11903_v24  ;;  %8353 = vmatprep.subr.bf16.mxu0 %v11906_v59  ;;  %v11913_v42 = vld [vmem:[%s16105_s7 + $0xe0] ss:$8 sps:$4 sm:$0xff]   ;;  %v16471_v40 = vld [vmem:[#allocation15_spill] sm:$0xff]  ;;  %v16472_v3 = vld [vmem:[#allocation34_spill] sm:$0xff]  ;;  %v7763_v34 = vpop.f32.mrf.mxu1 }
 0x5d3   :  { %v11194_v50 = vpop.f32.mrf.mxu0  ;;  %v11128_v24 = vadd.f32 %v16472_v3, %v16471_v40  ;;  %v8289_v37 = vld [vmem:[#allocation4 + $0x10] sm:$0xf]  ;;  %v16473_v53 = vld [vmem:[#allocation57_spill] sm:$0xff] }
 0x5d4   :  { %7903 = vst.msk [vmem:[#allocation4 + $0x18] sm:$0xf] %vm5157_vm6, %v10836_v51  ;;  %v7824_v29 = vmax.f32 %v7808_v1, 0.0  ;;  %v7786_v33 = vadd.f32 %v7748_v45, %v7239_v47  ;;  %v11195_v36 = vadd.f32 %v11194_v50, %v11193_v63  ;;  %v7242_v47 = vadd.f32 %v7212_v52, %v16473_v53  ;;  %v11937_v3 = vld [vmem:[%s16105_s7 + $0x160] ss:$8 sps:$4 sm:$0xff]  }
 0x5d5   :  { %8073 = vmatpush1.bf16.msra.mxu1 %v11901_v14  ;;  %8354 = vmatpush1.bf16.msra.mxu0 %v11904_v44  ;;  %v11196_v39 = vpop.f32.mrf.mxu0  ;;  %v7217_v12 = vadd.f32 %v11128_v24, %v15613_v19  ;;  %v11919_v14 = vld [vmem:[%s16105_s7 + $0xd0] ss:$8 sps:$4 sm:$0xff]   ;;  %v11922_v44 = vld [vmem:[%s16105_s7 + $0x1a0] ss:$8 sps:$4 sm:$0xff]   ;;  %v11927_v19 = vld [vmem:[%s16105_s7 + $0xc4] ss:$8 sps:$4 sm:$0xff]  }
 0x5d6   :  { %v10837_v9 = vpack.c.bf16 %v7824_v29, %v7824_v29  ;;  %v7809_v61 = vadd.f32 %v15631_v21, %v7786_v33  ;;  %v7751_v18 = vadd.f32 %v11195_v36, %v7750_v27  ;;  %8254 = vmatprep.subr.bf16.mxu1 %v11909_v17  ;;  %8355 = vmatprep.subr.bf16.mxu0 %v11912_v46  ;;  %v11930_v17 = vld [vmem:[%s16105_s7 + $0x194] ss:$8 sps:$4 sm:$0xff]   ;;  %v15793_v27 = vpop.f32.mrf.mxu1  ;;  %v11940_v24 = vld [vmem:[%s16105_s7 + $0x230] ss:$8 sps:$4 sm:$0xff]  }
 0x5d7   :  { %v11197_v15 = vpop.f32.mrf.mxu0  ;;  %v16474_v46 = vld [vmem:[#allocation38_spill] sm:$0xff] }
 0x5d8   :  { %7904 = vst.msk [vmem:[#allocation4 + $0x1c] sm:$0xf] %vm5157_vm6, %v10837_v9  ;;  %v7825_v22 = vmax.f32 %v7809_v61, 0.0  ;;  %v7787_v16 = vadd.f32 %v7751_v18, %v7240_v10  ;;  %v11198_v35 = vadd.f32 %v11197_v15, %v11196_v39  ;;  %10622 = vmatmul.mubr.msk.bf16.vlgmr.msra.gmra.mxu1 %vm1980_vm5, %v7913_v30  ;;  %v11131_v50 = vadd.f32 %v16475_v58, %v16474_v46  ;;  %v11928_v9 = vld [vmem:[%s16105_s7 + $0x190] ss:$8 sps:$4 sm:$0xff]   ;;  %v7766_v30 = vpop.f32.mrf.mxu1 }
 0x5d9   :  { %8255 = vmatpush1.bf16.msra.mxu1 %v11907_v5  ;;  %8356 = vmatpush1.bf16.msra.mxu0 %v11910_v41  ;;  %v11199_v55 = vpop.f32.mrf.mxu0  ;;  %v7243_v10 = vadd.f32 %v7217_v12, %v16476_v62  ;;  %v11925_v41 = vld [vmem:[%s16105_s7 + $0xc0] ss:$8 sps:$4 sm:$0xff]   ;;  %v11952_v58 = vld [vmem:[%s16105_s7 + $0x210] ss:$8 sps:$4 sm:$0xff]   ;;  %v11963_v62 = vld [vmem:[%s16105_s7 + $0x1e4] ss:$8 sps:$4 sm:$0xff]  }
 0x5da   :  { %v10838_v60 = vpack.c.bf16 %v7825_v22, %v7825_v22  ;;  %v7810_v25 = vadd.f32 %v15631_v21, %v7787_v16  ;;  %v7756_v6 = vadd.f32 %v15669_v38, %v11198_v35  ;;  %8256 = vmatprep.subr.bf16.mxu1 %v11915_v56  ;;  %8539 = vmatprep.subr.bf16.mxu0 %v11918_v32  ;;  %v11936_v32 = vld [vmem:[%s16105_s7 + $0x184] ss:$8 sps:$4 sm:$0xff]   ;;  %v16477_v22 = vld [vmem:[#allocation59_spill] sm:$0xff]  ;;  %v11949_v46 = vld [vmem:[%s16105_s7 + $0x140] ss:$8 sps:$4 sm:$0xff]  }
 0x5db   :  { %v11200_v59 = vpop.f32.mrf.mxu0  ;;  %8278 = vmatprep.mubr.bf16.mxu1 %v16452_v13  ;;  %v7220_v39 = vadd.f32 %v11131_v50, %v15617_v26  ;;  %v11933_v26 = vld [vmem:[%s16105_s7 + $0x174] ss:$8 sps:$4 sm:$0xff]   ;;  %v8479_v53 = vld [vmem:[#allocation4 + $0x18] sm:$0xf] }
 0x5dc   :  { %7905 = vst.msk [vmem:[#allocation4 + $0x20] sm:$0xf] %vm5157_vm6, %v10838_v60  ;;  %v7826_v38 = vmax.f32 %v7810_v25, 0.0  ;;  %v7788_v31 = vadd.f32 %v7756_v6, %v7241_v0  ;;  %v11201_v43 = vadd.f32 %v11200_v59, %v11199_v55  ;;  %10649 = vmatmul.mubr.msk.bf16.vlgmr.msra.gmra.mxu0 %vm1980_vm5, %v8289_v37  ;;  %v11934_v0 = vld [vmem:[%s16105_s7 + $0x180] ss:$8 sps:$4 sm:$0xff]  }
 0x5dd   :  { %8257 = vmatpush1.bf16.msra.mxu1 %v11913_v42  ;;  %8540 = vmatpush1.bf16.msra.mxu0 %v11916_v8  ;;  %v11202_v63 = vpop.f32.mrf.mxu0  ;;  %v7244_v16 = vadd.f32 %v7220_v39, %v16477_v22  ;;  %v11939_v42 = vld [vmem:[%s16105_s7 + $0x164] ss:$8 sps:$4 sm:$0xff]   ;;  %v11942_v8 = vld [vmem:[%s16105_s7 + $0x234] ss:$8 sps:$4 sm:$0xff]   ;;  %v11979_v22 = vld [vmem:[%s16105_s7 + $0x270] ss:$8 sps:$4 sm:$0xff]  }
 0x5de   :  { %v10839_v51 = vpack.c.bf16 %v7826_v38, %v7826_v38  ;;  %v7811_v1 = vadd.f32 %v15631_v21, %v7788_v31  ;;  %v7759_v45 = vadd.f32 %v15711_v49, %v11201_v43  ;;  %8258 = vmatprep.subr.bf16.mxu1 %v11921_v57  ;;  %8541 = vmatprep.subr.bf16.mxu0 %v11924_v7  ;;  %v8194_v25 = vld [vmem:[#allocation4 + $0xc] sm:$0xf]  ;;  %v11948_v43 = vld [vmem:[%s16105_s7 + $0x224] ss:$8 sps:$4 sm:$0xff]  }
 0x5df   :  { %v11203_v29 = vpop.f32.mrf.mxu0  ;;  %8563 = vmatprep.mubr.bf16.mxu0 %v16452_v13  ;;  %v11945_v31 = vld [vmem:[%s16105_s7 + $0x154] ss:$8 sps:$4 sm:$0xff]   ;;  %v8384_v39 = vld [vmem:[#allocation4 + $0x14] sm:$0xf] }
 0x5e0   :  { %7906 = vst.msk [vmem:[#allocation4 + $0x24] sm:$0xf] %vm5157_vm6, %v10839_v51  ;;  %v7827_v33 = vmax.f32 %v7811_v1, 0.0  ;;  %v7789_v49 = vadd.f32 %v7759_v45, %v7242_v47  ;;  %v11204_v36 = vadd.f32 %v11203_v29, %v11202_v63  ;;  %v11943_v63 = vld [vmem:[%s16105_s7 + $0x150] ss:$8 sps:$4 sm:$0xff]  }
 0x5e1   :  { %8259 = vmatpush1.bf16.msra.mxu1 %v11919_v14  ;;  %8542 = vmatpush1.bf16.msra.mxu0 %v11922_v44  ;;  %v11205_v5 = vpop.f32.mrf.mxu0  ;;  %v11946_v14 = vld [vmem:[%s16105_s7 + $0x220] ss:$8 sps:$4 sm:$0xff]   ;;  %v11954_v45 = vld [vmem:[%s16105_s7 + $0x214] ss:$8 sps:$4 sm:$0xff]  }
 0x5e2   :  { %v10840_v61 = vpack.c.bf16 %v7827_v33, %v7827_v33  ;;  %v7812_v18 = vadd.f32 %v15631_v21, %v7789_v49  ;;  %v7764_v56 = vadd.f32 %v11204_v36, %v7763_v34  ;;  %8260 = vmatprep.subr.bf16.mxu1 %v11927_v19  ;;  %8543 = vmatprep.subr.bf16.mxu0 %v11930_v17  ;;  %v11957_v33 = vld [vmem:[%s16105_s7 + $0x1f4] ss:$8 sps:$4 sm:$0xff]   ;;  %v11955_v36 = vld [vmem:[%s16105_s7 + $0x1f0] ss:$8 sps:$4 sm:$0xff]  }
 0x5e3   :  { %v11206_v2 = vpop.f32.mrf.mxu0 }
 0x5e4   :  { %7907 = vst.msk [vmem:[#allocation4 + $0x28] sm:$0xf] %vm5157_vm6, %v10840_v61  ;;  %v7828_v54 = vmax.f32 %v7812_v18, 0.0  ;;  %v7790_v20 = vadd.f32 %v7764_v56, %v7243_v10  ;;  %v11207_v15 = vadd.f32 %v11206_v2, %v11205_v5  ;;  %v11966_v10 = vld [vmem:[%s16105_s7 + $0x2b4] ss:$8 sps:$4 sm:$0xff]  }
 0x5e5   :  { %8261 = vmatpush1.bf16.msra.mxu1 %v11925_v41  ;;  %8544 = vmatpush1.bf16.msra.mxu0 %v11928_v9  ;;  %v11208_v35 = vpop.f32.mrf.mxu0  ;;  %v11961_v5 = vld [vmem:[%s16105_s7 + $0x1e0] ss:$8 sps:$4 sm:$0xff]   ;;  %v11964_v41 = vld [vmem:[%s16105_s7 + $0x2b0] ss:$8 sps:$4 sm:$0xff]   ;;  %v11969_v9 = vld [vmem:[%s16105_s7 + $0x1d4] ss:$8 sps:$4 sm:$0xff]  }
 0x5e6   :  { %v10841_v4 = vpack.c.bf16 %v7828_v54, %v7828_v54  ;;  %v7813_v52 = vadd.f32 %v15631_v21, %v7790_v20  ;;  %v7767_v55 = vadd.f32 %v11207_v15, %v7766_v30  ;;  %8444 = vmatprep.subr.bf16.mxu1 %v11933_v26  ;;  %8545 = vmatprep.subr.bf16.mxu0 %v11936_v32  ;;  %v11972_v61 = vld [vmem:[%s16105_s7 + $0x2a4] ss:$8 sps:$4 sm:$0xff]   ;;  %v8669_v18 = vld [vmem:[#allocation4 + $0x20] sm:$0xf]  ;;  %v11970_v26 = vld [vmem:[%s16105_s7 + $0x2a0] ss:$8 sps:$4 sm:$0xff]  }
 0x5e7   :  { %v11209_v60 = vpop.f32.mrf.mxu0  ;;  %v11967_v56 = vld [vmem:[%s16105_s7 + $0x1d0] ss:$8 sps:$4 sm:$0xff]   ;;  %v11975_v32 = vld [vmem:[%s16105_s7 + $0x1c4] ss:$8 sps:$4 sm:$0xff]   ;;  %v11978_v2 = vld [vmem:[%s16105_s7 + $0x294] ss:$8 sps:$4 sm:$0xff]  }
 0x5e8   :  { %7908 = vst.msk [vmem:[#allocation4 + $0x2c] sm:$0xf] %vm5157_vm6, %v10841_v4  ;;  %v7829_v6 = vmax.f32 %v7813_v52, 0.0  ;;  %v7791_v57 = vadd.f32 %v7767_v55, %v7244_v16  ;;  %v11210_v7 = vadd.f32 %v11209_v60, %v11208_v35  ;;  %10640 = vmatmul.mubr.msk.bf16.vlgmr.msra.gmra.mxu1 %vm1980_vm5, %v8194_v25  ;;  %v11973_v54 = vld [vmem:[%s16105_s7 + $0x1c0] ss:$8 sps:$4 sm:$0xff]  }
 0x5e9   :  { %8445 = vmatpush1.bf16.msra.mxu1 %v11931_v48  ;;  %8546 = vmatpush1.bf16.msra.mxu0 %v11934_v0  ;;  %v11211_v40 = vpop.f32.mrf.mxu0  ;;  %v11976_v20 = vld [vmem:[%s16105_s7 + $0x290] ss:$8 sps:$4 sm:$0xff]   ;;  %v11981_v15 = vld [vmem:[%s16105_s7 + $0x274] ss:$8 sps:$4 sm:$0xff]   ;;  %v11984_v30 = vld [vmem:[%s16105_s7 + $0x284] ss:$8 sps:$4 sm:$0xff]  }
 0x5ea   :  { %v10842_v59 = vpack.c.bf16 %v7829_v6, %v7829_v6  ;;  %v7814_v37 = vadd.f32 %v15631_v21, %v7791_v57  ;;  %v7772_v38 = vadd.f32 %v15750_v23, %v11210_v7  ;;  %8446 = vmatprep.subr.bf16.mxu1 %v11939_v42  ;;  %8729 = vmatprep.subr.bf16.mxu0 %v11942_v8  ;;  %v11982_v16 = vld [vmem:[%s16105_s7 + $0x280] ss:$8 sps:$4 sm:$0xff]   ;;  %v11987_v35 = vld [vmem:[%s16105_s7 + $0x264] ss:$8 sps:$4 sm:$0xff]   ;;  %v11990_v48 = vld [vmem:[%s16105_s7 + $0x334] ss:$8 sps:$4 sm:$0xff]  }
 0x5eb   :  { %v11212_v34 = vpop.f32.mrf.mxu0  ;;  %8468 = vmatprep.mubr.bf16.mxu1 %v16452_v13  ;;  %v8574_v0 = vld [vmem:[#allocation4 + $0x1c] sm:$0xf]  ;;  %v11985_v4 = vld [vmem:[%s16105_s7 + $0x260] ss:$8 sps:$4 sm:$0xff]   ;;  %v11988_v52 = vld [vmem:[%s16105_s7 + $0x330] ss:$8 sps:$4 sm:$0xff]  }
 0x5ec   :  { %7909 = vst.msk [vmem:[#allocation4 + $0x30] sm:$0xf] %vm5157_vm6, %v10842_v59  ;;  %v7830_v47 = vmax.f32 %v7814_v37, 0.0  ;;  %v7792_v12 = vadd.f32 %v7772_v38, %v15615_v28  ;;  %v11213_v23 = vadd.f32 %v11212_v34, %v11211_v40  ;;  %10667 = vmatmul.mubr.msk.bf16.vlgmr.msra.gmra.mxu0 %vm1980_vm5, %v8479_v53  ;;  %v11951_v28 = vld [vmem:[%s16105_s7 + $0x144] ss:$8 sps:$4 sm:$0xff]  }
 0x5ed   :  { %8447 = vmatpush1.bf16.msra.mxu1 %v11937_v3  ;;  %8730 = vmatpush1.bf16.msra.mxu0 %v11940_v24  ;;  %v11993_v55 = vld [vmem:[%s16105_s7 + $0x254] ss:$8 sps:$4 sm:$0xff]   ;;  %v11996_v42 = vld [vmem:[%s16105_s7 + $0x324] ss:$8 sps:$4 sm:$0xff]   ;;  %v8859_v8 = vld [vmem:[#allocation4 + $0x28] sm:$0xf] }
 0x5ee   :  { %v10843_v44 = vpack.c.bf16 %v7830_v47, %v7830_v47  ;;  %v7815_v51 = vadd.f32 %v15631_v21, %v7792_v12  ;;  %v7775_v1 = vadd.f32 %v15793_v27, %v11213_v23  ;;  %8448 = vmatprep.subr.bf16.mxu1 %v11945_v31  ;;  %8731 = vmatprep.subr.bf16.mxu0 %v11948_v43  ;;  %v11991_v60 = vld [vmem:[%s16105_s7 + $0x250] ss:$8 sps:$4 sm:$0xff]   ;;  %v11994_v25 = vld [vmem:[%s16105_s7 + $0x320] ss:$8 sps:$4 sm:$0xff]   ;;  %v11999_v6 = vld [vmem:[%s16105_s7 + $0x244] ss:$8 sps:$4 sm:$0xff]  }
 0x5ef   :  { %8753 = vmatprep.mubr.bf16.mxu0 %v16452_v13  ;;  %v12002_v57 = vld [vmem:[%s16105_s7 + $0x314] ss:$8 sps:$4 sm:$0xff]   ;;  %v11997_v7 = vld [vmem:[%s16105_s7 + $0x240] ss:$8 sps:$4 sm:$0xff]   ;;  %v12000_v40 = vld [vmem:[%s16105_s7 + $0x310] ss:$8 sps:$4 sm:$0xff]  }
 0x5f0   :  { %7910 = vst.msk [vmem:[#allocation4 + $0x34] sm:$0xf] %vm5157_vm6, %v10843_v44  ;;  %v7831_v19 = vmax.f32 %v7815_v51, 0.0  ;;  %v7793_v17 = vadd.f32 %v7775_v1, %v15621_v11  ;;  %v11960_v11 = vld [vmem:[%s16105_s7 + $0x204] ss:$8 sps:$4 sm:$0xff]  }
 0x5f1   :  { %8449 = vmatpush1.bf16.msra.mxu1 %v11943_v63  ;;  %8732 = vmatpush1.bf16.msra.mxu0 %v11946_v14  ;;  %v12005_v3 = vld [vmem:[%s16105_s7 + $0x2f4] ss:$8 sps:$4 sm:$0xff]   ;;  %v12008_v24 = vld [vmem:[%s16105_s7 + $0x304] ss:$8 sps:$4 sm:$0xff]   ;;  %v12003_v59 = vld [vmem:[%s16105_s7 + $0x2f0] ss:$8 sps:$4 sm:$0xff]  }
 0x5f2   :  { %v10844_v50 = vpack.c.bf16 %v7831_v19, %v7831_v19  ;;  %v7816_v29 = vadd.f32 %v15631_v21, %v7793_v17  ;;  %8450 = vmatprep.subr.bf16.mxu1 %v11951_v28  ;;  %8733 = vmatprep.subr.bf16.mxu0 %v11954_v45  ;;  %v11958_v21 = vld [vmem:[%s16105_s7 + $0x200] ss:$8 sps:$4 sm:$0xff]   ;;  %v12011_v38 = vld [vmem:[%s16105_s7 + $0x2e4] ss:$8 sps:$4 sm:$0xff]   ;;  %v12014_v31 = vld [vmem:[%s16105_s7 + $0x3b4] ss:$8 sps:$4 sm:$0xff]  }
 0x5f3   :  { %v12006_v37 = vld [vmem:[%s16105_s7 + $0x300] ss:$8 sps:$4 sm:$0xff]   ;;  %v8764_v43 = vld [vmem:[#allocation4 + $0x24] sm:$0xf]  ;;  %v12012_v53 = vld [vmem:[%s16105_s7 + $0x3b0] ss:$8 sps:$4 sm:$0xff]  }
 0x5f4   :  { %7911 = vst.msk [vmem:[#allocation4 + $0x38] sm:$0xf] %vm5157_vm6, %v10844_v50  ;;  %v7832_v49 = vmax.f32 %v7816_v29, 0.0  ;;  %v12009_v34 = vld [vmem:[%s16105_s7 + $0x2e0] ss:$8 sps:$4 sm:$0xff]  }
 0x5f5   :  { %8451 = vmatpush1.bf16.msra.mxu1 %v11949_v46  ;;  %8734 = vmatpush1.bf16.msra.mxu0 %v11952_v58  ;;  %v12017_v47 = vld [vmem:[%s16105_s7 + $0x2d4] ss:$8 sps:$4 sm:$0xff]   ;;  %v12020_v12 = vld [vmem:[%s16105_s7 + $0x3a4] ss:$8 sps:$4 sm:$0xff]   ;;  %v9049_v23 = vld [vmem:[#allocation4 + $0x30] sm:$0xf] }
 0x5f6   :  { %v10845_v27 = vpack.c.bf16 %v7832_v49, %v7832_v49  ;;  %8634 = vmatprep.subr.bf16.mxu1 %v11957_v33  ;;  %8735 = vmatprep.subr.bf16.mxu0 %v11960_v11  ;;  %v12015_v63 = vld [vmem:[%s16105_s7 + $0x2d0] ss:$8 sps:$4 sm:$0xff]   ;;  %v12018_v14 = vld [vmem:[%s16105_s7 + $0x3a0] ss:$8 sps:$4 sm:$0xff]   ;;  %v12023_v44 = vld [vmem:[%s16105_s7 + $0x2c4] ss:$8 sps:$4 sm:$0xff]  }
 0x5f7   :  { %v12026_v51 = vld [vmem:[%s16105_s7 + $0x394] ss:$8 sps:$4 sm:$0xff]   ;;  %v12021_v1 = vld [vmem:[%s16105_s7 + $0x2c0] ss:$8 sps:$4 sm:$0xff]   ;;  %v12024_v28 = vld [vmem:[%s16105_s7 + $0x390] ss:$8 sps:$4 sm:$0xff]  }
 0x5f8   :  { %7912 = vst.msk [vmem:[#allocation4 + $0x3c] sm:$0xf] %vm5157_vm6, %v10845_v27  ;;  %10658 = vmatmul.mubr.msk.bf16.vlgmr.msra.gmra.mxu1 %vm1980_vm5, %v8384_v39  ;;  %v12029_v45 = vld [vmem:[%s16105_s7 + $0x374] ss:$8 sps:$4 sm:$0xff]   ;;  %v12032_v19 = vld [vmem:[%s16105_s7 + $0x384] ss:$8 sps:$4 sm:$0xff]  }
 0x5f9   :  { %8635 = vmatpush1.bf16.msra.mxu1 %v11955_v36  ;;  %8736 = vmatpush1.bf16.msra.mxu0 %v11958_v21  ;;  %v12027_v17 = vld [vmem:[%s16105_s7 + $0x370] ss:$8 sps:$4 sm:$0xff]   ;;  %v12030_v46 = vld [vmem:[%s16105_s7 + $0x380] ss:$8 sps:$4 sm:$0xff]   ;;  %v12035_v58 = vld [vmem:[%s16105_s7 + $0x364] ss:$8 sps:$4 sm:$0xff]  }
 0x5fa   :  { %8636 = vmatprep.subr.bf16.mxu1 %v11963_v62  ;;  %8919 = vmatprep.subr.bf16.mxu0 %v11966_v10  ;;  %v8954_v50 = vld [vmem:[#allocation4 + $0x2c] sm:$0xf]  ;;  %v12033_v29 = vld [vmem:[%s16105_s7 + $0x360] ss:$8 sps:$4 sm:$0xff]   ;;  %v12036_v49 = vld [vmem:[%s16105_s7 + $0x350] ss:$8 sps:$4 sm:$0xff]  }
 0x5fb   :  { %8658 = vmatprep.mubr.bf16.mxu1 %v16452_v13  ;;  %v12038_v33 = vld [vmem:[%s16105_s7 + $0x354] ss:$8 sps:$4 sm:$0xff]   ;;  %v9239_v11 = vld [vmem:[#allocation4 + $0x38] sm:$0xf]  ;;  %v12041_v36 = vld [vmem:[%s16105_s7 + $0x344] ss:$8 sps:$4 sm:$0xff]  }
 0x5fc   :  { %10685 = vmatmul.mubr.msk.bf16.vlgmr.msra.gmra.mxu0 %vm1980_vm5, %v8669_v18  ;;  %v12039_v21 = vld [vmem:[%s16105_s7 + $0x340] ss:$8 sps:$4 sm:$0xff]   ;;  %v12044_v27 = vld [vmem:[%s16105_s7 + $0x3f4] ss:$8 sps:$4 sm:$0xff]   ;;  %v12042_v62 = vld [vmem:[%s16105_s7 + $0x3f0] ss:$8 sps:$4 sm:$0xff]  }
 0x5fd   :  { %8637 = vmatpush1.bf16.msra.mxu1 %v11961_v5  ;;  %8920 = vmatpush1.bf16.msra.mxu0 %v11964_v41  ;;  %v12047_v10 = vld [vmem:[%s16105_s7 + $0x3e4] ss:$8 sps:$4 sm:$0xff]   ;;  %v12045_v5 = vld [vmem:[%s16105_s7 + $0x3e0] ss:$8 sps:$4 sm:$0xff]   ;;  %v12050_v41 = vld [vmem:[%s16105_s7 + $0x3d4] ss:$8 sps:$4 sm:$0xff]  }
 0x5fe   :  { %8638 = vmatprep.subr.bf16.mxu1 %v11969_v9  ;;  %8921 = vmatprep.subr.bf16.mxu0 %v11972_v61  ;;  %v9144_v39 = vld [vmem:[#allocation4 + $0x34] sm:$0xf]  ;;  %v12048_v9 = vld [vmem:[%s16105_s7 + $0x3d0] ss:$8 sps:$4 sm:$0xff]  }
 0x5ff   :  { %8943 = vmatprep.mubr.bf16.mxu0 %v16452_v13  ;;  %v12053_v61 = vld [vmem:[%s16105_s7 + $0x3c4] ss:$8 sps:$4 sm:$0xff]  }
 0x600   :  { %v9334_v18 = vld [vmem:[#allocation4 + $0x3c] sm:$0xf] }
 0x601   :  { %8639 = vmatpush1.bf16.msra.mxu1 %v11967_v56  ;;  %8922 = vmatpush1.bf16.msra.mxu0 %v11970_v26  ;;  %v12054_v56 = vld [vmem:[#allocation10 + $0x78] sm:$0xff]  }
 0x602   :  { %8640 = vmatprep.subr.bf16.mxu1 %v11975_v32  ;;  %8923 = vmatprep.subr.bf16.mxu0 %v11978_v2  ;;  %v12055_v26 = vld [vmem:[#allocation10 + $0x38] sm:$0xff]   ;;  %v12056_v32 = vld [vmem:[#allocation10 + $0x70] sm:$0xff]  }
 0x603   :  { %v12057_v2 = vld [vmem:[#allocation10 + $0x30] sm:$0xff]  }
 0x605   :  { %8641 = vmatpush1.bf16.msra.mxu1 %v11973_v54  ;;  %8924 = vmatpush1.bf16.msra.mxu0 %v11976_v20  ;;  %v12058_v54 = vld [vmem:[#allocation10 + $0x68] sm:$0xff]  }
 0x606   :  { %8824 = vmatprep.subr.bf16.mxu1 %v11981_v15  ;;  %8925 = vmatprep.subr.bf16.mxu0 %v11984_v30  ;;  %v12059_v20 = vld [vmem:[#allocation10 + $0x28] sm:$0xff]   ;;  %v12060_v15 = vld [vmem:[#allocation10 + $0x60] sm:$0xff]  }
 0x607   :  { %v12061_v30 = vld [vmem:[#allocation10 + $0x20] sm:$0xff]  }
 0x608   :  { %10676 = vmatmul.mubr.msk.bf16.vlgmr.msra.gmra.mxu1 %vm1980_vm5, %v8574_v0 }
 0x609   :  { %8825 = vmatpush1.bf16.msra.mxu1 %v11979_v22  ;;  %8926 = vmatpush1.bf16.msra.mxu0 %v11982_v16  ;;  %v12062_v22 = vld [vmem:[#allocation10 + $0x58] sm:$0xff]  }
 0x60a   :  { %8826 = vmatprep.subr.bf16.mxu1 %v11987_v35  ;;  %9109 = vmatprep.subr.bf16.mxu0 %v11990_v48  ;;  %v12063_v16 = vld [vmem:[#allocation10 + $0x18] sm:$0xff]   ;;  %v12064_v48 = vld [vmem:[#allocation10 + $0x50] sm:$0xff]  }
 0x60b   :  { %8848 = vmatprep.mubr.bf16.mxu1 %v16452_v13 }
 0x60c   :  { %10703 = vmatmul.mubr.msk.bf16.vlgmr.msra.gmra.mxu0 %vm1980_vm5, %v8859_v8 }
 0x60d   :  { %8827 = vmatpush1.bf16.msra.mxu1 %v11985_v4  ;;  %9110 = vmatpush1.bf16.msra.mxu0 %v11988_v52  ;;  %v12065_v4 = vld [vmem:[#allocation10 + $0x10] sm:$0xff]  }
 0x60e   :  { %8828 = vmatprep.subr.bf16.mxu1 %v11993_v55  ;;  %9111 = vmatprep.subr.bf16.mxu0 %v11996_v42  ;;  %v12066_v42 = vld [vmem:[#allocation10 + $0x48] sm:$0xff]  }
 0x60f   :  { %9133 = vmatprep.mubr.bf16.mxu0 %v16452_v13 }
 0x611   :  { %8829 = vmatpush1.bf16.msra.mxu1 %v11991_v60  ;;  %9112 = vmatpush1.bf16.msra.mxu0 %v11994_v25  ;;  %v12067_v25 = vld [vmem:[#allocation10 + $0x8] sm:$0xff]  }
 0x612   :  { %8830 = vmatprep.subr.bf16.mxu1 %v11999_v6  ;;  %9113 = vmatprep.subr.bf16.mxu0 %v12002_v57  ;;  %v12068_v57 = vld [vmem:[#allocation10 + $0x40] sm:$0xff]  }
 0x615   :  { %8831 = vmatpush1.bf16.msra.mxu1 %v11997_v7  ;;  %9114 = vmatpush1.bf16.msra.mxu0 %v12000_v40  ;;  %v12069_v7 = vld [vmem:[#allocation10] sm:$0xff]  }
 0x616   :  { %9014 = vmatprep.subr.bf16.mxu1 %v12005_v3  ;;  %9115 = vmatprep.subr.bf16.mxu0 %v12008_v24 }
 0x618   :  { %10694 = vmatmul.mubr.msk.bf16.vlgmr.msra.gmra.mxu1 %vm1980_vm5, %v8764_v43 }
 0x619   :  { %9015 = vmatpush1.bf16.msra.mxu1 %v12003_v59  ;;  %9116 = vmatpush1.bf16.msra.mxu0 %v12006_v37 }
 0x61a   :  { %9016 = vmatprep.subr.bf16.mxu1 %v12011_v38  ;;  %9299 = vmatprep.subr.bf16.mxu0 %v12014_v31 }
 0x61b   :  { %9038 = vmatprep.mubr.bf16.mxu1 %v16452_v13 }
 0x61c   :  { %10721 = vmatmul.mubr.msk.bf16.vlgmr.msra.gmra.mxu0 %vm1980_vm5, %v9049_v23 }
 0x61d   :  { %9017 = vmatpush1.bf16.msra.mxu1 %v12009_v34  ;;  %9300 = vmatpush1.bf16.msra.mxu0 %v12012_v53 }
 0x61e   :  { %9018 = vmatprep.subr.bf16.mxu1 %v12017_v47  ;;  %9301 = vmatprep.subr.bf16.mxu0 %v12020_v12 }
 0x61f   :  { %9323 = vmatprep.mubr.bf16.mxu0 %v16452_v13 }
 0x621   :  { %9019 = vmatpush1.bf16.msra.mxu1 %v12015_v63  ;;  %9302 = vmatpush1.bf16.msra.mxu0 %v12018_v14 }
 0x622   :  { %9020 = vmatprep.subr.bf16.mxu1 %v12023_v44  ;;  %9303 = vmatprep.subr.bf16.mxu0 %v12026_v51 }
 0x625   :  { %9021 = vmatpush1.bf16.msra.mxu1 %v12021_v1  ;;  %9304 = vmatpush1.bf16.msra.mxu0 %v12024_v28 }
 0x626   :  { %9204 = vmatprep.subr.bf16.mxu1 %v12029_v45  ;;  %9305 = vmatprep.subr.bf16.mxu0 %v12032_v19 }
 0x628   :  { %10712 = vmatmul.mubr.msk.bf16.vlgmr.msra.gmra.mxu1 %vm1980_vm5, %v8954_v50 }
 0x629   :  { %9205 = vmatpush1.bf16.msra.mxu1 %v12027_v17  ;;  %9306 = vmatpush1.bf16.msra.mxu0 %v12030_v46 }
 0x62a   :  { %9206 = vmatprep.subr.bf16.mxu1 %v12035_v58  ;;  %9228 = vmatprep.mubr.bf16.mxu1 %v16452_v13 }
 0x62b   :  { %11226 = vmatprep.subr.bf16.mxu0 %v12054_v56 }
 0x62c   :  { %10739 = vmatmul.mubr.msk.bf16.vlgmr.msra.gmra.mxu0 %vm1980_vm5, %v9239_v11 }
 0x62d   :  { %9207 = vmatpush1.bf16.msra.mxu1 %v12033_v29  ;;  %11227 = vmatpush3.bf16.msra.mxu0 %v12055_v26 }
 0x62e   :  { %9208 = vmatprep.subr.bf16.mxu1 %v12038_v33  ;;  %11228 = vmatprep.subr.bf16.mxu0 %v12056_v32 }
 0x631   :  { %9209 = vmatpush1.bf16.msra.mxu1 %v12036_v49  ;;  %11229 = vmatpush3.bf16.msra.mxu0 %v12057_v2 }
 0x632   :  { %9210 = vmatprep.subr.bf16.mxu1 %v12041_v36  ;;  %11230 = vmatprep.subr.bf16.mxu0 %v12058_v54 }
 0x635   :  { %9211 = vmatpush1.bf16.msra.mxu1 %v12039_v21  ;;  %11231 = vmatpush3.bf16.msra.mxu0 %v12059_v20 }
 0x636   :  { %9394 = vmatprep.subr.bf16.mxu1 %v12044_v27  ;;  %11232 = vmatprep.subr.bf16.mxu0 %v12060_v15 }
 0x638   :  { %10730 = vmatmul.mubr.msk.bf16.vlgmr.msra.gmra.mxu1 %vm1980_vm5, %v9144_v39 }
 0x639   :  { %9395 = vmatpush1.bf16.msra.mxu1 %v12042_v62  ;;  %9418 = vmatprep.mubr.bf16.mxu1 %v16452_v13  ;;  %v12051_v13 = vld [vmem:[%s16105_s7 + $0x3c0] ss:$8 sps:$4 sm:$0xff]  }
 0x63a   :  { %9396 = vmatprep.subr.bf16.mxu1 %v12047_v10  ;;  %11233 = vmatpush3.bf16.msra.mxu0 %v12061_v30 }
 0x63b   :  { %11234 = vmatprep.subr.bf16.mxu0 %v12062_v22 }
 0x63d   :  { %9397 = vmatpush1.bf16.msra.mxu1 %v12045_v5 }
 0x63e   :  { %9398 = vmatprep.subr.bf16.mxu1 %v12050_v41  ;;  %11235 = vmatpush3.bf16.msra.mxu0 %v12063_v16 }
 0x63f   :  { %11236 = vmatprep.subr.bf16.mxu0 %v12064_v48 }
 0x641   :  { %9399 = vmatpush1.bf16.msra.mxu1 %v12048_v9 }
 0x642   :  { %9400 = vmatprep.subr.bf16.mxu1 %v12053_v61  ;;  %11237 = vmatpush3.bf16.msra.mxu0 %v12065_v4 }
 0x643   :  { %11238 = vmatprep.subr.bf16.mxu0 %v12066_v42 }
 0x645   :  { %9401 = vmatpush1.bf16.msra.mxu1 %v12051_v13 }
 0x646   :  { %11239 = vmatpush3.bf16.msra.mxu0 %v12067_v25 }
 0x647   :  { %11240 = vmatprep.subr.bf16.mxu0 %v12068_v57 }
 0x648   :  { %10748 = vmatmul.mubr.msk.bf16.vlgmr.msra.gmra.mxu1 %vm1980_vm5, %v9334_v18 }
 0x64a   :  { %11241 = vmatpush3.bf16.msra.mxu0 %v12069_v7 }
 0x688   :  { %v8008_v35 = vpop.f32.mrf.mxu1 }
 0x68a   :  { %v8010_v0 = vpop.f32.mrf.mxu1 }
 0x68c   :  { %v8012_v52 = vpop.f32.mrf.mxu1  ;;  %v8185_v55 = vpop.f32.mrf.mxu0 }
 0x68e   :  { %v8013_v8 = vpop.f32.mrf.mxu1  ;;  %v8187_v60 = vpop.f32.mrf.mxu0 }
 0x690   :  { %v8189_v6 = vpop.f32.mrf.mxu0 }
 0x692   :  { %v8190_v40 = vpop.f32.mrf.mxu0 }
 0x698   :  { %v8092_v3 = vpop.f32.mrf.mxu1 }
 0x699   :  { %v8093_v24 = vadd.f32 %v8092_v3, %v8008_v35 }
 0x69a   :  { %v8094_v59 = vpop.f32.mrf.mxu1 }
 0x69b   :  { %v8095_v37 = vadd.f32 %v8094_v59, %v8010_v0  ;;  %v8192_v38 = vadd.f32 %v8185_v55, %v8093_v24 }
 0x69c   :  { %v8096_v31 = vpop.f32.mrf.mxu1  ;;  %v8375_v43 = vpop.f32.mrf.mxu0 }
 0x69d   :  { %v8193_v34 = vadd.f32 %v8187_v60, %v8095_v37 }
 0x69e   :  { %v8097_v53 = vpop.f32.mrf.mxu1  ;;  %v8377_v47 = vpop.f32.mrf.mxu0 }
 0x6a0   :  { %v8379_v12 = vpop.f32.mrf.mxu0 }
 0x6a2   :  { %v8380_v23 = vpop.f32.mrf.mxu0 }
 0x6a8   :  { %v8280_v63 = vpop.f32.mrf.mxu1 }
 0x6a9   :  { %v8287_v14 = vadd.f32 %v8280_v63, %v8192_v38 }
 0x6aa   :  { %v8282_v44 = vpop.f32.mrf.mxu1 }
 0x6ab   :  { %v8288_v51 = vadd.f32 %v8282_v44, %v8193_v34  ;;  %v8382_v1 = vadd.f32 %v8375_v43, %v8287_v14  ;;  %v9429_v14 = vld [vmem:[%s16106_s8] sm:$0x3] }
 0x6ac   :  { %v8284_v28 = vpop.f32.mrf.mxu1  ;;  %v8565_v45 = vpop.f32.mrf.mxu0 }
 0x6ad   :  { %v8383_v19 = vadd.f32 %v8377_v47, %v8288_v51 }
 0x6ae   :  { %v8285_v17 = vpop.f32.mrf.mxu1  ;;  %v8567_v46 = vpop.f32.mrf.mxu0 }
 0x6b0   :  { %v8569_v58 = vpop.f32.mrf.mxu0 }
 0x6b2   :  { %v8570_v50 = vpop.f32.mrf.mxu0 }
 0x6b8   :  { %v8470_v29 = vpop.f32.mrf.mxu1 }
 0x6b9   :  { %v8477_v33 = vadd.f32 %v8470_v29, %v8382_v1  ;;  %v16478_v1 = vld [vmem:[#allocation61_spill] sm:$0xff] }
 0x6ba   :  { %v8472_v11 = vpop.f32.mrf.mxu1  ;;  %v9434_v28 = vrot.slane %v9429_v14, %v16478_v1 }
 0x6bb   :  { %v8478_v49 = vadd.f32 %v8472_v11, %v8383_v19  ;;  %v8572_v36 = vadd.f32 %v8565_v45, %v8477_v33 }
 0x6bc   :  { %v8474_v21 = vpop.f32.mrf.mxu1  ;;  %v8755_v27 = vpop.f32.mrf.mxu0 }
 0x6bd   :  { %v8573_v62 = vadd.f32 %v8567_v46, %v8478_v49  ;;  %v16479_v46 = vld [vmem:[#allocation63_spill] sm:$0xff] }
 0x6be   :  { %v8475_v10 = vpop.f32.mrf.mxu1  ;;  %v8757_v39 = vpop.f32.mrf.mxu0  ;;  %v9438_v58 = vrot.slane %v9429_v14, %v16479_v46 }
 0x6c0   :  { %v8759_v5 = vpop.f32.mrf.mxu0 }
 0x6c1   :  { %v10749_v5 = vld [vmem:[%s16108_s10] ss:$0 sm:$0xff] }
 0x6c2   :  { %v8760_v41 = vpop.f32.mrf.mxu0 }
 0x6c8   :  { %v8660_v9 = vpop.f32.mrf.mxu1 }
 0x6c9   :  { %v8667_v61 = vadd.f32 %v8660_v9, %v8572_v36 }
 0x6ca   :  { %v8662_v13 = vpop.f32.mrf.mxu1 }
 0x6cb   :  { %v8762_v18 = vadd.f32 %v8755_v27, %v8667_v61  ;;  %v8668_v7 = vadd.f32 %v8662_v13, %v8573_v62 }
 0x6cc   :  { %v8664_v56 = vpop.f32.mrf.mxu1  ;;  %v8945_v26 = vpop.f32.mrf.mxu0 }
 0x6cd   :  { %v8763_v3 = vadd.f32 %v8757_v39, %v8668_v7 }
 0x6ce   :  { %v8665_v32 = vpop.f32.mrf.mxu1  ;;  %v8947_v2 = vpop.f32.mrf.mxu0 }
 0x6d0   :  { %v8949_v54 = vpop.f32.mrf.mxu0 }
 0x6d2   :  { %v8950_v20 = vpop.f32.mrf.mxu0 }
 0x6d8   :  { %v8850_v15 = vpop.f32.mrf.mxu1 }
 0x6d9   :  { %v8857_v40 = vadd.f32 %v8850_v15, %v8762_v18 }
 0x6da   :  { %v8852_v30 = vpop.f32.mrf.mxu1 }
 0x6db   :  { %v8858_v59 = vadd.f32 %v8852_v30, %v8763_v3  ;;  %v8952_v38 = vadd.f32 %v8945_v26, %v8857_v40 }
 0x6dc   :  { %v8854_v22 = vpop.f32.mrf.mxu1  ;;  %v9135_v16 = vpop.f32.mrf.mxu0 }
 0x6dd   :  { %v8953_v34 = vadd.f32 %v8947_v2, %v8858_v59 }
 0x6de   :  { %v8855_v35 = vpop.f32.mrf.mxu1  ;;  %v9137_v48 = vpop.f32.mrf.mxu0 }
 0x6e0   :  { %v9139_v0 = vpop.f32.mrf.mxu0 }
 0x6e2   :  { %v9140_v4 = vpop.f32.mrf.mxu0 }
 0x6e8   :  { %v9040_v52 = vpop.f32.mrf.mxu1 }
 0x6e9   :  { %v9047_v43 = vadd.f32 %v9040_v52, %v8952_v38 }
 0x6ea   :  { %v9042_v55 = vpop.f32.mrf.mxu1 }
 0x6eb   :  { %v9048_v47 = vadd.f32 %v9042_v55, %v8953_v34  ;;  %v9142_v12 = vadd.f32 %v9135_v16, %v9047_v43 }
 0x6ec   :  { %v9044_v42 = vpop.f32.mrf.mxu1  ;;  %v9325_v8 = vpop.f32.mrf.mxu0 }
 0x6ed   :  { %v9143_v63 = vadd.f32 %v9137_v48, %v9048_v47 }
 0x6ee   :  { %v9045_v60 = vpop.f32.mrf.mxu1  ;;  %v9327_v25 = vpop.f32.mrf.mxu0 }
 0x6f0   :  { %v9329_v6 = vpop.f32.mrf.mxu0 }
 0x6f2   :  { %v9330_v57 = vpop.f32.mrf.mxu0 }
 0x6f8   :  { %v9230_v24 = vpop.f32.mrf.mxu1 }
 0x6f9   :  { %v9237_v23 = vadd.f32 %v9230_v24, %v9142_v12 }
 0x6fa   :  { %v9232_v37 = vpop.f32.mrf.mxu1 }
 0x6fb   :  { %v9238_v44 = vadd.f32 %v9232_v37, %v9143_v63  ;;  %v9332_v51 = vadd.f32 %v9325_v8, %v9237_v23 }
 0x6fc   :  { %v9234_v31 = vpop.f32.mrf.mxu1 }
 0x6fd   :  { %v9333_v17 = vadd.f32 %v9327_v25, %v9238_v44 }
 0x6fe   :  { %v9235_v53 = vpop.f32.mrf.mxu1 }
 0x708   :  { %v9420_v45 = vpop.f32.mrf.mxu1 }
 0x709   :  { %v9427_v19 = vadd.f32 %v9420_v45, %v9332_v51 }
 0x70a   :  { %v9422_v50 = vpop.f32.mrf.mxu1 }
 0x70b   :  { %v9441_v29 = vadd.f32 %v9434_v28, %v9427_v19  ;;  %v9428_v33 = vadd.f32 %v9422_v50, %v9333_v17 }
 0x70c   :  { %v9424_v11 = vpop.f32.mrf.mxu1 }
 0x70d   :  { %v9442_v49 = vadd.f32 %v9438_v58, %v9428_v33  ;;  %v9443_v36 = vmax.f32 %v9441_v29, 0.0 }
 0x70e   :  { %v9425_v21 = vpop.f32.mrf.mxu1 }
 0x70f   :  { %v9444_v27 = vmax.f32 %v9442_v49, 0.0  ;;  %v9445_v10 = vpack.c.bf16 %v9443_v36, %v9443_v36 }
 0x711   :  { %v9446_v62 = vpack.c.bf16 %v9444_v27, %v9444_v27 }
 0x713   :  { %9614 = vmatprep.mubr.bf16.mxu0 %v9446_v62 }
 0x714   :  { %9615 = vmatmul.mubr.bf16.vlgmr.msra.gmra.mxu0 %v9445_v10 }
 0x7d4   :  { %v11242_v39 = vpop.f32.mrf.mxu0 }
 0x7d6   :  { %v11243_v41 = vpop.f32.mrf.mxu0 }
 0x7d7   :  { %v11244_v9 = vadd.f32 %v11243_v41, %v11242_v39 }
 0x7d8   :  { %v11245_v61 = vpop.f32.mrf.mxu0 }
 0x7d9   :  { %v9617_v13 = vadd.f32 %v11244_v9, %v10749_v5 }
 0x7da   :  { %v11246_v18 = vpop.f32.mrf.mxu0 }
 0x7db   :  { %9622 = vst [vmem:[#allocation11] sm:$0xff] %v9617_v13 }
 0x7dc   :  { %12174 = shalt.err (!%p12171_p5)
}
 0x7dd   :  { %9632 = dma.vmem_to_hbm [thread:$0]  %s9630_s26, 128, %s16109_s11, [#allocation7]  }
 0x7de   :  { %12187 = dma.done.wait [#allocation7], 128  }
 0x7df   :  { %12188 = vsyncadd [#allocation7], 4294967168 }
 0x7e0   :  { %9636 = vsyncpa [#allocation6], 1 }
 0x7e1   :  { %9637 = vsyncpa [#allocation9], 1 }
 0x7e2   :  { %9638 = vsyncpa [#allocation7], 1 }

</bundles_post_ra>
